<compile_context>
chip_gen: v7x
topology: tpu7x:2x2x1
jax: 0.10.0
libtpu: 0.0.40
codegen_flags: <defaults>
</compile_context>

<pallas_src>
import functools

import jax
import jax.numpy as jnp
from jax.experimental import pallas as pl
from jax.experimental.pallas import tpu as pltpu

_VMEM_LIMIT_BYTES = 48 * 1024 * 1024   # safe on v5e/v6e (128 MiB) and v7x (64 MiB)


# ----------------------------------------------------------------------------
# Pallas kernels
# ----------------------------------------------------------------------------


def _conv_bn_kernel(relu, has_res, *refs):
    """Fused (cols @ W) -> BN(train) [+ residual] [+ ReLU].

    Grid = (Cout tiles, K tiles); K is the reduction axis (last, "arbitrary").
    The full M (= N*H*W) axis lives in one block so the per-channel batch
    statistics computed in the epilogue are exact.
    """
    if has_res:
        x_ref, w_ref, g_ref, b_ref, r_ref, o_ref, acc_ref = refs
    else:
        x_ref, w_ref, g_ref, b_ref, o_ref, acc_ref = refs
        r_ref = None

    k = pl.program_id(1)

    @pl.when(k == 0)
    def _():
        acc_ref[...] = jnp.zeros_like(acc_ref)

    # bf16 x bf16 -> f32 accumulate on the MXU.
    acc_ref[...] += jnp.dot(x_ref[...], w_ref[...],
                            preferred_element_type=jnp.float32)

    @pl.when(k == pl.num_programs(1) - 1)
    def _():
        acc = acc_ref[...]                                   # (M, tn) f32
        # training-mode BatchNorm: biased batch stats over the M axis
        mean = jnp.mean(acc, axis=0, keepdims=True)
        var = jnp.mean(jnp.square(acc - mean), axis=0, keepdims=True)
        y = (acc - mean) * jax.lax.rsqrt(var + 1e-5) * g_ref[...] + b_ref[...]
        if has_res:
            y = y + r_ref[...]
        if relu:
            y = jnp.maximum(y, 0.0)
        o_ref[...] = y


def _pick_tk(k_pad):
    """Largest K tile (multiple of 128) that divides the padded K."""
    for tk in (512, 384, 256, 128):
        if k_pad % tk == 0:
            return tk
    return 128


def fused_conv_bn(cols, w2, gamma, beta, residual, relu):
    """cols:(M,K) bf16, w2:(K,C) bf16, gamma/beta:(1,C) f32,
    residual:(M,C) f32 or None  ->  (M,C) f32."""
    M, K = cols.shape
    _, C = w2.shape

    # Pad K to a multiple of 128 (zero padding does not change the matmul).
    K_pad = ((K + 127) // 128) * 128
    if K_pad != K:
        cols = jnp.pad(cols, ((0, 0), (0, K_pad - K)))
        w2 = jnp.pad(w2, ((0, K_pad - K), (0, 0)))

    tk = _pick_tk(K_pad)
    tn = C if C <= 128 else 128
    grid = (C // tn, K_pad // tk)

    in_specs = [
        pl.BlockSpec((M, tk), lambda n, k: (0, k)),    # cols
        pl.BlockSpec((tk, tn), lambda n, k: (k, n)),   # weights
        pl.BlockSpec((1, tn), lambda n, k: (0, n)),    # gamma
        pl.BlockSpec((1, tn), lambda n, k: (0, n)),    # beta
    ]
    args = [cols, w2, gamma, beta]
    if residual is not None:
        in_specs.append(pl.BlockSpec((M, tn), lambda n, k: (0, n)))
        args.append(residual)

    return pl.pallas_call(
        functools.partial(_conv_bn_kernel, relu, residual is not None),
        out_shape=jax.ShapeDtypeStruct((M, C), jnp.float32),
        grid_spec=pltpu.PrefetchScalarGridSpec(
            num_scalar_prefetch=0,
            grid=grid,
            in_specs=in_specs,
            out_specs=pl.BlockSpec((M, tn), lambda n, k: (0, n)),
            scratch_shapes=[pltpu.VMEM((M, tn), jnp.float32)],
        ),
        compiler_params=pltpu.CompilerParams(
            dimension_semantics=("parallel", "arbitrary"),
            vmem_limit_bytes=_VMEM_LIMIT_BYTES),
    )(*args)


def _linear_kernel(x_ref, w_ref, b_ref, o_ref):
    o_ref[...] = (jnp.dot(x_ref[...], w_ref[...],
                          preferred_element_type=jnp.float32) + b_ref[...])


def pallas_linear(x, w, b):
    """x:(M,K)  w:(K,N)  b:(1,N)  ->  (M,N)  (== PyTorch nn.Linear)."""
    M, K = x.shape
    _, N = w.shape
    return pl.pallas_call(
        _linear_kernel,
        out_shape=jax.ShapeDtypeStruct((M, N), jnp.float32),
        in_specs=[pl.BlockSpec((M, K), lambda: (0, 0)),
                  pl.BlockSpec((K, N), lambda: (0, 0)),
                  pl.BlockSpec((1, N), lambda: (0, 0))],
        out_specs=pl.BlockSpec((M, N), lambda: (0, 0)),
        compiler_params=pltpu.CompilerParams(
            vmem_limit_bytes=_VMEM_LIMIT_BYTES),
    )(x.astype(jnp.bfloat16), w.astype(jnp.bfloat16), b.astype(jnp.float32))


# ----------------------------------------------------------------------------
# Glue: im2col, maxpool (layout plumbing only)
# ----------------------------------------------------------------------------


def im2col(x, kh, kw, stride, pad):
    """x: NHWC -> (N*Ho*Wo, kh*kw*C) patches ordered (kh, kw, C)."""
    N, H, W, C = x.shape
    xp = jnp.pad(x, ((0, 0), (pad, pad), (pad, pad), (0, 0)))
    Ho = (H + 2 * pad - kh) // stride + 1
    Wo = (W + 2 * pad - kw) // stride + 1
    patches = []
    for i in range(kh):
        for j in range(kw):
            patches.append(
                xp[:, i:i + stride * Ho:stride, j:j + stride * Wo:stride, :])
    cols = jnp.stack(patches, axis=3)                    # (N,Ho,Wo,kh*kw,C)
    return cols.reshape(N * Ho * Wo, kh * kw * C), (N, Ho, Wo)


def maxpool_3x3_s2_p1(x):
    # small 3x3 window reduction kept in JAX (negligible compute)
    return jax.lax.reduce_window(
        x, -jnp.inf, jax.lax.max,
        window_dimensions=(1, 3, 3, 1),
        window_strides=(1, 2, 2, 1),
        padding=((0, 0), (1, 1), (1, 1), (0, 0)))


# ----------------------------------------------------------------------------
# ResNet-18 backbone (torchvision structure, fc removed) on top of the kernels
# ----------------------------------------------------------------------------


def conv_bn(x, w, gamma, beta, stride, pad, relu, residual=None):
    """conv (no bias) + BN(train) [+ residual] [+ relu], fully fused.  x: NHWC."""
    kh, kw, cin, cout = w.shape
    cols, (N, Ho, Wo) = im2col(x.astype(jnp.bfloat16), kh, kw, stride, pad)
    w2 = w.reshape(kh * kw * cin, cout).astype(jnp.bfloat16)
    g = gamma.reshape(1, cout).astype(jnp.float32)
    b = beta.reshape(1, cout).astype(jnp.float32)
    res = (None if residual is None
           else residual.reshape(-1, cout).astype(jnp.float32))
    y = fused_conv_bn(cols, w2, g, b, res, relu)
    return y.reshape(N, Ho, Wo, cout)


def basic_block(x, blk, stride):
    identity = x
    out = conv_bn(x, blk["conv1_w"], blk["bn1_g"], blk["bn1_b"],
                  stride=stride, pad=1, relu=True)
    if "down_w" in blk:
        identity = conv_bn(x, blk["down_w"], blk["down_g"], blk["down_b"],
                           stride=stride, pad=0, relu=False)
    out = conv_bn(out, blk["conv2_w"], blk["bn2_g"], blk["bn2_b"],
                  stride=1, pad=1, relu=True, residual=identity)
    return out


def resnet18_backbone(params, x_nhwc):
    x = conv_bn(x_nhwc, params["conv1_w"], params["bn1_g"], params["bn1_b"],
                stride=2, pad=3, relu=True)
    x = maxpool_3x3_s2_p1(x)
    strides = [1, 2, 2, 2]
    for li in range(4):
        for bi in range(2):
            s = strides[li] if bi == 0 else 1
            x = basic_block(x, params[f"layer{li + 1}_{bi}"], s)
    # adaptive avg pool to 1x1 + squeeze -> (N, 512)
    return jnp.mean(x, axis=(1, 2))


# ----------------------------------------------------------------------------
# Parameter initialization (deterministic, synthetic)
# ----------------------------------------------------------------------------


def _make_initializer(key):
    counter = [0]

    def init(shape, std=0.05):
        counter[0] += 1
        k = jax.random.fold_in(key, counter[0])
        return (std * jax.random.normal(k, shape)).astype(jnp.float32)

    return init


def init_resnet18_params(init, in_ch):
    p = {
        "conv1_w": init((7, 7, in_ch, 64)),       # HWIO
        "bn1_g": jnp.ones((64,), jnp.float32),
        "bn1_b": jnp.zeros((64,), jnp.float32),
    }
    cfg = [(64, 64, 1), (64, 128, 2), (128, 256, 2), (256, 512, 2)]
    for li, (cin, cout, stride) in enumerate(cfg):
        for bi in range(2):
            s = stride if bi == 0 else 1
            ci = cin if bi == 0 else cout
            blk = {
                "conv1_w": init((3, 3, ci, cout)),
                "bn1_g": jnp.ones((cout,), jnp.float32),
                "bn1_b": jnp.zeros((cout,), jnp.float32),
                "conv2_w": init((3, 3, cout, cout)),
                "bn2_g": jnp.ones((cout,), jnp.float32),
                "bn2_b": jnp.zeros((cout,), jnp.float32),
            }
            if s != 1 or ci != cout:
                blk["down_w"] = init((1, 1, ci, cout))
                blk["down_g"] = jnp.ones((cout,), jnp.float32)
                blk["down_b"] = jnp.zeros((cout,), jnp.float32)
            p[f"layer{li + 1}_{bi}"] = blk
    return p


def init_shedd_params(key, in_ch_source=4, in_ch_target=2,
                      emb_dim=256, num_classes=10):
    init = _make_initializer(key)
    return {
        "source": init_resnet18_params(init, in_ch_source),
        "target": init_resnet18_params(init, in_ch_target),
        # classifiers stored as (in, out) so that y = x @ W + b
        "domain_w": init((emb_dim, 2)),
        "domain_b": jnp.zeros((1, 2), jnp.float32),
        "task_w": init((emb_dim, num_classes)),
        "task_b": jnp.zeros((1, num_classes), jnp.float32),
    }


# ----------------------------------------------------------------------------
# SHeDD forward
# ----------------------------------------------------------------------------


def classifier_heads(emb, params):
    """One fused linear for both heads via a block-diagonal weight.

    emb[:, :256] feeds the task head, emb[:, 256:] feeds the domain head.
    """
    half = params["task_w"].shape[0]           # 256
    n_task = params["task_w"].shape[1]         # 10
    n_dom = params["domain_w"].shape[1]        # 2
    W = jnp.zeros((2 * half, n_task + n_dom), jnp.float32)
    W = W.at[:half, :n_task].set(params["task_w"])
    W = W.at[half:, n_task:].set(params["domain_w"])
    bias = jnp.concatenate(
        [params["task_b"].reshape(1, -1), params["domain_b"].reshape(1, -1)],
        axis=1)
    out = pallas_linear(emb, W, bias)          # (N, n_task + n_dom)
    dom_cl = out[:, n_task:]
    task_cl = out[:, :n_task]
    return dom_cl, task_cl


def shedd_forward_source(params, x_nchw, source):
    x = jnp.transpose(x_nchw, (0, 2, 3, 1)).astype(jnp.float32)  # NCHW -> NHWC
    backbone = params["source"] if source == 0 else params["target"]
    emb = resnet18_backbone(backbone, x)          # (N, 512), == .squeeze()
    nfeat = emb.shape[1]
    emb_inv = emb[:, :nfeat // 2]
    emb_spec = emb[:, nfeat // 2:]
    dom_cl, task_cl = classifier_heads(emb, params)
    return emb_inv, emb_spec, dom_cl, task_cl


def shedd_forward(params, x_source, x_target):
    s_inv, s_spec, s_dom, s_task = shedd_forward_source(params, x_source, 0)
    t_inv, t_spec, t_dom, t_task = shedd_forward_source(params, x_target, 1)
    return (s_inv, s_spec, s_dom, s_task, t_inv, t_spec, t_dom, t_task)


# ----------------------------------------------------------------------------
# Demo
# ----------------------------------------------------------------------------

if __name__ == "__main__":
    key = jax.random.PRNGKey(0)
    params = init_shedd_params(key)

    kx1, kx2 = jax.random.split(jax.random.fold_in(key, 1234))
    # PyTorch-style NCHW inputs
    x_source = jax.random.normal(kx1, (2, 4, 16, 16), dtype=jnp.float32)
    x_target = jax.random.normal(kx2, (2, 2, 16, 16), dtype=jnp.float32)

    outs = jax.jit(shedd_forward)(params, x_source, x_target)
    outs = jax.block_until_ready(outs)

    expected = [(2, 256), (2, 256), (2, 2), (2, 10),
                (2, 256), (2, 256), (2, 2), (2, 10)]
    assert [tuple(o.shape) for o in outs] == expected, \
        [tuple(o.shape) for o in outs]
    assert all(bool(jnp.all(jnp.isfinite(o))) for o in outs)

    print("KERNEL_OK")
</pallas_src>

<mosaic_0001>
module attributes {stable_mosaic.version = 11 : i64} {
  func.func @_conv_bn_kernel(%arg0: i32, %arg1: i32, %arg2: memref<128x256xbf16, #tpu.memory_space<vmem>>, %arg3: memref<256x64xbf16, #tpu.memory_space<vmem>>, %arg4: memref<1x64xf32, #tpu.memory_space<vmem>>, %arg5: memref<1x64xf32, #tpu.memory_space<vmem>>, %arg6: memref<128x64xf32, #tpu.memory_space<vmem>>, %arg7: memref<128x64xf32, #tpu.memory_space<vmem>>) attributes {dimension_semantics = [#tpu.dimension_semantics<parallel>, #tpu.dimension_semantics<arbitrary>], iteration_bounds = array<i64: 1, 1>, scalar_prefetch = 0 : i64, scratch_operands = 1 : i64, tpu.core_type = #tpu.core_type<tc>, window_params = [{transform_indices = @transform_0, window_bounds = array<i64: 128, 256>}, {transform_indices = @transform_1, window_bounds = array<i64: 256, 64>}, {transform_indices = @transform_2, window_bounds = array<i64: 1, 64>}, {transform_indices = @transform_3, window_bounds = array<i64: 1, 64>}, {transform_indices = @transform_4, window_bounds = array<i64: 128, 64>}]} {
    %c0_i32 = arith.constant 0 : i32
    %0 = arith.cmpi eq, %arg1, %c0_i32 : i32
    %1 = arith.extui %0 : i1 to i32
    %c0_i32_0 = arith.constant 0 : i32
    %2 = arith.cmpi ne, %1, %c0_i32_0 : i32
    scf.if %2 {
      %cst_10 = arith.constant 0.000000e+00 : f32
      %12 = vector.broadcast %cst_10 : f32 to vector<128x64xf32>
      %c0_11 = arith.constant 0 : index
      %c0_12 = arith.constant 0 : index
      %13 = vector.load %arg7[%c0_11, %c0_12] : memref<128x64xf32, #tpu.memory_space<vmem>>, vector<128x64xf32>
      tpu.vector_store %arg7[%c0_11, %c0_12], %12 {strides = array<i32>} : memref<128x64xf32, #tpu.memory_space<vmem>>, vector<128x64xf32>,
    } else {
    }
    %c0 = arith.constant 0 : index
    %c0_1 = arith.constant 0 : index
    %3 = vector.load %arg7[%c0, %c0_1] : memref<128x64xf32, #tpu.memory_space<vmem>>, vector<128x64xf32>
    %c0_2 = arith.constant 0 : index
    %c0_3 = arith.constant 0 : index
    %4 = vector.load %arg2[%c0_2, %c0_3] : memref<128x256xbf16, #tpu.memory_space<vmem>>, vector<128x256xbf16>
    %c0_4 = arith.constant 0 : index
    %c0_5 = arith.constant 0 : index
    %5 = vector.load %arg3[%c0_4, %c0_5] : memref<256x64xbf16, #tpu.memory_space<vmem>>, vector<256x64xbf16>
    %cst = arith.constant dense<0.000000e+00> : vector<128x64xf32>
    %6 = tpu.matmul %4, %5, %cst {dimension_numbers = #tpu.dot_dimension_numbers<[1], [0], [0], [1], [0, 0, 1, 1], [], []>} : vector<128x256xbf16>, vector<256x64xbf16>, vector<128x64xf32> -> vector<128x64xf32>
    %7 = arith.addf %3, %6 : vector<128x64xf32>
    %c0_6 = arith.constant 0 : index
    %c0_7 = arith.constant 0 : index
    %8 = vector.load %arg7[%c0_6, %c0_7] : memref<128x64xf32, #tpu.memory_space<vmem>>, vector<128x64xf32>
    tpu.vector_store %arg7[%c0_6, %c0_7], %7 {strides = array<i32>} : memref<128x64xf32, #tpu.memory_space<vmem>>, vector<128x64xf32>,
    %c0_i32_8 = arith.constant 0 : i32
    %9 = arith.cmpi eq, %arg1, %c0_i32_8 : i32
    %10 = arith.extui %9 : i1 to i32
    %c0_i32_9 = arith.constant 0 : i32
    %11 = arith.cmpi ne, %10, %c0_i32_9 : i32
    scf.if %11 {
      %c0_10 = arith.constant 0 : index
      %c0_11 = arith.constant 0 : index
      %12 = vector.load %arg7[%c0_10, %c0_11] : memref<128x64xf32, #tpu.memory_space<vmem>>, vector<128x64xf32>
      %cst_12 = arith.constant dense<0.000000e+00> : vector<64xf32>
      %13 = vector.multi_reduction <add>, %12, %cst_12 [0] : vector<128x64xf32> to vector<64xf32>
      %14 = vector.shape_cast %13 : vector<64xf32> to vector<1x64xf32>
      %cst_13 = arith.constant 1.280000e+02 : f32
      %15 = vector.broadcast %cst_13 : f32 to vector<1x64xf32>
      %16 = arith.divf %14, %15 : vector<1x64xf32>
      %17 = vector.broadcast %16 : vector<1x64xf32> to vector<128x64xf32>
      %18 = arith.subf %12, %17 : vector<128x64xf32>
      %19 = arith.mulf %18, %18 : vector<128x64xf32>
      %cst_14 = arith.constant dense<0.000000e+00> : vector<64xf32>
      %20 = vector.multi_reduction <add>, %19, %cst_14 [0] : vector<128x64xf32> to vector<64xf32>
      %21 = vector.shape_cast %20 : vector<64xf32> to vector<1x64xf32>
      %cst_15 = arith.constant 1.280000e+02 : f32
      %22 = vector.broadcast %cst_15 : f32 to vector<1x64xf32>
      %23 = arith.divf %21, %22 : vector<1x64xf32>
      %24 = vector.broadcast %16 : vector<1x64xf32> to vector<128x64xf32>
      %25 = arith.subf %12, %24 : vector<128x64xf32>
      %cst_16 = arith.constant 9.99999974E-6 : f32
      %26 = vector.broadcast %cst_16 : f32 to vector<1x64xf32>
      %27 = arith.addf %23, %26 : vector<1x64xf32>
      %28 = math.rsqrt %27 : vector<1x64xf32>
      %29 = vector.broadcast %28 : vector<1x64xf32> to vector<128x64xf32>
      %30 = arith.mulf %25, %29 : vector<128x64xf32>
      %c0_17 = arith.constant 0 : index
      %c0_18 = arith.constant 0 : index
      %31 = vector.load %arg4[%c0_17, %c0_18] : memref<1x64xf32, #tpu.memory_space<vmem>>, vector<1x64xf32>
      %32 = vector.broadcast %31 : vector<1x64xf32> to vector<128x64xf32>
      %33 = arith.mulf %30, %32 : vector<128x64xf32>
      %c0_19 = arith.constant 0 : index
      %c0_20 = arith.constant 0 : index
      %34 = vector.load %arg5[%c0_19, %c0_20] : memref<1x64xf32, #tpu.memory_space<vmem>>, vector<1x64xf32>
      %35 = vector.broadcast %34 : vector<1x64xf32> to vector<128x64xf32>
      %36 = arith.addf %33, %35 : vector<128x64xf32>
      %cst_21 = arith.constant 0.000000e+00 : f32
      %37 = vector.broadcast %cst_21 : f32 to vector<128x64xf32>
      %38 = arith.maximumf %36, %37 : vector<128x64xf32>
      %c0_22 = arith.constant 0 : index
      %c0_23 = arith.constant 0 : index
      %39 = vector.load %arg6[%c0_22, %c0_23] : memref<128x64xf32, #tpu.memory_space<vmem>>, vector<128x64xf32>
      tpu.vector_store %arg6[%c0_22, %c0_23], %38 {strides = array<i32>} : memref<128x64xf32, #tpu.memory_space<vmem>>, vector<128x64xf32>,
    } else {
    }
    return
  }
  func.func @transform_0(%arg0: i32, %arg1: i32) -> (i32, i32) {
    %c0_i32 = arith.constant 0 : i32
    %c0_i32_0 = arith.constant 0 : i32
    return %c0_i32, %arg1 : i32, i32
  }
  func.func @transform_1(%arg0: i32, %arg1: i32) -> (i32, i32) {
    %c0_i32 = arith.constant 0 : i32
    return %arg1, %arg0 : i32, i32
  }
  func.func @transform_2(%arg0: i32, %arg1: i32) -> (i32, i32) {
    %c0_i32 = arith.constant 0 : i32
    %c0_i32_0 = arith.constant 0 : i32
    return %c0_i32, %arg0 : i32, i32
  }
  func.func @transform_3(%arg0: i32, %arg1: i32) -> (i32, i32) {
    %c0_i32 = arith.constant 0 : i32
    %c0_i32_0 = arith.constant 0 : i32
    return %c0_i32, %arg0 : i32, i32
  }
  func.func @transform_4(%arg0: i32, %arg1: i32) -> (i32, i32) {
    %c0_i32 = arith.constant 0 : i32
    %c0_i32_0 = arith.constant 0 : i32
    return %c0_i32, %arg0 : i32, i32
  }
}

module attributes {stable_mosaic.version = 11 : i64} {
  func.func @_conv_bn_kernel(%arg0: i32, %arg1: i32, %arg2: memref<32x128xbf16, #tpu.memory_space<vmem>>, %arg3: memref<128x64xbf16, #tpu.memory_space<vmem>>, %arg4: memref<1x64xf32, #tpu.memory_space<vmem>>, %arg5: memref<1x64xf32, #tpu.memory_space<vmem>>, %arg6: memref<32x64xf32, #tpu.memory_space<vmem>>, %arg7: memref<32x64xf32, #tpu.memory_space<vmem>>, %arg8: memref<32x64xf32, #tpu.memory_space<vmem>>) attributes {dimension_semantics = [#tpu.dimension_semantics<parallel>, #tpu.dimension_semantics<arbitrary>], iteration_bounds = array<i64: 1, 5>, scalar_prefetch = 0 : i64, scratch_operands = 1 : i64, tpu.core_type = #tpu.core_type<tc>, window_params = [{transform_indices = @transform_0, window_bounds = array<i64: 32, 128>}, {transform_indices = @transform_1, window_bounds = array<i64: 128, 64>}, {transform_indices = @transform_2, window_bounds = array<i64: 1, 64>}, {transform_indices = @transform_3, window_bounds = array<i64: 1, 64>}, {transform_indices = @transform_4, window_bounds = array<i64: 32, 64>}, {transform_indices = @transform_5, window_bounds = array<i64: 32, 64>}]} {
    %c0_i32 = arith.constant 0 : i32
    %0 = arith.cmpi eq, %arg1, %c0_i32 : i32
    %1 = arith.extui %0 : i1 to i32
    %c0_i32_0 = arith.constant 0 : i32
    %2 = arith.cmpi ne, %1, %c0_i32_0 : i32
    scf.if %2 {
      %cst_9 = arith.constant 0.000000e+00 : f32
      %12 = vector.broadcast %cst_9 : f32 to vector<32x64xf32>
      %c0_10 = arith.constant 0 : index
      %c0_11 = arith.constant 0 : index
      %13 = vector.load %arg8[%c0_10, %c0_11] : memref<32x64xf32, #tpu.memory_space<vmem>>, vector<32x64xf32>
      tpu.vector_store %arg8[%c0_10, %c0_11], %12 {strides = array<i32>} : memref<32x64xf32, #tpu.memory_space<vmem>>, vector<32x64xf32>,
    } else {
    }
    %c0 = arith.constant 0 : index
    %c0_1 = arith.constant 0 : index
    %3 = vector.load %arg8[%c0, %c0_1] : memref<32x64xf32, #tpu.memory_space<vmem>>, vector<32x64xf32>
    %c0_2 = arith.constant 0 : index
    %c0_3 = arith.constant 0 : index
    %4 = vector.load %arg2[%c0_2, %c0_3] : memref<32x128xbf16, #tpu.memory_space<vmem>>, vector<32x128xbf16>
    %c0_4 = arith.constant 0 : index
    %c0_5 = arith.constant 0 : index
    %5 = vector.load %arg3[%c0_4, %c0_5] : memref<128x64xbf16, #tpu.memory_space<vmem>>, vector<128x64xbf16>
    %cst = arith.constant dense<0.000000e+00> : vector<32x64xf32>
    %6 = tpu.matmul %4, %5, %cst {dimension_numbers = #tpu.dot_dimension_numbers<[1], [0], [0], [1], [0, 0, 1, 1], [], []>} : vector<32x128xbf16>, vector<128x64xbf16>, vector<32x64xf32> -> vector<32x64xf32>
    %7 = arith.addf %3, %6 : vector<32x64xf32>
    %c0_6 = arith.constant 0 : index
    %c0_7 = arith.constant 0 : index
    %8 = vector.load %arg8[%c0_6, %c0_7] : memref<32x64xf32, #tpu.memory_space<vmem>>, vector<32x64xf32>
    tpu.vector_store %arg8[%c0_6, %c0_7], %7 {strides = array<i32>} : memref<32x64xf32, #tpu.memory_space<vmem>>, vector<32x64xf32>,
    %c4_i32 = arith.constant 4 : i32
    %9 = arith.cmpi eq, %arg1, %c4_i32 : i32
    %10 = arith.extui %9 : i1 to i32
    %c0_i32_8 = arith.constant 0 : i32
    %11 = arith.cmpi ne, %10, %c0_i32_8 : i32
    scf.if %11 {
      %c0_9 = arith.constant 0 : index
      %c0_10 = arith.constant 0 : index
      %12 = vector.load %arg8[%c0_9, %c0_10] : memref<32x64xf32, #tpu.memory_space<vmem>>, vector<32x64xf32>
      %cst_11 = arith.constant dense<0.000000e+00> : vector<64xf32>
      %13 = vector.multi_reduction <add>, %12, %cst_11 [0] : vector<32x64xf32> to vector<64xf32>
      %14 = vector.shape_cast %13 : vector<64xf32> to vector<1x64xf32>
      %cst_12 = arith.constant 3.200000e+01 : f32
      %15 = vector.broadcast %cst_12 : f32 to vector<1x64xf32>
      %16 = arith.divf %14, %15 : vector<1x64xf32>
      %17 = vector.broadcast %16 : vector<1x64xf32> to vector<32x64xf32>
      %18 = arith.subf %12, %17 : vector<32x64xf32>
      %19 = arith.mulf %18, %18 : vector<32x64xf32>
      %cst_13 = arith.constant dense<0.000000e+00> : vector<64xf32>
      %20 = vector.multi_reduction <add>, %19, %cst_13 [0] : vector<32x64xf32> to vector<64xf32>
      %21 = vector.shape_cast %20 : vector<64xf32> to vector<1x64xf32>
      %cst_14 = arith.constant 3.200000e+01 : f32
      %22 = vector.broadcast %cst_14 : f32 to vector<1x64xf32>
      %23 = arith.divf %21, %22 : vector<1x64xf32>
      %24 = vector.broadcast %16 : vector<1x64xf32> to vector<32x64xf32>
      %25 = arith.subf %12, %24 : vector<32x64xf32>
      %cst_15 = arith.constant 9.99999974E-6 : f32
      %26 = vector.broadcast %cst_15 : f32 to vector<1x64xf32>
      %27 = arith.addf %23, %26 : vector<1x64xf32>
      %28 = math.rsqrt %27 : vector<1x64xf32>
      %29 = vector.broadcast %28 : vector<1x64xf32> to vector<32x64xf32>
      %30 = arith.mulf %25, %29 : vector<32x64xf32>
      %c0_16 = arith.constant 0 : index
      %c0_17 = arith.constant 0 : index
      %31 = vector.load %arg4[%c0_16, %c0_17] : memref<1x64xf32, #tpu.memory_space<vmem>>, vector<1x64xf32>
      %32 = vector.broadcast %31 : vector<1x64xf32> to vector<32x64xf32>
      %33 = arith.mulf %30, %32 : vector<32x64xf32>
      %c0_18 = arith.constant 0 : index
      %c0_19 = arith.constant 0 : index
      %34 = vector.load %arg5[%c0_18, %c0_19] : memref<1x64xf32, #tpu.memory_space<vmem>>, vector<1x64xf32>
      %35 = vector.broadcast %34 : vector<1x64xf32> to vector<32x64xf32>
      %36 = arith.addf %33, %35 : vector<32x64xf32>
      %c0_20 = arith.constant 0 : index
      %c0_21 = arith.constant 0 : index
      %37 = vector.load %arg6[%c0_20, %c0_21] : memref<32x64xf32, #tpu.memory_space<vmem>>, vector<32x64xf32>
      %38 = arith.addf %36, %37 : vector<32x64xf32>
      %cst_22 = arith.constant 0.000000e+00 : f32
      %39 = vector.broadcast %cst_22 : f32 to vector<32x64xf32>
      %40 = arith.maximumf %38, %39 : vector<32x64xf32>
      %c0_23 = arith.constant 0 : index
      %c0_24 = arith.constant 0 : index
      %41 = vector.load %arg7[%c0_23, %c0_24] : memref<32x64xf32, #tpu.memory_space<vmem>>, vector<32x64xf32>
      tpu.vector_store %arg7[%c0_23, %c0_24], %40 {strides = array<i32>} : memref<32x64xf32, #tpu.memory_space<vmem>>, vector<32x64xf32>,
    } else {
    }
    return
  }
  func.func @transform_0(%arg0: i32, %arg1: i32) -> (i32, i32) {
    %c0_i32 = arith.constant 0 : i32
    %c0_i32_0 = arith.constant 0 : i32
    return %c0_i32, %arg1 : i32, i32
  }
  func.func @transform_1(%arg0: i32, %arg1: i32) -> (i32, i32) {
    %c0_i32 = arith.constant 0 : i32
    return %arg1, %arg0 : i32, i32
  }
  func.func @transform_2(%arg0: i32, %arg1: i32) -> (i32, i32) {
    %c0_i32 = arith.constant 0 : i32
    %c0_i32_0 = arith.constant 0 : i32
    return %c0_i32, %arg0 : i32, i32
  }
  func.func @transform_3(%arg0: i32, %arg1: i32) -> (i32, i32) {
    %c0_i32 = arith.constant 0 : i32
    %c0_i32_0 = arith.constant 0 : i32
    return %c0_i32, %arg0 : i32, i32
  }
  func.func @transform_4(%arg0: i32, %arg1: i32) -> (i32, i32) {
    %c0_i32 = arith.constant 0 : i32
    %c0_i32_0 = arith.constant 0 : i32
    return %c0_i32, %arg0 : i32, i32
  }
  func.func @transform_5(%arg0: i32, %arg1: i32) -> (i32, i32) {
    %c0_i32 = arith.constant 0 : i32
    %c0_i32_0 = arith.constant 0 : i32
    return %c0_i32, %arg0 : i32, i32
  }
}

module attributes {stable_mosaic.version = 11 : i64} {
  func.func @_conv_bn_kernel(%arg0: i32, %arg1: i32, %arg2: memref<32x128xbf16, #tpu.memory_space<vmem>>, %arg3: memref<128x64xbf16, #tpu.memory_space<vmem>>, %arg4: memref<1x64xf32, #tpu.memory_space<vmem>>, %arg5: memref<1x64xf32, #tpu.memory_space<vmem>>, %arg6: memref<32x64xf32, #tpu.memory_space<vmem>>, %arg7: memref<32x64xf32, #tpu.memory_space<vmem>>) attributes {dimension_semantics = [#tpu.dimension_semantics<parallel>, #tpu.dimension_semantics<arbitrary>], iteration_bounds = array<i64: 1, 5>, scalar_prefetch = 0 : i64, scratch_operands = 1 : i64, tpu.core_type = #tpu.core_type<tc>, window_params = [{transform_indices = @transform_0, window_bounds = array<i64: 32, 128>}, {transform_indices = @transform_1, window_bounds = array<i64: 128, 64>}, {transform_indices = @transform_2, window_bounds = array<i64: 1, 64>}, {transform_indices = @transform_3, window_bounds = array<i64: 1, 64>}, {transform_indices = @transform_4, window_bounds = array<i64: 32, 64>}]} {
    %c0_i32 = arith.constant 0 : i32
    %0 = arith.cmpi eq, %arg1, %c0_i32 : i32
    %1 = arith.extui %0 : i1 to i32
    %c0_i32_0 = arith.constant 0 : i32
    %2 = arith.cmpi ne, %1, %c0_i32_0 : i32
    scf.if %2 {
      %cst_9 = arith.constant 0.000000e+00 : f32
      %12 = vector.broadcast %cst_9 : f32 to vector<32x64xf32>
      %c0_10 = arith.constant 0 : index
      %c0_11 = arith.constant 0 : index
      %13 = vector.load %arg7[%c0_10, %c0_11] : memref<32x64xf32, #tpu.memory_space<vmem>>, vector<32x64xf32>
      tpu.vector_store %arg7[%c0_10, %c0_11], %12 {strides = array<i32>} : memref<32x64xf32, #tpu.memory_space<vmem>>, vector<32x64xf32>,
    } else {
    }
    %c0 = arith.constant 0 : index
    %c0_1 = arith.constant 0 : index
    %3 = vector.load %arg7[%c0, %c0_1] : memref<32x64xf32, #tpu.memory_space<vmem>>, vector<32x64xf32>
    %c0_2 = arith.constant 0 : index
    %c0_3 = arith.constant 0 : index
    %4 = vector.load %arg2[%c0_2, %c0_3] : memref<32x128xbf16, #tpu.memory_space<vmem>>, vector<32x128xbf16>
    %c0_4 = arith.constant 0 : index
    %c0_5 = arith.constant 0 : index
    %5 = vector.load %arg3[%c0_4, %c0_5] : memref<128x64xbf16, #tpu.memory_space<vmem>>, vector<128x64xbf16>
    %cst = arith.constant dense<0.000000e+00> : vector<32x64xf32>
    %6 = tpu.matmul %4, %5, %cst {dimension_numbers = #tpu.dot_dimension_numbers<[1], [0], [0], [1], [0, 0, 1, 1], [], []>} : vector<32x128xbf16>, vector<128x64xbf16>, vector<32x64xf32> -> vector<32x64xf32>
    %7 = arith.addf %3, %6 : vector<32x64xf32>
    %c0_6 = arith.constant 0 : index
    %c0_7 = arith.constant 0 : index
    %8 = vector.load %arg7[%c0_6, %c0_7] : memref<32x64xf32, #tpu.memory_space<vmem>>, vector<32x64xf32>
    tpu.vector_store %arg7[%c0_6, %c0_7], %7 {strides = array<i32>} : memref<32x64xf32, #tpu.memory_space<vmem>>, vector<32x64xf32>,
    %c4_i32 = arith.constant 4 : i32
    %9 = arith.cmpi eq, %arg1, %c4_i32 : i32
    %10 = arith.extui %9 : i1 to i32
    %c0_i32_8 = arith.constant 0 : i32
    %11 = arith.cmpi ne, %10, %c0_i32_8 : i32
    scf.if %11 {
      %c0_9 = arith.constant 0 : index
      %c0_10 = arith.constant 0 : index
      %12 = vector.load %arg7[%c0_9, %c0_10] : memref<32x64xf32, #tpu.memory_space<vmem>>, vector<32x64xf32>
      %cst_11 = arith.constant dense<0.000000e+00> : vector<64xf32>
      %13 = vector.multi_reduction <add>, %12, %cst_11 [0] : vector<32x64xf32> to vector<64xf32>
      %14 = vector.shape_cast %13 : vector<64xf32> to vector<1x64xf32>
      %cst_12 = arith.constant 3.200000e+01 : f32
      %15 = vector.broadcast %cst_12 : f32 to vector<1x64xf32>
      %16 = arith.divf %14, %15 : vector<1x64xf32>
      %17 = vector.broadcast %16 : vector<1x64xf32> to vector<32x64xf32>
      %18 = arith.subf %12, %17 : vector<32x64xf32>
      %19 = arith.mulf %18, %18 : vector<32x64xf32>
      %cst_13 = arith.constant dense<0.000000e+00> : vector<64xf32>
      %20 = vector.multi_reduction <add>, %19, %cst_13 [0] : vector<32x64xf32> to vector<64xf32>
      %21 = vector.shape_cast %20 : vector<64xf32> to vector<1x64xf32>
      %cst_14 = arith.constant 3.200000e+01 : f32
      %22 = vector.broadcast %cst_14 : f32 to vector<1x64xf32>
      %23 = arith.divf %21, %22 : vector<1x64xf32>
      %24 = vector.broadcast %16 : vector<1x64xf32> to vector<32x64xf32>
      %25 = arith.subf %12, %24 : vector<32x64xf32>
      %cst_15 = arith.constant 9.99999974E-6 : f32
      %26 = vector.broadcast %cst_15 : f32 to vector<1x64xf32>
      %27 = arith.addf %23, %26 : vector<1x64xf32>
      %28 = math.rsqrt %27 : vector<1x64xf32>
      %29 = vector.broadcast %28 : vector<1x64xf32> to vector<32x64xf32>
      %30 = arith.mulf %25, %29 : vector<32x64xf32>
      %c0_16 = arith.constant 0 : index
      %c0_17 = arith.constant 0 : index
      %31 = vector.load %arg4[%c0_16, %c0_17] : memref<1x64xf32, #tpu.memory_space<vmem>>, vector<1x64xf32>
      %32 = vector.broadcast %31 : vector<1x64xf32> to vector<32x64xf32>
      %33 = arith.mulf %30, %32 : vector<32x64xf32>
      %c0_18 = arith.constant 0 : index
      %c0_19 = arith.constant 0 : index
      %34 = vector.load %arg5[%c0_18, %c0_19] : memref<1x64xf32, #tpu.memory_space<vmem>>, vector<1x64xf32>
      %35 = vector.broadcast %34 : vector<1x64xf32> to vector<32x64xf32>
      %36 = arith.addf %33, %35 : vector<32x64xf32>
      %cst_20 = arith.constant 0.000000e+00 : f32
      %37 = vector.broadcast %cst_20 : f32 to vector<32x64xf32>
      %38 = arith.maximumf %36, %37 : vector<32x64xf32>
      %c0_21 = arith.constant 0 : index
      %c0_22 = arith.constant 0 : index
      %39 = vector.load %arg6[%c0_21, %c0_22] : memref<32x64xf32, #tpu.memory_space<vmem>>, vector<32x64xf32>
      tpu.vector_store %arg6[%c0_21, %c0_22], %38 {strides = array<i32>} : memref<32x64xf32, #tpu.memory_space<vmem>>, vector<32x64xf32>,
    } else {
    }
    return
  }
  func.func @transform_0(%arg0: i32, %arg1: i32) -> (i32, i32) {
    %c0_i32 = arith.constant 0 : i32
    %c0_i32_0 = arith.constant 0 : i32
    return %c0_i32, %arg1 : i32, i32
  }
  func.func @transform_1(%arg0: i32, %arg1: i32) -> (i32, i32) {
    %c0_i32 = arith.constant 0 : i32
    return %arg1, %arg0 : i32, i32
  }
  func.func @transform_2(%arg0: i32, %arg1: i32) -> (i32, i32) {
    %c0_i32 = arith.constant 0 : i32
    %c0_i32_0 = arith.constant 0 : i32
    return %c0_i32, %arg0 : i32, i32
  }
  func.func @transform_3(%arg0: i32, %arg1: i32) -> (i32, i32) {
    %c0_i32 = arith.constant 0 : i32
    %c0_i32_0 = arith.constant 0 : i32
    return %c0_i32, %arg0 : i32, i32
  }
  func.func @transform_4(%arg0: i32, %arg1: i32) -> (i32, i32) {
    %c0_i32 = arith.constant 0 : i32
    %c0_i32_0 = arith.constant 0 : i32
    return %c0_i32, %arg0 : i32, i32
  }
}

module attributes {stable_mosaic.version = 11 : i64} {
  func.func @_conv_bn_kernel(%arg0: i32, %arg1: i32, %arg2: memref<8x128xbf16, #tpu.memory_space<vmem>>, %arg3: memref<128x128xbf16, #tpu.memory_space<vmem>>, %arg4: memref<1x128xf32, #tpu.memory_space<vmem>>, %arg5: memref<1x128xf32, #tpu.memory_space<vmem>>, %arg6: memref<8x128xf32, #tpu.memory_space<vmem>>, %arg7: memref<8x128xf32, #tpu.memory_space<vmem>>) attributes {dimension_semantics = [#tpu.dimension_semantics<parallel>, #tpu.dimension_semantics<arbitrary>], iteration_bounds = array<i64: 1, 5>, scalar_prefetch = 0 : i64, scratch_operands = 1 : i64, tpu.core_type = #tpu.core_type<tc>, window_params = [{transform_indices = @transform_0, window_bounds = array<i64: 8, 128>}, {transform_indices = @transform_1, window_bounds = array<i64: 128, 128>}, {transform_indices = @transform_2, window_bounds = array<i64: 1, 128>}, {transform_indices = @transform_3, window_bounds = array<i64: 1, 128>}, {transform_indices = @transform_4, window_bounds = array<i64: 8, 128>}]} {
    %c0_i32 = arith.constant 0 : i32
    %0 = arith.cmpi eq, %arg1, %c0_i32 : i32
    %1 = arith.extui %0 : i1 to i32
    %c0_i32_0 = arith.constant 0 : i32
    %2 = arith.cmpi ne, %1, %c0_i32_0 : i32
    scf.if %2 {
      %cst_9 = arith.constant 0.000000e+00 : f32
      %12 = vector.broadcast %cst_9 : f32 to vector<8x128xf32>
      %c0_10 = arith.constant 0 : index
      %c0_11 = arith.constant 0 : index
      %13 = vector.load %arg7[%c0_10, %c0_11] : memref<8x128xf32, #tpu.memory_space<vmem>>, vector<8x128xf32>
      tpu.vector_store %arg7[%c0_10, %c0_11], %12 {strides = array<i32>} : memref<8x128xf32, #tpu.memory_space<vmem>>, vector<8x128xf32>,
    } else {
    }
    %c0 = arith.constant 0 : index
    %c0_1 = arith.constant 0 : index
    %3 = vector.load %arg7[%c0, %c0_1] : memref<8x128xf32, #tpu.memory_space<vmem>>, vector<8x128xf32>
    %c0_2 = arith.constant 0 : index
    %c0_3 = arith.constant 0 : index
    %4 = vector.load %arg2[%c0_2, %c0_3] : memref<8x128xbf16, #tpu.memory_space<vmem>>, vector<8x128xbf16>
    %c0_4 = arith.constant 0 : index
    %c0_5 = arith.constant 0 : index
    %5 = vector.load %arg3[%c0_4, %c0_5] : memref<128x128xbf16, #tpu.memory_space<vmem>>, vector<128x128xbf16>
    %cst = arith.constant dense<0.000000e+00> : vector<8x128xf32>
    %6 = tpu.matmul %4, %5, %cst {dimension_numbers = #tpu.dot_dimension_numbers<[1], [0], [0], [1], [0, 0, 1, 1], [], []>} : vector<8x128xbf16>, vector<128x128xbf16>, vector<8x128xf32> -> vector<8x128xf32>
    %7 = arith.addf %3, %6 : vector<8x128xf32>
    %c0_6 = arith.constant 0 : index
    %c0_7 = arith.constant 0 : index
    %8 = vector.load %arg7[%c0_6, %c0_7] : memref<8x128xf32, #tpu.memory_space<vmem>>, vector<8x128xf32>
    tpu.vector_store %arg7[%c0_6, %c0_7], %7 {strides = array<i32>} : memref<8x128xf32, #tpu.memory_space<vmem>>, vector<8x128xf32>,
    %c4_i32 = arith.constant 4 : i32
    %9 = arith.cmpi eq, %arg1, %c4_i32 : i32
    %10 = arith.extui %9 : i1 to i32
    %c0_i32_8 = arith.constant 0 : i32
    %11 = arith.cmpi ne, %10, %c0_i32_8 : i32
    scf.if %11 {
      %c0_9 = arith.constant 0 : index
      %c0_10 = arith.constant 0 : index
      %12 = vector.load %arg7[%c0_9, %c0_10] : memref<8x128xf32, #tpu.memory_space<vmem>>, vector<8x128xf32>
      %cst_11 = arith.constant dense<0.000000e+00> : vector<128xf32>
      %13 = vector.multi_reduction <add>, %12, %cst_11 [0] : vector<8x128xf32> to vector<128xf32>
      %14 = vector.shape_cast %13 : vector<128xf32> to vector<1x128xf32>
      %cst_12 = arith.constant 8.000000e+00 : f32
      %15 = vector.broadcast %cst_12 : f32 to vector<1x128xf32>
      %16 = arith.divf %14, %15 : vector<1x128xf32>
      %17 = vector.broadcast %16 : vector<1x128xf32> to vector<8x128xf32>
      %18 = arith.subf %12, %17 : vector<8x128xf32>
      %19 = arith.mulf %18, %18 : vector<8x128xf32>
      %cst_13 = arith.constant dense<0.000000e+00> : vector<128xf32>
      %20 = vector.multi_reduction <add>, %19, %cst_13 [0] : vector<8x128xf32> to vector<128xf32>
      %21 = vector.shape_cast %20 : vector<128xf32> to vector<1x128xf32>
      %cst_14 = arith.constant 8.000000e+00 : f32
      %22 = vector.broadcast %cst_14 : f32 to vector<1x128xf32>
      %23 = arith.divf %21, %22 : vector<1x128xf32>
      %24 = vector.broadcast %16 : vector<1x128xf32> to vector<8x128xf32>
      %25 = arith.subf %12, %24 : vector<8x128xf32>
      %cst_15 = arith.constant 9.99999974E-6 : f32
      %26 = vector.broadcast %cst_15 : f32 to vector<1x128xf32>
      %27 = arith.addf %23, %26 : vector<1x128xf32>
      %28 = math.rsqrt %27 : vector<1x128xf32>
      %29 = vector.broadcast %28 : vector<1x128xf32> to vector<8x128xf32>
      %30 = arith.mulf %25, %29 : vector<8x128xf32>
      %c0_16 = arith.constant 0 : index
      %c0_17 = arith.constant 0 : index
      %31 = vector.load %arg4[%c0_16, %c0_17] : memref<1x128xf32, #tpu.memory_space<vmem>>, vector<1x128xf32>
      %32 = vector.broadcast %31 : vector<1x128xf32> to vector<8x128xf32>
      %33 = arith.mulf %30, %32 : vector<8x128xf32>
      %c0_18 = arith.constant 0 : index
      %c0_19 = arith.constant 0 : index
      %34 = vector.load %arg5[%c0_18, %c0_19] : memref<1x128xf32, #tpu.memory_space<vmem>>, vector<1x128xf32>
      %35 = vector.broadcast %34 : vector<1x128xf32> to vector<8x128xf32>
      %36 = arith.addf %33, %35 : vector<8x128xf32>
      %cst_20 = arith.constant 0.000000e+00 : f32
      %37 = vector.broadcast %cst_20 : f32 to vector<8x128xf32>
      %38 = arith.maximumf %36, %37 : vector<8x128xf32>
      %c0_21 = arith.constant 0 : index
      %c0_22 = arith.constant 0 : index
      %39 = vector.load %arg6[%c0_21, %c0_22] : memref<8x128xf32, #tpu.memory_space<vmem>>, vector<8x128xf32>
      tpu.vector_store %arg6[%c0_21, %c0_22], %38 {strides = array<i32>} : memref<8x128xf32, #tpu.memory_space<vmem>>, vector<8x128xf32>,
    } else {
    }
    return
  }
  func.func @transform_0(%arg0: i32, %arg1: i32) -> (i32, i32) {
    %c0_i32 = arith.constant 0 : i32
    %c0_i32_0 = arith.constant 0 : i32
    return %c0_i32, %arg1 : i32, i32
  }
  func.func @transform_1(%arg0: i32, %arg1: i32) -> (i32, i32) {
    %c0_i32 = arith.constant 0 : i32
    return %arg1, %arg0 : i32, i32
  }
  func.func @transform_2(%arg0: i32, %arg1: i32) -> (i32, i32) {
    %c0_i32 = arith.constant 0 : i32
    %c0_i32_0 = arith.constant 0 : i32
    return %c0_i32, %arg0 : i32, i32
  }
  func.func @transform_3(%arg0: i32, %arg1: i32) -> (i32, i32) {
    %c0_i32 = arith.constant 0 : i32
    %c0_i32_0 = arith.constant 0 : i32
    return %c0_i32, %arg0 : i32, i32
  }
  func.func @transform_4(%arg0: i32, %arg1: i32) -> (i32, i32) {
    %c0_i32 = arith.constant 0 : i32
    %c0_i32_0 = arith.constant 0 : i32
    return %c0_i32, %arg0 : i32, i32
  }
}

module attributes {stable_mosaic.version = 11 : i64} {
  func.func @_conv_bn_kernel(%arg0: i32, %arg1: i32, %arg2: memref<8x384xbf16, #tpu.memory_space<vmem>>, %arg3: memref<384x128xbf16, #tpu.memory_space<vmem>>, %arg4: memref<1x128xf32, #tpu.memory_space<vmem>>, %arg5: memref<1x128xf32, #tpu.memory_space<vmem>>, %arg6: memref<8x128xf32, #tpu.memory_space<vmem>>, %arg7: memref<8x128xf32, #tpu.memory_space<vmem>>, %arg8: memref<8x128xf32, #tpu.memory_space<vmem>>) attributes {dimension_semantics = [#tpu.dimension_semantics<parallel>, #tpu.dimension_semantics<arbitrary>], iteration_bounds = array<i64: 1, 3>, scalar_prefetch = 0 : i64, scratch_operands = 1 : i64, tpu.core_type = #tpu.core_type<tc>, window_params = [{transform_indices = @transform_0, window_bounds = array<i64: 8, 384>}, {transform_indices = @transform_1, window_bounds = array<i64: 384, 128>}, {transform_indices = @transform_2, window_bounds = array<i64: 1, 128>}, {transform_indices = @transform_3, window_bounds = array<i64: 1, 128>}, {transform_indices = @transform_4, window_bounds = array<i64: 8, 128>}, {transform_indices = @transform_5, window_bounds = array<i64: 8, 128>}]} {
    %c0_i32 = arith.constant 0 : i32
    %0 = arith.cmpi eq, %arg1, %c0_i32 : i32
    %1 = arith.extui %0 : i1 to i32
    %c0_i32_0 = arith.constant 0 : i32
    %2 = arith.cmpi ne, %1, %c0_i32_0 : i32
    scf.if %2 {
      %cst_9 = arith.constant 0.000000e+00 : f32
      %12 = vector.broadcast %cst_9 : f32 to vector<8x128xf32>
      %c0_10 = arith.constant 0 : index
      %c0_11 = arith.constant 0 : index
      %13 = vector.load %arg8[%c0_10, %c0_11] : memref<8x128xf32, #tpu.memory_space<vmem>>, vector<8x128xf32>
      tpu.vector_store %arg8[%c0_10, %c0_11], %12 {strides = array<i32>} : memref<8x128xf32, #tpu.memory_space<vmem>>, vector<8x128xf32>,
    } else {
    }
    %c0 = arith.constant 0 : index
    %c0_1 = arith.constant 0 : index
    %3 = vector.load %arg8[%c0, %c0_1] : memref<8x128xf32, #tpu.memory_space<vmem>>, vector<8x128xf32>
    %c0_2 = arith.constant 0 : index
    %c0_3 = arith.constant 0 : index
    %4 = vector.load %arg2[%c0_2, %c0_3] : memref<8x384xbf16, #tpu.memory_space<vmem>>, vector<8x384xbf16>
    %c0_4 = arith.constant 0 : index
    %c0_5 = arith.constant 0 : index
    %5 = vector.load %arg3[%c0_4, %c0_5] : memref<384x128xbf16, #tpu.memory_space<vmem>>, vector<384x128xbf16>
    %cst = arith.constant dense<0.000000e+00> : vector<8x128xf32>
    %6 = tpu.matmul %4, %5, %cst {dimension_numbers = #tpu.dot_dimension_numbers<[1], [0], [0], [1], [0, 0, 1, 1], [], []>} : vector<8x384xbf16>, vector<384x128xbf16>, vector<8x128xf32> -> vector<8x128xf32>
    %7 = arith.addf %3, %6 : vector<8x128xf32>
    %c0_6 = arith.constant 0 : index
    %c0_7 = arith.constant 0 : index
    %8 = vector.load %arg8[%c0_6, %c0_7] : memref<8x128xf32, #tpu.memory_space<vmem>>, vector<8x128xf32>
    tpu.vector_store %arg8[%c0_6, %c0_7], %7 {strides = array<i32>} : memref<8x128xf32, #tpu.memory_space<vmem>>, vector<8x128xf32>,
    %c2_i32 = arith.constant 2 : i32
    %9 = arith.cmpi eq, %arg1, %c2_i32 : i32
    %10 = arith.extui %9 : i1 to i32
    %c0_i32_8 = arith.constant 0 : i32
    %11 = arith.cmpi ne, %10, %c0_i32_8 : i32
    scf.if %11 {
      %c0_9 = arith.constant 0 : index
      %c0_10 = arith.constant 0 : index
      %12 = vector.load %arg8[%c0_9, %c0_10] : memref<8x128xf32, #tpu.memory_space<vmem>>, vector<8x128xf32>
      %cst_11 = arith.constant dense<0.000000e+00> : vector<128xf32>
      %13 = vector.multi_reduction <add>, %12, %cst_11 [0] : vector<8x128xf32> to vector<128xf32>
      %14 = vector.shape_cast %13 : vector<128xf32> to vector<1x128xf32>
      %cst_12 = arith.constant 8.000000e+00 : f32
      %15 = vector.broadcast %cst_12 : f32 to vector<1x128xf32>
      %16 = arith.divf %14, %15 : vector<1x128xf32>
      %17 = vector.broadcast %16 : vector<1x128xf32> to vector<8x128xf32>
      %18 = arith.subf %12, %17 : vector<8x128xf32>
      %19 = arith.mulf %18, %18 : vector<8x128xf32>
      %cst_13 = arith.constant dense<0.000000e+00> : vector<128xf32>
      %20 = vector.multi_reduction <add>, %19, %cst_13 [0] : vector<8x128xf32> to vector<128xf32>
      %21 = vector.shape_cast %20 : vector<128xf32> to vector<1x128xf32>
      %cst_14 = arith.constant 8.000000e+00 : f32
      %22 = vector.broadcast %cst_14 : f32 to vector<1x128xf32>
      %23 = arith.divf %21, %22 : vector<1x128xf32>
      %24 = vector.broadcast %16 : vector<1x128xf32> to vector<8x128xf32>
      %25 = arith.subf %12, %24 : vector<8x128xf32>
      %cst_15 = arith.constant 9.99999974E-6 : f32
      %26 = vector.broadcast %cst_15 : f32 to vector<1x128xf32>
      %27 = arith.addf %23, %26 : vector<1x128xf32>
      %28 = math.rsqrt %27 : vector<1x128xf32>
      %29 = vector.broadcast %28 : vector<1x128xf32> to vector<8x128xf32>
      %30 = arith.mulf %25, %29 : vector<8x128xf32>
      %c0_16 = arith.constant 0 : index
      %c0_17 = arith.constant 0 : index
      %31 = vector.load %arg4[%c0_16, %c0_17] : memref<1x128xf32, #tpu.memory_space<vmem>>, vector<1x128xf32>
      %32 = vector.broadcast %31 : vector<1x128xf32> to vector<8x128xf32>
      %33 = arith.mulf %30, %32 : vector<8x128xf32>
      %c0_18 = arith.constant 0 : index
      %c0_19 = arith.constant 0 : index
      %34 = vector.load %arg5[%c0_18, %c0_19] : memref<1x128xf32, #tpu.memory_space<vmem>>, vector<1x128xf32>
      %35 = vector.broadcast %34 : vector<1x128xf32> to vector<8x128xf32>
      %36 = arith.addf %33, %35 : vector<8x128xf32>
      %c0_20 = arith.constant 0 : index
      %c0_21 = arith.constant 0 : index
      %37 = vector.load %arg6[%c0_20, %c0_21] : memref<8x128xf32, #tpu.memory_space<vmem>>, vector<8x128xf32>
      %38 = arith.addf %36, %37 : vector<8x128xf32>
      %cst_22 = arith.constant 0.000000e+00 : f32
      %39 = vector.broadcast %cst_22 : f32 to vector<8x128xf32>
      %40 = arith.maximumf %38, %39 : vector<8x128xf32>
      %c0_23 = arith.constant 0 : index
      %c0_24 = arith.constant 0 : index
      %41 = vector.load %arg7[%c0_23, %c0_24] : memref<8x128xf32, #tpu.memory_space<vmem>>, vector<8x128xf32>
      tpu.vector_store %arg7[%c0_23, %c0_24], %40 {strides = array<i32>} : memref<8x128xf32, #tpu.memory_space<vmem>>, vector<8x128xf32>,
    } else {
    }
    return
  }
  func.func @transform_0(%arg0: i32, %arg1: i32) -> (i32, i32) {
    %c0_i32 = arith.constant 0 : i32
    %c0_i32_0 = arith.constant 0 : i32
    return %c0_i32, %arg1 : i32, i32
  }
  func.func @transform_1(%arg0: i32, %arg1: i32) -> (i32, i32) {
    %c0_i32 = arith.constant 0 : i32
    return %arg1, %arg0 : i32, i32
  }
  func.func @transform_2(%arg0: i32, %arg1: i32) -> (i32, i32) {
    %c0_i32 = arith.constant 0 : i32
    %c0_i32_0 = arith.constant 0 : i32
    return %c0_i32, %arg0 : i32, i32
  }
  func.func @transform_3(%arg0: i32, %arg1: i32) -> (i32, i32) {
    %c0_i32 = arith.constant 0 : i32
    %c0_i32_0 = arith.constant 0 : i32
    return %c0_i32, %arg0 : i32, i32
  }
  func.func @transform_4(%arg0: i32, %arg1: i32) -> (i32, i32) {
    %c0_i32 = arith.constant 0 : i32
    %c0_i32_0 = arith.constant 0 : i32
    return %c0_i32, %arg0 : i32, i32
  }
  func.func @transform_5(%arg0: i32, %arg1: i32) -> (i32, i32) {
    %c0_i32 = arith.constant 0 : i32
    %c0_i32_0 = arith.constant 0 : i32
    return %c0_i32, %arg0 : i32, i32
  }
}

module attributes {stable_mosaic.version = 11 : i64} {
  func.func @_conv_bn_kernel(%arg0: i32, %arg1: i32, %arg2: memref<8x128xbf16, #tpu.memory_space<vmem>>, %arg3: memref<128x128xbf16, #tpu.memory_space<vmem>>, %arg4: memref<1x128xf32, #tpu.memory_space<vmem>>, %arg5: memref<1x128xf32, #tpu.memory_space<vmem>>, %arg6: memref<8x128xf32, #tpu.memory_space<vmem>>, %arg7: memref<8x128xf32, #tpu.memory_space<vmem>>) attributes {dimension_semantics = [#tpu.dimension_semantics<parallel>, #tpu.dimension_semantics<arbitrary>], iteration_bounds = array<i64: 1, 1>, scalar_prefetch = 0 : i64, scratch_operands = 1 : i64, tpu.core_type = #tpu.core_type<tc>, window_params = [{transform_indices = @transform_0, window_bounds = array<i64: 8, 128>}, {transform_indices = @transform_1, window_bounds = array<i64: 128, 128>}, {transform_indices = @transform_2, window_bounds = array<i64: 1, 128>}, {transform_indices = @transform_3, window_bounds = array<i64: 1, 128>}, {transform_indices = @transform_4, window_bounds = array<i64: 8, 128>}]} {
    %c0_i32 = arith.constant 0 : i32
    %0 = arith.cmpi eq, %arg1, %c0_i32 : i32
    %1 = arith.extui %0 : i1 to i32
    %c0_i32_0 = arith.constant 0 : i32
    %2 = arith.cmpi ne, %1, %c0_i32_0 : i32
    scf.if %2 {
      %cst_10 = arith.constant 0.000000e+00 : f32
      %12 = vector.broadcast %cst_10 : f32 to vector<8x128xf32>
      %c0_11 = arith.constant 0 : index
      %c0_12 = arith.constant 0 : index
      %13 = vector.load %arg7[%c0_11, %c0_12] : memref<8x128xf32, #tpu.memory_space<vmem>>, vector<8x128xf32>
      tpu.vector_store %arg7[%c0_11, %c0_12], %12 {strides = array<i32>} : memref<8x128xf32, #tpu.memory_space<vmem>>, vector<8x128xf32>,
    } else {
    }
    %c0 = arith.constant 0 : index
    %c0_1 = arith.constant 0 : index
    %3 = vector.load %arg7[%c0, %c0_1] : memref<8x128xf32, #tpu.memory_space<vmem>>, vector<8x128xf32>
    %c0_2 = arith.constant 0 : index
    %c0_3 = arith.constant 0 : index
    %4 = vector.load %arg2[%c0_2, %c0_3] : memref<8x128xbf16, #tpu.memory_space<vmem>>, vector<8x128xbf16>
    %c0_4 = arith.constant 0 : index
    %c0_5 = arith.constant 0 : index
    %5 = vector.load %arg3[%c0_4, %c0_5] : memref<128x128xbf16, #tpu.memory_space<vmem>>, vector<128x128xbf16>
    %cst = arith.constant dense<0.000000e+00> : vector<8x128xf32>
    %6 = tpu.matmul %4, %5, %cst {dimension_numbers = #tpu.dot_dimension_numbers<[1], [0], [0], [1], [0, 0, 1, 1], [], []>} : vector<8x128xbf16>, vector<128x128xbf16>, vector<8x128xf32> -> vector<8x128xf32>
    %7 = arith.addf %3, %6 : vector<8x128xf32>
    %c0_6 = arith.constant 0 : index
    %c0_7 = arith.constant 0 : index
    %8 = vector.load %arg7[%c0_6, %c0_7] : memref<8x128xf32, #tpu.memory_space<vmem>>, vector<8x128xf32>
    tpu.vector_store %arg7[%c0_6, %c0_7], %7 {strides = array<i32>} : memref<8x128xf32, #tpu.memory_space<vmem>>, vector<8x128xf32>,
    %c0_i32_8 = arith.constant 0 : i32
    %9 = arith.cmpi eq, %arg1, %c0_i32_8 : i32
    %10 = arith.extui %9 : i1 to i32
    %c0_i32_9 = arith.constant 0 : i32
    %11 = arith.cmpi ne, %10, %c0_i32_9 : i32
    scf.if %11 {
      %c0_10 = arith.constant 0 : index
      %c0_11 = arith.constant 0 : index
      %12 = vector.load %arg7[%c0_10, %c0_11] : memref<8x128xf32, #tpu.memory_space<vmem>>, vector<8x128xf32>
      %cst_12 = arith.constant dense<0.000000e+00> : vector<128xf32>
      %13 = vector.multi_reduction <add>, %12, %cst_12 [0] : vector<8x128xf32> to vector<128xf32>
      %14 = vector.shape_cast %13 : vector<128xf32> to vector<1x128xf32>
      %cst_13 = arith.constant 8.000000e+00 : f32
      %15 = vector.broadcast %cst_13 : f32 to vector<1x128xf32>
      %16 = arith.divf %14, %15 : vector<1x128xf32>
      %17 = vector.broadcast %16 : vector<1x128xf32> to vector<8x128xf32>
      %18 = arith.subf %12, %17 : vector<8x128xf32>
      %19 = arith.mulf %18, %18 : vector<8x128xf32>
      %cst_14 = arith.constant dense<0.000000e+00> : vector<128xf32>
      %20 = vector.multi_reduction <add>, %19, %cst_14 [0] : vector<8x128xf32> to vector<128xf32>
      %21 = vector.shape_cast %20 : vector<128xf32> to vector<1x128xf32>
      %cst_15 = arith.constant 8.000000e+00 : f32
      %22 = vector.broadcast %cst_15 : f32 to vector<1x128xf32>
      %23 = arith.divf %21, %22 : vector<1x128xf32>
      %24 = vector.broadcast %16 : vector<1x128xf32> to vector<8x128xf32>
      %25 = arith.subf %12, %24 : vector<8x128xf32>
      %cst_16 = arith.constant 9.99999974E-6 : f32
      %26 = vector.broadcast %cst_16 : f32 to vector<1x128xf32>
      %27 = arith.addf %23, %26 : vector<1x128xf32>
      %28 = math.rsqrt %27 : vector<1x128xf32>
      %29 = vector.broadcast %28 : vector<1x128xf32> to vector<8x128xf32>
      %30 = arith.mulf %25, %29 : vector<8x128xf32>
      %c0_17 = arith.constant 0 : index
      %c0_18 = arith.constant 0 : index
      %31 = vector.load %arg4[%c0_17, %c0_18] : memref<1x128xf32, #tpu.memory_space<vmem>>, vector<1x128xf32>
      %32 = vector.broadcast %31 : vector<1x128xf32> to vector<8x128xf32>
      %33 = arith.mulf %30, %32 : vector<8x128xf32>
      %c0_19 = arith.constant 0 : index
      %c0_20 = arith.constant 0 : index
      %34 = vector.load %arg5[%c0_19, %c0_20] : memref<1x128xf32, #tpu.memory_space<vmem>>, vector<1x128xf32>
      %35 = vector.broadcast %34 : vector<1x128xf32> to vector<8x128xf32>
      %36 = arith.addf %33, %35 : vector<8x128xf32>
      %c0_21 = arith.constant 0 : index
      %c0_22 = arith.constant 0 : index
      %37 = vector.load %arg6[%c0_21, %c0_22] : memref<8x128xf32, #tpu.memory_space<vmem>>, vector<8x128xf32>
      tpu.vector_store %arg6[%c0_21, %c0_22], %36 {strides = array<i32>} : memref<8x128xf32, #tpu.memory_space<vmem>>, vector<8x128xf32>,
    } else {
    }
    return
  }
  func.func @transform_0(%arg0: i32, %arg1: i32) -> (i32, i32) {
    %c0_i32 = arith.constant 0 : i32
    %c0_i32_0 = arith.constant 0 : i32
    return %c0_i32, %arg1 : i32, i32
  }
  func.func @transform_1(%arg0: i32, %arg1: i32) -> (i32, i32) {
    %c0_i32 = arith.constant 0 : i32
    return %arg1, %arg0 : i32, i32
  }
  func.func @transform_2(%arg0: i32, %arg1: i32) -> (i32, i32) {
    %c0_i32 = arith.constant 0 : i32
    %c0_i32_0 = arith.constant 0 : i32
    return %c0_i32, %arg0 : i32, i32
  }
  func.func @transform_3(%arg0: i32, %arg1: i32) -> (i32, i32) {
    %c0_i32 = arith.constant 0 : i32
    %c0_i32_0 = arith.constant 0 : i32
    return %c0_i32, %arg0 : i32, i32
  }
  func.func @transform_4(%arg0: i32, %arg1: i32) -> (i32, i32) {
    %c0_i32 = arith.constant 0 : i32
    %c0_i32_0 = arith.constant 0 : i32
    return %c0_i32, %arg0 : i32, i32
  }
}

module attributes {stable_mosaic.version = 11 : i64} {
  func.func @_conv_bn_kernel(%arg0: i32, %arg1: i32, %arg2: memref<8x384xbf16, #tpu.memory_space<vmem>>, %arg3: memref<384x128xbf16, #tpu.memory_space<vmem>>, %arg4: memref<1x128xf32, #tpu.memory_space<vmem>>, %arg5: memref<1x128xf32, #tpu.memory_space<vmem>>, %arg6: memref<8x128xf32, #tpu.memory_space<vmem>>, %arg7: memref<8x128xf32, #tpu.memory_space<vmem>>) attributes {dimension_semantics = [#tpu.dimension_semantics<parallel>, #tpu.dimension_semantics<arbitrary>], iteration_bounds = array<i64: 1, 3>, scalar_prefetch = 0 : i64, scratch_operands = 1 : i64, tpu.core_type = #tpu.core_type<tc>, window_params = [{transform_indices = @transform_0, window_bounds = array<i64: 8, 384>}, {transform_indices = @transform_1, window_bounds = array<i64: 384, 128>}, {transform_indices = @transform_2, window_bounds = array<i64: 1, 128>}, {transform_indices = @transform_3, window_bounds = array<i64: 1, 128>}, {transform_indices = @transform_4, window_bounds = array<i64: 8, 128>}]} {
    %c0_i32 = arith.constant 0 : i32
    %0 = arith.cmpi eq, %arg1, %c0_i32 : i32
    %1 = arith.extui %0 : i1 to i32
    %c0_i32_0 = arith.constant 0 : i32
    %2 = arith.cmpi ne, %1, %c0_i32_0 : i32
    scf.if %2 {
      %cst_9 = arith.constant 0.000000e+00 : f32
      %12 = vector.broadcast %cst_9 : f32 to vector<8x128xf32>
      %c0_10 = arith.constant 0 : index
      %c0_11 = arith.constant 0 : index
      %13 = vector.load %arg7[%c0_10, %c0_11] : memref<8x128xf32, #tpu.memory_space<vmem>>, vector<8x128xf32>
      tpu.vector_store %arg7[%c0_10, %c0_11], %12 {strides = array<i32>} : memref<8x128xf32, #tpu.memory_space<vmem>>, vector<8x128xf32>,
    } else {
    }
    %c0 = arith.constant 0 : index
    %c0_1 = arith.constant 0 : index
    %3 = vector.load %arg7[%c0, %c0_1] : memref<8x128xf32, #tpu.memory_space<vmem>>, vector<8x128xf32>
    %c0_2 = arith.constant 0 : index
    %c0_3 = arith.constant 0 : index
    %4 = vector.load %arg2[%c0_2, %c0_3] : memref<8x384xbf16, #tpu.memory_space<vmem>>, vector<8x384xbf16>
    %c0_4 = arith.constant 0 : index
    %c0_5 = arith.constant 0 : index
    %5 = vector.load %arg3[%c0_4, %c0_5] : memref<384x128xbf16, #tpu.memory_space<vmem>>, vector<384x128xbf16>
    %cst = arith.constant dense<0.000000e+00> : vector<8x128xf32>
    %6 = tpu.matmul %4, %5, %cst {dimension_numbers = #tpu.dot_dimension_numbers<[1], [0], [0], [1], [0, 0, 1, 1], [], []>} : vector<8x384xbf16>, vector<384x128xbf16>, vector<8x128xf32> -> vector<8x128xf32>
    %7 = arith.addf %3, %6 : vector<8x128xf32>
    %c0_6 = arith.constant 0 : index
    %c0_7 = arith.constant 0 : index
    %8 = vector.load %arg7[%c0_6, %c0_7] : memref<8x128xf32, #tpu.memory_space<vmem>>, vector<8x128xf32>
    tpu.vector_store %arg7[%c0_6, %c0_7], %7 {strides = array<i32>} : memref<8x128xf32, #tpu.memory_space<vmem>>, vector<8x128xf32>,
    %c2_i32 = arith.constant 2 : i32
    %9 = arith.cmpi eq, %arg1, %c2_i32 : i32
    %10 = arith.extui %9 : i1 to i32
    %c0_i32_8 = arith.constant 0 : i32
    %11 = arith.cmpi ne, %10, %c0_i32_8 : i32
    scf.if %11 {
      %c0_9 = arith.constant 0 : index
      %c0_10 = arith.constant 0 : index
      %12 = vector.load %arg7[%c0_9, %c0_10] : memref<8x128xf32, #tpu.memory_space<vmem>>, vector<8x128xf32>
      %cst_11 = arith.constant dense<0.000000e+00> : vector<128xf32>
      %13 = vector.multi_reduction <add>, %12, %cst_11 [0] : vector<8x128xf32> to vector<128xf32>
      %14 = vector.shape_cast %13 : vector<128xf32> to vector<1x128xf32>
      %cst_12 = arith.constant 8.000000e+00 : f32
      %15 = vector.broadcast %cst_12 : f32 to vector<1x128xf32>
      %16 = arith.divf %14, %15 : vector<1x128xf32>
      %17 = vector.broadcast %16 : vector<1x128xf32> to vector<8x128xf32>
      %18 = arith.subf %12, %17 : vector<8x128xf32>
      %19 = arith.mulf %18, %18 : vector<8x128xf32>
      %cst_13 = arith.constant dense<0.000000e+00> : vector<128xf32>
      %20 = vector.multi_reduction <add>, %19, %cst_13 [0] : vector<8x128xf32> to vector<128xf32>
      %21 = vector.shape_cast %20 : vector<128xf32> to vector<1x128xf32>
      %cst_14 = arith.constant 8.000000e+00 : f32
      %22 = vector.broadcast %cst_14 : f32 to vector<1x128xf32>
      %23 = arith.divf %21, %22 : vector<1x128xf32>
      %24 = vector.broadcast %16 : vector<1x128xf32> to vector<8x128xf32>
      %25 = arith.subf %12, %24 : vector<8x128xf32>
      %cst_15 = arith.constant 9.99999974E-6 : f32
      %26 = vector.broadcast %cst_15 : f32 to vector<1x128xf32>
      %27 = arith.addf %23, %26 : vector<1x128xf32>
      %28 = math.rsqrt %27 : vector<1x128xf32>
      %29 = vector.broadcast %28 : vector<1x128xf32> to vector<8x128xf32>
      %30 = arith.mulf %25, %29 : vector<8x128xf32>
      %c0_16 = arith.constant 0 : index
      %c0_17 = arith.constant 0 : index
      %31 = vector.load %arg4[%c0_16, %c0_17] : memref<1x128xf32, #tpu.memory_space<vmem>>, vector<1x128xf32>
      %32 = vector.broadcast %31 : vector<1x128xf32> to vector<8x128xf32>
      %33 = arith.mulf %30, %32 : vector<8x128xf32>
      %c0_18 = arith.constant 0 : index
      %c0_19 = arith.constant 0 : index
      %34 = vector.load %arg5[%c0_18, %c0_19] : memref<1x128xf32, #tpu.memory_space<vmem>>, vector<1x128xf32>
      %35 = vector.broadcast %34 : vector<1x128xf32> to vector<8x128xf32>
      %36 = arith.addf %33, %35 : vector<8x128xf32>
      %cst_20 = arith.constant 0.000000e+00 : f32
      %37 = vector.broadcast %cst_20 : f32 to vector<8x128xf32>
      %38 = arith.maximumf %36, %37 : vector<8x128xf32>
      %c0_21 = arith.constant 0 : index
      %c0_22 = arith.constant 0 : index
      %39 = vector.load %arg6[%c0_21, %c0_22] : memref<8x128xf32, #tpu.memory_space<vmem>>, vector<8x128xf32>
      tpu.vector_store %arg6[%c0_21, %c0_22], %38 {strides = array<i32>} : memref<8x128xf32, #tpu.memory_space<vmem>>, vector<8x128xf32>,
    } else {
    }
    return
  }
  func.func @transform_0(%arg0: i32, %arg1: i32) -> (i32, i32) {
    %c0_i32 = arith.constant 0 : i32
    %c0_i32_0 = arith.constant 0 : i32
    return %c0_i32, %arg1 : i32, i32
  }
  func.func @transform_1(%arg0: i32, %arg1: i32) -> (i32, i32) {
    %c0_i32 = arith.constant 0 : i32
    return %arg1, %arg0 : i32, i32
  }
  func.func @transform_2(%arg0: i32, %arg1: i32) -> (i32, i32) {
    %c0_i32 = arith.constant 0 : i32
    %c0_i32_0 = arith.constant 0 : i32
    return %c0_i32, %arg0 : i32, i32
  }
  func.func @transform_3(%arg0: i32, %arg1: i32) -> (i32, i32) {
    %c0_i32 = arith.constant 0 : i32
    %c0_i32_0 = arith.constant 0 : i32
    return %c0_i32, %arg0 : i32, i32
  }
  func.func @transform_4(%arg0: i32, %arg1: i32) -> (i32, i32) {
    %c0_i32 = arith.constant 0 : i32
    %c0_i32_0 = arith.constant 0 : i32
    return %c0_i32, %arg0 : i32, i32
  }
}

module attributes {stable_mosaic.version = 11 : i64} {
  func.func @_conv_bn_kernel(%arg0: i32, %arg1: i32, %arg2: memref<2x384xbf16, #tpu.memory_space<vmem>>, %arg3: memref<384x128xbf16, #tpu.memory_space<vmem>>, %arg4: memref<1x128xf32, #tpu.memory_space<vmem>>, %arg5: memref<1x128xf32, #tpu.memory_space<vmem>>, %arg6: memref<2x128xf32, #tpu.memory_space<vmem>>, %arg7: memref<2x128xf32, #tpu.memory_space<vmem>>) attributes {dimension_semantics = [#tpu.dimension_semantics<parallel>, #tpu.dimension_semantics<arbitrary>], iteration_bounds = array<i64: 2, 3>, scalar_prefetch = 0 : i64, scratch_operands = 1 : i64, tpu.core_type = #tpu.core_type<tc>, window_params = [{transform_indices = @transform_0, window_bounds = array<i64: 2, 384>}, {transform_indices = @transform_1, window_bounds = array<i64: 384, 128>}, {transform_indices = @transform_2, window_bounds = array<i64: 1, 128>}, {transform_indices = @transform_3, window_bounds = array<i64: 1, 128>}, {transform_indices = @transform_4, window_bounds = array<i64: 2, 128>}]} {
    %c0_i32 = arith.constant 0 : i32
    %0 = arith.cmpi eq, %arg1, %c0_i32 : i32
    %1 = arith.extui %0 : i1 to i32
    %c0_i32_0 = arith.constant 0 : i32
    %2 = arith.cmpi ne, %1, %c0_i32_0 : i32
    scf.if %2 {
      %cst_9 = arith.constant 0.000000e+00 : f32
      %12 = vector.broadcast %cst_9 : f32 to vector<2x128xf32>
      %c0_10 = arith.constant 0 : index
      %c0_11 = arith.constant 0 : index
      %13 = vector.load %arg7[%c0_10, %c0_11] : memref<2x128xf32, #tpu.memory_space<vmem>>, vector<2x128xf32>
      tpu.vector_store %arg7[%c0_10, %c0_11], %12 {strides = array<i32>} : memref<2x128xf32, #tpu.memory_space<vmem>>, vector<2x128xf32>,
    } else {
    }
    %c0 = arith.constant 0 : index
    %c0_1 = arith.constant 0 : index
    %3 = vector.load %arg7[%c0, %c0_1] : memref<2x128xf32, #tpu.memory_space<vmem>>, vector<2x128xf32>
    %c0_2 = arith.constant 0 : index
    %c0_3 = arith.constant 0 : index
    %4 = vector.load %arg2[%c0_2, %c0_3] : memref<2x384xbf16, #tpu.memory_space<vmem>>, vector<2x384xbf16>
    %c0_4 = arith.constant 0 : index
    %c0_5 = arith.constant 0 : index
    %5 = vector.load %arg3[%c0_4, %c0_5] : memref<384x128xbf16, #tpu.memory_space<vmem>>, vector<384x128xbf16>
    %cst = arith.constant dense<0.000000e+00> : vector<2x128xf32>
    %6 = tpu.matmul %4, %5, %cst {dimension_numbers = #tpu.dot_dimension_numbers<[1], [0], [0], [1], [0, 0, 1, 1], [], []>} : vector<2x384xbf16>, vector<384x128xbf16>, vector<2x128xf32> -> vector<2x128xf32>
    %7 = arith.addf %3, %6 : vector<2x128xf32>
    %c0_6 = arith.constant 0 : index
    %c0_7 = arith.constant 0 : index
    %8 = vector.load %arg7[%c0_6, %c0_7] : memref<2x128xf32, #tpu.memory_space<vmem>>, vector<2x128xf32>
    tpu.vector_store %arg7[%c0_6, %c0_7], %7 {strides = array<i32>} : memref<2x128xf32, #tpu.memory_space<vmem>>, vector<2x128xf32>,
    %c2_i32 = arith.constant 2 : i32
    %9 = arith.cmpi eq, %arg1, %c2_i32 : i32
    %10 = arith.extui %9 : i1 to i32
    %c0_i32_8 = arith.constant 0 : i32
    %11 = arith.cmpi ne, %10, %c0_i32_8 : i32
    scf.if %11 {
      %c0_9 = arith.constant 0 : index
      %c0_10 = arith.constant 0 : index
      %12 = vector.load %arg7[%c0_9, %c0_10] : memref<2x128xf32, #tpu.memory_space<vmem>>, vector<2x128xf32>
      %cst_11 = arith.constant dense<0.000000e+00> : vector<128xf32>
      %13 = vector.multi_reduction <add>, %12, %cst_11 [0] : vector<2x128xf32> to vector<128xf32>
      %14 = vector.shape_cast %13 : vector<128xf32> to vector<1x128xf32>
      %cst_12 = arith.constant 2.000000e+00 : f32
      %15 = vector.broadcast %cst_12 : f32 to vector<1x128xf32>
      %16 = arith.divf %14, %15 : vector<1x128xf32>
      %17 = vector.broadcast %16 : vector<1x128xf32> to vector<2x128xf32>
      %18 = arith.subf %12, %17 : vector<2x128xf32>
      %19 = arith.mulf %18, %18 : vector<2x128xf32>
      %cst_13 = arith.constant dense<0.000000e+00> : vector<128xf32>
      %20 = vector.multi_reduction <add>, %19, %cst_13 [0] : vector<2x128xf32> to vector<128xf32>
      %21 = vector.shape_cast %20 : vector<128xf32> to vector<1x128xf32>
      %cst_14 = arith.constant 2.000000e+00 : f32
      %22 = vector.broadcast %cst_14 : f32 to vector<1x128xf32>
      %23 = arith.divf %21, %22 : vector<1x128xf32>
      %24 = vector.broadcast %16 : vector<1x128xf32> to vector<2x128xf32>
      %25 = arith.subf %12, %24 : vector<2x128xf32>
      %cst_15 = arith.constant 9.99999974E-6 : f32
      %26 = vector.broadcast %cst_15 : f32 to vector<1x128xf32>
      %27 = arith.addf %23, %26 : vector<1x128xf32>
      %28 = math.rsqrt %27 : vector<1x128xf32>
      %29 = vector.broadcast %28 : vector<1x128xf32> to vector<2x128xf32>
      %30 = arith.mulf %25, %29 : vector<2x128xf32>
      %c0_16 = arith.constant 0 : index
      %c0_17 = arith.constant 0 : index
      %31 = vector.load %arg4[%c0_16, %c0_17] : memref<1x128xf32, #tpu.memory_space<vmem>>, vector<1x128xf32>
      %32 = vector.broadcast %31 : vector<1x128xf32> to vector<2x128xf32>
      %33 = arith.mulf %30, %32 : vector<2x128xf32>
      %c0_18 = arith.constant 0 : index
      %c0_19 = arith.constant 0 : index
      %34 = vector.load %arg5[%c0_18, %c0_19] : memref<1x128xf32, #tpu.memory_space<vmem>>, vector<1x128xf32>
      %35 = vector.broadcast %34 : vector<1x128xf32> to vector<2x128xf32>
      %36 = arith.addf %33, %35 : vector<2x128xf32>
      %cst_20 = arith.constant 0.000000e+00 : f32
      %37 = vector.broadcast %cst_20 : f32 to vector<2x128xf32>
      %38 = arith.maximumf %36, %37 : vector<2x128xf32>
      %c0_21 = arith.constant 0 : index
      %c0_22 = arith.constant 0 : index
      %39 = vector.load %arg6[%c0_21, %c0_22] : memref<2x128xf32, #tpu.memory_space<vmem>>, vector<2x128xf32>
      tpu.vector_store %arg6[%c0_21, %c0_22], %38 {strides = array<i32>} : memref<2x128xf32, #tpu.memory_space<vmem>>, vector<2x128xf32>,
    } else {
    }
    return
  }
  func.func @transform_0(%arg0: i32, %arg1: i32) -> (i32, i32) {
    %c0_i32 = arith.constant 0 : i32
    %c0_i32_0 = arith.constant 0 : i32
    return %c0_i32, %arg1 : i32, i32
  }
  func.func @transform_1(%arg0: i32, %arg1: i32) -> (i32, i32) {
    %c0_i32 = arith.constant 0 : i32
    return %arg1, %arg0 : i32, i32
  }
  func.func @transform_2(%arg0: i32, %arg1: i32) -> (i32, i32) {
    %c0_i32 = arith.constant 0 : i32
    %c0_i32_0 = arith.constant 0 : i32
    return %c0_i32, %arg0 : i32, i32
  }
  func.func @transform_3(%arg0: i32, %arg1: i32) -> (i32, i32) {
    %c0_i32 = arith.constant 0 : i32
    %c0_i32_0 = arith.constant 0 : i32
    return %c0_i32, %arg0 : i32, i32
  }
  func.func @transform_4(%arg0: i32, %arg1: i32) -> (i32, i32) {
    %c0_i32 = arith.constant 0 : i32
    %c0_i32_0 = arith.constant 0 : i32
    return %c0_i32, %arg0 : i32, i32
  }
}

module attributes {stable_mosaic.version = 11 : i64} {
  func.func @_conv_bn_kernel(%arg0: i32, %arg1: i32, %arg2: memref<2x128xbf16, #tpu.memory_space<vmem>>, %arg3: memref<128x128xbf16, #tpu.memory_space<vmem>>, %arg4: memref<1x128xf32, #tpu.memory_space<vmem>>, %arg5: memref<1x128xf32, #tpu.memory_space<vmem>>, %arg6: memref<2x128xf32, #tpu.memory_space<vmem>>, %arg7: memref<2x128xf32, #tpu.memory_space<vmem>>) attributes {dimension_semantics = [#tpu.dimension_semantics<parallel>, #tpu.dimension_semantics<arbitrary>], iteration_bounds = array<i64: 2, 1>, scalar_prefetch = 0 : i64, scratch_operands = 1 : i64, tpu.core_type = #tpu.core_type<tc>, window_params = [{transform_indices = @transform_0, window_bounds = array<i64: 2, 128>}, {transform_indices = @transform_1, window_bounds = array<i64: 128, 128>}, {transform_indices = @transform_2, window_bounds = array<i64: 1, 128>}, {transform_indices = @transform_3, window_bounds = array<i64: 1, 128>}, {transform_indices = @transform_4, window_bounds = array<i64: 2, 128>}]} {
    %c0_i32 = arith.constant 0 : i32
    %0 = arith.cmpi eq, %arg1, %c0_i32 : i32
    %1 = arith.extui %0 : i1 to i32
    %c0_i32_0 = arith.constant 0 : i32
    %2 = arith.cmpi ne, %1, %c0_i32_0 : i32
    scf.if %2 {
      %cst_10 = arith.constant 0.000000e+00 : f32
      %12 = vector.broadcast %cst_10 : f32 to vector<2x128xf32>
      %c0_11 = arith.constant 0 : index
      %c0_12 = arith.constant 0 : index
      %13 = vector.load %arg7[%c0_11, %c0_12] : memref<2x128xf32, #tpu.memory_space<vmem>>, vector<2x128xf32>
      tpu.vector_store %arg7[%c0_11, %c0_12], %12 {strides = array<i32>} : memref<2x128xf32, #tpu.memory_space<vmem>>, vector<2x128xf32>,
    } else {
    }
    %c0 = arith.constant 0 : index
    %c0_1 = arith.constant 0 : index
    %3 = vector.load %arg7[%c0, %c0_1] : memref<2x128xf32, #tpu.memory_space<vmem>>, vector<2x128xf32>
    %c0_2 = arith.constant 0 : index
    %c0_3 = arith.constant 0 : index
    %4 = vector.load %arg2[%c0_2, %c0_3] : memref<2x128xbf16, #tpu.memory_space<vmem>>, vector<2x128xbf16>
    %c0_4 = arith.constant 0 : index
    %c0_5 = arith.constant 0 : index
    %5 = vector.load %arg3[%c0_4, %c0_5] : memref<128x128xbf16, #tpu.memory_space<vmem>>, vector<128x128xbf16>
    %cst = arith.constant dense<0.000000e+00> : vector<2x128xf32>
    %6 = tpu.matmul %4, %5, %cst {dimension_numbers = #tpu.dot_dimension_numbers<[1], [0], [0], [1], [0, 0, 1, 1], [], []>} : vector<2x128xbf16>, vector<128x128xbf16>, vector<2x128xf32> -> vector<2x128xf32>
    %7 = arith.addf %3, %6 : vector<2x128xf32>
    %c0_6 = arith.constant 0 : index
    %c0_7 = arith.constant 0 : index
    %8 = vector.load %arg7[%c0_6, %c0_7] : memref<2x128xf32, #tpu.memory_space<vmem>>, vector<2x128xf32>
    tpu.vector_store %arg7[%c0_6, %c0_7], %7 {strides = array<i32>} : memref<2x128xf32, #tpu.memory_space<vmem>>, vector<2x128xf32>,
    %c0_i32_8 = arith.constant 0 : i32
    %9 = arith.cmpi eq, %arg1, %c0_i32_8 : i32
    %10 = arith.extui %9 : i1 to i32
    %c0_i32_9 = arith.constant 0 : i32
    %11 = arith.cmpi ne, %10, %c0_i32_9 : i32
    scf.if %11 {
      %c0_10 = arith.constant 0 : index
      %c0_11 = arith.constant 0 : index
      %12 = vector.load %arg7[%c0_10, %c0_11] : memref<2x128xf32, #tpu.memory_space<vmem>>, vector<2x128xf32>
      %cst_12 = arith.constant dense<0.000000e+00> : vector<128xf32>
      %13 = vector.multi_reduction <add>, %12, %cst_12 [0] : vector<2x128xf32> to vector<128xf32>
      %14 = vector.shape_cast %13 : vector<128xf32> to vector<1x128xf32>
      %cst_13 = arith.constant 2.000000e+00 : f32
      %15 = vector.broadcast %cst_13 : f32 to vector<1x128xf32>
      %16 = arith.divf %14, %15 : vector<1x128xf32>
      %17 = vector.broadcast %16 : vector<1x128xf32> to vector<2x128xf32>
      %18 = arith.subf %12, %17 : vector<2x128xf32>
      %19 = arith.mulf %18, %18 : vector<2x128xf32>
      %cst_14 = arith.constant dense<0.000000e+00> : vector<128xf32>
      %20 = vector.multi_reduction <add>, %19, %cst_14 [0] : vector<2x128xf32> to vector<128xf32>
      %21 = vector.shape_cast %20 : vector<128xf32> to vector<1x128xf32>
      %cst_15 = arith.constant 2.000000e+00 : f32
      %22 = vector.broadcast %cst_15 : f32 to vector<1x128xf32>
      %23 = arith.divf %21, %22 : vector<1x128xf32>
      %24 = vector.broadcast %16 : vector<1x128xf32> to vector<2x128xf32>
      %25 = arith.subf %12, %24 : vector<2x128xf32>
      %cst_16 = arith.constant 9.99999974E-6 : f32
      %26 = vector.broadcast %cst_16 : f32 to vector<1x128xf32>
      %27 = arith.addf %23, %26 : vector<1x128xf32>
      %28 = math.rsqrt %27 : vector<1x128xf32>
      %29 = vector.broadcast %28 : vector<1x128xf32> to vector<2x128xf32>
      %30 = arith.mulf %25, %29 : vector<2x128xf32>
      %c0_17 = arith.constant 0 : index
      %c0_18 = arith.constant 0 : index
      %31 = vector.load %arg4[%c0_17, %c0_18] : memref<1x128xf32, #tpu.memory_space<vmem>>, vector<1x128xf32>
      %32 = vector.broadcast %31 : vector<1x128xf32> to vector<2x128xf32>
      %33 = arith.mulf %30, %32 : vector<2x128xf32>
      %c0_19 = arith.constant 0 : index
      %c0_20 = arith.constant 0 : index
      %34 = vector.load %arg5[%c0_19, %c0_20] : memref<1x128xf32, #tpu.memory_space<vmem>>, vector<1x128xf32>
      %35 = vector.broadcast %34 : vector<1x128xf32> to vector<2x128xf32>
      %36 = arith.addf %33, %35 : vector<2x128xf32>
      %c0_21 = arith.constant 0 : index
      %c0_22 = arith.constant 0 : index
      %37 = vector.load %arg6[%c0_21, %c0_22] : memref<2x128xf32, #tpu.memory_space<vmem>>, vector<2x128xf32>
      tpu.vector_store %arg6[%c0_21, %c0_22], %36 {strides = array<i32>} : memref<2x128xf32, #tpu.memory_space<vmem>>, vector<2x128xf32>,
    } else {
    }
    return
  }
  func.func @transform_0(%arg0: i32, %arg1: i32) -> (i32, i32) {
    %c0_i32 = arith.constant 0 : i32
    %c0_i32_0 = arith.constant 0 : i32
    return %c0_i32, %arg1 : i32, i32
  }
  func.func @transform_1(%arg0: i32, %arg1: i32) -> (i32, i32) {
    %c0_i32 = arith.constant 0 : i32
    return %arg1, %arg0 : i32, i32
  }
  func.func @transform_2(%arg0: i32, %arg1: i32) -> (i32, i32) {
    %c0_i32 = arith.constant 0 : i32
    %c0_i32_0 = arith.constant 0 : i32
    return %c0_i32, %arg0 : i32, i32
  }
  func.func @transform_3(%arg0: i32, %arg1: i32) -> (i32, i32) {
    %c0_i32 = arith.constant 0 : i32
    %c0_i32_0 = arith.constant 0 : i32
    return %c0_i32, %arg0 : i32, i32
  }
  func.func @transform_4(%arg0: i32, %arg1: i32) -> (i32, i32) {
    %c0_i32 = arith.constant 0 : i32
    %c0_i32_0 = arith.constant 0 : i32
    return %c0_i32, %arg0 : i32, i32
  }
}

module attributes {stable_mosaic.version = 11 : i64} {
  func.func @_conv_bn_kernel(%arg0: i32, %arg1: i32, %arg2: memref<2x384xbf16, #tpu.memory_space<vmem>>, %arg3: memref<384x128xbf16, #tpu.memory_space<vmem>>, %arg4: memref<1x128xf32, #tpu.memory_space<vmem>>, %arg5: memref<1x128xf32, #tpu.memory_space<vmem>>, %arg6: memref<2x128xf32, #tpu.memory_space<vmem>>, %arg7: memref<2x128xf32, #tpu.memory_space<vmem>>, %arg8: memref<2x128xf32, #tpu.memory_space<vmem>>) attributes {dimension_semantics = [#tpu.dimension_semantics<parallel>, #tpu.dimension_semantics<arbitrary>], iteration_bounds = array<i64: 2, 6>, scalar_prefetch = 0 : i64, scratch_operands = 1 : i64, tpu.core_type = #tpu.core_type<tc>, window_params = [{transform_indices = @transform_0, window_bounds = array<i64: 2, 384>}, {transform_indices = @transform_1, window_bounds = array<i64: 384, 128>}, {transform_indices = @transform_2, window_bounds = array<i64: 1, 128>}, {transform_indices = @transform_3, window_bounds = array<i64: 1, 128>}, {transform_indices = @transform_4, window_bounds = array<i64: 2, 128>}, {transform_indices = @transform_5, window_bounds = array<i64: 2, 128>}]} {
    %c0_i32 = arith.constant 0 : i32
    %0 = arith.cmpi eq, %arg1, %c0_i32 : i32
    %1 = arith.extui %0 : i1 to i32
    %c0_i32_0 = arith.constant 0 : i32
    %2 = arith.cmpi ne, %1, %c0_i32_0 : i32
    scf.if %2 {
      %cst_9 = arith.constant 0.000000e+00 : f32
      %12 = vector.broadcast %cst_9 : f32 to vector<2x128xf32>
      %c0_10 = arith.constant 0 : index
      %c0_11 = arith.constant 0 : index
      %13 = vector.load %arg8[%c0_10, %c0_11] : memref<2x128xf32, #tpu.memory_space<vmem>>, vector<2x128xf32>
      tpu.vector_store %arg8[%c0_10, %c0_11], %12 {strides = array<i32>} : memref<2x128xf32, #tpu.memory_space<vmem>>, vector<2x128xf32>,
    } else {
    }
    %c0 = arith.constant 0 : index
    %c0_1 = arith.constant 0 : index
    %3 = vector.load %arg8[%c0, %c0_1] : memref<2x128xf32, #tpu.memory_space<vmem>>, vector<2x128xf32>
    %c0_2 = arith.constant 0 : index
    %c0_3 = arith.constant 0 : index
    %4 = vector.load %arg2[%c0_2, %c0_3] : memref<2x384xbf16, #tpu.memory_space<vmem>>, vector<2x384xbf16>
    %c0_4 = arith.constant 0 : index
    %c0_5 = arith.constant 0 : index
    %5 = vector.load %arg3[%c0_4, %c0_5] : memref<384x128xbf16, #tpu.memory_space<vmem>>, vector<384x128xbf16>
    %cst = arith.constant dense<0.000000e+00> : vector<2x128xf32>
    %6 = tpu.matmul %4, %5, %cst {dimension_numbers = #tpu.dot_dimension_numbers<[1], [0], [0], [1], [0, 0, 1, 1], [], []>} : vector<2x384xbf16>, vector<384x128xbf16>, vector<2x128xf32> -> vector<2x128xf32>
    %7 = arith.addf %3, %6 : vector<2x128xf32>
    %c0_6 = arith.constant 0 : index
    %c0_7 = arith.constant 0 : index
    %8 = vector.load %arg8[%c0_6, %c0_7] : memref<2x128xf32, #tpu.memory_space<vmem>>, vector<2x128xf32>
    tpu.vector_store %arg8[%c0_6, %c0_7], %7 {strides = array<i32>} : memref<2x128xf32, #tpu.memory_space<vmem>>, vector<2x128xf32>,
    %c5_i32 = arith.constant 5 : i32
    %9 = arith.cmpi eq, %arg1, %c5_i32 : i32
    %10 = arith.extui %9 : i1 to i32
    %c0_i32_8 = arith.constant 0 : i32
    %11 = arith.cmpi ne, %10, %c0_i32_8 : i32
    scf.if %11 {
      %c0_9 = arith.constant 0 : index
      %c0_10 = arith.constant 0 : index
      %12 = vector.load %arg8[%c0_9, %c0_10] : memref<2x128xf32, #tpu.memory_space<vmem>>, vector<2x128xf32>
      %cst_11 = arith.constant dense<0.000000e+00> : vector<128xf32>
      %13 = vector.multi_reduction <add>, %12, %cst_11 [0] : vector<2x128xf32> to vector<128xf32>
      %14 = vector.shape_cast %13 : vector<128xf32> to vector<1x128xf32>
      %cst_12 = arith.constant 2.000000e+00 : f32
      %15 = vector.broadcast %cst_12 : f32 to vector<1x128xf32>
      %16 = arith.divf %14, %15 : vector<1x128xf32>
      %17 = vector.broadcast %16 : vector<1x128xf32> to vector<2x128xf32>
      %18 = arith.subf %12, %17 : vector<2x128xf32>
      %19 = arith.mulf %18, %18 : vector<2x128xf32>
      %cst_13 = arith.constant dense<0.000000e+00> : vector<128xf32>
      %20 = vector.multi_reduction <add>, %19, %cst_13 [0] : vector<2x128xf32> to vector<128xf32>
      %21 = vector.shape_cast %20 : vector<128xf32> to vector<1x128xf32>
      %cst_14 = arith.constant 2.000000e+00 : f32
      %22 = vector.broadcast %cst_14 : f32 to vector<1x128xf32>
      %23 = arith.divf %21, %22 : vector<1x128xf32>
      %24 = vector.broadcast %16 : vector<1x128xf32> to vector<2x128xf32>
      %25 = arith.subf %12, %24 : vector<2x128xf32>
      %cst_15 = arith.constant 9.99999974E-6 : f32
      %26 = vector.broadcast %cst_15 : f32 to vector<1x128xf32>
      %27 = arith.addf %23, %26 : vector<1x128xf32>
      %28 = math.rsqrt %27 : vector<1x128xf32>
      %29 = vector.broadcast %28 : vector<1x128xf32> to vector<2x128xf32>
      %30 = arith.mulf %25, %29 : vector<2x128xf32>
      %c0_16 = arith.constant 0 : index
      %c0_17 = arith.constant 0 : index
      %31 = vector.load %arg4[%c0_16, %c0_17] : memref<1x128xf32, #tpu.memory_space<vmem>>, vector<1x128xf32>
      %32 = vector.broadcast %31 : vector<1x128xf32> to vector<2x128xf32>
      %33 = arith.mulf %30, %32 : vector<2x128xf32>
      %c0_18 = arith.constant 0 : index
      %c0_19 = arith.constant 0 : index
      %34 = vector.load %arg5[%c0_18, %c0_19] : memref<1x128xf32, #tpu.memory_space<vmem>>, vector<1x128xf32>
      %35 = vector.broadcast %34 : vector<1x128xf32> to vector<2x128xf32>
      %36 = arith.addf %33, %35 : vector<2x128xf32>
      %c0_20 = arith.constant 0 : index
      %c0_21 = arith.constant 0 : index
      %37 = vector.load %arg6[%c0_20, %c0_21] : memref<2x128xf32, #tpu.memory_space<vmem>>, vector<2x128xf32>
      %38 = arith.addf %36, %37 : vector<2x128xf32>
      %cst_22 = arith.constant 0.000000e+00 : f32
      %39 = vector.broadcast %cst_22 : f32 to vector<2x128xf32>
      %40 = arith.maximumf %38, %39 : vector<2x128xf32>
      %c0_23 = arith.constant 0 : index
      %c0_24 = arith.constant 0 : index
      %41 = vector.load %arg7[%c0_23, %c0_24] : memref<2x128xf32, #tpu.memory_space<vmem>>, vector<2x128xf32>
      tpu.vector_store %arg7[%c0_23, %c0_24], %40 {strides = array<i32>} : memref<2x128xf32, #tpu.memory_space<vmem>>, vector<2x128xf32>,
    } else {
    }
    return
  }
  func.func @transform_0(%arg0: i32, %arg1: i32) -> (i32, i32) {
    %c0_i32 = arith.constant 0 : i32
    %c0_i32_0 = arith.constant 0 : i32
    return %c0_i32, %arg1 : i32, i32
  }
  func.func @transform_1(%arg0: i32, %arg1: i32) -> (i32, i32) {
    %c0_i32 = arith.constant 0 : i32
    return %arg1, %arg0 : i32, i32
  }
  func.func @transform_2(%arg0: i32, %arg1: i32) -> (i32, i32) {
    %c0_i32 = arith.constant 0 : i32
    %c0_i32_0 = arith.constant 0 : i32
    return %c0_i32, %arg0 : i32, i32
  }
  func.func @transform_3(%arg0: i32, %arg1: i32) -> (i32, i32) {
    %c0_i32 = arith.constant 0 : i32
    %c0_i32_0 = arith.constant 0 : i32
    return %c0_i32, %arg0 : i32, i32
  }
  func.func @transform_4(%arg0: i32, %arg1: i32) -> (i32, i32) {
    %c0_i32 = arith.constant 0 : i32
    %c0_i32_0 = arith.constant 0 : i32
    return %c0_i32, %arg0 : i32, i32
  }
  func.func @transform_5(%arg0: i32, %arg1: i32) -> (i32, i32) {
    %c0_i32 = arith.constant 0 : i32
    %c0_i32_0 = arith.constant 0 : i32
    return %c0_i32, %arg0 : i32, i32
  }
}

module attributes {stable_mosaic.version = 11 : i64} {
  func.func @_conv_bn_kernel(%arg0: i32, %arg1: i32, %arg2: memref<2x384xbf16, #tpu.memory_space<vmem>>, %arg3: memref<384x128xbf16, #tpu.memory_space<vmem>>, %arg4: memref<1x128xf32, #tpu.memory_space<vmem>>, %arg5: memref<1x128xf32, #tpu.memory_space<vmem>>, %arg6: memref<2x128xf32, #tpu.memory_space<vmem>>, %arg7: memref<2x128xf32, #tpu.memory_space<vmem>>) attributes {dimension_semantics = [#tpu.dimension_semantics<parallel>, #tpu.dimension_semantics<arbitrary>], iteration_bounds = array<i64: 2, 6>, scalar_prefetch = 0 : i64, scratch_operands = 1 : i64, tpu.core_type = #tpu.core_type<tc>, window_params = [{transform_indices = @transform_0, window_bounds = array<i64: 2, 384>}, {transform_indices = @transform_1, window_bounds = array<i64: 384, 128>}, {transform_indices = @transform_2, window_bounds = array<i64: 1, 128>}, {transform_indices = @transform_3, window_bounds = array<i64: 1, 128>}, {transform_indices = @transform_4, window_bounds = array<i64: 2, 128>}]} {
    %c0_i32 = arith.constant 0 : i32
    %0 = arith.cmpi eq, %arg1, %c0_i32 : i32
    %1 = arith.extui %0 : i1 to i32
    %c0_i32_0 = arith.constant 0 : i32
    %2 = arith.cmpi ne, %1, %c0_i32_0 : i32
    scf.if %2 {
      %cst_9 = arith.constant 0.000000e+00 : f32
      %12 = vector.broadcast %cst_9 : f32 to vector<2x128xf32>
      %c0_10 = arith.constant 0 : index
      %c0_11 = arith.constant 0 : index
      %13 = vector.load %arg7[%c0_10, %c0_11] : memref<2x128xf32, #tpu.memory_space<vmem>>, vector<2x128xf32>
      tpu.vector_store %arg7[%c0_10, %c0_11], %12 {strides = array<i32>} : memref<2x128xf32, #tpu.memory_space<vmem>>, vector<2x128xf32>,
    } else {
    }
    %c0 = arith.constant 0 : index
    %c0_1 = arith.constant 0 : index
    %3 = vector.load %arg7[%c0, %c0_1] : memref<2x128xf32, #tpu.memory_space<vmem>>, vector<2x128xf32>
    %c0_2 = arith.constant 0 : index
    %c0_3 = arith.constant 0 : index
    %4 = vector.load %arg2[%c0_2, %c0_3] : memref<2x384xbf16, #tpu.memory_space<vmem>>, vector<2x384xbf16>
    %c0_4 = arith.constant 0 : index
    %c0_5 = arith.constant 0 : index
    %5 = vector.load %arg3[%c0_4, %c0_5] : memref<384x128xbf16, #tpu.memory_space<vmem>>, vector<384x128xbf16>
    %cst = arith.constant dense<0.000000e+00> : vector<2x128xf32>
    %6 = tpu.matmul %4, %5, %cst {dimension_numbers = #tpu.dot_dimension_numbers<[1], [0], [0], [1], [0, 0, 1, 1], [], []>} : vector<2x384xbf16>, vector<384x128xbf16>, vector<2x128xf32> -> vector<2x128xf32>
    %7 = arith.addf %3, %6 : vector<2x128xf32>
    %c0_6 = arith.constant 0 : index
    %c0_7 = arith.constant 0 : index
    %8 = vector.load %arg7[%c0_6, %c0_7] : memref<2x128xf32, #tpu.memory_space<vmem>>, vector<2x128xf32>
    tpu.vector_store %arg7[%c0_6, %c0_7], %7 {strides = array<i32>} : memref<2x128xf32, #tpu.memory_space<vmem>>, vector<2x128xf32>,
    %c5_i32 = arith.constant 5 : i32
    %9 = arith.cmpi eq, %arg1, %c5_i32 : i32
    %10 = arith.extui %9 : i1 to i32
    %c0_i32_8 = arith.constant 0 : i32
    %11 = arith.cmpi ne, %10, %c0_i32_8 : i32
    scf.if %11 {
      %c0_9 = arith.constant 0 : index
      %c0_10 = arith.constant 0 : index
      %12 = vector.load %arg7[%c0_9, %c0_10] : memref<2x128xf32, #tpu.memory_space<vmem>>, vector<2x128xf32>
      %cst_11 = arith.constant dense<0.000000e+00> : vector<128xf32>
      %13 = vector.multi_reduction <add>, %12, %cst_11 [0] : vector<2x128xf32> to vector<128xf32>
      %14 = vector.shape_cast %13 : vector<128xf32> to vector<1x128xf32>
      %cst_12 = arith.constant 2.000000e+00 : f32
      %15 = vector.broadcast %cst_12 : f32 to vector<1x128xf32>
      %16 = arith.divf %14, %15 : vector<1x128xf32>
      %17 = vector.broadcast %16 : vector<1x128xf32> to vector<2x128xf32>
      %18 = arith.subf %12, %17 : vector<2x128xf32>
      %19 = arith.mulf %18, %18 : vector<2x128xf32>
      %cst_13 = arith.constant dense<0.000000e+00> : vector<128xf32>
      %20 = vector.multi_reduction <add>, %19, %cst_13 [0] : vector<2x128xf32> to vector<128xf32>
      %21 = vector.shape_cast %20 : vector<128xf32> to vector<1x128xf32>
      %cst_14 = arith.constant 2.000000e+00 : f32
      %22 = vector.broadcast %cst_14 : f32 to vector<1x128xf32>
      %23 = arith.divf %21, %22 : vector<1x128xf32>
      %24 = vector.broadcast %16 : vector<1x128xf32> to vector<2x128xf32>
      %25 = arith.subf %12, %24 : vector<2x128xf32>
      %cst_15 = arith.constant 9.99999974E-6 : f32
      %26 = vector.broadcast %cst_15 : f32 to vector<1x128xf32>
      %27 = arith.addf %23, %26 : vector<1x128xf32>
      %28 = math.rsqrt %27 : vector<1x128xf32>
      %29 = vector.broadcast %28 : vector<1x128xf32> to vector<2x128xf32>
      %30 = arith.mulf %25, %29 : vector<2x128xf32>
      %c0_16 = arith.constant 0 : index
      %c0_17 = arith.constant 0 : index
      %31 = vector.load %arg4[%c0_16, %c0_17] : memref<1x128xf32, #tpu.memory_space<vmem>>, vector<1x128xf32>
      %32 = vector.broadcast %31 : vector<1x128xf32> to vector<2x128xf32>
      %33 = arith.mulf %30, %32 : vector<2x128xf32>
      %c0_18 = arith.constant 0 : index
      %c0_19 = arith.constant 0 : index
      %34 = vector.load %arg5[%c0_18, %c0_19] : memref<1x128xf32, #tpu.memory_space<vmem>>, vector<1x128xf32>
      %35 = vector.broadcast %34 : vector<1x128xf32> to vector<2x128xf32>
      %36 = arith.addf %33, %35 : vector<2x128xf32>
      %cst_20 = arith.constant 0.000000e+00 : f32
      %37 = vector.broadcast %cst_20 : f32 to vector<2x128xf32>
      %38 = arith.maximumf %36, %37 : vector<2x128xf32>
      %c0_21 = arith.constant 0 : index
      %c0_22 = arith.constant 0 : index
      %39 = vector.load %arg6[%c0_21, %c0_22] : memref<2x128xf32, #tpu.memory_space<vmem>>, vector<2x128xf32>
      tpu.vector_store %arg6[%c0_21, %c0_22], %38 {strides = array<i32>} : memref<2x128xf32, #tpu.memory_space<vmem>>, vector<2x128xf32>,
    } else {
    }
    return
  }
  func.func @transform_0(%arg0: i32, %arg1: i32) -> (i32, i32) {
    %c0_i32 = arith.constant 0 : i32
    %c0_i32_0 = arith.constant 0 : i32
    return %c0_i32, %arg1 : i32, i32
  }
  func.func @transform_1(%arg0: i32, %arg1: i32) -> (i32, i32) {
    %c0_i32 = arith.constant 0 : i32
    return %arg1, %arg0 : i32, i32
  }
  func.func @transform_2(%arg0: i32, %arg1: i32) -> (i32, i32) {
    %c0_i32 = arith.constant 0 : i32
    %c0_i32_0 = arith.constant 0 : i32
    return %c0_i32, %arg0 : i32, i32
  }
  func.func @transform_3(%arg0: i32, %arg1: i32) -> (i32, i32) {
    %c0_i32 = arith.constant 0 : i32
    %c0_i32_0 = arith.constant 0 : i32
    return %c0_i32, %arg0 : i32, i32
  }
  func.func @transform_4(%arg0: i32, %arg1: i32) -> (i32, i32) {
    %c0_i32 = arith.constant 0 : i32
    %c0_i32_0 = arith.constant 0 : i32
    return %c0_i32, %arg0 : i32, i32
  }
}

module attributes {stable_mosaic.version = 11 : i64} {
  func.func @_conv_bn_kernel(%arg0: i32, %arg1: i32, %arg2: memref<2x384xbf16, #tpu.memory_space<vmem>>, %arg3: memref<384x128xbf16, #tpu.memory_space<vmem>>, %arg4: memref<1x128xf32, #tpu.memory_space<vmem>>, %arg5: memref<1x128xf32, #tpu.memory_space<vmem>>, %arg6: memref<2x128xf32, #tpu.memory_space<vmem>>, %arg7: memref<2x128xf32, #tpu.memory_space<vmem>>) attributes {dimension_semantics = [#tpu.dimension_semantics<parallel>, #tpu.dimension_semantics<arbitrary>], iteration_bounds = array<i64: 4, 6>, scalar_prefetch = 0 : i64, scratch_operands = 1 : i64, tpu.core_type = #tpu.core_type<tc>, window_params = [{transform_indices = @transform_0, window_bounds = array<i64: 2, 384>}, {transform_indices = @transform_1, window_bounds = array<i64: 384, 128>}, {transform_indices = @transform_2, window_bounds = array<i64: 1, 128>}, {transform_indices = @transform_3, window_bounds = array<i64: 1, 128>}, {transform_indices = @transform_4, window_bounds = array<i64: 2, 128>}]} {
    %c0_i32 = arith.constant 0 : i32
    %0 = arith.cmpi eq, %arg1, %c0_i32 : i32
    %1 = arith.extui %0 : i1 to i32
    %c0_i32_0 = arith.constant 0 : i32
    %2 = arith.cmpi ne, %1, %c0_i32_0 : i32
    scf.if %2 {
      %cst_9 = arith.constant 0.000000e+00 : f32
      %12 = vector.broadcast %cst_9 : f32 to vector<2x128xf32>
      %c0_10 = arith.constant 0 : index
      %c0_11 = arith.constant 0 : index
      %13 = vector.load %arg7[%c0_10, %c0_11] : memref<2x128xf32, #tpu.memory_space<vmem>>, vector<2x128xf32>
      tpu.vector_store %arg7[%c0_10, %c0_11], %12 {strides = array<i32>} : memref<2x128xf32, #tpu.memory_space<vmem>>, vector<2x128xf32>,
    } else {
    }
    %c0 = arith.constant 0 : index
    %c0_1 = arith.constant 0 : index
    %3 = vector.load %arg7[%c0, %c0_1] : memref<2x128xf32, #tpu.memory_space<vmem>>, vector<2x128xf32>
    %c0_2 = arith.constant 0 : index
    %c0_3 = arith.constant 0 : index
    %4 = vector.load %arg2[%c0_2, %c0_3] : memref<2x384xbf16, #tpu.memory_space<vmem>>, vector<2x384xbf16>
    %c0_4 = arith.constant 0 : index
    %c0_5 = arith.constant 0 : index
    %5 = vector.load %arg3[%c0_4, %c0_5] : memref<384x128xbf16, #tpu.memory_space<vmem>>, vector<384x128xbf16>
    %cst = arith.constant dense<0.000000e+00> : vector<2x128xf32>
    %6 = tpu.matmul %4, %5, %cst {dimension_numbers = #tpu.dot_dimension_numbers<[1], [0], [0], [1], [0, 0, 1, 1], [], []>} : vector<2x384xbf16>, vector<384x128xbf16>, vector<2x128xf32> -> vector<2x128xf32>
    %7 = arith.addf %3, %6 : vector<2x128xf32>
    %c0_6 = arith.constant 0 : index
    %c0_7 = arith.constant 0 : index
    %8 = vector.load %arg7[%c0_6, %c0_7] : memref<2x128xf32, #tpu.memory_space<vmem>>, vector<2x128xf32>
    tpu.vector_store %arg7[%c0_6, %c0_7], %7 {strides = array<i32>} : memref<2x128xf32, #tpu.memory_space<vmem>>, vector<2x128xf32>,
    %c5_i32 = arith.constant 5 : i32
    %9 = arith.cmpi eq, %arg1, %c5_i32 : i32
    %10 = arith.extui %9 : i1 to i32
    %c0_i32_8 = arith.constant 0 : i32
    %11 = arith.cmpi ne, %10, %c0_i32_8 : i32
    scf.if %11 {
      %c0_9 = arith.constant 0 : index
      %c0_10 = arith.constant 0 : index
      %12 = vector.load %arg7[%c0_9, %c0_10] : memref<2x128xf32, #tpu.memory_space<vmem>>, vector<2x128xf32>
      %cst_11 = arith.constant dense<0.000000e+00> : vector<128xf32>
      %13 = vector.multi_reduction <add>, %12, %cst_11 [0] : vector<2x128xf32> to vector<128xf32>
      %14 = vector.shape_cast %13 : vector<128xf32> to vector<1x128xf32>
      %cst_12 = arith.constant 2.000000e+00 : f32
      %15 = vector.broadcast %cst_12 : f32 to vector<1x128xf32>
      %16 = arith.divf %14, %15 : vector<1x128xf32>
      %17 = vector.broadcast %16 : vector<1x128xf32> to vector<2x128xf32>
      %18 = arith.subf %12, %17 : vector<2x128xf32>
      %19 = arith.mulf %18, %18 : vector<2x128xf32>
      %cst_13 = arith.constant dense<0.000000e+00> : vector<128xf32>
      %20 = vector.multi_reduction <add>, %19, %cst_13 [0] : vector<2x128xf32> to vector<128xf32>
      %21 = vector.shape_cast %20 : vector<128xf32> to vector<1x128xf32>
      %cst_14 = arith.constant 2.000000e+00 : f32
      %22 = vector.broadcast %cst_14 : f32 to vector<1x128xf32>
      %23 = arith.divf %21, %22 : vector<1x128xf32>
      %24 = vector.broadcast %16 : vector<1x128xf32> to vector<2x128xf32>
      %25 = arith.subf %12, %24 : vector<2x128xf32>
      %cst_15 = arith.constant 9.99999974E-6 : f32
      %26 = vector.broadcast %cst_15 : f32 to vector<1x128xf32>
      %27 = arith.addf %23, %26 : vector<1x128xf32>
      %28 = math.rsqrt %27 : vector<1x128xf32>
      %29 = vector.broadcast %28 : vector<1x128xf32> to vector<2x128xf32>
      %30 = arith.mulf %25, %29 : vector<2x128xf32>
      %c0_16 = arith.constant 0 : index
      %c0_17 = arith.constant 0 : index
      %31 = vector.load %arg4[%c0_16, %c0_17] : memref<1x128xf32, #tpu.memory_space<vmem>>, vector<1x128xf32>
      %32 = vector.broadcast %31 : vector<1x128xf32> to vector<2x128xf32>
      %33 = arith.mulf %30, %32 : vector<2x128xf32>
      %c0_18 = arith.constant 0 : index
      %c0_19 = arith.constant 0 : index
      %34 = vector.load %arg5[%c0_18, %c0_19] : memref<1x128xf32, #tpu.memory_space<vmem>>, vector<1x128xf32>
      %35 = vector.broadcast %34 : vector<1x128xf32> to vector<2x128xf32>
      %36 = arith.addf %33, %35 : vector<2x128xf32>
      %cst_20 = arith.constant 0.000000e+00 : f32
      %37 = vector.broadcast %cst_20 : f32 to vector<2x128xf32>
      %38 = arith.maximumf %36, %37 : vector<2x128xf32>
      %c0_21 = arith.constant 0 : index
      %c0_22 = arith.constant 0 : index
      %39 = vector.load %arg6[%c0_21, %c0_22] : memref<2x128xf32, #tpu.memory_space<vmem>>, vector<2x128xf32>
      tpu.vector_store %arg6[%c0_21, %c0_22], %38 {strides = array<i32>} : memref<2x128xf32, #tpu.memory_space<vmem>>, vector<2x128xf32>,
    } else {
    }
    return
  }
  func.func @transform_0(%arg0: i32, %arg1: i32) -> (i32, i32) {
    %c0_i32 = arith.constant 0 : i32
    %c0_i32_0 = arith.constant 0 : i32
    return %c0_i32, %arg1 : i32, i32
  }
  func.func @transform_1(%arg0: i32, %arg1: i32) -> (i32, i32) {
    %c0_i32 = arith.constant 0 : i32
    return %arg1, %arg0 : i32, i32
  }
  func.func @transform_2(%arg0: i32, %arg1: i32) -> (i32, i32) {
    %c0_i32 = arith.constant 0 : i32
    %c0_i32_0 = arith.constant 0 : i32
    return %c0_i32, %arg0 : i32, i32
  }
  func.func @transform_3(%arg0: i32, %arg1: i32) -> (i32, i32) {
    %c0_i32 = arith.constant 0 : i32
    %c0_i32_0 = arith.constant 0 : i32
    return %c0_i32, %arg0 : i32, i32
  }
  func.func @transform_4(%arg0: i32, %arg1: i32) -> (i32, i32) {
    %c0_i32 = arith.constant 0 : i32
    %c0_i32_0 = arith.constant 0 : i32
    return %c0_i32, %arg0 : i32, i32
  }
}

module attributes {stable_mosaic.version = 11 : i64} {
  func.func @_conv_bn_kernel(%arg0: i32, %arg1: i32, %arg2: memref<2x256xbf16, #tpu.memory_space<vmem>>, %arg3: memref<256x128xbf16, #tpu.memory_space<vmem>>, %arg4: memref<1x128xf32, #tpu.memory_space<vmem>>, %arg5: memref<1x128xf32, #tpu.memory_space<vmem>>, %arg6: memref<2x128xf32, #tpu.memory_space<vmem>>, %arg7: memref<2x128xf32, #tpu.memory_space<vmem>>) attributes {dimension_semantics = [#tpu.dimension_semantics<parallel>, #tpu.dimension_semantics<arbitrary>], iteration_bounds = array<i64: 4, 1>, scalar_prefetch = 0 : i64, scratch_operands = 1 : i64, tpu.core_type = #tpu.core_type<tc>, window_params = [{transform_indices = @transform_0, window_bounds = array<i64: 2, 256>}, {transform_indices = @transform_1, window_bounds = array<i64: 256, 128>}, {transform_indices = @transform_2, window_bounds = array<i64: 1, 128>}, {transform_indices = @transform_3, window_bounds = array<i64: 1, 128>}, {transform_indices = @transform_4, window_bounds = array<i64: 2, 128>}]} {
    %c0_i32 = arith.constant 0 : i32
    %0 = arith.cmpi eq, %arg1, %c0_i32 : i32
    %1 = arith.extui %0 : i1 to i32
    %c0_i32_0 = arith.constant 0 : i32
    %2 = arith.cmpi ne, %1, %c0_i32_0 : i32
    scf.if %2 {
      %cst_10 = arith.constant 0.000000e+00 : f32
      %12 = vector.broadcast %cst_10 : f32 to vector<2x128xf32>
      %c0_11 = arith.constant 0 : index
      %c0_12 = arith.constant 0 : index
      %13 = vector.load %arg7[%c0_11, %c0_12] : memref<2x128xf32, #tpu.memory_space<vmem>>, vector<2x128xf32>
      tpu.vector_store %arg7[%c0_11, %c0_12], %12 {strides = array<i32>} : memref<2x128xf32, #tpu.memory_space<vmem>>, vector<2x128xf32>,
    } else {
    }
    %c0 = arith.constant 0 : index
    %c0_1 = arith.constant 0 : index
    %3 = vector.load %arg7[%c0, %c0_1] : memref<2x128xf32, #tpu.memory_space<vmem>>, vector<2x128xf32>
    %c0_2 = arith.constant 0 : index
    %c0_3 = arith.constant 0 : index
    %4 = vector.load %arg2[%c0_2, %c0_3] : memref<2x256xbf16, #tpu.memory_space<vmem>>, vector<2x256xbf16>
    %c0_4 = arith.constant 0 : index
    %c0_5 = arith.constant 0 : index
    %5 = vector.load %arg3[%c0_4, %c0_5] : memref<256x128xbf16, #tpu.memory_space<vmem>>, vector<256x128xbf16>
    %cst = arith.constant dense<0.000000e+00> : vector<2x128xf32>
    %6 = tpu.matmul %4, %5, %cst {dimension_numbers = #tpu.dot_dimension_numbers<[1], [0], [0], [1], [0, 0, 1, 1], [], []>} : vector<2x256xbf16>, vector<256x128xbf16>, vector<2x128xf32> -> vector<2x128xf32>
    %7 = arith.addf %3, %6 : vector<2x128xf32>
    %c0_6 = arith.constant 0 : index
    %c0_7 = arith.constant 0 : index
    %8 = vector.load %arg7[%c0_6, %c0_7] : memref<2x128xf32, #tpu.memory_space<vmem>>, vector<2x128xf32>
    tpu.vector_store %arg7[%c0_6, %c0_7], %7 {strides = array<i32>} : memref<2x128xf32, #tpu.memory_space<vmem>>, vector<2x128xf32>,
    %c0_i32_8 = arith.constant 0 : i32
    %9 = arith.cmpi eq, %arg1, %c0_i32_8 : i32
    %10 = arith.extui %9 : i1 to i32
    %c0_i32_9 = arith.constant 0 : i32
    %11 = arith.cmpi ne, %10, %c0_i32_9 : i32
    scf.if %11 {
      %c0_10 = arith.constant 0 : index
      %c0_11 = arith.constant 0 : index
      %12 = vector.load %arg7[%c0_10, %c0_11] : memref<2x128xf32, #tpu.memory_space<vmem>>, vector<2x128xf32>
      %cst_12 = arith.constant dense<0.000000e+00> : vector<128xf32>
      %13 = vector.multi_reduction <add>, %12, %cst_12 [0] : vector<2x128xf32> to vector<128xf32>
      %14 = vector.shape_cast %13 : vector<128xf32> to vector<1x128xf32>
      %cst_13 = arith.constant 2.000000e+00 : f32
      %15 = vector.broadcast %cst_13 : f32 to vector<1x128xf32>
      %16 = arith.divf %14, %15 : vector<1x128xf32>
      %17 = vector.broadcast %16 : vector<1x128xf32> to vector<2x128xf32>
      %18 = arith.subf %12, %17 : vector<2x128xf32>
      %19 = arith.mulf %18, %18 : vector<2x128xf32>
      %cst_14 = arith.constant dense<0.000000e+00> : vector<128xf32>
      %20 = vector.multi_reduction <add>, %19, %cst_14 [0] : vector<2x128xf32> to vector<128xf32>
      %21 = vector.shape_cast %20 : vector<128xf32> to vector<1x128xf32>
      %cst_15 = arith.constant 2.000000e+00 : f32
      %22 = vector.broadcast %cst_15 : f32 to vector<1x128xf32>
      %23 = arith.divf %21, %22 : vector<1x128xf32>
      %24 = vector.broadcast %16 : vector<1x128xf32> to vector<2x128xf32>
      %25 = arith.subf %12, %24 : vector<2x128xf32>
      %cst_16 = arith.constant 9.99999974E-6 : f32
      %26 = vector.broadcast %cst_16 : f32 to vector<1x128xf32>
      %27 = arith.addf %23, %26 : vector<1x128xf32>
      %28 = math.rsqrt %27 : vector<1x128xf32>
      %29 = vector.broadcast %28 : vector<1x128xf32> to vector<2x128xf32>
      %30 = arith.mulf %25, %29 : vector<2x128xf32>
      %c0_17 = arith.constant 0 : index
      %c0_18 = arith.constant 0 : index
      %31 = vector.load %arg4[%c0_17, %c0_18] : memref<1x128xf32, #tpu.memory_space<vmem>>, vector<1x128xf32>
      %32 = vector.broadcast %31 : vector<1x128xf32> to vector<2x128xf32>
      %33 = arith.mulf %30, %32 : vector<2x128xf32>
      %c0_19 = arith.constant 0 : index
      %c0_20 = arith.constant 0 : index
      %34 = vector.load %arg5[%c0_19, %c0_20] : memref<1x128xf32, #tpu.memory_space<vmem>>, vector<1x128xf32>
      %35 = vector.broadcast %34 : vector<1x128xf32> to vector<2x128xf32>
      %36 = arith.addf %33, %35 : vector<2x128xf32>
      %c0_21 = arith.constant 0 : index
      %c0_22 = arith.constant 0 : index
      %37 = vector.load %arg6[%c0_21, %c0_22] : memref<2x128xf32, #tpu.memory_space<vmem>>, vector<2x128xf32>
      tpu.vector_store %arg6[%c0_21, %c0_22], %36 {strides = array<i32>} : memref<2x128xf32, #tpu.memory_space<vmem>>, vector<2x128xf32>,
    } else {
    }
    return
  }
  func.func @transform_0(%arg0: i32, %arg1: i32) -> (i32, i32) {
    %c0_i32 = arith.constant 0 : i32
    %c0_i32_0 = arith.constant 0 : i32
    return %c0_i32, %arg1 : i32, i32
  }
  func.func @transform_1(%arg0: i32, %arg1: i32) -> (i32, i32) {
    %c0_i32 = arith.constant 0 : i32
    return %arg1, %arg0 : i32, i32
  }
  func.func @transform_2(%arg0: i32, %arg1: i32) -> (i32, i32) {
    %c0_i32 = arith.constant 0 : i32
    %c0_i32_0 = arith.constant 0 : i32
    return %c0_i32, %arg0 : i32, i32
  }
  func.func @transform_3(%arg0: i32, %arg1: i32) -> (i32, i32) {
    %c0_i32 = arith.constant 0 : i32
    %c0_i32_0 = arith.constant 0 : i32
    return %c0_i32, %arg0 : i32, i32
  }
  func.func @transform_4(%arg0: i32, %arg1: i32) -> (i32, i32) {
    %c0_i32 = arith.constant 0 : i32
    %c0_i32_0 = arith.constant 0 : i32
    return %c0_i32, %arg0 : i32, i32
  }
}

module attributes {stable_mosaic.version = 11 : i64} {
  func.func @_conv_bn_kernel(%arg0: i32, %arg1: i32, %arg2: memref<2x512xbf16, #tpu.memory_space<vmem>>, %arg3: memref<512x128xbf16, #tpu.memory_space<vmem>>, %arg4: memref<1x128xf32, #tpu.memory_space<vmem>>, %arg5: memref<1x128xf32, #tpu.memory_space<vmem>>, %arg6: memref<2x128xf32, #tpu.memory_space<vmem>>, %arg7: memref<2x128xf32, #tpu.memory_space<vmem>>, %arg8: memref<2x128xf32, #tpu.memory_space<vmem>>) attributes {dimension_semantics = [#tpu.dimension_semantics<parallel>, #tpu.dimension_semantics<arbitrary>], iteration_bounds = array<i64: 4, 9>, scalar_prefetch = 0 : i64, scratch_operands = 1 : i64, tpu.core_type = #tpu.core_type<tc>, window_params = [{transform_indices = @transform_0, window_bounds = array<i64: 2, 512>}, {transform_indices = @transform_1, window_bounds = array<i64: 512, 128>}, {transform_indices = @transform_2, window_bounds = array<i64: 1, 128>}, {transform_indices = @transform_3, window_bounds = array<i64: 1, 128>}, {transform_indices = @transform_4, window_bounds = array<i64: 2, 128>}, {transform_indices = @transform_5, window_bounds = array<i64: 2, 128>}]} {
    %c0_i32 = arith.constant 0 : i32
    %0 = arith.cmpi eq, %arg1, %c0_i32 : i32
    %1 = arith.extui %0 : i1 to i32
    %c0_i32_0 = arith.constant 0 : i32
    %2 = arith.cmpi ne, %1, %c0_i32_0 : i32
    scf.if %2 {
      %cst_9 = arith.constant 0.000000e+00 : f32
      %12 = vector.broadcast %cst_9 : f32 to vector<2x128xf32>
      %c0_10 = arith.constant 0 : index
      %c0_11 = arith.constant 0 : index
      %13 = vector.load %arg8[%c0_10, %c0_11] : memref<2x128xf32, #tpu.memory_space<vmem>>, vector<2x128xf32>
      tpu.vector_store %arg8[%c0_10, %c0_11], %12 {strides = array<i32>} : memref<2x128xf32, #tpu.memory_space<vmem>>, vector<2x128xf32>,
    } else {
    }
    %c0 = arith.constant 0 : index
    %c0_1 = arith.constant 0 : index
    %3 = vector.load %arg8[%c0, %c0_1] : memref<2x128xf32, #tpu.memory_space<vmem>>, vector<2x128xf32>
    %c0_2 = arith.constant 0 : index
    %c0_3 = arith.constant 0 : index
    %4 = vector.load %arg2[%c0_2, %c0_3] : memref<2x512xbf16, #tpu.memory_space<vmem>>, vector<2x512xbf16>
    %c0_4 = arith.constant 0 : index
    %c0_5 = arith.constant 0 : index
    %5 = vector.load %arg3[%c0_4, %c0_5] : memref<512x128xbf16, #tpu.memory_space<vmem>>, vector<512x128xbf16>
    %cst = arith.constant dense<0.000000e+00> : vector<2x128xf32>
    %6 = tpu.matmul %4, %5, %cst {dimension_numbers = #tpu.dot_dimension_numbers<[1], [0], [0], [1], [0, 0, 1, 1], [], []>} : vector<2x512xbf16>, vector<512x128xbf16>, vector<2x128xf32> -> vector<2x128xf32>
    %7 = arith.addf %3, %6 : vector<2x128xf32>
    %c0_6 = arith.constant 0 : index
    %c0_7 = arith.constant 0 : index
    %8 = vector.load %arg8[%c0_6, %c0_7] : memref<2x128xf32, #tpu.memory_space<vmem>>, vector<2x128xf32>
    tpu.vector_store %arg8[%c0_6, %c0_7], %7 {strides = array<i32>} : memref<2x128xf32, #tpu.memory_space<vmem>>, vector<2x128xf32>,
    %c8_i32 = arith.constant 8 : i32
    %9 = arith.cmpi eq, %arg1, %c8_i32 : i32
    %10 = arith.extui %9 : i1 to i32
    %c0_i32_8 = arith.constant 0 : i32
    %11 = arith.cmpi ne, %10, %c0_i32_8 : i32
    scf.if %11 {
      %c0_9 = arith.constant 0 : index
      %c0_10 = arith.constant 0 : index
      %12 = vector.load %arg8[%c0_9, %c0_10] : memref<2x128xf32, #tpu.memory_space<vmem>>, vector<2x128xf32>
      %cst_11 = arith.constant dense<0.000000e+00> : vector<128xf32>
      %13 = vector.multi_reduction <add>, %12, %cst_11 [0] : vector<2x128xf32> to vector<128xf32>
      %14 = vector.shape_cast %13 : vector<128xf32> to vector<1x128xf32>
      %cst_12 = arith.constant 2.000000e+00 : f32
      %15 = vector.broadcast %cst_12 : f32 to vector<1x128xf32>
      %16 = arith.divf %14, %15 : vector<1x128xf32>
      %17 = vector.broadcast %16 : vector<1x128xf32> to vector<2x128xf32>
      %18 = arith.subf %12, %17 : vector<2x128xf32>
      %19 = arith.mulf %18, %18 : vector<2x128xf32>
      %cst_13 = arith.constant dense<0.000000e+00> : vector<128xf32>
      %20 = vector.multi_reduction <add>, %19, %cst_13 [0] : vector<2x128xf32> to vector<128xf32>
      %21 = vector.shape_cast %20 : vector<128xf32> to vector<1x128xf32>
      %cst_14 = arith.constant 2.000000e+00 : f32
      %22 = vector.broadcast %cst_14 : f32 to vector<1x128xf32>
      %23 = arith.divf %21, %22 : vector<1x128xf32>
      %24 = vector.broadcast %16 : vector<1x128xf32> to vector<2x128xf32>
      %25 = arith.subf %12, %24 : vector<2x128xf32>
      %cst_15 = arith.constant 9.99999974E-6 : f32
      %26 = vector.broadcast %cst_15 : f32 to vector<1x128xf32>
      %27 = arith.addf %23, %26 : vector<1x128xf32>
      %28 = math.rsqrt %27 : vector<1x128xf32>
      %29 = vector.broadcast %28 : vector<1x128xf32> to vector<2x128xf32>
      %30 = arith.mulf %25, %29 : vector<2x128xf32>
      %c0_16 = arith.constant 0 : index
      %c0_17 = arith.constant 0 : index
      %31 = vector.load %arg4[%c0_16, %c0_17] : memref<1x128xf32, #tpu.memory_space<vmem>>, vector<1x128xf32>
      %32 = vector.broadcast %31 : vector<1x128xf32> to vector<2x128xf32>
      %33 = arith.mulf %30, %32 : vector<2x128xf32>
      %c0_18 = arith.constant 0 : index
      %c0_19 = arith.constant 0 : index
      %34 = vector.load %arg5[%c0_18, %c0_19] : memref<1x128xf32, #tpu.memory_space<vmem>>, vector<1x128xf32>
      %35 = vector.broadcast %34 : vector<1x128xf32> to vector<2x128xf32>
      %36 = arith.addf %33, %35 : vector<2x128xf32>
      %c0_20 = arith.constant 0 : index
      %c0_21 = arith.constant 0 : index
      %37 = vector.load %arg6[%c0_20, %c0_21] : memref<2x128xf32, #tpu.memory_space<vmem>>, vector<2x128xf32>
      %38 = arith.addf %36, %37 : vector<2x128xf32>
      %cst_22 = arith.constant 0.000000e+00 : f32
      %39 = vector.broadcast %cst_22 : f32 to vector<2x128xf32>
      %40 = arith.maximumf %38, %39 : vector<2x128xf32>
      %c0_23 = arith.constant 0 : index
      %c0_24 = arith.constant 0 : index
      %41 = vector.load %arg7[%c0_23, %c0_24] : memref<2x128xf32, #tpu.memory_space<vmem>>, vector<2x128xf32>
      tpu.vector_store %arg7[%c0_23, %c0_24], %40 {strides = array<i32>} : memref<2x128xf32, #tpu.memory_space<vmem>>, vector<2x128xf32>,
    } else {
    }
    return
  }
  func.func @transform_0(%arg0: i32, %arg1: i32) -> (i32, i32) {
    %c0_i32 = arith.constant 0 : i32
    %c0_i32_0 = arith.constant 0 : i32
    return %c0_i32, %arg1 : i32, i32
  }
  func.func @transform_1(%arg0: i32, %arg1: i32) -> (i32, i32) {
    %c0_i32 = arith.constant 0 : i32
    return %arg1, %arg0 : i32, i32
  }
  func.func @transform_2(%arg0: i32, %arg1: i32) -> (i32, i32) {
    %c0_i32 = arith.constant 0 : i32
    %c0_i32_0 = arith.constant 0 : i32
    return %c0_i32, %arg0 : i32, i32
  }
  func.func @transform_3(%arg0: i32, %arg1: i32) -> (i32, i32) {
    %c0_i32 = arith.constant 0 : i32
    %c0_i32_0 = arith.constant 0 : i32
    return %c0_i32, %arg0 : i32, i32
  }
  func.func @transform_4(%arg0: i32, %arg1: i32) -> (i32, i32) {
    %c0_i32 = arith.constant 0 : i32
    %c0_i32_0 = arith.constant 0 : i32
    return %c0_i32, %arg0 : i32, i32
  }
  func.func @transform_5(%arg0: i32, %arg1: i32) -> (i32, i32) {
    %c0_i32 = arith.constant 0 : i32
    %c0_i32_0 = arith.constant 0 : i32
    return %c0_i32, %arg0 : i32, i32
  }
}

module attributes {stable_mosaic.version = 11 : i64} {
  func.func @_conv_bn_kernel(%arg0: i32, %arg1: i32, %arg2: memref<2x512xbf16, #tpu.memory_space<vmem>>, %arg3: memref<512x128xbf16, #tpu.memory_space<vmem>>, %arg4: memref<1x128xf32, #tpu.memory_space<vmem>>, %arg5: memref<1x128xf32, #tpu.memory_space<vmem>>, %arg6: memref<2x128xf32, #tpu.memory_space<vmem>>, %arg7: memref<2x128xf32, #tpu.memory_space<vmem>>) attributes {dimension_semantics = [#tpu.dimension_semantics<parallel>, #tpu.dimension_semantics<arbitrary>], iteration_bounds = array<i64: 4, 9>, scalar_prefetch = 0 : i64, scratch_operands = 1 : i64, tpu.core_type = #tpu.core_type<tc>, window_params = [{transform_indices = @transform_0, window_bounds = array<i64: 2, 512>}, {transform_indices = @transform_1, window_bounds = array<i64: 512, 128>}, {transform_indices = @transform_2, window_bounds = array<i64: 1, 128>}, {transform_indices = @transform_3, window_bounds = array<i64: 1, 128>}, {transform_indices = @transform_4, window_bounds = array<i64: 2, 128>}]} {
    %c0_i32 = arith.constant 0 : i32
    %0 = arith.cmpi eq, %arg1, %c0_i32 : i32
    %1 = arith.extui %0 : i1 to i32
    %c0_i32_0 = arith.constant 0 : i32
    %2 = arith.cmpi ne, %1, %c0_i32_0 : i32
    scf.if %2 {
      %cst_9 = arith.constant 0.000000e+00 : f32
      %12 = vector.broadcast %cst_9 : f32 to vector<2x128xf32>
      %c0_10 = arith.constant 0 : index
      %c0_11 = arith.constant 0 : index
      %13 = vector.load %arg7[%c0_10, %c0_11] : memref<2x128xf32, #tpu.memory_space<vmem>>, vector<2x128xf32>
      tpu.vector_store %arg7[%c0_10, %c0_11], %12 {strides = array<i32>} : memref<2x128xf32, #tpu.memory_space<vmem>>, vector<2x128xf32>,
    } else {
    }
    %c0 = arith.constant 0 : index
    %c0_1 = arith.constant 0 : index
    %3 = vector.load %arg7[%c0, %c0_1] : memref<2x128xf32, #tpu.memory_space<vmem>>, vector<2x128xf32>
    %c0_2 = arith.constant 0 : index
    %c0_3 = arith.constant 0 : index
    %4 = vector.load %arg2[%c0_2, %c0_3] : memref<2x512xbf16, #tpu.memory_space<vmem>>, vector<2x512xbf16>
    %c0_4 = arith.constant 0 : index
    %c0_5 = arith.constant 0 : index
    %5 = vector.load %arg3[%c0_4, %c0_5] : memref<512x128xbf16, #tpu.memory_space<vmem>>, vector<512x128xbf16>
    %cst = arith.constant dense<0.000000e+00> : vector<2x128xf32>
    %6 = tpu.matmul %4, %5, %cst {dimension_numbers = #tpu.dot_dimension_numbers<[1], [0], [0], [1], [0, 0, 1, 1], [], []>} : vector<2x512xbf16>, vector<512x128xbf16>, vector<2x128xf32> -> vector<2x128xf32>
    %7 = arith.addf %3, %6 : vector<2x128xf32>
    %c0_6 = arith.constant 0 : index
    %c0_7 = arith.constant 0 : index
    %8 = vector.load %arg7[%c0_6, %c0_7] : memref<2x128xf32, #tpu.memory_space<vmem>>, vector<2x128xf32>
    tpu.vector_store %arg7[%c0_6, %c0_7], %7 {strides = array<i32>} : memref<2x128xf32, #tpu.memory_space<vmem>>, vector<2x128xf32>,
    %c8_i32 = arith.constant 8 : i32
    %9 = arith.cmpi eq, %arg1, %c8_i32 : i32
    %10 = arith.extui %9 : i1 to i32
    %c0_i32_8 = arith.constant 0 : i32
    %11 = arith.cmpi ne, %10, %c0_i32_8 : i32
    scf.if %11 {
      %c0_9 = arith.constant 0 : index
      %c0_10 = arith.constant 0 : index
      %12 = vector.load %arg7[%c0_9, %c0_10] : memref<2x128xf32, #tpu.memory_space<vmem>>, vector<2x128xf32>
      %cst_11 = arith.constant dense<0.000000e+00> : vector<128xf32>
      %13 = vector.multi_reduction <add>, %12, %cst_11 [0] : vector<2x128xf32> to vector<128xf32>
      %14 = vector.shape_cast %13 : vector<128xf32> to vector<1x128xf32>
      %cst_12 = arith.constant 2.000000e+00 : f32
      %15 = vector.broadcast %cst_12 : f32 to vector<1x128xf32>
      %16 = arith.divf %14, %15 : vector<1x128xf32>
      %17 = vector.broadcast %16 : vector<1x128xf32> to vector<2x128xf32>
      %18 = arith.subf %12, %17 : vector<2x128xf32>
      %19 = arith.mulf %18, %18 : vector<2x128xf32>
      %cst_13 = arith.constant dense<0.000000e+00> : vector<128xf32>
      %20 = vector.multi_reduction <add>, %19, %cst_13 [0] : vector<2x128xf32> to vector<128xf32>
      %21 = vector.shape_cast %20 : vector<128xf32> to vector<1x128xf32>
      %cst_14 = arith.constant 2.000000e+00 : f32
      %22 = vector.broadcast %cst_14 : f32 to vector<1x128xf32>
      %23 = arith.divf %21, %22 : vector<1x128xf32>
      %24 = vector.broadcast %16 : vector<1x128xf32> to vector<2x128xf32>
      %25 = arith.subf %12, %24 : vector<2x128xf32>
      %cst_15 = arith.constant 9.99999974E-6 : f32
      %26 = vector.broadcast %cst_15 : f32 to vector<1x128xf32>
      %27 = arith.addf %23, %26 : vector<1x128xf32>
      %28 = math.rsqrt %27 : vector<1x128xf32>
      %29 = vector.broadcast %28 : vector<1x128xf32> to vector<2x128xf32>
      %30 = arith.mulf %25, %29 : vector<2x128xf32>
      %c0_16 = arith.constant 0 : index
      %c0_17 = arith.constant 0 : index
      %31 = vector.load %arg4[%c0_16, %c0_17] : memref<1x128xf32, #tpu.memory_space<vmem>>, vector<1x128xf32>
      %32 = vector.broadcast %31 : vector<1x128xf32> to vector<2x128xf32>
      %33 = arith.mulf %30, %32 : vector<2x128xf32>
      %c0_18 = arith.constant 0 : index
      %c0_19 = arith.constant 0 : index
      %34 = vector.load %arg5[%c0_18, %c0_19] : memref<1x128xf32, #tpu.memory_space<vmem>>, vector<1x128xf32>
      %35 = vector.broadcast %34 : vector<1x128xf32> to vector<2x128xf32>
      %36 = arith.addf %33, %35 : vector<2x128xf32>
      %cst_20 = arith.constant 0.000000e+00 : f32
      %37 = vector.broadcast %cst_20 : f32 to vector<2x128xf32>
      %38 = arith.maximumf %36, %37 : vector<2x128xf32>
      %c0_21 = arith.constant 0 : index
      %c0_22 = arith.constant 0 : index
      %39 = vector.load %arg6[%c0_21, %c0_22] : memref<2x128xf32, #tpu.memory_space<vmem>>, vector<2x128xf32>
      tpu.vector_store %arg6[%c0_21, %c0_22], %38 {strides = array<i32>} : memref<2x128xf32, #tpu.memory_space<vmem>>, vector<2x128xf32>,
    } else {
    }
    return
  }
  func.func @transform_0(%arg0: i32, %arg1: i32) -> (i32, i32) {
    %c0_i32 = arith.constant 0 : i32
    %c0_i32_0 = arith.constant 0 : i32
    return %c0_i32, %arg1 : i32, i32
  }
  func.func @transform_1(%arg0: i32, %arg1: i32) -> (i32, i32) {
    %c0_i32 = arith.constant 0 : i32
    return %arg1, %arg0 : i32, i32
  }
  func.func @transform_2(%arg0: i32, %arg1: i32) -> (i32, i32) {
    %c0_i32 = arith.constant 0 : i32
    %c0_i32_0 = arith.constant 0 : i32
    return %c0_i32, %arg0 : i32, i32
  }
  func.func @transform_3(%arg0: i32, %arg1: i32) -> (i32, i32) {
    %c0_i32 = arith.constant 0 : i32
    %c0_i32_0 = arith.constant 0 : i32
    return %c0_i32, %arg0 : i32, i32
  }
  func.func @transform_4(%arg0: i32, %arg1: i32) -> (i32, i32) {
    %c0_i32 = arith.constant 0 : i32
    %c0_i32_0 = arith.constant 0 : i32
    return %c0_i32, %arg0 : i32, i32
  }
}

module attributes {stable_mosaic.version = 11 : i64} {
  func.func @_linear_kernel(%arg0: memref<2x512xbf16, #tpu.memory_space<vmem>>, %arg1: memref<512x12xbf16, #tpu.memory_space<vmem>>, %arg2: memref<1x12xf32, #tpu.memory_space<vmem>>, %arg3: memref<2x12xf32, #tpu.memory_space<vmem>>) attributes {dimension_semantics = [], scalar_prefetch = 0 : i64, scratch_operands = 0 : i64, tpu.core_type = #tpu.core_type<tc>} {
    %c0 = arith.constant 0 : index
    %c0_0 = arith.constant 0 : index
    %0 = vector.load %arg0[%c0, %c0_0] : memref<2x512xbf16, #tpu.memory_space<vmem>>, vector<2x512xbf16>
    %c0_1 = arith.constant 0 : index
    %c0_2 = arith.constant 0 : index
    %1 = vector.load %arg1[%c0_1, %c0_2] : memref<512x12xbf16, #tpu.memory_space<vmem>>, vector<512x12xbf16>
    %cst = arith.constant dense<0.000000e+00> : vector<2x12xf32>
    %2 = tpu.matmul %0, %1, %cst {dimension_numbers = #tpu.dot_dimension_numbers<[1], [0], [0], [1], [0, 0, 1, 1], [], []>} : vector<2x512xbf16>, vector<512x12xbf16>, vector<2x12xf32> -> vector<2x12xf32>
    %c0_3 = arith.constant 0 : index
    %c0_4 = arith.constant 0 : index
    %3 = vector.load %arg2[%c0_3, %c0_4] : memref<1x12xf32, #tpu.memory_space<vmem>>, vector<1x12xf32>
    %4 = vector.broadcast %3 : vector<1x12xf32> to vector<2x12xf32>
    %5 = arith.addf %2, %4 : vector<2x12xf32>
    %c0_5 = arith.constant 0 : index
    %c0_6 = arith.constant 0 : index
    %6 = vector.load %arg3[%c0_5, %c0_6] : memref<2x12xf32, #tpu.memory_space<vmem>>, vector<2x12xf32>
    tpu.vector_store %arg3[%c0_5, %c0_6], %5 {strides = array<i32>} : memref<2x12xf32, #tpu.memory_space<vmem>>, vector<2x12xf32>,
    return
  }
}

module attributes {stable_mosaic.version = 11 : i64} {
  func.func @_conv_bn_kernel(%arg0: i32, %arg1: i32, %arg2: memref<128x128xbf16, #tpu.memory_space<vmem>>, %arg3: memref<128x64xbf16, #tpu.memory_space<vmem>>, %arg4: memref<1x64xf32, #tpu.memory_space<vmem>>, %arg5: memref<1x64xf32, #tpu.memory_space<vmem>>, %arg6: memref<128x64xf32, #tpu.memory_space<vmem>>, %arg7: memref<128x64xf32, #tpu.memory_space<vmem>>) attributes {dimension_semantics = [#tpu.dimension_semantics<parallel>, #tpu.dimension_semantics<arbitrary>], iteration_bounds = array<i64: 1, 1>, scalar_prefetch = 0 : i64, scratch_operands = 1 : i64, tpu.core_type = #tpu.core_type<tc>, window_params = [{transform_indices = @transform_0, window_bounds = array<i64: 128, 128>}, {transform_indices = @transform_1, window_bounds = array<i64: 128, 64>}, {transform_indices = @transform_2, window_bounds = array<i64: 1, 64>}, {transform_indices = @transform_3, window_bounds = array<i64: 1, 64>}, {transform_indices = @transform_4, window_bounds = array<i64: 128, 64>}]} {
    %c0_i32 = arith.constant 0 : i32
    %0 = arith.cmpi eq, %arg1, %c0_i32 : i32
    %1 = arith.extui %0 : i1 to i32
    %c0_i32_0 = arith.constant 0 : i32
    %2 = arith.cmpi ne, %1, %c0_i32_0 : i32
    scf.if %2 {
      %cst_10 = arith.constant 0.000000e+00 : f32
      %12 = vector.broadcast %cst_10 : f32 to vector<128x64xf32>
      %c0_11 = arith.constant 0 : index
      %c0_12 = arith.constant 0 : index
      %13 = vector.load %arg7[%c0_11, %c0_12] : memref<128x64xf32, #tpu.memory_space<vmem>>, vector<128x64xf32>
      tpu.vector_store %arg7[%c0_11, %c0_12], %12 {strides = array<i32>} : memref<128x64xf32, #tpu.memory_space<vmem>>, vector<128x64xf32>,
    } else {
    }
    %c0 = arith.constant 0 : index
    %c0_1 = arith.constant 0 : index
    %3 = vector.load %arg7[%c0, %c0_1] : memref<128x64xf32, #tpu.memory_space<vmem>>, vector<128x64xf32>
    %c0_2 = arith.constant 0 : index
    %c0_3 = arith.constant 0 : index
    %4 = vector.load %arg2[%c0_2, %c0_3] : memref<128x128xbf16, #tpu.memory_space<vmem>>, vector<128x128xbf16>
    %c0_4 = arith.constant 0 : index
    %c0_5 = arith.constant 0 : index
    %5 = vector.load %arg3[%c0_4, %c0_5] : memref<128x64xbf16, #tpu.memory_space<vmem>>, vector<128x64xbf16>
    %cst = arith.constant dense<0.000000e+00> : vector<128x64xf32>
    %6 = tpu.matmul %4, %5, %cst {dimension_numbers = #tpu.dot_dimension_numbers<[1], [0], [0], [1], [0, 0, 1, 1], [], []>} : vector<128x128xbf16>, vector<128x64xbf16>, vector<128x64xf32> -> vector<128x64xf32>
    %7 = arith.addf %3, %6 : vector<128x64xf32>
    %c0_6 = arith.constant 0 : index
    %c0_7 = arith.constant 0 : index
    %8 = vector.load %arg7[%c0_6, %c0_7] : memref<128x64xf32, #tpu.memory_space<vmem>>, vector<128x64xf32>
    tpu.vector_store %arg7[%c0_6, %c0_7], %7 {strides = array<i32>} : memref<128x64xf32, #tpu.memory_space<vmem>>, vector<128x64xf32>,
    %c0_i32_8 = arith.constant 0 : i32
    %9 = arith.cmpi eq, %arg1, %c0_i32_8 : i32
    %10 = arith.extui %9 : i1 to i32
    %c0_i32_9 = arith.constant 0 : i32
    %11 = arith.cmpi ne, %10, %c0_i32_9 : i32
    scf.if %11 {
      %c0_10 = arith.constant 0 : index
      %c0_11 = arith.constant 0 : index
      %12 = vector.load %arg7[%c0_10, %c0_11] : memref<128x64xf32, #tpu.memory_space<vmem>>, vector<128x64xf32>
      %cst_12 = arith.constant dense<0.000000e+00> : vector<64xf32>
      %13 = vector.multi_reduction <add>, %12, %cst_12 [0] : vector<128x64xf32> to vector<64xf32>
      %14 = vector.shape_cast %13 : vector<64xf32> to vector<1x64xf32>
      %cst_13 = arith.constant 1.280000e+02 : f32
      %15 = vector.broadcast %cst_13 : f32 to vector<1x64xf32>
      %16 = arith.divf %14, %15 : vector<1x64xf32>
      %17 = vector.broadcast %16 : vector<1x64xf32> to vector<128x64xf32>
      %18 = arith.subf %12, %17 : vector<128x64xf32>
      %19 = arith.mulf %18, %18 : vector<128x64xf32>
      %cst_14 = arith.constant dense<0.000000e+00> : vector<64xf32>
      %20 = vector.multi_reduction <add>, %19, %cst_14 [0] : vector<128x64xf32> to vector<64xf32>
      %21 = vector.shape_cast %20 : vector<64xf32> to vector<1x64xf32>
      %cst_15 = arith.constant 1.280000e+02 : f32
      %22 = vector.broadcast %cst_15 : f32 to vector<1x64xf32>
      %23 = arith.divf %21, %22 : vector<1x64xf32>
      %24 = vector.broadcast %16 : vector<1x64xf32> to vector<128x64xf32>
      %25 = arith.subf %12, %24 : vector<128x64xf32>
      %cst_16 = arith.constant 9.99999974E-6 : f32
      %26 = vector.broadcast %cst_16 : f32 to vector<1x64xf32>
      %27 = arith.addf %23, %26 : vector<1x64xf32>
      %28 = math.rsqrt %27 : vector<1x64xf32>
      %29 = vector.broadcast %28 : vector<1x64xf32> to vector<128x64xf32>
      %30 = arith.mulf %25, %29 : vector<128x64xf32>
      %c0_17 = arith.constant 0 : index
      %c0_18 = arith.constant 0 : index
      %31 = vector.load %arg4[%c0_17, %c0_18] : memref<1x64xf32, #tpu.memory_space<vmem>>, vector<1x64xf32>
      %32 = vector.broadcast %31 : vector<1x64xf32> to vector<128x64xf32>
      %33 = arith.mulf %30, %32 : vector<128x64xf32>
      %c0_19 = arith.constant 0 : index
      %c0_20 = arith.constant 0 : index
      %34 = vector.load %arg5[%c0_19, %c0_20] : memref<1x64xf32, #tpu.memory_space<vmem>>, vector<1x64xf32>
      %35 = vector.broadcast %34 : vector<1x64xf32> to vector<128x64xf32>
      %36 = arith.addf %33, %35 : vector<128x64xf32>
      %cst_21 = arith.constant 0.000000e+00 : f32
      %37 = vector.broadcast %cst_21 : f32 to vector<128x64xf32>
      %38 = arith.maximumf %36, %37 : vector<128x64xf32>
      %c0_22 = arith.constant 0 : index
      %c0_23 = arith.constant 0 : index
      %39 = vector.load %arg6[%c0_22, %c0_23] : memref<128x64xf32, #tpu.memory_space<vmem>>, vector<128x64xf32>
      tpu.vector_store %arg6[%c0_22, %c0_23], %38 {strides = array<i32>} : memref<128x64xf32, #tpu.memory_space<vmem>>, vector<128x64xf32>,
    } else {
    }
    return
  }
  func.func @transform_0(%arg0: i32, %arg1: i32) -> (i32, i32) {
    %c0_i32 = arith.constant 0 : i32
    %c0_i32_0 = arith.constant 0 : i32
    return %c0_i32, %arg1 : i32, i32
  }
  func.func @transform_1(%arg0: i32, %arg1: i32) -> (i32, i32) {
    %c0_i32 = arith.constant 0 : i32
    return %arg1, %arg0 : i32, i32
  }
  func.func @transform_2(%arg0: i32, %arg1: i32) -> (i32, i32) {
    %c0_i32 = arith.constant 0 : i32
    %c0_i32_0 = arith.constant 0 : i32
    return %c0_i32, %arg0 : i32, i32
  }
  func.func @transform_3(%arg0: i32, %arg1: i32) -> (i32, i32) {
    %c0_i32 = arith.constant 0 : i32
    %c0_i32_0 = arith.constant 0 : i32
    return %c0_i32, %arg0 : i32, i32
  }
  func.func @transform_4(%arg0: i32, %arg1: i32) -> (i32, i32) {
    %c0_i32 = arith.constant 0 : i32
    %c0_i32_0 = arith.constant 0 : i32
    return %c0_i32, %arg0 : i32, i32
  }
}

module attributes {stable_mosaic.version = 11 : i64} {
  func.func @_conv_bn_kernel(%arg0: i32, %arg1: i32, %arg2: memref<2x384xbf16, #tpu.memory_space<vmem>>, %arg3: memref<384x128xbf16, #tpu.memory_space<vmem>>, %arg4: memref<1x128xf32, #tpu.memory_space<vmem>>, %arg5: memref<1x128xf32, #tpu.memory_space<vmem>>, %arg6: memref<2x128xf32, #tpu.memory_space<vmem>>, %arg7: memref<2x128xf32, #tpu.memory_space<vmem>>, %arg8: memref<2x128xf32, #tpu.memory_space<vmem>>) attributes {dimension_semantics = [#tpu.dimension_semantics<parallel>, #tpu.dimension_semantics<arbitrary>], iteration_bounds = array<i64: 2, 6>, scalar_prefetch = 0 : i64, scratch_operands = 1 : i64, tpu.core_type = #tpu.core_type<tc>, window_params = [{transform_indices = @transform_0, window_bounds = array<i64: 2, 384>}, {transform_indices = @transform_1, window_bounds = array<i64: 384, 128>}, {transform_indices = @transform_2, window_bounds = array<i64: 1, 128>}, {transform_indices = @transform_3, window_bounds = array<i64: 1, 128>}, {transform_indices = @transform_4, window_bounds = array<i64: 2, 128>}, {transform_indices = @transform_5, window_bounds = array<i64: 2, 128>}]} {
    %c0_i32 = arith.constant 0 : i32
    %0 = arith.cmpi eq, %arg1, %c0_i32 : i32
    %1 = arith.extui %0 : i1 to i32
    %c0_i32_0 = arith.constant 0 : i32
    %2 = arith.cmpi ne, %1, %c0_i32_0 : i32
    scf.if %2 {
      %cst_9 = arith.constant 0.000000e+00 : f32
      %12 = vector.broadcast %cst_9 : f32 to vector<2x128xf32>
      %c0_10 = arith.constant 0 : index
      %c0_11 = arith.constant 0 : index
      %13 = vector.load %arg8[%c0_10, %c0_11] : memref<2x128xf32, #tpu.memory_space<vmem>>, vector<2x128xf32>
      tpu.vector_store %arg8[%c0_10, %c0_11], %12 {strides = array<i32>} : memref<2x128xf32, #tpu.memory_space<vmem>>, vector<2x128xf32>,
    } else {
    }
    %c0 = arith.constant 0 : index
    %c0_1 = arith.constant 0 : index
    %3 = vector.load %arg8[%c0, %c0_1] : memref<2x128xf32, #tpu.memory_space<vmem>>, vector<2x128xf32>
    %c0_2 = arith.constant 0 : index
    %c0_3 = arith.constant 0 : index
    %4 = vector.load %arg2[%c0_2, %c0_3] : memref<2x384xbf16, #tpu.memory_space<vmem>>, vector<2x384xbf16>
    %c0_4 = arith.constant 0 : index
    %c0_5 = arith.constant 0 : index
    %5 = vector.load %arg3[%c0_4, %c0_5] : memref<384x128xbf16, #tpu.memory_space<vmem>>, vector<384x128xbf16>
    %cst = arith.constant dense<0.000000e+00> : vector<2x128xf32>
    %6 = tpu.matmul %4, %5, %cst {dimension_numbers = #tpu.dot_dimension_numbers<[1], [0], [0], [1], [0, 0, 1, 1], [], []>} : vector<2x384xbf16>, vector<384x128xbf16>, vector<2x128xf32> -> vector<2x128xf32>
    %7 = arith.addf %3, %6 : vector<2x128xf32>
    %c0_6 = arith.constant 0 : index
    %c0_7 = arith.constant 0 : index
    %8 = vector.load %arg8[%c0_6, %c0_7] : memref<2x128xf32, #tpu.memory_space<vmem>>, vector<2x128xf32>
    tpu.vector_store %arg8[%c0_6, %c0_7], %7 {strides = array<i32>} : memref<2x128xf32, #tpu.memory_space<vmem>>, vector<2x128xf32>,
    %c5_i32 = arith.constant 5 : i32
    %9 = arith.cmpi eq, %arg1, %c5_i32 : i32
    %10 = arith.extui %9 : i1 to i32
    %c0_i32_8 = arith.constant 0 : i32
    %11 = arith.cmpi ne, %10, %c0_i32_8 : i32
    scf.if %11 {
      %c0_9 = arith.constant 0 : index
      %c0_10 = arith.constant 0 : index
      %12 = vector.load %arg8[%c0_9, %c0_10] : memref<2x128xf32, #tpu.memory_space<vmem>>, vector<2x128xf32>
      %cst_11 = arith.constant dense<0.000000e+00> : vector<128xf32>
      %13 = vector.multi_reduction <add>, %12, %cst_11 [0] : vector<2x128xf32> to vector<128xf32>
      %14 = vector.shape_cast %13 : vector<128xf32> to vector<1x128xf32>
      %cst_12 = arith.constant 2.000000e+00 : f32
      %15 = vector.broadcast %cst_12 : f32 to vector<1x128xf32>
      %16 = arith.divf %14, %15 : vector<1x128xf32>
      %17 = vector.broadcast %16 : vector<1x128xf32> to vector<2x128xf32>
      %18 = arith.subf %12, %17 : vector<2x128xf32>
      %19 = arith.mulf %18, %18 : vector<2x128xf32>
      %cst_13 = arith.constant dense<0.000000e+00> : vector<128xf32>
      %20 = vector.multi_reduction <add>, %19, %cst_13 [0] : vector<2x128xf32> to vector<128xf32>
      %21 = vector.shape_cast %20 : vector<128xf32> to vector<1x128xf32>
      %cst_14 = arith.constant 2.000000e+00 : f32
      %22 = vector.broadcast %cst_14 : f32 to vector<1x128xf32>
      %23 = arith.divf %21, %22 : vector<1x128xf32>
      %24 = vector.broadcast %16 : vector<1x128xf32> to vector<2x128xf32>
      %25 = arith.subf %12, %24 : vector<2x128xf32>
      %cst_15 = arith.constant 9.99999974E-6 : f32
      %26 = vector.broadcast %cst_15 : f32 to vector<1x128xf32>
      %27 = arith.addf %23, %26 : vector<1x128xf32>
      %28 = math.rsqrt %27 : vector<1x128xf32>
      %29 = vector.broadcast %28 : vector<1x128xf32> to vector<2x128xf32>
      %30 = arith.mulf %25, %29 : vector<2x128xf32>
      %c0_16 = arith.constant 0 : index
      %c0_17 = arith.constant 0 : index
      %31 = vector.load %arg4[%c0_16, %c0_17] : memref<1x128xf32, #tpu.memory_space<vmem>>, vector<1x128xf32>
      %32 = vector.broadcast %31 : vector<1x128xf32> to vector<2x128xf32>
      %33 = arith.mulf %30, %32 : vector<2x128xf32>
      %c0_18 = arith.constant 0 : index
      %c0_19 = arith.constant 0 : index
      %34 = vector.load %arg5[%c0_18, %c0_19] : memref<1x128xf32, #tpu.memory_space<vmem>>, vector<1x128xf32>
      %35 = vector.broadcast %34 : vector<1x128xf32> to vector<2x128xf32>
      %36 = arith.addf %33, %35 : vector<2x128xf32>
      %c0_20 = arith.constant 0 : index
      %c0_21 = arith.constant 0 : index
      %37 = vector.load %arg6[%c0_20, %c0_21] : memref<2x128xf32, #tpu.memory_space<vmem>>, vector<2x128xf32>
      %38 = arith.addf %36, %37 : vector<2x128xf32>
      %cst_22 = arith.constant 0.000000e+00 : f32
      %39 = vector.broadcast %cst_22 : f32 to vector<2x128xf32>
      %40 = arith.maximumf %38, %39 : vector<2x128xf32>
      %c0_23 = arith.constant 0 : index
      %c0_24 = arith.constant 0 : index
      %41 = vector.load %arg7[%c0_23, %c0_24] : memref<2x128xf32, #tpu.memory_space<vmem>>, vector<2x128xf32>
      tpu.vector_store %arg7[%c0_23, %c0_24], %40 {strides = array<i32>} : memref<2x128xf32, #tpu.memory_space<vmem>>, vector<2x128xf32>,
    } else {
    }
    return
  }
  func.func @transform_0(%arg0: i32, %arg1: i32) -> (i32, i32) {
    %c0_i32 = arith.constant 0 : i32
    %c0_i32_0 = arith.constant 0 : i32
    return %c0_i32, %arg1 : i32, i32
  }
  func.func @transform_1(%arg0: i32, %arg1: i32) -> (i32, i32) {
    %c0_i32 = arith.constant 0 : i32
    return %arg1, %arg0 : i32, i32
  }
  func.func @transform_2(%arg0: i32, %arg1: i32) -> (i32, i32) {
    %c0_i32 = arith.constant 0 : i32
    %c0_i32_0 = arith.constant 0 : i32
    return %c0_i32, %arg0 : i32, i32
  }
  func.func @transform_3(%arg0: i32, %arg1: i32) -> (i32, i32) {
    %c0_i32 = arith.constant 0 : i32
    %c0_i32_0 = arith.constant 0 : i32
    return %c0_i32, %arg0 : i32, i32
  }
  func.func @transform_4(%arg0: i32, %arg1: i32) -> (i32, i32) {
    %c0_i32 = arith.constant 0 : i32
    %c0_i32_0 = arith.constant 0 : i32
    return %c0_i32, %arg0 : i32, i32
  }
  func.func @transform_5(%arg0: i32, %arg1: i32) -> (i32, i32) {
    %c0_i32 = arith.constant 0 : i32
    %c0_i32_0 = arith.constant 0 : i32
    return %c0_i32, %arg0 : i32, i32
  }
}

</mosaic_0001>

<bundles_post_ra>
// kernel: shedd_forward.42
= control target key start
LH: loop header
LB: loop body
LE: loop exit
PB: predicated region body
PF: predicated region fallthrough
CT: control target
= control target key end

     0   :  { %vm22_vm0 = vcmask 523264   ;;  %v794_v32 = vmov 0.0   ;;  %s1111_s1 = inlined_call_operand.vmem [shape: bf16[256,64], index: 1, kind: input, shape index: {}]   ;;  %s1112_s0 = inlined_call_operand.vmem [shape: bf16[128,256], index: 0, kind: input, shape index: {}]   ;;  %s1113_s2 = inlined_call_operand.vmem [shape: f32[1,64], index: 2, kind: input, shape index: {}]   ;;  %s1114_s3 = inlined_call_operand.vmem [shape: f32[1,64], index: 3, kind: input, shape index: {}]   ;;  %s1115_s4 = inlined_call_operand.vmem [shape: f32[128,64], index: 4, kind: output, shape index: {}]  }
   0x1   :  { %v752_v0 = vld [vmem:[%s1111_s1 + $0x40] sm:$0xff]   ;;  %v754_v2 = vld [vmem:[%s1111_s1 + $0x48] sm:$0xff]   ;;  %v756_v4 = vld [vmem:[%s1111_s1 + $0x50] sm:$0xff]   ;;  %23 = vst.msk [vmem:[#allocation2] sm:$0xff] %vm22_vm0, %v794_v32 }
   0x2   :  { %v753_v1 = vld [vmem:[%s1111_s1] sm:$0xff]   ;;  %671 = vmatprep.subr.bf16.mxu0 %v752_v0  ;;  %735 = vmatprep.subr.bf16.mxu1 %v752_v0  ;;  %v755_v3 = vld [vmem:[%s1111_s1 + $0x8] sm:$0xff]   ;;  %v757_v5 = vld [vmem:[%s1111_s1 + $0x10] sm:$0xff]   ;;  %24 = vst.msk [vmem:[#allocation2 + $0x8] sm:$0xff] %vm22_vm0, %v794_v32 }
   0x3   :  { %672 = vmatpush3.bf16.msra.mxu0 %v753_v1  ;;  %743 = vmatpush3.bf16.msra.mxu1 %v753_v1  ;;  %v758_v6 = vld [vmem:[%s1111_s1 + $0x58] sm:$0xff]   ;;  %v760_v8 = vld [vmem:[%s1111_s1 + $0x60] sm:$0xff]   ;;  %v762_v10 = vld [vmem:[%s1111_s1 + $0x68] sm:$0xff]   ;;  %25 = vst.msk [vmem:[#allocation2 + $0x10] sm:$0xff] %vm22_vm0, %v794_v32 }
   0x4   :  { %673 = vmatprep.subr.bf16.mxu0 %v754_v2  ;;  %736 = vmatprep.subr.bf16.mxu1 %v754_v2  ;;  %v759_v7 = vld [vmem:[%s1111_s1 + $0x18] sm:$0xff]   ;;  %v761_v9 = vld [vmem:[%s1111_s1 + $0x20] sm:$0xff]   ;;  %v763_v12 = vld [vmem:[%s1111_s1 + $0x28] sm:$0xff]   ;;  %26 = vst.msk [vmem:[#allocation2 + $0x18] sm:$0xff] %vm22_vm0, %v794_v32 }
   0x5   :  { %v770_v11 = vld [vmem:[%s1112_s0 + $0x4] ss:$8 sps:$4 sm:$0xff]   ;;  %v764_v14 = vld [vmem:[%s1111_s1 + $0x70] sm:$0xff]   ;;  %v766_v16 = vld [vmem:[%s1111_s1 + $0x78] sm:$0xff]   ;;  %27 = vst.msk [vmem:[#allocation2 + $0x20] sm:$0xff] %vm22_vm0, %v794_v32 }
   0x6   :  { %v776_v13 = vld [vmem:[%s1112_s0 + $0x44] ss:$8 sps:$4 sm:$0xff]   ;;  %311 = vmatprep.mubr.bf16.mxu0 %v770_v11  ;;  %v765_v15 = vld [vmem:[%s1111_s1 + $0x30] sm:$0xff]   ;;  %v767_v17 = vld [vmem:[%s1111_s1 + $0x38] sm:$0xff]   ;;  %28 = vst.msk [vmem:[#allocation2 + $0x28] sm:$0xff] %vm22_vm0, %v794_v32 }
   0x7   :  { %674 = vmatpush3.bf16.msra.mxu0 %v755_v3  ;;  %744 = vmatpush3.bf16.msra.mxu1 %v755_v3  ;;  %v768_v18 = vld [vmem:[%s1112_s0] ss:$8 sps:$4 sm:$0xff]   ;;  %v771_v20 = vld [vmem:[%s1112_s0 + $0x14] ss:$8 sps:$4 sm:$0xff]   ;;  %v773_v22 = vld [vmem:[%s1112_s0 + $0x10] ss:$8 sps:$4 sm:$0xff]  }
   0x8   :  { %675 = vmatprep.subr.bf16.mxu0 %v756_v4  ;;  %737 = vmatprep.subr.bf16.mxu1 %v756_v4  ;;  %v774_v19 = vld [vmem:[%s1112_s0 + $0x40] ss:$8 sps:$4 sm:$0xff]   ;;  %v780_v21 = vld [vmem:[%s1112_s0 + $0x54] ss:$8 sps:$4 sm:$0xff]   ;;  %v782_v23 = vld [vmem:[%s1112_s0 + $0x50] ss:$8 sps:$4 sm:$0xff]  }
   0x9   :  { %343 = vmatprep.mubr.bf16.mxu1 %v776_v13  ;;  %v777_v24 = vld [vmem:[%s1112_s0 + $0x24] ss:$8 sps:$4 sm:$0xff]   ;;  %v779_v26 = vld [vmem:[%s1112_s0 + $0x20] ss:$8 sps:$4 sm:$0xff]   ;;  %v783_v28 = vld [vmem:[%s1112_s0 + $0x34] ss:$8 sps:$4 sm:$0xff]  }
   0xa   :  { %v786_v25 = vld [vmem:[%s1112_s0 + $0x64] ss:$8 sps:$4 sm:$0xff]   ;;  %v788_v27 = vld [vmem:[%s1112_s0 + $0x60] ss:$8 sps:$4 sm:$0xff]   ;;  %v789_v29 = vld [vmem:[%s1112_s0 + $0x74] ss:$8 sps:$4 sm:$0xff]  }
   0xb   :  { %676 = vmatpush3.bf16.msra.mxu0 %v757_v5  ;;  %745 = vmatpush3.bf16.msra.mxu1 %v757_v5  ;;  %v785_v30 = vld [vmem:[%s1112_s0 + $0x30] ss:$8 sps:$4 sm:$0xff]   ;;  %29 = vst.msk [vmem:[#allocation2 + $0x30] sm:$0xff] %vm22_vm0, %v794_v32  ;;  %30 = vst.msk [vmem:[#allocation2 + $0x38] sm:$0xff] %vm22_vm0, %v794_v32  ;;  %v39_v35 = vld [vmem:[#allocation2] sm:$0xff] }
   0xc   :  { %677 = vmatprep.subr.bf16.mxu0 %v758_v6  ;;  %738 = vmatprep.subr.bf16.mxu1 %v758_v6  ;;  %v791_v31 = vld [vmem:[%s1112_s0 + $0x70] ss:$8 sps:$4 sm:$0xff]   ;;  %31 = vst.msk [vmem:[#allocation2 + $0x40] sm:$0xff] %vm22_vm0, %v794_v32  ;;  %32 = vst.msk [vmem:[#allocation2 + $0x48] sm:$0xff] %vm22_vm0, %v794_v32  ;;  %v40_v43 = vld [vmem:[#allocation2 + $0x8] sm:$0xff] }
   0xd   :  { %33 = vst.msk [vmem:[#allocation2 + $0x50] sm:$0xff] %vm22_vm0, %v794_v32  ;;  %34 = vst.msk [vmem:[#allocation2 + $0x58] sm:$0xff] %vm22_vm0, %v794_v32  ;;  %v41_v55 = vld [vmem:[#allocation2 + $0x10] sm:$0xff]  ;;  %v42_v63 = vld [vmem:[#allocation2 + $0x18] sm:$0xff] }
   0xe   :  { %35 = vst.msk [vmem:[#allocation2 + $0x60] sm:$0xff] %vm22_vm0, %v794_v32  ;;  %36 = vst.msk [vmem:[#allocation2 + $0x68] sm:$0xff] %vm22_vm0, %v794_v32  ;;  %v43_v11 = vld [vmem:[#allocation2 + $0x20] sm:$0xff] }
   0xf   :  { %678 = vmatpush3.bf16.msra.mxu0 %v759_v7  ;;  %746 = vmatpush3.bf16.msra.mxu1 %v759_v7  ;;  %37 = vst.msk [vmem:[#allocation2 + $0x70] sm:$0xff] %vm22_vm0, %v794_v32  ;;  %38 = vst.msk [vmem:[#allocation2 + $0x78] sm:$0xff] %vm22_vm0, %v794_v32 }
  0x10   :  { %679 = vmatprep.subr.bf16.mxu0 %v760_v8  ;;  %739 = vmatprep.subr.bf16.mxu1 %v760_v8 }
  0x13   :  { %680 = vmatpush3.bf16.msra.mxu0 %v761_v9  ;;  %747 = vmatpush3.bf16.msra.mxu1 %v761_v9  ;;  %v47_v37 = vld [vmem:[#allocation2 + $0x40] sm:$0xff]  ;;  %v48_v45 = vld [vmem:[#allocation2 + $0x48] sm:$0xff] }
  0x14   :  { %681 = vmatprep.subr.bf16.mxu0 %v762_v10  ;;  %740 = vmatprep.subr.bf16.mxu1 %v762_v10  ;;  %v49_v57 = vld [vmem:[#allocation2 + $0x50] sm:$0xff]  ;;  %v50_v1 = vld [vmem:[#allocation2 + $0x58] sm:$0xff] }
  0x15   :  { %v51_v13 = vld [vmem:[#allocation2 + $0x60] sm:$0xff] }
  0x17   :  { %682 = vmatpush3.bf16.msra.mxu0 %v763_v12  ;;  %748 = vmatpush3.bf16.msra.mxu1 %v763_v12 }
  0x18   :  { %683 = vmatprep.subr.bf16.mxu0 %v764_v14  ;;  %741 = vmatprep.subr.bf16.mxu1 %v764_v14 }
  0x1b   :  { %684 = vmatpush3.bf16.msra.mxu0 %v765_v15  ;;  %749 = vmatpush3.bf16.msra.mxu1 %v765_v15 }
  0x1c   :  { %685 = vmatprep.subr.bf16.mxu0 %v766_v16  ;;  %742 = vmatprep.subr.bf16.mxu1 %v766_v16 }
  0x1f   :  { %686 = vmatpush3.bf16.msra.mxu0 %v767_v17  ;;  %750 = vmatpush3.bf16.msra.mxu1 %v767_v17 }
  0x22   :  { %312 = vmatmul.mubr.bf16.vlgmr.msra.gmra.mrb[0].mxu0 %v768_v18  ;;  %344 = vmatmul.mubr.bf16.vlgmr.msra.gmra.mrb[0].mxu1 %v774_v19 }
  0x23   :  { %319 = vmatprep.mubr.bf16.mxu0 %v771_v20  ;;  %351 = vmatprep.mubr.bf16.mxu1 %v780_v21  ;;  %v44_v20 = vld [vmem:[#allocation2 + $0x28] sm:$0xff] }
  0x2a   :  { %320 = vmatmul.mubr.bf16.gmra.mrb[4].mxu0 %v773_v22  ;;  %352 = vmatmul.mubr.bf16.gmra.mrb[4].mxu1 %v782_v23  ;;  %v52_v22 = vld [vmem:[#allocation2 + $0x68] sm:$0xff] }
  0x2b   :  { %327 = vmatprep.mubr.bf16.mxu0 %v777_v24  ;;  %359 = vmatprep.mubr.bf16.mxu1 %v786_v25 }
  0x32   :  { %328 = vmatmul.mubr.bf16.gmra.mrb[8].mxu0 %v779_v26  ;;  %360 = vmatmul.mubr.bf16.gmra.mrb[8].mxu1 %v788_v27 }
  0x33   :  { %335 = vmatprep.mubr.bf16.mxu0 %v783_v28  ;;  %367 = vmatprep.mubr.bf16.mxu1 %v789_v29 }
  0x3a   :  { %336 = vmatmul.mubr.bf16.gmra.mrb[12].mxu0 %v785_v30  ;;  %368 = vmatmul.mubr.bf16.gmra.mrb[12].mxu1 %v791_v31 }
  0xf5   :  { %v687_v33 = vpop.f32.mrb[0].mxu0  ;;  %v711_v34 = vpop.f32.mrb[0].mxu1 }
  0xf6   :  { %v688_v36 = vpop.f32.mrb[1].mxu0  ;;  %v712_v38 = vpop.f32.mrb[1].mxu1 }
  0xf7   :  { %v689_v39 = vadd.f32 %v688_v36, %v687_v33  ;;  %v690_v40 = vpop.f32.mrb[2].mxu0  ;;  %v713_v41 = vadd.f32 %v712_v38, %v711_v34  ;;  %v714_v42 = vpop.f32.mrb[2].mxu1 }
  0xf8   :  { %v691_v44 = vpop.f32.mrb[3].mxu0  ;;  %v715_v46 = vpop.f32.mrb[3].mxu1 }
  0xf9   :  { %v376_v47 = vadd.f32 %v689_v39, %v39_v35  ;;  %v692_v48 = vadd.f32 %v691_v44, %v690_v40  ;;  %v384_v49 = vadd.f32 %v713_v41, %v47_v37  ;;  %v716_v50 = vadd.f32 %v715_v46, %v714_v42  ;;  %v45_v39 = vld [vmem:[#allocation2 + $0x30] sm:$0xff] }
  0xfa   :  { %v53_v41 = vld [vmem:[#allocation2 + $0x70] sm:$0xff] }
  0xfb   :  { %393 = vst.msk [vmem:[#allocation2] sm:$0xff] %vm22_vm0, %v376_v47  ;;  %v377_v51 = vadd.f32 %v692_v48, %v40_v43  ;;  %401 = vst.msk [vmem:[#allocation2 + $0x40] sm:$0xff] %vm22_vm0, %v384_v49  ;;  %v385_v52 = vadd.f32 %v716_v50, %v48_v45  ;;  %v46_v49 = vld [vmem:[#allocation2 + $0x38] sm:$0xff] }
  0xfd   :  { %394 = vst.msk [vmem:[#allocation2 + $0x8] sm:$0xff] %vm22_vm0, %v377_v51  ;;  %v693_v53 = vpop.f32.mrb[4].mxu0  ;;  %402 = vst.msk [vmem:[#allocation2 + $0x48] sm:$0xff] %vm22_vm0, %v385_v52  ;;  %v717_v54 = vpop.f32.mrb[4].mxu1  ;;  %v54_v51 = vld [vmem:[#allocation2 + $0x78] sm:$0xff] }
  0xfe   :  { %v694_v56 = vpop.f32.mrb[5].mxu0  ;;  %v718_v58 = vpop.f32.mrb[5].mxu1 }
  0xff   :  { %v695_v59 = vadd.f32 %v694_v56, %v693_v53  ;;  %v696_v60 = vpop.f32.mrb[6].mxu0  ;;  %v719_v61 = vadd.f32 %v718_v58, %v717_v54  ;;  %v720_v62 = vpop.f32.mrb[6].mxu1 }
 0x100   :  { %v697_v0 = vpop.f32.mrb[7].mxu0  ;;  %v721_v2 = vpop.f32.mrb[7].mxu1 }
 0x101   :  { %v378_v3 = vadd.f32 %v695_v59, %v41_v55  ;;  %v698_v4 = vadd.f32 %v697_v0, %v696_v60  ;;  %v386_v5 = vadd.f32 %v719_v61, %v49_v57  ;;  %v722_v6 = vadd.f32 %v721_v2, %v720_v62 }
 0x102   :  { %v942_v28 = vld [vmem:[#allocation2] sm:$0xff] }
 0x103   :  { %395 = vst.msk [vmem:[#allocation2 + $0x10] sm:$0xff] %vm22_vm0, %v378_v3  ;;  %v379_v7 = vadd.f32 %v698_v4, %v42_v63  ;;  %403 = vst.msk [vmem:[#allocation2 + $0x50] sm:$0xff] %vm22_vm0, %v386_v5  ;;  %v387_v8 = vadd.f32 %v722_v6, %v50_v1  ;;  %v428_v33 = vsel %vm22_vm0, %v942_v28, 0.0  ;;  %v420_v4 = vld [vmem:[#allocation2 + $0x40] sm:$0xff] }
 0x104   :  { %v940_v19 = vld [vmem:[#allocation2 + $0x8] sm:$0xff] }
 0x105   :  { %396 = vst.msk [vmem:[#allocation2 + $0x18] sm:$0xff] %vm22_vm0, %v379_v7  ;;  %v699_v9 = vpop.f32.mrb[8].mxu0  ;;  %404 = vst.msk [vmem:[#allocation2 + $0x58] sm:$0xff] %vm22_vm0, %v387_v8  ;;  %v723_v10 = vpop.f32.mrb[8].mxu1  ;;  %v429_v30 = vsel %vm22_vm0, %v940_v19, 0.0  ;;  %v421_v8 = vld [vmem:[#allocation2 + $0x48] sm:$0xff] }
 0x106   :  { %v700_v12 = vpop.f32.mrb[9].mxu0  ;;  %v724_v14 = vpop.f32.mrb[9].mxu1  ;;  %v430_v38 = vadd.f32 %v429_v30, %v428_v33 }
 0x107   :  { %v701_v15 = vadd.f32 %v700_v12, %v699_v9  ;;  %v702_v16 = vpop.f32.mrb[10].mxu0  ;;  %v725_v17 = vadd.f32 %v724_v14, %v723_v10  ;;  %v726_v18 = vpop.f32.mrb[10].mxu1  ;;  %v443_v10 = vsel %vm22_vm0, %v420_v4, 0.0 }
 0x108   :  { %v703_v21 = vpop.f32.mrb[11].mxu0  ;;  %v727_v23 = vpop.f32.mrb[11].mxu1 }
 0x109   :  { %v380_v24 = vadd.f32 %v701_v15, %v43_v11  ;;  %v704_v25 = vadd.f32 %v703_v21, %v702_v16  ;;  %v388_v26 = vadd.f32 %v725_v17, %v51_v13  ;;  %v728_v27 = vadd.f32 %v727_v23, %v726_v18 }
 0x10a   :  { %v944_v29 = vld [vmem:[#allocation2 + $0x10] sm:$0xff]  ;;  %v445_v13 = vsel %vm22_vm0, %v421_v8, 0.0 }
 0x10b   :  { %397 = vst.msk [vmem:[#allocation2 + $0x20] sm:$0xff] %vm22_vm0, %v380_v24  ;;  %v381_v31 = vadd.f32 %v704_v25, %v44_v20  ;;  %405 = vst.msk [vmem:[#allocation2 + $0x60] sm:$0xff] %vm22_vm0, %v388_v26  ;;  %v389_v32 = vadd.f32 %v728_v27, %v52_v22  ;;  %v431_v34 = vsel %vm22_vm0, %v944_v29, 0.0  ;;  %v422_v11 = vld [vmem:[#allocation2 + $0x50] sm:$0xff] }
 0x10c   :  { %v954_v35 = vld [vmem:[#allocation2 + $0x18] sm:$0xff]  ;;  %v432_v47 = vadd.f32 %v431_v34, %v430_v38  ;;  %v447_v16 = vsel %vm22_vm0, %v422_v11, 0.0 }
 0x10d   :  { %398 = vst.msk [vmem:[#allocation2 + $0x28] sm:$0xff] %vm22_vm0, %v381_v31  ;;  %v705_v36 = vpop.f32.mrb[12].mxu0  ;;  %406 = vst.msk [vmem:[#allocation2 + $0x68] sm:$0xff] %vm22_vm0, %v389_v32  ;;  %v729_v37 = vpop.f32.mrb[12].mxu1  ;;  %v433_v48 = vsel %vm22_vm0, %v954_v35, 0.0  ;;  %v423_v14 = vld [vmem:[#allocation2 + $0x58] sm:$0xff] }
 0x10e   :  { %v706_v40 = vpop.f32.mrb[13].mxu0  ;;  %v730_v42 = vpop.f32.mrb[13].mxu1  ;;  %v434_v61 = vadd.f32 %v433_v48, %v432_v47  ;;  %v449_v20 = vsel %vm22_vm0, %v423_v14, 0.0 }
 0x10f   :  { %v707_v43 = vadd.f32 %v706_v40, %v705_v36  ;;  %v708_v44 = vpop.f32.mrb[14].mxu0  ;;  %v731_v45 = vadd.f32 %v730_v42, %v729_v37  ;;  %v732_v46 = vpop.f32.mrb[14].mxu1 }
 0x110   :  { %v709_v50 = vpop.f32.mrb[15].mxu0  ;;  %v733_v52 = vpop.f32.mrb[15].mxu1 }
 0x111   :  { %v382_v53 = vadd.f32 %v707_v43, %v45_v39  ;;  %v710_v54 = vadd.f32 %v709_v50, %v708_v44  ;;  %v390_v55 = vadd.f32 %v731_v45, %v53_v41  ;;  %v734_v56 = vadd.f32 %v733_v52, %v732_v46 }
 0x112   :  { %v416_v57 = vld [vmem:[#allocation2 + $0x20] sm:$0xff] }
 0x113   :  { %v435_v58 = vsel %vm22_vm0, %v416_v57, 0.0  ;;  %399 = vst.msk [vmem:[#allocation2 + $0x30] sm:$0xff] %vm22_vm0, %v382_v53  ;;  %v383_v59 = vadd.f32 %v710_v54, %v46_v49  ;;  %407 = vst.msk [vmem:[#allocation2 + $0x70] sm:$0xff] %vm22_vm0, %v390_v55  ;;  %v391_v60 = vadd.f32 %v734_v56, %v54_v51  ;;  %v424_v17 = vld [vmem:[#allocation2 + $0x60] sm:$0xff] }
 0x114   :  { %v417_v62 = vld [vmem:[#allocation2 + $0x28] sm:$0xff]  ;;  %v436_v63 = vadd.f32 %v435_v58, %v434_v61  ;;  %v451_v24 = vsel %vm22_vm0, %v424_v17, 0.0 }
 0x115   :  { %400 = vst.msk [vmem:[#allocation2 + $0x38] sm:$0xff] %vm22_vm0, %v383_v59  ;;  %408 = vst.msk [vmem:[#allocation2 + $0x78] sm:$0xff] %vm22_vm0, %v391_v60  ;;  %v437_v0 = vsel %vm22_vm0, %v417_v62, 0.0  ;;  %v425_v22 = vld [vmem:[#allocation2 + $0x68] sm:$0xff] }
 0x116   :  { %v438_v1 = vadd.f32 %v437_v0, %v436_v63  ;;  %v453_v26 = vsel %vm22_vm0, %v425_v22, 0.0 }
 0x11a   :  { %v418_v2 = vld [vmem:[#allocation2 + $0x30] sm:$0xff] }
 0x11b   :  { %v439_v3 = vsel %vm22_vm0, %v418_v2, 0.0  ;;  %v426_v23 = vld [vmem:[#allocation2 + $0x70] sm:$0xff] }
 0x11c   :  { %v440_v5 = vadd.f32 %v439_v3, %v438_v1  ;;  %v419_v6 = vld [vmem:[#allocation2 + $0x38] sm:$0xff]  ;;  %v455_v27 = vsel %vm22_vm0, %v426_v23, 0.0 }
 0x11d   :  { %v441_v7 = vsel %vm22_vm0, %v419_v6, 0.0  ;;  %v427_v31 = vld [vmem:[#allocation2 + $0x78] sm:$0xff] }
 0x11e   :  { %v442_v9 = vadd.f32 %v441_v7, %v440_v5  ;;  %v457_v33 = vsel %vm22_vm0, %v427_v31, 0.0 }
 0x120   :  { %v444_v12 = vadd.f32 %v443_v10, %v442_v9 }
 0x122   :  { %v446_v15 = vadd.f32 %v445_v13, %v444_v12 }
 0x124   :  { %v448_v18 = vadd.f32 %v447_v16, %v446_v15 }
 0x126   :  { %v450_v21 = vadd.f32 %v449_v20, %v448_v18 }
 0x128   :  { %v452_v25 = vadd.f32 %v451_v24, %v450_v21 }
 0x12a   :  { %v454_v30 = vadd.f32 %v453_v26, %v452_v25 }
 0x12c   :  { %v456_v32 = vadd.f32 %v455_v27, %v454_v30 }
 0x12e   :  { %v458_v34 = vadd.f32 %v457_v33, %v456_v32 }
 0x130   :  { %v459_v36 = vrot.slane %v458_v34, 4 }
 0x132   :  { %v460_v37 = vadd.f32 %v459_v36, %v458_v34 }
 0x134   :  { %v461_v38 = vrot.slane %v460_v37, 2 }
 0x136   :  { %v462_v39 = vadd.f32 %v461_v38, %v460_v37 }
 0x138   :  { %v463_v40 = vrot.slane %v462_v39, 1 }
 0x13a   :  { %v464_v41 = vadd.f32 %v463_v40, %v462_v39 }
 0x13c   :  { %v466_v42 = vmul.f32 0.0078125, %v464_v41 }
 0x13e   :  { %v977_v43 = vsub.f32 %v942_v28, %v466_v42  ;;  %v980_v44 = vsub.f32 %v940_v19, %v466_v42  ;;  %v983_v45 = vsub.f32 %v944_v29, %v466_v42  ;;  %v986_v46 = vsub.f32 %v954_v35, %v466_v42 }
 0x13f   :  { %v992_v49 = vsub.f32 %v416_v57, %v466_v42  ;;  %v996_v50 = vsub.f32 %v417_v62, %v466_v42  ;;  %v1002_v52 = vsub.f32 %v418_v2, %v466_v42  ;;  %v1007_v56 = vsub.f32 %v419_v6, %v466_v42 }
 0x140   :  { %v483_v47 = vmul.f32 %v977_v43, %v977_v43  ;;  %v484_v48 = vmul.f32 %v980_v44, %v980_v44  ;;  %v485_v28 = vmul.f32 %v983_v45, %v983_v45  ;;  %v486_v19 = vmul.f32 %v986_v46, %v986_v46 }
 0x141   :  { %v487_v53 = vmul.f32 %v992_v49, %v992_v49  ;;  %v488_v57 = vmul.f32 %v996_v50, %v996_v50  ;;  %v1012_v60 = vsub.f32 %v420_v4, %v466_v42  ;;  %v489_v61 = vmul.f32 %v1002_v52, %v1002_v52 }
 0x142   :  { %v499_v29 = vsel %vm22_vm0, %v483_v47, 0.0  ;;  %v500_v35 = vsel %vm22_vm0, %v484_v48, 0.0  ;;  %v502_v54 = vsel %vm22_vm0, %v485_v28, 0.0  ;;  %v504_v58 = vsel %vm22_vm0, %v486_v19, 0.0 }
 0x143   :  { %v501_v51 = vadd.f32 %v500_v35, %v499_v29  ;;  %v506_v62 = vsel %vm22_vm0, %v487_v53, 0.0  ;;  %v476_v0 = vsub.f32 %v421_v8, %v466_v42  ;;  %v490_v1 = vmul.f32 %v1007_v56, %v1007_v56 }
 0x144   :  { %v508_v2 = vsel %vm22_vm0, %v488_v57, 0.0  ;;  %v477_v5 = vsub.f32 %v422_v11, %v466_v42  ;;  %v491_v6 = vmul.f32 %v1012_v60, %v1012_v60  ;;  %v510_v4 = vsel %vm22_vm0, %v489_v61, 0.0 }
 0x145   :  { %v503_v55 = vadd.f32 %v502_v54, %v501_v51  ;;  %v478_v9 = vsub.f32 %v423_v14, %v466_v42  ;;  %v492_v10 = vmul.f32 %v476_v0, %v476_v0  ;;  %v512_v12 = vsel %vm22_vm0, %v490_v1, 0.0  ;;  %v669_v1 = vld [vmem:[%s1113_s2] ss:$0 sm:$0xff] }
 0x146   :  { %v479_v15 = vsub.f32 %v424_v17, %v466_v42  ;;  %v493_v8 = vmul.f32 %v477_v5, %v477_v5  ;;  %v514_v16 = vsel %vm22_vm0, %v491_v6, 0.0  ;;  %v480_v20 = vsub.f32 %v425_v22, %v466_v42 }
 0x147   :  { %v505_v59 = vadd.f32 %v504_v58, %v503_v55  ;;  %v494_v21 = vmul.f32 %v478_v9, %v478_v9  ;;  %v516_v11 = vsel %vm22_vm0, %v492_v10, 0.0  ;;  %v481_v25 = vsub.f32 %v426_v23, %v466_v42 }
 0x148   :  { %v495_v26 = vmul.f32 %v479_v15, %v479_v15  ;;  %v518_v27 = vsel %vm22_vm0, %v493_v8, 0.0  ;;  %v482_v14 = vsub.f32 %v427_v31, %v466_v42  ;;  %v496_v32 = vmul.f32 %v480_v20, %v480_v20  ;;  %v670_v8 = vld [vmem:[%s1114_s3] ss:$0 sm:$0xff] }
 0x149   :  { %v507_v63 = vadd.f32 %v506_v62, %v505_v59  ;;  %v520_v33 = vsel %vm22_vm0, %v494_v21, 0.0  ;;  %v497_v17 = vmul.f32 %v481_v25, %v481_v25 }
 0x14a   :  { %v522_v36 = vsel %vm22_vm0, %v495_v26, 0.0  ;;  %v498_v38 = vmul.f32 %v482_v14, %v482_v14  ;;  %v524_v22 = vsel %vm22_vm0, %v496_v32, 0.0 }
 0x14b   :  { %v509_v3 = vadd.f32 %v508_v2, %v507_v63  ;;  %v526_v40 = vsel %vm22_vm0, %v497_v17, 0.0 }
 0x14c   :  { %v528_v41 = vsel %vm22_vm0, %v498_v38, 0.0 }
 0x14d   :  { %v511_v7 = vadd.f32 %v510_v4, %v509_v3 }
 0x14f   :  { %v513_v13 = vadd.f32 %v512_v12, %v511_v7 }
 0x151   :  { %v515_v18 = vadd.f32 %v514_v16, %v513_v13 }
 0x153   :  { %v517_v24 = vadd.f32 %v516_v11, %v515_v18 }
 0x155   :  { %v519_v30 = vadd.f32 %v518_v27, %v517_v24 }
 0x157   :  { %v521_v34 = vadd.f32 %v520_v33, %v519_v30 }
 0x159   :  { %v523_v37 = vadd.f32 %v522_v36, %v521_v34 }
 0x15b   :  { %v525_v39 = vadd.f32 %v524_v22, %v523_v37 }
 0x15d   :  { %v527_v23 = vadd.f32 %v526_v40, %v525_v39 }
 0x15f   :  { %v529_v47 = vadd.f32 %v528_v41, %v527_v23 }
 0x161   :  { %v530_v48 = vrot.slane %v529_v47, 4 }
 0x163   :  { %v531_v31 = vadd.f32 %v530_v48, %v529_v47 }
 0x165   :  { %v532_v42 = vrot.slane %v531_v31, 2 }
 0x167   :  { %v533_v28 = vadd.f32 %v532_v42, %v531_v31 }
 0x169   :  { %v534_v19 = vrot.slane %v533_v28, 1 }
 0x16b   :  { %v535_v29 = vadd.f32 %v534_v19, %v533_v28 }
 0x16d   :  { %v536_v35 = vmul.f32 0.0078125, %v535_v29 }
 0x16f   :  { %v537_v51 = vadd.f32 1e-05, %v536_v35 }
 0x171   :  { %792 = vrsqrt.f32 %v537_v51 }
 0x17b   :  { %v793_v53 = vpop.eup %792 }
 0x17c   :  { %v539_v54 = vmul.f32 %v793_v53, %v977_v43  ;;  %v540_v55 = vmul.f32 %v793_v53, %v980_v44  ;;  %v541_v57 = vmul.f32 %v793_v53, %v983_v45  ;;  %v542_v58 = vmul.f32 %v793_v53, %v986_v46 }
 0x17d   :  { %v543_v59 = vmul.f32 %v793_v53, %v992_v49  ;;  %v544_v61 = vmul.f32 %v793_v53, %v996_v50  ;;  %v545_v62 = vmul.f32 %v793_v53, %v1002_v52  ;;  %v546_v63 = vmul.f32 %v793_v53, %v1007_v56 }
 0x17e   :  { %v547_v43 = vmul.f32 %v793_v53, %v1012_v60  ;;  %v548_v2 = vmul.f32 %v793_v53, %v476_v0  ;;  %v549_v44 = vmul.f32 %v793_v53, %v477_v5  ;;  %v550_v3 = vmul.f32 %v793_v53, %v478_v9 }
 0x17f   :  { %v551_v45 = vmul.f32 %v793_v53, %v479_v15  ;;  %v552_v6 = vmul.f32 %v793_v53, %v480_v20  ;;  %v553_v46 = vmul.f32 %v793_v53, %v481_v25  ;;  %v554_v4 = vmul.f32 %v793_v53, %v482_v14 }
 0x180   :  { %v562_v49 = vmul.f32 %v669_v1, %v539_v54  ;;  %v563_v7 = vmul.f32 %v669_v1, %v540_v55  ;;  %v564_v50 = vmul.f32 %v669_v1, %v541_v57  ;;  %v565_v10 = vmul.f32 %v669_v1, %v542_v58 }
 0x181   :  { %v566_v52 = vmul.f32 %v669_v1, %v543_v59  ;;  %v567_v12 = vmul.f32 %v669_v1, %v544_v61  ;;  %v568_v56 = vmul.f32 %v669_v1, %v545_v62  ;;  %v569_v13 = vmul.f32 %v669_v1, %v546_v63 }
 0x182   :  { %v570_v60 = vmul.f32 %v669_v1, %v547_v43  ;;  %v571_v0 = vmul.f32 %v669_v1, %v548_v2  ;;  %v572_v5 = vmul.f32 %v669_v1, %v549_v44  ;;  %v573_v9 = vmul.f32 %v669_v1, %v550_v3 }
 0x183   :  { %v574_v15 = vmul.f32 %v669_v1, %v551_v45  ;;  %v575_v16 = vmul.f32 %v669_v1, %v552_v6  ;;  %v576_v18 = vmul.f32 %v669_v1, %v553_v46  ;;  %v577_v20 = vmul.f32 %v669_v1, %v554_v4 }
 0x184   :  { %v585_v21 = vadd.f32 %v670_v8, %v562_v49  ;;  %v586_v11 = vadd.f32 %v670_v8, %v563_v7  ;;  %v587_v24 = vadd.f32 %v670_v8, %v564_v50  ;;  %v588_v25 = vadd.f32 %v670_v8, %v565_v10 }
 0x185   :  { %v589_v26 = vadd.f32 %v670_v8, %v566_v52  ;;  %v590_v27 = vadd.f32 %v670_v8, %v567_v12  ;;  %v591_v30 = vadd.f32 %v670_v8, %v568_v56  ;;  %v592_v14 = vadd.f32 %v670_v8, %v569_v13 }
 0x186   :  { %v593_v32 = vadd.f32 %v670_v8, %v570_v60  ;;  %v594_v33 = vadd.f32 %v670_v8, %v571_v0  ;;  %v595_v34 = vadd.f32 %v670_v8, %v572_v5  ;;  %v596_v17 = vadd.f32 %v670_v8, %v573_v9 }
 0x187   :  { %v597_v36 = vadd.f32 %v670_v8, %v574_v15  ;;  %v598_v37 = vadd.f32 %v670_v8, %v575_v16  ;;  %v599_v38 = vadd.f32 %v670_v8, %v576_v18  ;;  %v600_v22 = vadd.f32 %v670_v8, %v577_v20 }
 0x188   :  { %v601_v39 = vmax.f32 %v585_v21, 0.0  ;;  %v602_v40 = vmax.f32 %v586_v11, 0.0  ;;  %v603_v23 = vmax.f32 %v587_v24, 0.0  ;;  %v604_v41 = vmax.f32 %v588_v25, 0.0 }
 0x189   :  { %v605_v47 = vmax.f32 %v589_v26, 0.0  ;;  %v606_v48 = vmax.f32 %v590_v27, 0.0  ;;  %v607_v31 = vmax.f32 %v591_v30, 0.0  ;;  %v608_v42 = vmax.f32 %v592_v14, 0.0 }
 0x18a   :  { %v609_v28 = vmax.f32 %v593_v32, 0.0  ;;  %v610_v19 = vmax.f32 %v594_v33, 0.0  ;;  %v611_v29 = vmax.f32 %v595_v34, 0.0  ;;  %v612_v35 = vmax.f32 %v596_v17, 0.0  ;;  %617 = vst.msk [vmem:[%s1115_s4] sm:$0xff] %vm22_vm0, %v601_v39  ;;  %618 = vst.msk [vmem:[%s1115_s4 + $0x8] sm:$0xff] %vm22_vm0, %v602_v40 }
 0x18b   :  { %619 = vst.msk [vmem:[%s1115_s4 + $0x10] sm:$0xff] %vm22_vm0, %v603_v23  ;;  %620 = vst.msk [vmem:[%s1115_s4 + $0x18] sm:$0xff] %vm22_vm0, %v604_v41  ;;  %v613_v51 = vmax.f32 %v597_v36, 0.0  ;;  %v614_v53 = vmax.f32 %v598_v37, 0.0  ;;  %v615_v54 = vmax.f32 %v599_v38, 0.0  ;;  %v616_v55 = vmax.f32 %v600_v22, 0.0 }
 0x18c   :  { %621 = vst.msk [vmem:[%s1115_s4 + $0x20] sm:$0xff] %vm22_vm0, %v605_v47  ;;  %622 = vst.msk [vmem:[%s1115_s4 + $0x28] sm:$0xff] %vm22_vm0, %v606_v48 }
 0x18d   :  { %623 = vst.msk [vmem:[%s1115_s4 + $0x30] sm:$0xff] %vm22_vm0, %v607_v31  ;;  %624 = vst.msk [vmem:[%s1115_s4 + $0x38] sm:$0xff] %vm22_vm0, %v608_v42 }
 0x18e   :  { %625 = vst.msk [vmem:[%s1115_s4 + $0x40] sm:$0xff] %vm22_vm0, %v609_v28  ;;  %626 = vst.msk [vmem:[%s1115_s4 + $0x48] sm:$0xff] %vm22_vm0, %v610_v19 }
 0x18f   :  { %627 = vst.msk [vmem:[%s1115_s4 + $0x50] sm:$0xff] %vm22_vm0, %v611_v29  ;;  %628 = vst.msk [vmem:[%s1115_s4 + $0x58] sm:$0xff] %vm22_vm0, %v612_v35 }
 0x190   :  { %629 = vst.msk [vmem:[%s1115_s4 + $0x60] sm:$0xff] %vm22_vm0, %v613_v51  ;;  %630 = vst.msk [vmem:[%s1115_s4 + $0x68] sm:$0xff] %vm22_vm0, %v614_v53 }
 0x191   :  { %631 = vst.msk [vmem:[%s1115_s4 + $0x70] sm:$0xff] %vm22_vm0, %v615_v54  ;;  %632 = vst.msk [vmem:[%s1115_s4 + $0x78] sm:$0xff] %vm22_vm0, %v616_v55 }

// kernel: shedd_forward.44
= control target key start
LH: loop header
LB: loop body
LE: loop exit
PB: predicated region body
PF: predicated region fallthrough
CT: control target
= control target key end

     0   :  { %s909_s18 = smov 0   ;;  %s911_s19 = smov 0   ;;  %s1039_s0 = inlined_call_operand.vmem [shape: bf16[32,640], index: 0, kind: input, shape index: {}]   ;;  %s1040_s1 = inlined_call_operand.vmem [shape: bf16[640,64], index: 1, kind: input, shape index: {}]   ;;  %s1041_s2 = inlined_call_operand.vmem [shape: f32[1,64], index: 2, kind: input, shape index: {}]   ;;  %s1042_s3 = inlined_call_operand.vmem [shape: f32[1,64], index: 3, kind: input, shape index: {}]   ;;  %s1043_s4 = inlined_call_operand.vmem [shape: f32[32,64], index: 4, kind: input, shape index: {}]   ;;  %s1044_s5 = inlined_call_operand.vmem [shape: f32[32,64], index: 5, kind: output, shape index: {}]  }
   0x1   :  { %s913_s20 = smov 0   ;;  %s915_s21 = smov 0  }
   0x2   :  { %s917_s22 = smov 0  }
   0x3 LB: > { %s24_s23 = sadd.s32 1, %s872_s21  ;;  %p41_p1 = scmp.ne.s32.totalorder %s864_s19, %s860_s18  ;;  %s876_s22 = sphi %s917_s22, %s15_s22   ;;  %s872_s21 = sphi %s915_s21, %s1048_s21   ;;  %s868_s20 = sphi %s913_s20, %s1047_s20   ;;  %s864_s19 = sphi %s911_s19, %s1046_s19   ;;  %s860_s18 = sphi %s909_s18, %s1045_s18  }
   0x4   : > { %p25_p0 = scmp.ge.s32.totalorder %s24_s23, 5  ;;  %p42_p2 = scmp.eq.s32.totalorder %s876_s22, 0 }
   0x5   : > { %s34_s25 = sadd.s32 1, %s864_s19  ;;  %p731_p5 = scmp.ge.s32.totalorder %s876_s22, 5 }
   0x6   : > { %s1050_s23 = smov (%p25_p0, %s24_s23), 0  ;;  %p43_p3 = por %p42_p2, %p41_p1 }
   0x7   : > { %s31_s24 = ssub.s32 %s872_s21, %s1050_s23  ;;  %218 = sbr.rel (%p731_p5) target bundleno = 21 (0x15), region = 28 }
   0x8   : > { %p32_p4 = scmp.eq.s32.totalorder %s31_s24, 0 }
   0xa   : > { %s944_s26 = scalar_select %p32_p4, %s864_s19, %s34_s25  }
   0xe   : > { %221 = sbr.rel (!%p43_p3) target bundleno = 21 (0x15), region = 32  ;;  %s223_s27 = sand.u32 (%p43_p3), 1, %s864_s19  }
   0xf   : > { %s733_s28 = sshll.u32 (%p43_p3), %s872_s21, 2  ;;  %s732_s29 = sshll.u32 (%p43_p3), %s223_s27, 4 }
  0x10   : > { %s227_s7 = scalar_lea.vmem (%p43_p3), %s1039_s0, %s733_s28  ;;  %s225_s8 = scalar_lea.vmem (%p43_p3), [#allocation3], %s732_s29 }
  0x11   : > { %v243_v0 = vld [vmem:[%s227_s7] sm:$0xf] (%p43_p3)  ;;  %v245_v1 = vld [vmem:[%s227_s7 + $0x14] sm:$0xf] (%p43_p3)  ;;  %v247_v2 = vld [vmem:[%s227_s7 + $0x28] sm:$0xf] (%p43_p3) }
  0x12   : > { %244 = vst [vmem:[%s225_s8] sm:$0xf] (%p43_p3), %v243_v0  ;;  %246 = vst [vmem:[%s225_s8 + $0x4] sm:$0xf] (%p43_p3), %v245_v1  ;;  %v249_v3 = vld [vmem:[%s227_s7 + $0x3c] sm:$0xf] (%p43_p3) }
  0x13   : > { %248 = vst [vmem:[%s225_s8 + $0x8] sm:$0xf] (%p43_p3), %v247_v2  ;;  %250 = vst [vmem:[%s225_s8 + $0xc] sm:$0xf] (%p43_p3), %v249_v3 }
  0x15 PF: > { %p734_p6 = scmp.ge.s32.totalorder %s876_s22, 1  ;;  %p292_p7 = scmp.lt.s32.totalorder %s876_s22, 6 }
  0x17   : > { %p293_p8 = pnand %p734_p6, %p292_p7 }
  0x18   : > { %s299_s9 = sand.u32 (!%p293_p8), 1, %s860_s18   ;;  %s736_s10 = sshll.u32 (!%p293_p8), %s868_s20, 4 }
  0x19   : > { %296 = sbr.rel (%p293_p8) target bundleno = 368 (0x170), region = 77  ;;  %s956_s11 = sshll.u32 (!%p293_p8), %s299_s9, 4 }
  0x1a   : > { %p344_p9 = scmp.lt.s32.totalorder (!%p293_p8), %s736_s10, 79  ;;  %s301_s16 = scalar_lea.vmem (!%p293_p8), [#allocation3], %s956_s11 }
  0x1b   : > { %p738_p10 = scmp.ne.s32.totalorder (!%p293_p8), %s868_s20, 0 }
  0x20   : > { %s1052_s10 = smov (!%p344_p9, %s736_s10), 79  ;;  %370 = sbr.rel (%p738_p10) target bundleno = 39 (0x27), region = 85 }
  0x21   : > { %s737_s12 = sshll.u32 %s1052_s10, 2  ;;  %vm371_vm0 = vcmask (!%p738_p10), 523264   ;;  %v878_v4 = vmov (!%p738_p10), 0.0  }
  0x22   : > { %s961_s15 = scalar_lea.vmem %s1040_s1, %s737_s12  ;;  %372 = vst.msk [vmem:[#allocation2] sm:$0xff] (!%p738_p10), %vm371_vm0, %v878_v4  ;;  %373 = vst.msk [vmem:[#allocation2 + $0x8] sm:$0xff] (!%p738_p10), %vm371_vm0, %v878_v4 }
  0x23   : > { %374 = vst.msk [vmem:[#allocation2 + $0x10] sm:$0xff] (!%p738_p10), %vm371_vm0, %v878_v4  ;;  %375 = vst.msk [vmem:[#allocation2 + $0x18] sm:$0xff] (!%p738_p10), %vm371_vm0, %v878_v4 }
  0x27 PF: > { %v826_v5 = vld [vmem:[%s961_s15] sm:$0xff]   ;;  %v827_v6 = vld [vmem:[%s961_s15 + $0x8] sm:$0xff]   ;;  %v828_v7 = vld [vmem:[%s961_s15 + $0x10] sm:$0xff]   ;;  %vm513_vm1 = vcmask 523264   ;;  %p749_p11 = scmp.ne.s32.totalorder %s868_s20, 4 }
  0x28   : > { %765 = vmatprep.subr.bf16.mxu0 %v826_v5  ;;  %v829_v8 = vld [vmem:[%s961_s15 + $0x18] sm:$0xff]   ;;  %v834_v9 = vld [vmem:[%s301_s16] sm:$0xff]   ;;  %v831_v11 = vld [vmem:[%s961_s15 + $0x28] sm:$0xff]  }
  0x29   : > { %766 = vmatpush3.bf16.msra.mxu0 %v826_v5  ;;  %781 = vmatprep.mubr.bf16.mxu0 %v834_v9  ;;  %v830_v10 = vld [vmem:[%s961_s15 + $0x20] sm:$0xff]   ;;  %v832_v12 = vld [vmem:[%s961_s15 + $0x30] sm:$0xff]   ;;  %v833_v13 = vld [vmem:[%s961_s15 + $0x38] sm:$0xff]  }
  0x2a   : > { %767 = vmatprep.subr.bf16.mxu0 %v827_v6  ;;  %v835_v14 = vld [vmem:[%s301_s16 + $0x8] sm:$0xff]   ;;  %v378_v15 = vld [vmem:[#allocation2 + $0x10] sm:$0xff]  ;;  %v376_v16 = vld [vmem:[#allocation2] sm:$0xff] }
  0x2b   : > { %v379_v18 = vld [vmem:[#allocation2 + $0x18] sm:$0xff]  ;;  %v377_v21 = vld [vmem:[#allocation2 + $0x8] sm:$0xff]  ;;  %v750_v5 = vld [vmem:[%s1041_s2] ss:$0 sm:$0xff] (!%p749_p11) }
  0x2d   : > { %768 = vmatpush3.bf16.msra.mxu0 %v827_v6 }
  0x2e   : > { %769 = vmatprep.subr.bf16.mxu0 %v828_v7 }
  0x31   : > { %770 = vmatpush3.bf16.msra.mxu0 %v828_v7 }
  0x32   : > { %771 = vmatprep.subr.bf16.mxu0 %v829_v8 }
  0x35   : > { %772 = vmatpush3.bf16.msra.mxu0 %v829_v8 }
  0x36   : > { %773 = vmatprep.subr.bf16.mxu0 %v830_v10 }
  0x39   : > { %774 = vmatpush3.bf16.msra.mxu0 %v830_v10  ;;  %v751_v10 = vld [vmem:[%s1042_s3] ss:$0 sm:$0xff] (!%p749_p11) }
  0x3a   : > { %775 = vmatprep.subr.bf16.mxu0 %v831_v11 }
  0x3d   : > { %776 = vmatpush3.bf16.msra.mxu0 %v831_v11 }
  0x3e   : > { %777 = vmatprep.subr.bf16.mxu0 %v832_v12 }
  0x41   : > { %778 = vmatpush3.bf16.msra.mxu0 %v832_v12  ;;  %v591_v12 = vld [vmem:[%s1043_s4] sm:$0xff] (!%p749_p11) }
  0x42   : > { %779 = vmatprep.subr.bf16.mxu0 %v833_v13 }
  0x45   : > { %780 = vmatpush3.bf16.msra.mxu0 %v833_v13 }
  0x48   : > { %782 = vmatmul.mubr.bf16.vlgmr.msra.gmra.mrb[0].mxu0 %v835_v14 }
 0x11b   : > { %v783_v17 = vpop.f32.mrb[0].mxu0  ;;  %521 = sbr.rel (%p749_p11) target bundleno = 368 (0x170), region = 89 }
 0x11c   : > { %v511_v19 = vadd.f32 %v783_v17, %v378_v15  ;;  %v494_v20 = vpop.f32.mrb[1].mxu0  ;;  %v593_v17 = vld [vmem:[%s1043_s4 + $0x10] sm:$0xff] (!%p749_p11) }
 0x11d   : > { %v509_v22 = vadd.f32 %v494_v20, %v376_v16  ;;  %v784_v23 = vpop.f32.mrb[2].mxu0  ;;  %v592_v16 = vld [vmem:[%s1043_s4 + $0x8] sm:$0xff] (!%p749_p11) }
 0x11e   : > { %516 = vst.msk [vmem:[#allocation2 + $0x10] sm:$0xff] %vm513_vm1, %v511_v19  ;;  %v512_v24 = vadd.f32 %v784_v23, %v379_v18  ;;  %v497_v25 = vpop.f32.mrb[3].mxu0  ;;  %v594_v18 = vld [vmem:[%s1043_s4 + $0x18] sm:$0xff] (!%p749_p11) }
 0x11f   : > { %514 = vst.msk [vmem:[#allocation2] sm:$0xff] %vm513_vm1, %v509_v22  ;;  %v510_v26 = vadd.f32 %v497_v25, %v377_v21 }
 0x120   : > { %517 = vst.msk [vmem:[#allocation2 + $0x18] sm:$0xff] %vm513_vm1, %v512_v24 }
 0x121   : > { %515 = vst.msk [vmem:[#allocation2 + $0x8] sm:$0xff] %vm513_vm1, %v510_v26 }
 0x125   : > { %v524_v29 = vld [vmem:[#allocation2 + $0x10] sm:$0xff] }
 0x126   : > { %v522_v27 = vld [vmem:[#allocation2] sm:$0xff]  ;;  %v529_v33 = vsel %vm513_vm1, %v524_v29, 0.0 }
 0x127   : > { %v525_v30 = vld [vmem:[#allocation2 + $0x18] sm:$0xff]  ;;  %v526_v31 = vsel %vm513_vm1, %v522_v27, 0.0 }
 0x128   : > { %v523_v28 = vld [vmem:[#allocation2 + $0x8] sm:$0xff]  ;;  %v531_v35 = vsel %vm513_vm1, %v525_v30, 0.0 }
 0x129   : > { %v527_v32 = vsel %vm513_vm1, %v523_v28, 0.0 }
 0x12a   : > { %v528_v34 = vadd.f32 %v527_v32, %v526_v31 }
 0x12c   : > { %v530_v36 = vadd.f32 %v529_v33, %v528_v34 }
 0x12e   : > { %v532_v37 = vadd.f32 %v531_v35, %v530_v36 }
 0x130   : > { %v533_v38 = vrot.slane %v532_v37, 4 }
 0x132   : > { %v534_v39 = vadd.f32 %v533_v38, %v532_v37 }
 0x134   : > { %v535_v40 = vrot.slane %v534_v39, 2 }
 0x136   : > { %v536_v41 = vadd.f32 %v535_v40, %v534_v39 }
 0x138   : > { %v537_v42 = vrot.slane %v536_v41, 1 }
 0x13a   : > { %v538_v43 = vadd.f32 %v537_v42, %v536_v41 }
 0x13c   : > { %v540_v44 = vmul.f32 0.03125, %v538_v43 }
 0x13e   : > { %v541_v45 = vsub.f32 %v522_v27, %v540_v44  ;;  %v542_v46 = vsub.f32 %v523_v28, %v540_v44  ;;  %v543_v47 = vsub.f32 %v524_v29, %v540_v44  ;;  %v544_v48 = vsub.f32 %v525_v30, %v540_v44 }
 0x140   : > { %v545_v49 = vmul.f32 %v541_v45, %v541_v45  ;;  %v546_v50 = vmul.f32 %v542_v46, %v542_v46  ;;  %v547_v51 = vmul.f32 %v543_v47, %v543_v47  ;;  %v548_v52 = vmul.f32 %v544_v48, %v544_v48 }
 0x142   : > { %v549_v53 = vsel %vm513_vm1, %v545_v49, 0.0  ;;  %v550_v54 = vsel %vm513_vm1, %v546_v50, 0.0  ;;  %v552_v55 = vsel %vm513_vm1, %v547_v51, 0.0  ;;  %v554_v57 = vsel %vm513_vm1, %v548_v52, 0.0 }
 0x143   : > { %v551_v56 = vadd.f32 %v550_v54, %v549_v53 }
 0x145   : > { %v553_v58 = vadd.f32 %v552_v55, %v551_v56 }
 0x147   : > { %v555_v59 = vadd.f32 %v554_v57, %v553_v58 }
 0x149   : > { %v556_v60 = vrot.slane %v555_v59, 4 }
 0x14b   : > { %v557_v61 = vadd.f32 %v556_v60, %v555_v59 }
 0x14d   : > { %v558_v62 = vrot.slane %v557_v61, 2 }
 0x14f   : > { %v559_v63 = vadd.f32 %v558_v62, %v557_v61 }
 0x151   : > { %v560_v0 = vrot.slane %v559_v63, 1 }
 0x153   : > { %v561_v1 = vadd.f32 %v560_v0, %v559_v63 }
 0x155   : > { %v562_v2 = vmul.f32 0.03125, %v561_v1 }
 0x157   : > { %v563_v3 = vadd.f32 1e-05, %v562_v2 }
 0x159   : > { %836 = vrsqrt.f32 %v563_v3 }
 0x163   : > { %v837_v4 = vpop.eup %836 }
 0x164   : > { %v565_v6 = vmul.f32 %v837_v4, %v541_v45  ;;  %v566_v7 = vmul.f32 %v837_v4, %v542_v46  ;;  %v567_v8 = vmul.f32 %v837_v4, %v543_v47  ;;  %v568_v9 = vmul.f32 %v837_v4, %v544_v48 }
 0x166   : > { %v576_v11 = vmul.f32 %v750_v5, %v565_v6  ;;  %v577_v13 = vmul.f32 %v750_v5, %v566_v7  ;;  %v578_v14 = vmul.f32 %v750_v5, %v567_v8  ;;  %v579_v15 = vmul.f32 %v750_v5, %v568_v9 }
 0x168   : > { %v587_v19 = vadd.f32 %v751_v10, %v576_v11  ;;  %v588_v20 = vadd.f32 %v751_v10, %v577_v13  ;;  %v589_v21 = vadd.f32 %v751_v10, %v578_v14  ;;  %v590_v22 = vadd.f32 %v751_v10, %v579_v15 }
 0x16a   : > { %v595_v23 = vadd.f32 %v591_v12, %v587_v19  ;;  %v596_v24 = vadd.f32 %v592_v16, %v588_v20  ;;  %v597_v25 = vadd.f32 %v593_v17, %v589_v21  ;;  %v598_v26 = vadd.f32 %v594_v18, %v590_v22 }
 0x16c   : > { %v599_v27 = vmax.f32 %v595_v23, 0.0  ;;  %v600_v28 = vmax.f32 %v596_v24, 0.0  ;;  %v601_v29 = vmax.f32 %v597_v25, 0.0  ;;  %v602_v30 = vmax.f32 %v598_v26, 0.0 }
 0x16e   : > { %603 = vst.msk [vmem:[%s1044_s5] sm:$0xff] %vm513_vm1, %v599_v27  ;;  %604 = vst.msk [vmem:[%s1044_s5 + $0x8] sm:$0xff] %vm513_vm1, %v600_v28 }
 0x16f   : > { %605 = vst.msk [vmem:[%s1044_s5 + $0x10] sm:$0xff] %vm513_vm1, %v601_v29  ;;  %606 = vst.msk [vmem:[%s1044_s5 + $0x18] sm:$0xff] %vm513_vm1, %v602_v30 }
 0x170 PF: > { %s15_s22 = sadd.s32 1, %s876_s22   ;;  %s1045_s18 = smov %s864_s19 }
 0x171   : > { %p12_p12 = scmp.ge.s32.totalorder %s15_s22, 7   ;;  %s1046_s19 = smov %s944_s26 }
 0x172   : > { %s1047_s20 = smov %s872_s21  ;;  %s1048_s21 = smov %s1050_s23 }
 0x173   :  { %14 = sbr.rel (!%p12_p12) target bundleno = 3 (0x3), region = 136 }

// kernel: shedd_forward.43
= control target key start
LH: loop header
LB: loop body
LE: loop exit
PB: predicated region body
PF: predicated region fallthrough
CT: control target
= control target key end

     0   :  { %s836_s15 = smov 0   ;;  %s838_s16 = smov 0   ;;  %s954_s0 = inlined_call_operand.vmem [shape: bf16[32,640], index: 0, kind: input, shape index: {}]   ;;  %s955_s1 = inlined_call_operand.vmem [shape: bf16[640,64], index: 1, kind: input, shape index: {}]   ;;  %s956_s2 = inlined_call_operand.vmem [shape: f32[1,64], index: 2, kind: input, shape index: {}]   ;;  %s957_s3 = inlined_call_operand.vmem [shape: f32[1,64], index: 3, kind: input, shape index: {}]   ;;  %s958_s4 = inlined_call_operand.vmem [shape: f32[32,64], index: 4, kind: output, shape index: {}]  }
   0x1   :  { %s840_s17 = smov 0   ;;  %s842_s18 = smov 0  }
   0x2   :  { %s844_s19 = smov 0  }
   0x3 LB: > { %s23_s20 = sadd.s32 1, %s804_s18  ;;  %p40_p1 = scmp.ne.s32.totalorder %s796_s16, %s792_s15  ;;  %s808_s19 = sphi %s844_s19, %s14_s19   ;;  %s804_s18 = sphi %s842_s18, %s962_s18   ;;  %s800_s17 = sphi %s840_s17, %s961_s17   ;;  %s796_s16 = sphi %s838_s16, %s960_s16   ;;  %s792_s15 = sphi %s836_s15, %s959_s15  }
   0x4   : > { %p24_p0 = scmp.ge.s32.totalorder %s23_s20, 5  ;;  %p41_p2 = scmp.eq.s32.totalorder %s808_s19, 0 }
   0x5   : > { %s33_s22 = sadd.s32 1, %s796_s16  ;;  %p663_p5 = scmp.ge.s32.totalorder %s808_s19, 5 }
   0x6   : > { %s964_s20 = smov (%p24_p0, %s23_s20), 0  ;;  %p42_p3 = por %p41_p2, %p40_p1 }
   0x7   : > { %s30_s21 = ssub.s32 %s804_s18, %s964_s20  ;;  %184 = sbr.rel (%p663_p5) target bundleno = 21 (0x15), region = 24 }
   0x8   : > { %p31_p4 = scmp.eq.s32.totalorder %s30_s21, 0 }
   0xa   : > { %s871_s23 = scalar_select %p31_p4, %s796_s16, %s33_s22  }
   0xe   : > { %187 = sbr.rel (!%p42_p3) target bundleno = 21 (0x15), region = 28  ;;  %s189_s24 = sand.u32 (%p42_p3), 1, %s796_s16  }
   0xf   : > { %s665_s25 = sshll.u32 (%p42_p3), %s804_s18, 2  ;;  %s664_s26 = sshll.u32 (%p42_p3), %s189_s24, 4 }
  0x10   : > { %s193_s29 = scalar_lea.vmem (%p42_p3), %s954_s0, %s665_s25  ;;  %s191_s30 = scalar_lea.vmem (%p42_p3), [#allocation3], %s664_s26 }
  0x11   : > { %v209_v0 = vld [vmem:[%s193_s29] sm:$0xf] (%p42_p3)  ;;  %v211_v1 = vld [vmem:[%s193_s29 + $0x14] sm:$0xf] (%p42_p3)  ;;  %v213_v2 = vld [vmem:[%s193_s29 + $0x28] sm:$0xf] (%p42_p3) }
  0x12   : > { %210 = vst [vmem:[%s191_s30] sm:$0xf] (%p42_p3), %v209_v0  ;;  %212 = vst [vmem:[%s191_s30 + $0x4] sm:$0xf] (%p42_p3), %v211_v1  ;;  %v215_v3 = vld [vmem:[%s193_s29 + $0x3c] sm:$0xf] (%p42_p3) }
  0x13   : > { %214 = vst [vmem:[%s191_s30 + $0x8] sm:$0xf] (%p42_p3), %v213_v2  ;;  %216 = vst [vmem:[%s191_s30 + $0xc] sm:$0xf] (%p42_p3), %v215_v3 }
  0x15 PF: > { %p666_p6 = scmp.ge.s32.totalorder %s808_s19, 1  ;;  %p258_p7 = scmp.lt.s32.totalorder %s808_s19, 6 }
  0x17   : > { %p259_p8 = pnand %p666_p6, %p258_p7 }
  0x18   : > { %s265_s5 = sand.u32 (!%p259_p8), 1, %s792_s15   ;;  %s668_s6 = sshll.u32 (!%p259_p8), %s800_s17, 4 }
  0x19   : > { %262 = sbr.rel (%p259_p8) target bundleno = 366 (0x16e), region = 73  ;;  %s883_s7 = sshll.u32 (!%p259_p8), %s265_s5, 4 }
  0x1a   : > { %p304_p9 = scmp.lt.s32.totalorder (!%p259_p8), %s668_s6, 79  ;;  %s267_s12 = scalar_lea.vmem (!%p259_p8), [#allocation3], %s883_s7 }
  0x1b   : > { %p670_p10 = scmp.ne.s32.totalorder (!%p259_p8), %s800_s17, 0 }
  0x20   : > { %s966_s6 = smov (!%p304_p9, %s668_s6), 79  ;;  %326 = sbr.rel (%p670_p10) target bundleno = 39 (0x27), region = 81 }
  0x21   : > { %s669_s8 = sshll.u32 %s966_s6, 2  ;;  %vm327_vm0 = vcmask (!%p670_p10), 523264   ;;  %v810_v4 = vmov (!%p670_p10), 0.0  }
  0x22   : > { %s888_s11 = scalar_lea.vmem %s955_s1, %s669_s8  ;;  %328 = vst.msk [vmem:[#allocation2] sm:$0xff] (!%p670_p10), %vm327_vm0, %v810_v4  ;;  %329 = vst.msk [vmem:[#allocation2 + $0x8] sm:$0xff] (!%p670_p10), %vm327_vm0, %v810_v4 }
  0x23   : > { %330 = vst.msk [vmem:[#allocation2 + $0x10] sm:$0xff] (!%p670_p10), %vm327_vm0, %v810_v4  ;;  %331 = vst.msk [vmem:[#allocation2 + $0x18] sm:$0xff] (!%p670_p10), %vm327_vm0, %v810_v4 }
  0x27 PF: > { %v758_v5 = vld [vmem:[%s888_s11] sm:$0xff]   ;;  %v759_v6 = vld [vmem:[%s888_s11 + $0x8] sm:$0xff]   ;;  %v760_v7 = vld [vmem:[%s888_s11 + $0x10] sm:$0xff]   ;;  %vm469_vm1 = vcmask 523264   ;;  %p681_p11 = scmp.ne.s32.totalorder %s800_s17, 4 }
  0x28   : > { %697 = vmatprep.subr.bf16.mxu0 %v758_v5  ;;  %v761_v8 = vld [vmem:[%s888_s11 + $0x18] sm:$0xff]   ;;  %v766_v9 = vld [vmem:[%s267_s12] sm:$0xff]   ;;  %v763_v11 = vld [vmem:[%s888_s11 + $0x28] sm:$0xff]  }
  0x29   : > { %698 = vmatpush3.bf16.msra.mxu0 %v758_v5  ;;  %713 = vmatprep.mubr.bf16.mxu0 %v766_v9  ;;  %v762_v10 = vld [vmem:[%s888_s11 + $0x20] sm:$0xff]   ;;  %v764_v12 = vld [vmem:[%s888_s11 + $0x30] sm:$0xff]   ;;  %v765_v13 = vld [vmem:[%s888_s11 + $0x38] sm:$0xff]  }
  0x2a   : > { %699 = vmatprep.subr.bf16.mxu0 %v759_v6  ;;  %v767_v14 = vld [vmem:[%s267_s12 + $0x8] sm:$0xff]   ;;  %v334_v15 = vld [vmem:[#allocation2 + $0x10] sm:$0xff]  ;;  %v332_v16 = vld [vmem:[#allocation2] sm:$0xff] }
  0x2b   : > { %v335_v18 = vld [vmem:[#allocation2 + $0x18] sm:$0xff]  ;;  %v333_v21 = vld [vmem:[#allocation2 + $0x8] sm:$0xff]  ;;  %v682_v5 = vld [vmem:[%s956_s2] ss:$0 sm:$0xff] (!%p681_p11) }
  0x2d   : > { %700 = vmatpush3.bf16.msra.mxu0 %v759_v6 }
  0x2e   : > { %701 = vmatprep.subr.bf16.mxu0 %v760_v7 }
  0x31   : > { %702 = vmatpush3.bf16.msra.mxu0 %v760_v7 }
  0x32   : > { %703 = vmatprep.subr.bf16.mxu0 %v761_v8 }
  0x35   : > { %704 = vmatpush3.bf16.msra.mxu0 %v761_v8 }
  0x36   : > { %705 = vmatprep.subr.bf16.mxu0 %v762_v10 }
  0x39   : > { %706 = vmatpush3.bf16.msra.mxu0 %v762_v10  ;;  %v683_v10 = vld [vmem:[%s957_s3] ss:$0 sm:$0xff] (!%p681_p11) }
  0x3a   : > { %707 = vmatprep.subr.bf16.mxu0 %v763_v11 }
  0x3d   : > { %708 = vmatpush3.bf16.msra.mxu0 %v763_v11 }
  0x3e   : > { %709 = vmatprep.subr.bf16.mxu0 %v764_v12 }
  0x41   : > { %710 = vmatpush3.bf16.msra.mxu0 %v764_v12 }
  0x42   : > { %711 = vmatprep.subr.bf16.mxu0 %v765_v13 }
  0x45   : > { %712 = vmatpush3.bf16.msra.mxu0 %v765_v13 }
  0x48   : > { %714 = vmatmul.mubr.bf16.vlgmr.msra.gmra.mrb[0].mxu0 %v767_v14 }
 0x11b   : > { %v715_v17 = vpop.f32.mrb[0].mxu0  ;;  %477 = sbr.rel (%p681_p11) target bundleno = 366 (0x16e), region = 85 }
 0x11c   : > { %v467_v19 = vadd.f32 %v715_v17, %v334_v15  ;;  %v450_v20 = vpop.f32.mrb[1].mxu0 }
 0x11d   : > { %v465_v22 = vadd.f32 %v450_v20, %v332_v16  ;;  %v716_v23 = vpop.f32.mrb[2].mxu0 }
 0x11e   : > { %472 = vst.msk [vmem:[#allocation2 + $0x10] sm:$0xff] %vm469_vm1, %v467_v19  ;;  %v468_v24 = vadd.f32 %v716_v23, %v335_v18  ;;  %v453_v25 = vpop.f32.mrb[3].mxu0 }
 0x11f   : > { %470 = vst.msk [vmem:[#allocation2] sm:$0xff] %vm469_vm1, %v465_v22  ;;  %v466_v26 = vadd.f32 %v453_v25, %v333_v21 }
 0x120   : > { %473 = vst.msk [vmem:[#allocation2 + $0x18] sm:$0xff] %vm469_vm1, %v468_v24 }
 0x121   : > { %471 = vst.msk [vmem:[#allocation2 + $0x8] sm:$0xff] %vm469_vm1, %v466_v26 }
 0x125   : > { %v480_v29 = vld [vmem:[#allocation2 + $0x10] sm:$0xff] }
 0x126   : > { %v478_v27 = vld [vmem:[#allocation2] sm:$0xff]  ;;  %v485_v33 = vsel %vm469_vm1, %v480_v29, 0.0 }
 0x127   : > { %v481_v30 = vld [vmem:[#allocation2 + $0x18] sm:$0xff]  ;;  %v482_v31 = vsel %vm469_vm1, %v478_v27, 0.0 }
 0x128   : > { %v479_v28 = vld [vmem:[#allocation2 + $0x8] sm:$0xff]  ;;  %v487_v35 = vsel %vm469_vm1, %v481_v30, 0.0 }
 0x129   : > { %v483_v32 = vsel %vm469_vm1, %v479_v28, 0.0 }
 0x12a   : > { %v484_v34 = vadd.f32 %v483_v32, %v482_v31 }
 0x12c   : > { %v486_v36 = vadd.f32 %v485_v33, %v484_v34 }
 0x12e   : > { %v488_v37 = vadd.f32 %v487_v35, %v486_v36 }
 0x130   : > { %v489_v38 = vrot.slane %v488_v37, 4 }
 0x132   : > { %v490_v39 = vadd.f32 %v489_v38, %v488_v37 }
 0x134   : > { %v491_v40 = vrot.slane %v490_v39, 2 }
 0x136   : > { %v492_v41 = vadd.f32 %v491_v40, %v490_v39 }
 0x138   : > { %v493_v42 = vrot.slane %v492_v41, 1 }
 0x13a   : > { %v494_v43 = vadd.f32 %v493_v42, %v492_v41 }
 0x13c   : > { %v496_v44 = vmul.f32 0.03125, %v494_v43 }
 0x13e   : > { %v497_v45 = vsub.f32 %v478_v27, %v496_v44  ;;  %v498_v46 = vsub.f32 %v479_v28, %v496_v44  ;;  %v499_v47 = vsub.f32 %v480_v29, %v496_v44  ;;  %v500_v48 = vsub.f32 %v481_v30, %v496_v44 }
 0x140   : > { %v501_v49 = vmul.f32 %v497_v45, %v497_v45  ;;  %v502_v50 = vmul.f32 %v498_v46, %v498_v46  ;;  %v503_v51 = vmul.f32 %v499_v47, %v499_v47  ;;  %v504_v52 = vmul.f32 %v500_v48, %v500_v48 }
 0x142   : > { %v505_v53 = vsel %vm469_vm1, %v501_v49, 0.0  ;;  %v506_v54 = vsel %vm469_vm1, %v502_v50, 0.0  ;;  %v508_v55 = vsel %vm469_vm1, %v503_v51, 0.0  ;;  %v510_v57 = vsel %vm469_vm1, %v504_v52, 0.0 }
 0x143   : > { %v507_v56 = vadd.f32 %v506_v54, %v505_v53 }
 0x145   : > { %v509_v58 = vadd.f32 %v508_v55, %v507_v56 }
 0x147   : > { %v511_v59 = vadd.f32 %v510_v57, %v509_v58 }
 0x149   : > { %v512_v60 = vrot.slane %v511_v59, 4 }
 0x14b   : > { %v513_v61 = vadd.f32 %v512_v60, %v511_v59 }
 0x14d   : > { %v514_v62 = vrot.slane %v513_v61, 2 }
 0x14f   : > { %v515_v63 = vadd.f32 %v514_v62, %v513_v61 }
 0x151   : > { %v516_v0 = vrot.slane %v515_v63, 1 }
 0x153   : > { %v517_v1 = vadd.f32 %v516_v0, %v515_v63 }
 0x155   : > { %v518_v2 = vmul.f32 0.03125, %v517_v1 }
 0x157   : > { %v519_v3 = vadd.f32 1e-05, %v518_v2 }
 0x159   : > { %768 = vrsqrt.f32 %v519_v3 }
 0x163   : > { %v769_v4 = vpop.eup %768 }
 0x164   : > { %v521_v6 = vmul.f32 %v769_v4, %v497_v45  ;;  %v522_v7 = vmul.f32 %v769_v4, %v498_v46  ;;  %v523_v8 = vmul.f32 %v769_v4, %v499_v47  ;;  %v524_v9 = vmul.f32 %v769_v4, %v500_v48 }
 0x166   : > { %v532_v11 = vmul.f32 %v682_v5, %v521_v6  ;;  %v533_v12 = vmul.f32 %v682_v5, %v522_v7  ;;  %v534_v13 = vmul.f32 %v682_v5, %v523_v8  ;;  %v535_v14 = vmul.f32 %v682_v5, %v524_v9 }
 0x168   : > { %v543_v15 = vadd.f32 %v683_v10, %v532_v11  ;;  %v544_v16 = vadd.f32 %v683_v10, %v533_v12  ;;  %v545_v17 = vadd.f32 %v683_v10, %v534_v13  ;;  %v546_v18 = vadd.f32 %v683_v10, %v535_v14 }
 0x16a   : > { %v547_v19 = vmax.f32 %v543_v15, 0.0  ;;  %v548_v20 = vmax.f32 %v544_v16, 0.0  ;;  %v549_v21 = vmax.f32 %v545_v17, 0.0  ;;  %v550_v22 = vmax.f32 %v546_v18, 0.0 }
 0x16c   : > { %551 = vst.msk [vmem:[%s958_s4] sm:$0xff] %vm469_vm1, %v547_v19  ;;  %552 = vst.msk [vmem:[%s958_s4 + $0x8] sm:$0xff] %vm469_vm1, %v548_v20 }
 0x16d   : > { %553 = vst.msk [vmem:[%s958_s4 + $0x10] sm:$0xff] %vm469_vm1, %v549_v21  ;;  %554 = vst.msk [vmem:[%s958_s4 + $0x18] sm:$0xff] %vm469_vm1, %v550_v22 }
 0x16e PF: > { %s14_s19 = sadd.s32 1, %s808_s19   ;;  %s959_s15 = smov %s796_s16 }
 0x16f   : > { %p11_p12 = scmp.ge.s32.totalorder %s14_s19, 7   ;;  %s960_s16 = smov %s871_s23 }
 0x170   : > { %s961_s17 = smov %s804_s18  ;;  %s962_s18 = smov %s964_s20 }
 0x171   :  { %13 = sbr.rel (!%p11_p12) target bundleno = 3 (0x3), region = 129 }

// kernel: shedd_forward.47
= control target key start
LH: loop header
LB: loop body
LE: loop exit
PB: predicated region body
PF: predicated region fallthrough
CT: control target
= control target key end

     0   :  { %s663_s15 = smov 0   ;;  %s665_s16 = smov 0   ;;  %s715_s0 = inlined_call_operand.vmem [shape: bf16[8,640], index: 0, kind: input, shape index: {}]   ;;  %s716_s1 = inlined_call_operand.vmem [shape: bf16[640,128], index: 1, kind: input, shape index: {}]   ;;  %s717_s2 = inlined_call_operand.vmem [shape: f32[1,128], index: 2, kind: input, shape index: {}]   ;;  %s718_s3 = inlined_call_operand.vmem [shape: f32[1,128], index: 3, kind: input, shape index: {}]   ;;  %s719_s4 = inlined_call_operand.vmem [shape: f32[8,128], index: 4, kind: output, shape index: {}]  }
   0x1   :  { %s667_s17 = smov 0  }
   0x2 LB: > { %s23_s18 = sadd.s32 1, %s629_s16  ;;  %p526_p0 = scmp.ge.s32.totalorder %s633_s17, 1  ;;  %s633_s17 = sphi %s667_s17, %s14_s17   ;;  %s629_s16 = sphi %s665_s16, %s721_s16   ;;  %s625_s15 = sphi %s663_s15, %s720_s15  }
   0x3   : > { %p24_p1 = scmp.ge.s32.totalorder %s23_s18, 5  ;;  %p205_p2 = scmp.lt.s32.totalorder %s633_s17, 6 }
   0x5   : > { %s723_s18 = smov (%p24_p1, %s23_s18), 0  ;;  %p206_p3 = pnand %p526_p0, %p205_p2 }
   0x6   : > { %p243_p4 = scmp.lt.s32.totalorder (!%p206_p3), %s625_s15, 4  ;;  %s528_s19 = sshll.u32 (!%p206_p3), %s625_s15, 4 }
   0x7   : > { %209 = sbr.rel (%p206_p3) target bundleno = 331 (0x14b), region = 36  ;;  %p248_p5 = scmp.lt.s32.totalorder (!%p206_p3), %s528_s19, 79 }
   0x8   : > { %p530_p6 = scmp.ne.s32.totalorder (!%p206_p3), %s625_s15, 0 }
   0xe   : > { %s244_s20 = scalar_select %p243_p4, %s625_s15, 4 }
   0xf   : > { %s725_s19 = smov (!%p248_p5, %s528_s19), 79  ;;  %270 = sbr.rel (%p530_p6) target bundleno = 22 (0x16), region = 40 }
  0x10   : > { %s527_s21 = sshll.u32 %s244_s20, 2  ;;  %s529_s25 = sshll.u32 %s725_s19, 2  ;;  %v635_v0 = vmov (!%p530_p6), 0.0  }
  0x11   : > { %s689_s24 = scalar_lea.vmem %s715_s0, %s527_s21  ;;  %s254_s28 = scalar_lea.vmem %s716_s1, %s529_s25  ;;  %271 = vst [vmem:[#allocation2] sm:$0xff] (!%p530_p6), %v635_v0 }
  0x16 PF: > { %v601_v1 = vld [vmem:[%s254_s28] sm:$0xff]   ;;  %v636_v2 = vmov 0.0   ;;  %v602_v3 = vld [vmem:[%s254_s28 + $0x8] sm:$0xff]   ;;  %vm637_vm0 = vmmov 0   ;;  %v603_v4 = vld [vmem:[%s254_s28 + $0x10] sm:$0xff]   ;;  %p539_p7 = scmp.ne.s32.totalorder %s625_s15, 4 }
  0x17   : > { %554 = vmatprep.subr.bf16.mxu0 %v636_v2  ;;  %570 = vmatprep.mubr.msk.bf16.mxu0 %vm637_vm0, %v636_v2  ;;  %v604_v5 = vld [vmem:[%s254_s28 + $0x18] sm:$0xff]   ;;  %v605_v6 = vld [vmem:[%s254_s28 + $0x20] sm:$0xff]   ;;  %v606_v7 = vld [vmem:[%s254_s28 + $0x28] sm:$0xff]  }
  0x18   : > { %555 = vmatpush3.bf16.msra.mxu0 %v601_v1  ;;  %v607_v8 = vld [vmem:[%s254_s28 + $0x30] sm:$0xff]   ;;  %v608_v9 = vld [vmem:[%s254_s28 + $0x38] sm:$0xff]   ;;  %v273_v10 = vld [vmem:[%s689_s24] sm:$0xf] }
  0x19   : > { %556 = vmatprep.subr.bf16.mxu0 %v636_v2  ;;  %v272_v11 = vld [vmem:[#allocation2] sm:$0xff] }
  0x1a   : > { %v540_v36 = vld [vmem:[%s717_s2] ss:$0 sm:$0xff] (!%p539_p7) }
  0x1b   : > { %v541_v38 = vld [vmem:[%s718_s3] ss:$0 sm:$0xff] (!%p539_p7) }
  0x1c   : > { %557 = vmatpush3.bf16.msra.mxu0 %v602_v3 }
  0x1d   : > { %558 = vmatprep.subr.bf16.mxu0 %v636_v2 }
  0x20   : > { %559 = vmatpush3.bf16.msra.mxu0 %v603_v4 }
  0x21   : > { %560 = vmatprep.subr.bf16.mxu0 %v636_v2 }
  0x24   : > { %561 = vmatpush3.bf16.msra.mxu0 %v604_v5 }
  0x25   : > { %562 = vmatprep.subr.bf16.mxu0 %v636_v2 }
  0x28   : > { %563 = vmatpush3.bf16.msra.mxu0 %v605_v6 }
  0x29   : > { %564 = vmatprep.subr.bf16.mxu0 %v636_v2 }
  0x2c   : > { %565 = vmatpush3.bf16.msra.mxu0 %v606_v7 }
  0x2d   : > { %566 = vmatprep.subr.bf16.mxu0 %v636_v2 }
  0x30   : > { %567 = vmatpush3.bf16.msra.mxu0 %v607_v8 }
  0x31   : > { %568 = vmatprep.subr.bf16.mxu0 %v636_v2 }
  0x34   : > { %569 = vmatpush3.bf16.msra.mxu0 %v608_v9 }
  0x37   : > { %571 = vmatmul.mubr.bf16.vlgmr.msra.gmra.mrb[0].mxu0 %v273_v10 }
 0x107   : > { %383 = sbr.rel (%p539_p7) target bundleno = 331 (0x14b), region = 44 }
 0x10a   : > { %v372_v12 = vpop.f32.mrb[0].mxu0 }
 0x10b   : > { %v378_v13 = vadd.f32 %v372_v12, %v272_v11  ;;  %v572_v14 = vpop.f32.mrb[1].mxu0 }
 0x10c   : > { %v375_v15 = vpop.f32.mrb[2].mxu0 }
 0x10d   : > { %379 = vst [vmem:[#allocation2] sm:$0xff] %v378_v13  ;;  %v573_v16 = vpop.f32.mrb[3].mxu0 }
 0x114   : > { %v384_v17 = vld [vmem:[#allocation2] sm:$0xff] }
 0x115   : > { %v385_v18 = vrot.slane %v384_v17, 4 }
 0x117   : > { %v386_v19 = vadd.f32 %v385_v18, %v384_v17 }
 0x119   : > { %v387_v20 = vrot.slane %v386_v19, 2 }
 0x11b   : > { %v388_v21 = vadd.f32 %v387_v20, %v386_v19 }
 0x11d   : > { %v389_v22 = vrot.slane %v388_v21, 1 }
 0x11f   : > { %v390_v23 = vadd.f32 %v389_v22, %v388_v21 }
 0x121   : > { %v392_v24 = vmul.f32 0.125, %v390_v23 }
 0x123   : > { %v393_v25 = vsub.f32 %v384_v17, %v392_v24 }
 0x125   : > { %v394_v26 = vmul.f32 %v393_v25, %v393_v25 }
 0x127   : > { %v395_v27 = vrot.slane %v394_v26, 4 }
 0x129   : > { %v396_v28 = vadd.f32 %v395_v27, %v394_v26 }
 0x12b   : > { %v397_v29 = vrot.slane %v396_v28, 2 }
 0x12d   : > { %v398_v30 = vadd.f32 %v397_v29, %v396_v28 }
 0x12f   : > { %v399_v31 = vrot.slane %v398_v30, 1 }
 0x131   : > { %v400_v32 = vadd.f32 %v399_v31, %v398_v30 }
 0x133   : > { %v401_v33 = vmul.f32 0.125, %v400_v32 }
 0x135   : > { %v402_v34 = vadd.f32 1e-05, %v401_v33 }
 0x137   : > { %609 = vrsqrt.f32 %v402_v34 }
 0x141   : > { %v610_v35 = vpop.eup %609 }
 0x142   : > { %v404_v37 = vmul.f32 %v610_v35, %v393_v25 }
 0x144   : > { %v412_v39 = vmul.f32 %v540_v36, %v404_v37 }
 0x146   : > { %v420_v40 = vadd.f32 %v541_v38, %v412_v39 }
 0x148   : > { %v421_v41 = vmax.f32 %v420_v40, 0.0 }
 0x14a   : > { %422 = vst [vmem:[%s719_s4] sm:$0xff] %v421_v41 }
 0x14b PF: > { %s14_s17 = sadd.s32 1, %s633_s17   ;;  %s720_s15 = smov %s629_s16 }
 0x14c   : > { %p11_p8 = scmp.ge.s32.totalorder %s14_s17, 7   ;;  %s721_s16 = smov %s723_s18 }
 0x14e   :  { %13 = sbr.rel (!%p11_p8) target bundleno = 2 (0x2), region = 83 }

// kernel: shedd_forward.48
= control target key start
LH: loop header
LB: loop body
LE: loop exit
PB: predicated region body
PF: predicated region fallthrough
CT: control target
= control target key end

     0   :  { %v227_v0 = vmov 0.0   ;;  %vm228_vm0 = vmmov 0   ;;  %s290_s1 = inlined_call_operand.vmem [shape: bf16[128,128], index: 1, kind: input, shape index: {}]   ;;  %s291_s0 = inlined_call_operand.vmem [shape: bf16[8,128], index: 0, kind: input, shape index: {}]   ;;  %s292_s2 = inlined_call_operand.vmem [shape: f32[1,128], index: 2, kind: input, shape index: {}]   ;;  %s293_s3 = inlined_call_operand.vmem [shape: f32[1,128], index: 3, kind: input, shape index: {}]   ;;  %s294_s4 = inlined_call_operand.vmem [shape: f32[8,128], index: 4, kind: output, shape index: {}]  }
   0x1   :  { %195 = vmatprep.subr.bf16.mxu0 %v227_v0  ;;  %v217_v1 = vld [vmem:[%s290_s1] sm:$0xff]   ;;  %211 = vmatprep.mubr.msk.bf16.mxu0 %vm228_vm0, %v227_v0  ;;  %v218_v2 = vld [vmem:[%s290_s1 + $0x8] sm:$0xff]   ;;  %v219_v3 = vld [vmem:[%s290_s1 + $0x10] sm:$0xff]  }
   0x2   :  { %196 = vmatpush3.bf16.msra.mxu0 %v217_v1  ;;  %v220_v4 = vld [vmem:[%s290_s1 + $0x18] sm:$0xff]   ;;  %v221_v5 = vld [vmem:[%s290_s1 + $0x20] sm:$0xff]   ;;  %v222_v6 = vld [vmem:[%s290_s1 + $0x28] sm:$0xff]  }
   0x3   :  { %197 = vmatprep.subr.bf16.mxu0 %v227_v0  ;;  %v223_v7 = vld [vmem:[%s290_s1 + $0x30] sm:$0xff]   ;;  %v224_v8 = vld [vmem:[%s290_s1 + $0x38] sm:$0xff]   ;;  %v24_v9 = vld [vmem:[%s291_s0] sm:$0xf] }
   0x4   :  { %v184_v32 = vld [vmem:[%s292_s2] ss:$0 sm:$0xff] }
   0x5   :  { %v185_v34 = vld [vmem:[%s293_s3] ss:$0 sm:$0xff] }
   0x6   :  { %198 = vmatpush3.bf16.msra.mxu0 %v218_v2 }
   0x7   :  { %199 = vmatprep.subr.bf16.mxu0 %v227_v0 }
   0xa   :  { %200 = vmatpush3.bf16.msra.mxu0 %v219_v3 }
   0xb   :  { %201 = vmatprep.subr.bf16.mxu0 %v227_v0 }
   0xe   :  { %202 = vmatpush3.bf16.msra.mxu0 %v220_v4 }
   0xf   :  { %203 = vmatprep.subr.bf16.mxu0 %v227_v0 }
  0x12   :  { %204 = vmatpush3.bf16.msra.mxu0 %v221_v5 }
  0x13   :  { %205 = vmatprep.subr.bf16.mxu0 %v227_v0 }
  0x16   :  { %206 = vmatpush3.bf16.msra.mxu0 %v222_v6 }
  0x17   :  { %207 = vmatprep.subr.bf16.mxu0 %v227_v0 }
  0x1a   :  { %208 = vmatpush3.bf16.msra.mxu0 %v223_v7 }
  0x1b   :  { %209 = vmatprep.subr.bf16.mxu0 %v227_v0 }
  0x1e   :  { %210 = vmatpush3.bf16.msra.mxu0 %v224_v8 }
  0x21   :  { %212 = vmatmul.mubr.bf16.vlgmr.msra.gmra.mrb[0].mxu0 %v24_v9 }
  0xf4   :  { %v123_v10 = vpop.f32.mrb[0].mxu0 }
  0xf5   :  { %v135_v11 = vrot.slane %v123_v10, 4  ;;  %v213_v12 = vpop.f32.mrb[1].mxu0 }
  0xf6   :  { %v126_v13 = vpop.f32.mrb[2].mxu0 }
  0xf7   :  { %v136_v14 = vadd.f32 %v135_v11, %v123_v10  ;;  %v214_v15 = vpop.f32.mrb[3].mxu0 }
  0xf9   :  { %v137_v16 = vrot.slane %v136_v14, 2 }
  0xfb   :  { %v138_v17 = vadd.f32 %v137_v16, %v136_v14 }
  0xfd   :  { %v139_v18 = vrot.slane %v138_v17, 1 }
  0xff   :  { %v140_v19 = vadd.f32 %v139_v18, %v138_v17 }
 0x101   :  { %v142_v20 = vmul.f32 0.125, %v140_v19 }
 0x103   :  { %v143_v21 = vsub.f32 %v123_v10, %v142_v20 }
 0x105   :  { %v144_v22 = vmul.f32 %v143_v21, %v143_v21 }
 0x107   :  { %v145_v23 = vrot.slane %v144_v22, 4 }
 0x109   :  { %v146_v24 = vadd.f32 %v145_v23, %v144_v22 }
 0x10b   :  { %v147_v25 = vrot.slane %v146_v24, 2 }
 0x10d   :  { %v148_v26 = vadd.f32 %v147_v25, %v146_v24 }
 0x10f   :  { %v149_v27 = vrot.slane %v148_v26, 1 }
 0x111   :  { %v150_v28 = vadd.f32 %v149_v27, %v148_v26 }
 0x113   :  { %v151_v29 = vmul.f32 0.125, %v150_v28 }
 0x115   :  { %v152_v30 = vadd.f32 1e-05, %v151_v29 }
 0x117   :  { %225 = vrsqrt.f32 %v152_v30 }
 0x121   :  { %v226_v31 = vpop.eup %225 }
 0x122   :  { %v154_v33 = vmul.f32 %v226_v31, %v143_v21 }
 0x124   :  { %v162_v35 = vmul.f32 %v184_v32, %v154_v33 }
 0x126   :  { %v170_v36 = vadd.f32 %v185_v34, %v162_v35 }
 0x128   :  { %171 = vst [vmem:[%s294_s4] sm:$0xff] %v170_v36 }

// kernel: shedd_forward.49
= control target key start
LH: loop header
LB: loop body
LE: loop exit
PB: predicated region body
PF: predicated region fallthrough
CT: control target
= control target key end

     0   :  { %s974_s18 = smov 0   ;;  %s976_s19 = smov 0   ;;  %s1055_s0 = inlined_call_operand.vmem [shape: bf16[8,1152], index: 0, kind: input, shape index: {}]   ;;  %s1056_s1 = inlined_call_operand.vmem [shape: bf16[1152,128], index: 1, kind: input, shape index: {}]   ;;  %s1057_s2 = inlined_call_operand.vmem [shape: f32[1,128], index: 2, kind: input, shape index: {}]   ;;  %s1058_s3 = inlined_call_operand.vmem [shape: f32[1,128], index: 3, kind: input, shape index: {}]   ;;  %s1059_s4 = inlined_call_operand.vmem [shape: f32[8,128], index: 4, kind: input, shape index: {}]   ;;  %s1060_s5 = inlined_call_operand.vmem [shape: f32[8,128], index: 5, kind: output, shape index: {}]  }
   0x1   :  { %s978_s20 = smov 0  }
   0x2 LB: > { %s24_s21 = sadd.s32 1, %s935_s19  ;;  %p773_p0 = scmp.ge.s32.totalorder %s939_s20, 1  ;;  %s939_s20 = sphi %s978_s20, %s15_s20   ;;  %s935_s19 = sphi %s976_s19, %s1062_s19   ;;  %s931_s18 = sphi %s974_s18, %s1061_s18  }
   0x3   : > { %p25_p1 = scmp.ge.s32.totalorder %s24_s21, 3  ;;  %p241_p2 = scmp.lt.s32.totalorder %s939_s20, 4 }
   0x5   : > { %s1064_s21 = smov (%p25_p1, %s24_s21), 0  ;;  %p242_p3 = pnand %p773_p0, %p241_p2 }
   0x6   : > { %s286_s22 = smul.u32 (!%p242_p3), 3, %s931_s18  ;;  %p776_p6 = scmp.ne.s32.totalorder (!%p242_p3), %s931_s18, 0 }
   0x7   : > { %245 = sbr.rel (%p242_p3) target bundleno = 340 (0x154), region = 40 }
   0x8   : > { %s292_s23 = smul.u32 (!%p242_p3), 48, %s931_s18  ;;  %p287_p4 = scmp.lt.s32.totalorder (!%p242_p3), %s286_s22, 8 }
   0xa   : > { %p293_p5 = scmp.lt.s32.totalorder (!%p242_p3), %s292_s23, 143 }
   0xe   : > { %s1066_s22 = smov (!%p287_p4, %s286_s22), 8  ;;  %s1068_s23 = smov (!%p293_p5, %s292_s23), 143 }
   0xf   : > { %s774_s24 = sshll.u32 %s1066_s22, 2  ;;  %s775_s28 = sshll.u32 %s1068_s23, 2  ;;  %v941_v0 = vmov (!%p776_p6), 0.0  }
  0x10   : > { %s999_s27 = scalar_lea.vmem %s1055_s0, %s774_s24  ;;  %s1004_s6 = scalar_lea.vmem %s1056_s1, %s775_s28  ;;  %320 = vst [vmem:[#allocation2] sm:$0xff] (!%p776_p6), %v941_v0 }
  0x11   : > { %319 = sbr.rel (%p776_p6) target bundleno = 24 (0x18), region = 44 }
  0x18 PF: > { %v888_v1 = vld [vmem:[%s1004_s6 + $0x40] sm:$0xff]   ;;  %v942_v2 = vmov 0.0   ;;  %vm943_vm0 = vmmov 0   ;;  %v891_v5 = vld [vmem:[%s1004_s6 + $0x48] sm:$0xff]   ;;  %v894_v8 = vld [vmem:[%s1004_s6 + $0x50] sm:$0xff]   ;;  %p804_p7 = scmp.ne.s32.totalorder %s931_s18, 2 }
  0x19   : > { %841 = vmatprep.subr.bf16.mxu1 %v942_v2  ;;  %v889_v3 = vld [vmem:[%s1004_s6] sm:$0xff]   ;;  %810 = vmatprep.subr.bf16.mxu0 %v888_v1  ;;  %v892_v6 = vld [vmem:[%s1004_s6 + $0x8] sm:$0xff]   ;;  %v895_v9 = vld [vmem:[%s1004_s6 + $0x10] sm:$0xff]  }
  0x1a   : > { %v890_v4 = vld [vmem:[%s1004_s6 + $0x80] sm:$0xff]   ;;  %857 = vmatprep.mubr.msk.bf16.mxu1 %vm943_vm0, %v942_v2  ;;  %811 = vmatpush3.bf16.msra.mxu0 %v889_v3  ;;  %v893_v7 = vld [vmem:[%s1004_s6 + $0x88] sm:$0xff]   ;;  %v896_v10 = vld [vmem:[%s1004_s6 + $0x90] sm:$0xff]  }
  0x1b   : > { %842 = vmatpush3.bf16.msra.mxu1 %v890_v4  ;;  %812 = vmatprep.subr.bf16.mxu0 %v891_v5  ;;  %v897_v11 = vld [vmem:[%s1004_s6 + $0x58] sm:$0xff]   ;;  %v900_v14 = vld [vmem:[%s1004_s6 + $0x60] sm:$0xff]   ;;  %v903_v17 = vld [vmem:[%s1004_s6 + $0x68] sm:$0xff]  }
  0x1c   : > { %843 = vmatprep.subr.bf16.mxu1 %v942_v2  ;;  %v898_v12 = vld [vmem:[%s1004_s6 + $0x18] sm:$0xff]   ;;  %v901_v15 = vld [vmem:[%s1004_s6 + $0x20] sm:$0xff]   ;;  %v904_v18 = vld [vmem:[%s1004_s6 + $0x28] sm:$0xff]  }
  0x1d   : > { %v899_v13 = vld [vmem:[%s1004_s6 + $0x98] sm:$0xff]   ;;  %v902_v16 = vld [vmem:[%s1004_s6 + $0xa0] sm:$0xff]   ;;  %v905_v19 = vld [vmem:[%s1004_s6 + $0xa8] sm:$0xff]  }
  0x1e   : > { %813 = vmatpush3.bf16.msra.mxu0 %v892_v6  ;;  %v906_v20 = vld [vmem:[%s1004_s6 + $0x70] sm:$0xff]   ;;  %v909_v23 = vld [vmem:[%s1004_s6 + $0x78] sm:$0xff]   ;;  %v322_v24 = vld [vmem:[%s999_s27] sm:$0xff] }
  0x1f   : > { %844 = vmatpush3.bf16.msra.mxu1 %v893_v7  ;;  %814 = vmatprep.subr.bf16.mxu0 %v894_v8  ;;  %v907_v21 = vld [vmem:[%s1004_s6 + $0x30] sm:$0xff]   ;;  %v778_v25 = vcombine.high %v322_v24, %v322_v24  ;;  %v910_v26 = vld [vmem:[%s1004_s6 + $0x38] sm:$0xff]   ;;  %v777_v28 = vcombine.low %v322_v24, %v322_v24  ;;  %v914_v29 = vld [vmem:[%s999_s27 + $0x8] ss:$0 sps:$4 sm:$0xff]  }
  0x20   : > { %845 = vmatprep.subr.bf16.mxu1 %v942_v2  ;;  %v908_v22 = vld [vmem:[%s1004_s6 + $0xb0] sm:$0xff]   ;;  %v911_v27 = vld [vmem:[%s1004_s6 + $0xb8] sm:$0xff]   ;;  %v321_v36 = vld [vmem:[#allocation2] sm:$0xff] }
  0x21   : > { %559 = vmatprep.mubr.bf16.mxu0 %v778_v25  ;;  %v805_v61 = vld [vmem:[%s1057_s2] ss:$0 sm:$0xff] (!%p804_p7) }
  0x22   : > { %815 = vmatpush3.bf16.msra.mxu0 %v895_v9  ;;  %v806_v63 = vld [vmem:[%s1058_s3] ss:$0 sm:$0xff] (!%p804_p7) }
  0x23   : > { %846 = vmatpush3.bf16.msra.mxu1 %v896_v10  ;;  %816 = vmatprep.subr.bf16.mxu0 %v897_v11  ;;  %v650_v1 = vld [vmem:[%s1059_s4] sm:$0xff] (!%p804_p7) }
  0x24   : > { %847 = vmatprep.subr.bf16.mxu1 %v942_v2 }
  0x26   : > { %817 = vmatpush3.bf16.msra.mxu0 %v898_v12 }
  0x27   : > { %848 = vmatpush3.bf16.msra.mxu1 %v899_v13  ;;  %818 = vmatprep.subr.bf16.mxu0 %v900_v14 }
  0x28   : > { %849 = vmatprep.subr.bf16.mxu1 %v942_v2 }
  0x2a   : > { %819 = vmatpush3.bf16.msra.mxu0 %v901_v15 }
  0x2b   : > { %850 = vmatpush3.bf16.msra.mxu1 %v902_v16  ;;  %820 = vmatprep.subr.bf16.mxu0 %v903_v17 }
  0x2c   : > { %851 = vmatprep.subr.bf16.mxu1 %v942_v2 }
  0x2e   : > { %821 = vmatpush3.bf16.msra.mxu0 %v904_v18 }
  0x2f   : > { %852 = vmatpush3.bf16.msra.mxu1 %v905_v19  ;;  %822 = vmatprep.subr.bf16.mxu0 %v906_v20 }
  0x30   : > { %853 = vmatprep.subr.bf16.mxu1 %v942_v2 }
  0x32   : > { %823 = vmatpush3.bf16.msra.mxu0 %v907_v21 }
  0x33   : > { %854 = vmatpush3.bf16.msra.mxu1 %v908_v22  ;;  %824 = vmatprep.subr.bf16.mxu0 %v909_v23 }
  0x34   : > { %855 = vmatprep.subr.bf16.mxu1 %v942_v2 }
  0x36   : > { %825 = vmatpush3.bf16.msra.mxu0 %v910_v26 }
  0x37   : > { %856 = vmatpush3.bf16.msra.mxu1 %v911_v27 }
  0x39   : > { %560 = vmatmul.mubr.bf16.vlgmr.msra.gmra.mrb[0].mxu0 %v777_v28 }
  0x3a   : > { %858 = vmatmul.mubr.bf16.vlgmr.msra.gmra.mrb[0].mxu1 %v914_v29 }
 0x10c   : > { %v826_v30 = vpop.f32.mrb[0].mxu0 }
 0x10d   : > { %v601_v31 = vpop.f32.mrb[0].mxu1  ;;  %v827_v32 = vpop.f32.mrb[1].mxu0 }
 0x10e   : > { %v828_v33 = vadd.f32 %v827_v32, %v826_v30  ;;  %v859_v34 = vpop.f32.mrb[1].mxu1  ;;  %v829_v35 = vpop.f32.mrb[2].mxu0  ;;  %612 = sbr.rel (%p804_p7) target bundleno = 340 (0x154), region = 48 }
 0x10f   : > { %v604_v37 = vpop.f32.mrb[2].mxu1  ;;  %v830_v38 = vpop.f32.mrb[3].mxu0 }
 0x110   : > { %v602_v39 = vadd.f32 %v828_v33, %v601_v31  ;;  %v860_v40 = vpop.f32.mrb[3].mxu1 }
 0x112   : > { %v607_v41 = vadd.f32 %v602_v39, %v321_v36 }
 0x114   : > { %608 = vst [vmem:[#allocation2] sm:$0xff] %v607_v41 }
 0x11b   : > { %v613_v42 = vld [vmem:[#allocation2] sm:$0xff] }
 0x11c   : > { %v614_v43 = vrot.slane %v613_v42, 4 }
 0x11e   : > { %v615_v44 = vadd.f32 %v614_v43, %v613_v42 }
 0x120   : > { %v616_v45 = vrot.slane %v615_v44, 2 }
 0x122   : > { %v617_v46 = vadd.f32 %v616_v45, %v615_v44 }
 0x124   : > { %v618_v47 = vrot.slane %v617_v46, 1 }
 0x126   : > { %v619_v48 = vadd.f32 %v618_v47, %v617_v46 }
 0x128   : > { %v621_v49 = vmul.f32 0.125, %v619_v48 }
 0x12a   : > { %v622_v50 = vsub.f32 %v613_v42, %v621_v49 }
 0x12c   : > { %v623_v51 = vmul.f32 %v622_v50, %v622_v50 }
 0x12e   : > { %v624_v52 = vrot.slane %v623_v51, 4 }
 0x130   : > { %v625_v53 = vadd.f32 %v624_v52, %v623_v51 }
 0x132   : > { %v626_v54 = vrot.slane %v625_v53, 2 }
 0x134   : > { %v627_v55 = vadd.f32 %v626_v54, %v625_v53 }
 0x136   : > { %v628_v56 = vrot.slane %v627_v55, 1 }
 0x138   : > { %v629_v57 = vadd.f32 %v628_v56, %v627_v55 }
 0x13a   : > { %v630_v58 = vmul.f32 0.125, %v629_v57 }
 0x13c   : > { %v631_v59 = vadd.f32 1e-05, %v630_v58 }
 0x13e   : > { %915 = vrsqrt.f32 %v631_v59 }
 0x148   : > { %v916_v60 = vpop.eup %915 }
 0x149   : > { %v633_v62 = vmul.f32 %v916_v60, %v622_v50 }
 0x14b   : > { %v641_v0 = vmul.f32 %v805_v61, %v633_v62 }
 0x14d   : > { %v649_v2 = vadd.f32 %v806_v63, %v641_v0 }
 0x14f   : > { %v651_v3 = vadd.f32 %v650_v1, %v649_v2 }
 0x151   : > { %v652_v4 = vmax.f32 %v651_v3, 0.0 }
 0x153   : > { %653 = vst [vmem:[%s1060_s5] sm:$0xff] %v652_v4 }
 0x154 PF: > { %s15_s20 = sadd.s32 1, %s939_s20   ;;  %s1061_s18 = smov %s935_s19 }
 0x155   : > { %p12_p8 = scmp.ge.s32.totalorder %s15_s20, 5   ;;  %s1062_s19 = smov %s1064_s21 }
 0x157   :  { %14 = sbr.rel (!%p12_p8) target bundleno = 2 (0x2), region = 90 }

// kernel: shedd_forward.50
= control target key start
LH: loop header
LB: loop body
LE: loop exit
PB: predicated region body
PF: predicated region fallthrough
CT: control target
= control target key end

     0   :  { %s907_s15 = smov 0   ;;  %s909_s16 = smov 0   ;;  %s985_s0 = inlined_call_operand.vmem [shape: bf16[8,1152], index: 0, kind: input, shape index: {}]   ;;  %s986_s1 = inlined_call_operand.vmem [shape: bf16[1152,128], index: 1, kind: input, shape index: {}]   ;;  %s987_s2 = inlined_call_operand.vmem [shape: f32[1,128], index: 2, kind: input, shape index: {}]   ;;  %s988_s3 = inlined_call_operand.vmem [shape: f32[1,128], index: 3, kind: input, shape index: {}]   ;;  %s989_s4 = inlined_call_operand.vmem [shape: f32[8,128], index: 4, kind: output, shape index: {}]  }
   0x1   :  { %s911_s17 = smov 0  }
   0x2 LB: > { %s23_s18 = sadd.s32 1, %s873_s16  ;;  %p711_p0 = scmp.ge.s32.totalorder %s877_s17, 1  ;;  %s877_s17 = sphi %s911_s17, %s14_s17   ;;  %s873_s16 = sphi %s909_s16, %s991_s16   ;;  %s869_s15 = sphi %s907_s15, %s990_s15  }
   0x3   : > { %p24_p1 = scmp.ge.s32.totalorder %s23_s18, 3  ;;  %p207_p2 = scmp.lt.s32.totalorder %s877_s17, 4 }
   0x5   : > { %s993_s18 = smov (%p24_p1, %s23_s18), 0  ;;  %p208_p3 = pnand %p711_p0, %p207_p2 }
   0x6   : > { %s246_s19 = smul.u32 (!%p208_p3), 3, %s869_s15  ;;  %p714_p6 = scmp.ne.s32.totalorder (!%p208_p3), %s869_s15, 0 }
   0x7   : > { %211 = sbr.rel (%p208_p3) target bundleno = 338 (0x152), region = 36 }
   0x8   : > { %s252_s20 = smul.u32 (!%p208_p3), 48, %s869_s15  ;;  %p247_p4 = scmp.lt.s32.totalorder (!%p208_p3), %s246_s19, 8 }
   0xa   : > { %p253_p5 = scmp.lt.s32.totalorder (!%p208_p3), %s252_s20, 143 }
   0xe   : > { %s995_s19 = smov (!%p247_p4, %s246_s19), 8  ;;  %s997_s20 = smov (!%p253_p5, %s252_s20), 143 }
   0xf   : > { %s712_s21 = sshll.u32 %s995_s19, 2  ;;  %s713_s25 = sshll.u32 %s997_s20, 2  ;;  %v879_v0 = vmov (!%p714_p6), 0.0  }
  0x10   : > { %s932_s24 = scalar_lea.vmem %s985_s0, %s712_s21  ;;  %s937_s28 = scalar_lea.vmem %s986_s1, %s713_s25  ;;  %276 = vst [vmem:[#allocation2] sm:$0xff] (!%p714_p6), %v879_v0 }
  0x11   : > { %275 = sbr.rel (%p714_p6) target bundleno = 24 (0x18), region = 40 }
  0x18 PF: > { %v826_v1 = vld [vmem:[%s937_s28 + $0x40] sm:$0xff]   ;;  %v880_v2 = vmov 0.0   ;;  %vm881_vm0 = vmmov 0   ;;  %v829_v5 = vld [vmem:[%s937_s28 + $0x48] sm:$0xff]   ;;  %v832_v8 = vld [vmem:[%s937_s28 + $0x50] sm:$0xff]   ;;  %p742_p7 = scmp.ne.s32.totalorder %s869_s15, 2 }
  0x19   : > { %779 = vmatprep.subr.bf16.mxu1 %v880_v2  ;;  %v827_v3 = vld [vmem:[%s937_s28] sm:$0xff]   ;;  %748 = vmatprep.subr.bf16.mxu0 %v826_v1  ;;  %v830_v6 = vld [vmem:[%s937_s28 + $0x8] sm:$0xff]   ;;  %v833_v9 = vld [vmem:[%s937_s28 + $0x10] sm:$0xff]  }
  0x1a   : > { %v828_v4 = vld [vmem:[%s937_s28 + $0x80] sm:$0xff]   ;;  %795 = vmatprep.mubr.msk.bf16.mxu1 %vm881_vm0, %v880_v2  ;;  %749 = vmatpush3.bf16.msra.mxu0 %v827_v3  ;;  %v831_v7 = vld [vmem:[%s937_s28 + $0x88] sm:$0xff]   ;;  %v834_v10 = vld [vmem:[%s937_s28 + $0x90] sm:$0xff]  }
  0x1b   : > { %780 = vmatpush3.bf16.msra.mxu1 %v828_v4  ;;  %750 = vmatprep.subr.bf16.mxu0 %v829_v5  ;;  %v835_v11 = vld [vmem:[%s937_s28 + $0x58] sm:$0xff]   ;;  %v838_v14 = vld [vmem:[%s937_s28 + $0x60] sm:$0xff]   ;;  %v841_v17 = vld [vmem:[%s937_s28 + $0x68] sm:$0xff]  }
  0x1c   : > { %781 = vmatprep.subr.bf16.mxu1 %v880_v2  ;;  %v836_v12 = vld [vmem:[%s937_s28 + $0x18] sm:$0xff]   ;;  %v839_v15 = vld [vmem:[%s937_s28 + $0x20] sm:$0xff]   ;;  %v842_v18 = vld [vmem:[%s937_s28 + $0x28] sm:$0xff]  }
  0x1d   : > { %v837_v13 = vld [vmem:[%s937_s28 + $0x98] sm:$0xff]   ;;  %v840_v16 = vld [vmem:[%s937_s28 + $0xa0] sm:$0xff]   ;;  %v843_v19 = vld [vmem:[%s937_s28 + $0xa8] sm:$0xff]  }
  0x1e   : > { %751 = vmatpush3.bf16.msra.mxu0 %v830_v6  ;;  %v844_v20 = vld [vmem:[%s937_s28 + $0x70] sm:$0xff]   ;;  %v847_v23 = vld [vmem:[%s937_s28 + $0x78] sm:$0xff]   ;;  %v278_v24 = vld [vmem:[%s932_s24] sm:$0xff] }
  0x1f   : > { %782 = vmatpush3.bf16.msra.mxu1 %v831_v7  ;;  %752 = vmatprep.subr.bf16.mxu0 %v832_v8  ;;  %v845_v21 = vld [vmem:[%s937_s28 + $0x30] sm:$0xff]   ;;  %v716_v25 = vcombine.high %v278_v24, %v278_v24  ;;  %v848_v26 = vld [vmem:[%s937_s28 + $0x38] sm:$0xff]   ;;  %v715_v28 = vcombine.low %v278_v24, %v278_v24  ;;  %v852_v29 = vld [vmem:[%s932_s24 + $0x8] ss:$0 sps:$4 sm:$0xff]  }
  0x20   : > { %783 = vmatprep.subr.bf16.mxu1 %v880_v2  ;;  %v846_v22 = vld [vmem:[%s937_s28 + $0xb0] sm:$0xff]   ;;  %v849_v27 = vld [vmem:[%s937_s28 + $0xb8] sm:$0xff]   ;;  %v277_v36 = vld [vmem:[#allocation2] sm:$0xff] }
  0x21   : > { %515 = vmatprep.mubr.bf16.mxu0 %v716_v25  ;;  %v743_v61 = vld [vmem:[%s987_s2] ss:$0 sm:$0xff] (!%p742_p7) }
  0x22   : > { %753 = vmatpush3.bf16.msra.mxu0 %v833_v9  ;;  %v744_v63 = vld [vmem:[%s988_s3] ss:$0 sm:$0xff] (!%p742_p7) }
  0x23   : > { %784 = vmatpush3.bf16.msra.mxu1 %v834_v10  ;;  %754 = vmatprep.subr.bf16.mxu0 %v835_v11 }
  0x24   : > { %785 = vmatprep.subr.bf16.mxu1 %v880_v2 }
  0x26   : > { %755 = vmatpush3.bf16.msra.mxu0 %v836_v12 }
  0x27   : > { %786 = vmatpush3.bf16.msra.mxu1 %v837_v13  ;;  %756 = vmatprep.subr.bf16.mxu0 %v838_v14 }
  0x28   : > { %787 = vmatprep.subr.bf16.mxu1 %v880_v2 }
  0x2a   : > { %757 = vmatpush3.bf16.msra.mxu0 %v839_v15 }
  0x2b   : > { %788 = vmatpush3.bf16.msra.mxu1 %v840_v16  ;;  %758 = vmatprep.subr.bf16.mxu0 %v841_v17 }
  0x2c   : > { %789 = vmatprep.subr.bf16.mxu1 %v880_v2 }
  0x2e   : > { %759 = vmatpush3.bf16.msra.mxu0 %v842_v18 }
  0x2f   : > { %790 = vmatpush3.bf16.msra.mxu1 %v843_v19  ;;  %760 = vmatprep.subr.bf16.mxu0 %v844_v20 }
  0x30   : > { %791 = vmatprep.subr.bf16.mxu1 %v880_v2 }
  0x32   : > { %761 = vmatpush3.bf16.msra.mxu0 %v845_v21 }
  0x33   : > { %792 = vmatpush3.bf16.msra.mxu1 %v846_v22  ;;  %762 = vmatprep.subr.bf16.mxu0 %v847_v23 }
  0x34   : > { %793 = vmatprep.subr.bf16.mxu1 %v880_v2 }
  0x36   : > { %763 = vmatpush3.bf16.msra.mxu0 %v848_v26 }
  0x37   : > { %794 = vmatpush3.bf16.msra.mxu1 %v849_v27 }
  0x39   : > { %516 = vmatmul.mubr.bf16.vlgmr.msra.gmra.mrb[0].mxu0 %v715_v28 }
  0x3a   : > { %796 = vmatmul.mubr.bf16.vlgmr.msra.gmra.mrb[0].mxu1 %v852_v29 }
 0x10c   : > { %v764_v30 = vpop.f32.mrb[0].mxu0 }
 0x10d   : > { %v557_v31 = vpop.f32.mrb[0].mxu1  ;;  %v765_v32 = vpop.f32.mrb[1].mxu0 }
 0x10e   : > { %v766_v33 = vadd.f32 %v765_v32, %v764_v30  ;;  %v797_v34 = vpop.f32.mrb[1].mxu1  ;;  %v767_v35 = vpop.f32.mrb[2].mxu0  ;;  %568 = sbr.rel (%p742_p7) target bundleno = 338 (0x152), region = 44 }
 0x10f   : > { %v560_v37 = vpop.f32.mrb[2].mxu1  ;;  %v768_v38 = vpop.f32.mrb[3].mxu0 }
 0x110   : > { %v558_v39 = vadd.f32 %v766_v33, %v557_v31  ;;  %v798_v40 = vpop.f32.mrb[3].mxu1 }
 0x112   : > { %v563_v41 = vadd.f32 %v558_v39, %v277_v36 }
 0x114   : > { %564 = vst [vmem:[#allocation2] sm:$0xff] %v563_v41 }
 0x11b   : > { %v569_v42 = vld [vmem:[#allocation2] sm:$0xff] }
 0x11c   : > { %v570_v43 = vrot.slane %v569_v42, 4 }
 0x11e   : > { %v571_v44 = vadd.f32 %v570_v43, %v569_v42 }
 0x120   : > { %v572_v45 = vrot.slane %v571_v44, 2 }
 0x122   : > { %v573_v46 = vadd.f32 %v572_v45, %v571_v44 }
 0x124   : > { %v574_v47 = vrot.slane %v573_v46, 1 }
 0x126   : > { %v575_v48 = vadd.f32 %v574_v47, %v573_v46 }
 0x128   : > { %v577_v49 = vmul.f32 0.125, %v575_v48 }
 0x12a   : > { %v578_v50 = vsub.f32 %v569_v42, %v577_v49 }
 0x12c   : > { %v579_v51 = vmul.f32 %v578_v50, %v578_v50 }
 0x12e   : > { %v580_v52 = vrot.slane %v579_v51, 4 }
 0x130   : > { %v581_v53 = vadd.f32 %v580_v52, %v579_v51 }
 0x132   : > { %v582_v54 = vrot.slane %v581_v53, 2 }
 0x134   : > { %v583_v55 = vadd.f32 %v582_v54, %v581_v53 }
 0x136   : > { %v584_v56 = vrot.slane %v583_v55, 1 }
 0x138   : > { %v585_v57 = vadd.f32 %v584_v56, %v583_v55 }
 0x13a   : > { %v586_v58 = vmul.f32 0.125, %v585_v57 }
 0x13c   : > { %v587_v59 = vadd.f32 1e-05, %v586_v58 }
 0x13e   : > { %853 = vrsqrt.f32 %v587_v59 }
 0x148   : > { %v854_v60 = vpop.eup %853 }
 0x149   : > { %v589_v62 = vmul.f32 %v854_v60, %v578_v50 }
 0x14b   : > { %v597_v0 = vmul.f32 %v743_v61, %v589_v62 }
 0x14d   : > { %v605_v1 = vadd.f32 %v744_v63, %v597_v0 }
 0x14f   : > { %v606_v2 = vmax.f32 %v605_v1, 0.0 }
 0x151   : > { %607 = vst [vmem:[%s989_s4] sm:$0xff] %v606_v2 }
 0x152 PF: > { %s14_s17 = sadd.s32 1, %s877_s17   ;;  %s990_s15 = smov %s873_s16 }
 0x153   : > { %p11_p8 = scmp.ge.s32.totalorder %s14_s17, 5   ;;  %s991_s16 = smov %s993_s18 }
 0x155   :  { %13 = sbr.rel (!%p11_p8) target bundleno = 2 (0x2), region = 83 }

// kernel: shedd_forward.52
= control target key start
LH: loop header
LB: loop body
LE: loop exit
PB: predicated region body
PF: predicated region fallthrough
CT: control target
= control target key end

     0   :  { %s1208_s15 = smov 0   ;;  %s1210_s16 = smov 0   ;;  %s1461_s0 = inlined_call_operand.vmem [shape: bf16[2,1152], index: 0, kind: input, shape index: {}]   ;;  %s1462_s1 = inlined_call_operand.vmem [shape: bf16[1152,256], index: 1, kind: input, shape index: {}]   ;;  %s1463_s2 = inlined_call_operand.vmem [shape: f32[1,256], index: 2, kind: input, shape index: {}]   ;;  %s1464_s3 = inlined_call_operand.vmem [shape: f32[1,256], index: 3, kind: input, shape index: {}]   ;;  %s1465_s4 = inlined_call_operand.vmem [shape: f32[2,256], index: 4, kind: output, shape index: {}]  }
   0x1   :  { %s1212_s17 = smov 0   ;;  %s1214_s18 = smov 0  }
   0x2   :  { %s1216_s19 = smov 0   ;;  %s1218_s20 = smov 0  }
   0x3   :  { %s1220_s21 = smov 0  }
   0x4 LB: > { %s23_s22 = sadd.s32 1, %s1169_s19  ;;  %s26_s23 = sadd.s32 1, %s1173_s20  ;;  %s1177_s21 = sphi %s1220_s21, %s14_s21   ;;  %s1173_s20 = sphi %s1218_s20, %s1471_s20   ;;  %s1169_s19 = sphi %s1216_s19, %s1470_s19   ;;  %s1165_s18 = sphi %s1214_s18, %s1469_s18   ;;  %s1161_s17 = sphi %s1212_s17, %s1468_s17   ;;  %s1157_s16 = sphi %s1210_s16, %s1467_s16   ;;  %s1153_s15 = sphi %s1208_s15, %s1466_s15  }
   0x5   : > { %p24_p0 = scmp.ge.s32.totalorder %s23_s22, 3  ;;  %p68_p1 = scmp.ne.s32.totalorder %s1157_s16, %s1153_s15 }
   0x6   : > { %p69_p2 = scmp.eq.s32.totalorder %s1177_s21, 0  ;;  %s61_s27 = sadd.s32 1, %s1157_s16 }
   0x7   : > { %s1473_s22 = smov (%p24_p0, %s23_s22), 0  ;;  %s1475_s23 = smov (!%p24_p0, %s26_s23), %s1173_s20 }
   0x8   : > { %p70_p3 = por %p69_p2, %p68_p1  ;;  %p28_p4 = scmp.ge.s32.totalorder %s1475_s23, 2 }
   0x9   : > { %s56_s24 = ssub.s32 %s1169_s19, %s1473_s22  ;;  %p947_p6 = scmp.ge.s32.totalorder %s1177_s21, 6 }
   0xa   : > { %s1477_s23 = smov (%p28_p4, %s1475_s23), 0 }
   0xb   : > { %s57_s25 = ssub.s32 %s1173_s20, %s1477_s23  ;;  %172 = sbr.rel (%p947_p6) target bundleno = 57 (0x39), region = 16 }
   0xc   : > { %s58_s26 = sor.u32 %s57_s25, %s56_s24 }
   0xd   : > { %p59_p5 = scmp.eq.s32.totalorder %s58_s26, 0 }
   0xf   : > { %s1259_s28 = scalar_select %p59_p5, %s1157_s16, %s61_s27  }
  0x12   : > { %183 = sbr.rel (!%p70_p3) target bundleno = 57 (0x39), region = 24  ;;  %s185_s29 = sand.u32 (%p70_p3), 1, %s1157_s16  }
  0x13   : > { %s983_s30 = smul.u32 (%p70_p3), 96, %s1169_s19 }
  0x14   : > { %s1035_s5 = smul.u32 (%p70_p3), 192, %s185_s29 }
  0x15   : > { %s190_s6 = sadd.s32 (%p70_p3), %s1173_s20, %s983_s30 }
  0x16   : > { %s949_s7 = sshll.u32 (%p70_p3), %s190_s6, 2  ;;  %s1273_s11 = scalar_lea.vmem (%p70_p3), [#allocation3], %s1035_s5 }
  0x17   : > { %s1268_s10 = scalar_lea.vmem (%p70_p3), %s1462_s1, %s949_s7 }
  0x18   : > { %v208_v0 = vld [vmem:[%s1268_s10] sm:$0xf] (%p70_p3)  ;;  %v210_v1 = vld [vmem:[%s1268_s10 + $0x8] sm:$0xf] (%p70_p3)  ;;  %v212_v2 = vld [vmem:[%s1268_s10 + $0x10] sm:$0xf] (%p70_p3) }
  0x19   : > { %209 = vst [vmem:[%s1273_s11] sm:$0xf] %v208_v0  ;;  %211 = vst [vmem:[%s1273_s11 + $0x4] sm:$0xf] %v210_v1  ;;  %v214_v3 = vld [vmem:[%s1268_s10 + $0x18] sm:$0xf] }
  0x1a   : > { %213 = vst [vmem:[%s1273_s11 + $0x8] sm:$0xf] %v212_v2  ;;  %v216_v4 = vld [vmem:[%s1268_s10 + $0x20] sm:$0xf]  ;;  %v218_v5 = vld [vmem:[%s1268_s10 + $0x28] sm:$0xf] }
  0x1b   : > { %215 = vst [vmem:[%s1273_s11 + $0xc] sm:$0xf] %v214_v3  ;;  %217 = vst [vmem:[%s1273_s11 + $0x10] sm:$0xf] %v216_v4  ;;  %v220_v6 = vld [vmem:[%s1268_s10 + $0x30] sm:$0xf] }
  0x1c   : > { %219 = vst [vmem:[%s1273_s11 + $0x14] sm:$0xf] %v218_v5  ;;  %v222_v7 = vld [vmem:[%s1268_s10 + $0x38] sm:$0xf]  ;;  %v224_v8 = vld [vmem:[%s1268_s10 + $0x40] sm:$0xf] }
  0x1d   : > { %221 = vst [vmem:[%s1273_s11 + $0x18] sm:$0xf] %v220_v6  ;;  %223 = vst [vmem:[%s1273_s11 + $0x1c] sm:$0xf] %v222_v7  ;;  %v226_v9 = vld [vmem:[%s1268_s10 + $0x48] sm:$0xf] }
  0x1e   : > { %225 = vst [vmem:[%s1273_s11 + $0x20] sm:$0xf] %v224_v8  ;;  %v228_v10 = vld [vmem:[%s1268_s10 + $0x50] sm:$0xf]  ;;  %v230_v11 = vld [vmem:[%s1268_s10 + $0x58] sm:$0xf] }
  0x1f   : > { %227 = vst [vmem:[%s1273_s11 + $0x24] sm:$0xf] %v226_v9  ;;  %229 = vst [vmem:[%s1273_s11 + $0x28] sm:$0xf] %v228_v10  ;;  %v232_v12 = vld [vmem:[%s1268_s10 + $0x60] sm:$0xf] }
  0x20   : > { %231 = vst [vmem:[%s1273_s11 + $0x2c] sm:$0xf] %v230_v11  ;;  %v234_v13 = vld [vmem:[%s1268_s10 + $0x68] sm:$0xf]  ;;  %v236_v14 = vld [vmem:[%s1268_s10 + $0x70] sm:$0xf] }
  0x21   : > { %233 = vst [vmem:[%s1273_s11 + $0x30] sm:$0xf] %v232_v12  ;;  %235 = vst [vmem:[%s1273_s11 + $0x34] sm:$0xf] %v234_v13  ;;  %v238_v15 = vld [vmem:[%s1268_s10 + $0x78] sm:$0xf] }
  0x22   : > { %237 = vst [vmem:[%s1273_s11 + $0x38] sm:$0xf] %v236_v14  ;;  %v240_v16 = vld [vmem:[%s1268_s10 + $0x80] sm:$0xf]  ;;  %v242_v17 = vld [vmem:[%s1268_s10 + $0x88] sm:$0xf] }
  0x23   : > { %239 = vst [vmem:[%s1273_s11 + $0x3c] sm:$0xf] %v238_v15  ;;  %241 = vst [vmem:[%s1273_s11 + $0x40] sm:$0xf] %v240_v16  ;;  %v244_v18 = vld [vmem:[%s1268_s10 + $0x90] sm:$0xf] }
  0x24   : > { %243 = vst [vmem:[%s1273_s11 + $0x44] sm:$0xf] %v242_v17  ;;  %v246_v19 = vld [vmem:[%s1268_s10 + $0x98] sm:$0xf]  ;;  %v248_v20 = vld [vmem:[%s1268_s10 + $0xa0] sm:$0xf] }
  0x25   : > { %245 = vst [vmem:[%s1273_s11 + $0x48] sm:$0xf] %v244_v18  ;;  %247 = vst [vmem:[%s1273_s11 + $0x4c] sm:$0xf] %v246_v19  ;;  %v250_v21 = vld [vmem:[%s1268_s10 + $0xa8] sm:$0xf] }
  0x26   : > { %249 = vst [vmem:[%s1273_s11 + $0x50] sm:$0xf] %v248_v20  ;;  %v252_v22 = vld [vmem:[%s1268_s10 + $0xb0] sm:$0xf]  ;;  %v254_v23 = vld [vmem:[%s1268_s10 + $0xb8] sm:$0xf] }
  0x27   : > { %251 = vst [vmem:[%s1273_s11 + $0x54] sm:$0xf] %v250_v21  ;;  %253 = vst [vmem:[%s1273_s11 + $0x58] sm:$0xf] %v252_v22  ;;  %v256_v24 = vld [vmem:[%s1268_s10 + $0xc0] sm:$0xf] }
  0x28   : > { %255 = vst [vmem:[%s1273_s11 + $0x5c] sm:$0xf] %v254_v23  ;;  %v258_v25 = vld [vmem:[%s1268_s10 + $0xc8] sm:$0xf]  ;;  %v260_v26 = vld [vmem:[%s1268_s10 + $0xd0] sm:$0xf] }
  0x29   : > { %257 = vst [vmem:[%s1273_s11 + $0x60] sm:$0xf] %v256_v24  ;;  %259 = vst [vmem:[%s1273_s11 + $0x64] sm:$0xf] %v258_v25  ;;  %v262_v27 = vld [vmem:[%s1268_s10 + $0xd8] sm:$0xf] }
  0x2a   : > { %261 = vst [vmem:[%s1273_s11 + $0x68] sm:$0xf] %v260_v26  ;;  %v264_v28 = vld [vmem:[%s1268_s10 + $0xe0] sm:$0xf]  ;;  %v266_v29 = vld [vmem:[%s1268_s10 + $0xe8] sm:$0xf] }
  0x2b   : > { %263 = vst [vmem:[%s1273_s11 + $0x6c] sm:$0xf] %v262_v27  ;;  %265 = vst [vmem:[%s1273_s11 + $0x70] sm:$0xf] %v264_v28  ;;  %v268_v30 = vld [vmem:[%s1268_s10 + $0xf0] sm:$0xf] }
  0x2c   : > { %267 = vst [vmem:[%s1273_s11 + $0x74] sm:$0xf] %v266_v29  ;;  %v270_v31 = vld [vmem:[%s1268_s10 + $0xf8] sm:$0xf]  ;;  %v272_v32 = vld [vmem:[%s1268_s10 + $0x100] sm:$0xf] }
  0x2d   : > { %269 = vst [vmem:[%s1273_s11 + $0x78] sm:$0xf] %v268_v30  ;;  %271 = vst [vmem:[%s1273_s11 + $0x7c] sm:$0xf] %v270_v31  ;;  %v274_v33 = vld [vmem:[%s1268_s10 + $0x108] sm:$0xf] }
  0x2e   : > { %273 = vst [vmem:[%s1273_s11 + $0x80] sm:$0xf] %v272_v32  ;;  %v276_v34 = vld [vmem:[%s1268_s10 + $0x110] sm:$0xf]  ;;  %v278_v35 = vld [vmem:[%s1268_s10 + $0x118] sm:$0xf] }
  0x2f   : > { %275 = vst [vmem:[%s1273_s11 + $0x84] sm:$0xf] %v274_v33  ;;  %277 = vst [vmem:[%s1273_s11 + $0x88] sm:$0xf] %v276_v34  ;;  %v280_v36 = vld [vmem:[%s1268_s10 + $0x120] sm:$0xf] }
  0x30   : > { %279 = vst [vmem:[%s1273_s11 + $0x8c] sm:$0xf] %v278_v35  ;;  %v282_v37 = vld [vmem:[%s1268_s10 + $0x128] sm:$0xf]  ;;  %v284_v38 = vld [vmem:[%s1268_s10 + $0x130] sm:$0xf] }
  0x31   : > { %281 = vst [vmem:[%s1273_s11 + $0x90] sm:$0xf] %v280_v36  ;;  %283 = vst [vmem:[%s1273_s11 + $0x94] sm:$0xf] %v282_v37  ;;  %v286_v39 = vld [vmem:[%s1268_s10 + $0x138] sm:$0xf] }
  0x32   : > { %285 = vst [vmem:[%s1273_s11 + $0x98] sm:$0xf] %v284_v38  ;;  %v288_v40 = vld [vmem:[%s1268_s10 + $0x140] sm:$0xf]  ;;  %v290_v41 = vld [vmem:[%s1268_s10 + $0x148] sm:$0xf] }
  0x33   : > { %287 = vst [vmem:[%s1273_s11 + $0x9c] sm:$0xf] %v286_v39  ;;  %289 = vst [vmem:[%s1273_s11 + $0xa0] sm:$0xf] %v288_v40  ;;  %v292_v42 = vld [vmem:[%s1268_s10 + $0x150] sm:$0xf] }
  0x34   : > { %291 = vst [vmem:[%s1273_s11 + $0xa4] sm:$0xf] %v290_v41  ;;  %v294_v43 = vld [vmem:[%s1268_s10 + $0x158] sm:$0xf]  ;;  %v296_v44 = vld [vmem:[%s1268_s10 + $0x160] sm:$0xf] }
  0x35   : > { %293 = vst [vmem:[%s1273_s11 + $0xa8] sm:$0xf] %v292_v42  ;;  %295 = vst [vmem:[%s1273_s11 + $0xac] sm:$0xf] %v294_v43  ;;  %v298_v45 = vld [vmem:[%s1268_s10 + $0x168] sm:$0xf] }
  0x36   : > { %297 = vst [vmem:[%s1273_s11 + $0xb0] sm:$0xf] %v296_v44  ;;  %v300_v46 = vld [vmem:[%s1268_s10 + $0x170] sm:$0xf]  ;;  %v302_v47 = vld [vmem:[%s1268_s10 + $0x178] sm:$0xf] }
  0x37   : > { %299 = vst [vmem:[%s1273_s11 + $0xb4] sm:$0xf] %v298_v45  ;;  %301 = vst [vmem:[%s1273_s11 + $0xb8] sm:$0xf] %v300_v46 }
  0x38   : > { %303 = vst [vmem:[%s1273_s11 + $0xbc] sm:$0xf] %v302_v47 }
  0x39 PF: > { %p950_p7 = scmp.ge.s32.totalorder %s1177_s21, 1  ;;  %p433_p8 = scmp.lt.s32.totalorder %s1177_s21, 7 }
  0x3b   : > { %p434_p9 = pnand %p950_p7, %p433_p8 }
  0x3c   : > { %s440_s12 = sand.u32 (!%p434_p9), 1, %s1153_s15   ;;  %s474_s13 = smul.u32 (!%p434_p9), 3, %s1161_s17 }
  0x3d   : > { %437 = sbr.rel (%p434_p9) target bundleno = 394 (0x18a), region = 73  ;;  %p480_p10 = scmp.lt.s32.totalorder (!%p434_p9), %s1165_s18, 1 }
  0x3e   : > { %s1036_s14 = smul.u32 (!%p434_p9), 192, %s440_s12  ;;  %p475_p11 = scmp.lt.s32.totalorder (!%p434_p9), %s474_s13, 8 }
  0x3f   : > { %p952_p12 = scmp.ne.s32.totalorder (!%p434_p9), %s1161_s17, 0 }
  0x40   : > { %s1396_s11 = scalar_lea.vmem (!%p434_p9), [#allocation3], %s1036_s14 }
  0x44   : > { %s1479_s13 = smov (!%p475_p11, %s474_s13), 8  ;;  %s1481_s18 = smov (!%p480_p10, %s1165_s18), 1 }
  0x45   : > { %s477_s26 = scalar_lea.vmem %s1461_s0, %s1479_s13  ;;  %s482_s15 = scalar_lea.vmem %s1463_s2, %s1481_s18  ;;  %v1179_v48 = vmov (!%p952_p12), 0.0  }
  0x46   : > { %s485_s6 = scalar_lea.vmem %s1464_s3, %s1481_s18  ;;  %s951_s7 = sshll.u32 %s1481_s18, 1  ;;  %495 = vst [vmem:[#allocation2] sm:$0x3] (!%p952_p12), %v1179_v48 }
  0x47   : > { %s1394_s10 = scalar_lea.vmem %s1465_s4, %s951_s7  ;;  %494 = sbr.rel (%p952_p12) target bundleno = 78 (0x4e), region = 81 }
  0x4e PF: > { %v1097_v49 = vld [vmem:[%s1396_s11 + $0x40] sm:$0xff]   ;;  %v1180_v50 = vmov 0.0   ;;  %vm1181_vm0 = vmmov 0   ;;  %v1100_v53 = vld [vmem:[%s1396_s11 + $0x48] sm:$0xff]   ;;  %v1103_v56 = vld [vmem:[%s1396_s11 + $0x50] sm:$0xff]   ;;  %v558_v6 = vlaneseq  ;;  %p978_p13 = scmp.ne.s32.totalorder %s1161_s17, 2 }
  0x4f   : > { %1015 = vmatprep.subr.bf16.mxu1 %v1180_v50  ;;  %v1098_v51 = vld [vmem:[%s1396_s11] sm:$0xff]   ;;  %984 = vmatprep.subr.bf16.mxu0 %v1097_v49  ;;  %v1101_v54 = vld [vmem:[%s1396_s11 + $0x8] sm:$0xff]   ;;  %v1104_v57 = vld [vmem:[%s1396_s11 + $0x10] sm:$0xff]   ;;  %v1182_v10 = vmov 1966171168   ;;  %vm804_vm1 = vcmask (!%p978_p13), 1041408  }
  0x50   : > { %v1099_v52 = vld [vmem:[%s1396_s11 + $0x80] sm:$0xff]   ;;  %1031 = vmatprep.mubr.msk.bf16.mxu1 %vm1181_vm0, %v1180_v50  ;;  %985 = vmatpush3.bf16.msra.mxu0 %v1098_v51  ;;  %v1102_v55 = vld [vmem:[%s1396_s11 + $0x88] sm:$0xff]   ;;  %v1105_v58 = vld [vmem:[%s1396_s11 + $0x90] sm:$0xff]   ;;  %v556_v11 = vunpack.c.l.s4 %v1182_v10  ;;  %v559_v12 = vshrl.u32 %v558_v6, 7 }
  0x51   : > { %1016 = vmatpush3.bf16.msra.mxu1 %v1099_v52  ;;  %986 = vmatprep.subr.bf16.mxu0 %v1100_v53  ;;  %v1106_v59 = vld [vmem:[%s1396_s11 + $0x58] sm:$0xff]   ;;  %v1109_v62 = vld [vmem:[%s1396_s11 + $0x60] sm:$0xff]   ;;  %v1112_v1 = vld [vmem:[%s1396_s11 + $0x68] sm:$0xff]  }
  0x52   : > { %1017 = vmatprep.subr.bf16.mxu1 %v1180_v50  ;;  %v1107_v60 = vld [vmem:[%s1396_s11 + $0x18] sm:$0xff]   ;;  %v1110_v63 = vld [vmem:[%s1396_s11 + $0x20] sm:$0xff]   ;;  %v1113_v2 = vld [vmem:[%s1396_s11 + $0x28] sm:$0xff]   ;;  %v557_v15 = vunpack.c.0.s8 %v556_v11 }
  0x53   : > { %v1108_v61 = vld [vmem:[%s1396_s11 + $0x98] sm:$0xff]   ;;  %v1111_v0 = vld [vmem:[%s1396_s11 + $0xa0] sm:$0xff]   ;;  %v1114_v3 = vld [vmem:[%s1396_s11 + $0xa8] sm:$0xff]  }
  0x54   : > { %987 = vmatpush3.bf16.msra.mxu0 %v1101_v54  ;;  %v1115_v4 = vld [vmem:[%s1396_s11 + $0x70] sm:$0xff]   ;;  %v1118_v8 = vld [vmem:[%s1396_s11 + $0x78] sm:$0xff]   ;;  %v560_v17 = vsub.s32 %v557_v15, %v559_v12 }
  0x55   : > { %1018 = vmatpush3.bf16.msra.mxu1 %v1102_v55  ;;  %988 = vmatprep.subr.bf16.mxu0 %v1103_v56  ;;  %v1116_v5 = vld [vmem:[%s1396_s11 + $0x30] sm:$0xff]   ;;  %v953_v9 = vld.sshfl [vmem:[%s477_s26] sm:$0x13 pattern:$0x75316420] }
  0x56   : > { %1019 = vmatprep.subr.bf16.mxu1 %v1180_v50  ;;  %v1117_v7 = vld [vmem:[%s1396_s11 + $0xb0] sm:$0xff]   ;;  %v1119_v13 = vld [vmem:[%s1396_s11 + $0x38] sm:$0xff]   ;;  %v554_v14 = vcombine.high %v953_v9, %v953_v9  ;;  %v561_v19 = vrot.slane %v953_v9, %v560_v17 }
  0x57   : > { %v1120_v16 = vld [vmem:[%s1396_s11 + $0xb8] sm:$0xff]  }
  0x58   : > { %989 = vmatpush3.bf16.msra.mxu0 %v1104_v57  ;;  %v568_v18 = vrot.slane %v554_v14, %v560_v17  ;;  %v569_v20 = vcombine.high %v561_v19, %v561_v19  ;;  %v496_v27 = vld [vmem:[#allocation2] sm:$0x3] }
  0x59   : > { %1020 = vmatpush3.bf16.msra.mxu1 %v1105_v58  ;;  %990 = vmatprep.subr.bf16.mxu0 %v1106_v59  ;;  %v979_v54 = vld [vmem:[%s482_s15] ss:$0 sm:$0xff] (!%p978_p13) }
  0x5a   : > { %1021 = vmatprep.subr.bf16.mxu1 %v1180_v50  ;;  %749 = vmatprep.mubr.bf16.mxu0 %v568_v18  ;;  %v980_v56 = vld [vmem:[%s485_s6] ss:$0 sm:$0xff] (!%p978_p13) }
  0x5c   : > { %991 = vmatpush3.bf16.msra.mxu0 %v1107_v60 }
  0x5d   : > { %1022 = vmatpush3.bf16.msra.mxu1 %v1108_v61  ;;  %992 = vmatprep.subr.bf16.mxu0 %v1109_v62 }
  0x5e   : > { %1023 = vmatprep.subr.bf16.mxu1 %v1180_v50 }
  0x60   : > { %993 = vmatpush3.bf16.msra.mxu0 %v1110_v63 }
  0x61   : > { %1024 = vmatpush3.bf16.msra.mxu1 %v1111_v0  ;;  %994 = vmatprep.subr.bf16.mxu0 %v1112_v1 }
  0x62   : > { %1025 = vmatprep.subr.bf16.mxu1 %v1180_v50 }
  0x64   : > { %995 = vmatpush3.bf16.msra.mxu0 %v1113_v2 }
  0x65   : > { %1026 = vmatpush3.bf16.msra.mxu1 %v1114_v3  ;;  %996 = vmatprep.subr.bf16.mxu0 %v1115_v4 }
  0x66   : > { %1027 = vmatprep.subr.bf16.mxu1 %v1180_v50 }
  0x68   : > { %997 = vmatpush3.bf16.msra.mxu0 %v1116_v5 }
  0x69   : > { %1028 = vmatpush3.bf16.msra.mxu1 %v1117_v7  ;;  %998 = vmatprep.subr.bf16.mxu0 %v1118_v8 }
  0x6a   : > { %1029 = vmatprep.subr.bf16.mxu1 %v1180_v50 }
  0x6c   : > { %999 = vmatpush3.bf16.msra.mxu0 %v1119_v13 }
  0x6d   : > { %1030 = vmatpush3.bf16.msra.mxu1 %v1120_v16 }
  0x6f   : > { %750 = vmatmul.mubr.bf16.vlgmr.msra.gmra.mrb[0].mxu0 %v561_v19 }
  0x70   : > { %1032 = vmatmul.mubr.bf16.vlgmr.msra.gmra.mrb[0].mxu1 %v569_v20 }
 0x142   : > { %v1000_v21 = vpop.f32.mrb[0].mxu0 }
 0x143   : > { %v791_v22 = vpop.f32.mrb[0].mxu1  ;;  %v1001_v23 = vpop.f32.mrb[1].mxu0 }
 0x144   : > { %v1002_v24 = vadd.f32 %v1001_v23, %v1000_v21  ;;  %v1033_v25 = vpop.f32.mrb[1].mxu1  ;;  %v1003_v26 = vpop.f32.mrb[2].mxu0  ;;  %802 = sbr.rel (%p978_p13) target bundleno = 394 (0x18a), region = 85 }
 0x145   : > { %v794_v28 = vpop.f32.mrb[2].mxu1  ;;  %v1004_v29 = vpop.f32.mrb[3].mxu0 }
 0x146   : > { %v792_v30 = vadd.f32 %v1002_v24, %v791_v22  ;;  %v1034_v31 = vpop.f32.mrb[3].mxu1 }
 0x148   : > { %v797_v32 = vadd.f32 %v792_v30, %v496_v27 }
 0x14a   : > { %798 = vst [vmem:[#allocation2] sm:$0x3] %v797_v32 }
 0x151   : > { %v803_v33 = vld [vmem:[#allocation2] sm:$0x3] }
 0x152   : > { %v805_v34 = vsel %vm804_vm1, %v803_v33, 0.0 }
 0x153   : > { %v806_v35 = vrot.slane %v805_v34, 4 }
 0x155   : > { %v807_v36 = vadd.f32 %v806_v35, %v805_v34 }
 0x157   : > { %v808_v37 = vrot.slane %v807_v36, 2 }
 0x159   : > { %v809_v38 = vadd.f32 %v808_v37, %v807_v36 }
 0x15b   : > { %v810_v39 = vrot.slane %v809_v38, 1 }
 0x15d   : > { %v811_v40 = vadd.f32 %v810_v39, %v809_v38 }
 0x15f   : > { %v813_v41 = vmul.f32 0.5, %v811_v40 }
 0x161   : > { %v814_v42 = vsub.f32 %v803_v33, %v813_v41 }
 0x163   : > { %v815_v43 = vmul.f32 %v814_v42, %v814_v42 }
 0x165   : > { %v816_v44 = vsel %vm804_vm1, %v815_v43, 0.0 }
 0x166   : > { %v817_v45 = vrot.slane %v816_v44, 4 }
 0x168   : > { %v818_v46 = vadd.f32 %v817_v45, %v816_v44 }
 0x16a   : > { %v819_v47 = vrot.slane %v818_v46, 2 }
 0x16c   : > { %v820_v48 = vadd.f32 %v819_v47, %v818_v46 }
 0x16e   : > { %v821_v49 = vrot.slane %v820_v48, 1 }
 0x170   : > { %v822_v50 = vadd.f32 %v821_v49, %v820_v48 }
 0x172   : > { %v823_v51 = vmul.f32 0.5, %v822_v50 }
 0x174   : > { %v824_v52 = vadd.f32 1e-05, %v823_v51 }
 0x176   : > { %1121 = vrsqrt.f32 %v824_v52 }
 0x180   : > { %v1122_v53 = vpop.eup %1121 }
 0x181   : > { %v826_v55 = vmul.f32 %v1122_v53, %v814_v42 }
 0x183   : > { %v834_v57 = vmul.f32 %v979_v54, %v826_v55 }
 0x185   : > { %v842_v58 = vadd.f32 %v980_v56, %v834_v57 }
 0x187   : > { %v843_v59 = vmax.f32 %v842_v58, 0.0 }
 0x189   : > { %844 = vst [vmem:[%s1394_s10] sm:$0x3] %v843_v59 }
 0x18a PF: > { %s14_s21 = sadd.s32 1, %s1177_s21   ;;  %s1466_s15 = smov %s1157_s16 }
 0x18b   : > { %p11_p0 = scmp.ge.s32.totalorder %s14_s21, 8   ;;  %s1467_s16 = smov %s1259_s28 }
 0x18c   : > { %s1468_s17 = smov %s1169_s19  ;;  %s1469_s18 = smov %s1173_s20 }
 0x18d   : > { %s1470_s19 = smov %s1473_s22  ;;  %s1471_s20 = smov %s1477_s23 }
 0x18e   :  { %13 = sbr.rel (!%p11_p0) target bundleno = 4 (0x4), region = 129 }

// kernel: shedd_forward.53
= control target key start
LH: loop header
LB: loop body
LE: loop exit
PB: predicated region body
PF: predicated region fallthrough
CT: control target
= control target key end

     0   :  { %s785_s15 = smov 0   ;;  %s787_s16 = smov 0   ;;  %s878_s0 = inlined_call_operand.vmem [shape: bf16[2,128], index: 0, kind: input, shape index: {}]   ;;  %s879_s1 = inlined_call_operand.vmem [shape: bf16[128,256], index: 1, kind: input, shape index: {}]   ;;  %s880_s2 = inlined_call_operand.vmem [shape: f32[1,256], index: 2, kind: input, shape index: {}]   ;;  %s881_s3 = inlined_call_operand.vmem [shape: f32[1,256], index: 3, kind: input, shape index: {}]   ;;  %s882_s4 = inlined_call_operand.vmem [shape: f32[2,256], index: 4, kind: output, shape index: {}]  }
   0x1   :  { %s789_s17 = smov 0   ;;  %s791_s18 = smov 0  }
   0x2   :  { %s793_s19 = smov 0  }
   0x3 LB: > { %s26_s20 = sadd.s32 1, %s752_s18  ;;  %p68_p1 = scmp.ne.s32.totalorder %s744_s16, %s740_s15  ;;  %s756_s19 = sphi %s793_s19, %s14_s19   ;;  %s752_s18 = sphi %s791_s18, %s886_s18   ;;  %s748_s17 = sphi %s789_s17, %s885_s17   ;;  %s744_s16 = sphi %s787_s16, %s884_s16   ;;  %s740_s15 = sphi %s785_s15, %s883_s15  }
   0x4   : > { %p28_p0 = scmp.ge.s32.totalorder %s26_s20, 2  ;;  %p69_p2 = scmp.eq.s32.totalorder %s756_s19, 0 }
   0x5   : > { %s61_s22 = sadd.s32 1, %s744_s16  ;;  %p619_p5 = scmp.ge.s32.totalorder %s756_s19, 2 }
   0x6   : > { %s888_s20 = smov (%p28_p0, %s26_s20), 0  ;;  %p70_p3 = por %p69_p2, %p68_p1 }
   0x7   : > { %s57_s21 = ssub.s32 %s752_s18, %s888_s20  ;;  %178 = sbr.rel (%p619_p5) target bundleno = 28 (0x1c), region = 20 }
   0x8   : > { %p59_p4 = scmp.eq.s32.totalorder %s57_s21, 0 }
   0xa   : > { %s820_s23 = scalar_select %p59_p4, %s744_s16, %s61_s22  }
   0xe   : > { %181 = sbr.rel (!%p70_p3) target bundleno = 28 (0x1c), region = 24  ;;  %s183_s24 = sand.u32 (%p70_p3), 1, %s744_s16  }
   0xf   : > { %s621_s25 = sshll.u32 (%p70_p3), %s752_s18, 2  ;;  %s620_s26 = sshll.u32 (%p70_p3), %s183_s24, 6 }
  0x10   : > { %s828_s29 = scalar_lea.vmem (%p70_p3), %s879_s1, %s621_s25  ;;  %s185_s30 = scalar_lea.vmem (%p70_p3), [#allocation3], %s620_s26 }
  0x11   : > { %v206_v0 = vld [vmem:[%s828_s29] sm:$0xf] (%p70_p3)  ;;  %v208_v1 = vld [vmem:[%s828_s29 + $0x8] sm:$0xf] (%p70_p3)  ;;  %v210_v2 = vld [vmem:[%s828_s29 + $0x10] sm:$0xf] (%p70_p3) }
  0x12   : > { %207 = vst [vmem:[%s185_s30] sm:$0xf] (%p70_p3), %v206_v0  ;;  %209 = vst [vmem:[%s185_s30 + $0x4] sm:$0xf] (%p70_p3), %v208_v1  ;;  %v212_v3 = vld [vmem:[%s828_s29 + $0x18] sm:$0xf] (%p70_p3) }
  0x13   : > { %v214_v4 = vld [vmem:[%s828_s29 + $0x20] sm:$0xf] (%p70_p3)  ;;  %211 = vst [vmem:[%s185_s30 + $0x8] sm:$0xf] (%p70_p3), %v210_v2  ;;  %213 = vst [vmem:[%s185_s30 + $0xc] sm:$0xf] (%p70_p3), %v212_v3 }
  0x14   : > { %215 = vst [vmem:[%s185_s30 + $0x10] sm:$0xf] (%p70_p3), %v214_v4  ;;  %v216_v5 = vld [vmem:[%s828_s29 + $0x28] sm:$0xf] (%p70_p3)  ;;  %v218_v6 = vld [vmem:[%s828_s29 + $0x30] sm:$0xf] (%p70_p3) }
  0x15   : > { %v220_v7 = vld [vmem:[%s828_s29 + $0x38] sm:$0xf]  ;;  %217 = vst [vmem:[%s185_s30 + $0x14] sm:$0xf] %v216_v5  ;;  %219 = vst [vmem:[%s185_s30 + $0x18] sm:$0xf] %v218_v6 }
  0x16   : > { %221 = vst [vmem:[%s185_s30 + $0x1c] sm:$0xf] %v220_v7  ;;  %v222_v8 = vld [vmem:[%s828_s29 + $0x40] sm:$0xf]  ;;  %v224_v9 = vld [vmem:[%s828_s29 + $0x48] sm:$0xf] }
  0x17   : > { %v226_v10 = vld [vmem:[%s828_s29 + $0x50] sm:$0xf]  ;;  %223 = vst [vmem:[%s185_s30 + $0x20] sm:$0xf] %v222_v8  ;;  %225 = vst [vmem:[%s185_s30 + $0x24] sm:$0xf] %v224_v9 }
  0x18   : > { %227 = vst [vmem:[%s185_s30 + $0x28] sm:$0xf] %v226_v10  ;;  %v228_v11 = vld [vmem:[%s828_s29 + $0x58] sm:$0xf]  ;;  %v230_v12 = vld [vmem:[%s828_s29 + $0x60] sm:$0xf] }
  0x19   : > { %v232_v13 = vld [vmem:[%s828_s29 + $0x68] sm:$0xf]  ;;  %229 = vst [vmem:[%s185_s30 + $0x2c] sm:$0xf] %v228_v11  ;;  %231 = vst [vmem:[%s185_s30 + $0x30] sm:$0xf] %v230_v12 }
  0x1a   : > { %233 = vst [vmem:[%s185_s30 + $0x34] sm:$0xf] %v232_v13  ;;  %v234_v14 = vld [vmem:[%s828_s29 + $0x70] sm:$0xf]  ;;  %v236_v15 = vld [vmem:[%s828_s29 + $0x78] sm:$0xf] }
  0x1b   : > { %235 = vst [vmem:[%s185_s30 + $0x38] sm:$0xf] %v234_v14  ;;  %237 = vst [vmem:[%s185_s30 + $0x3c] sm:$0xf] %v236_v15 }
  0x1c PF: > { %p622_p6 = scmp.ge.s32.totalorder %s756_s19, 1  ;;  %p303_p7 = scmp.lt.s32.totalorder %s756_s19, 3 }
  0x1e   : > { %p304_p8 = pnand %p622_p6, %p303_p7 }
  0x1f   : > { %s310_s5 = sand.u32 (!%p304_p8), 1, %s740_s15   ;;  %v758_v16 = vmov (!%p304_p8), 0.0   ;;  %vm759_vm0 = vmmov (!%p304_p8), 0   ;;  %v364_v25 = vld [vmem:[%s878_s0] sm:$0x1] (!%p304_p8)  ;;  %vm475_vm1 = vcmask (!%p304_p8), 1041408  }
  0x20   : > { %307 = sbr.rel (%p304_p8) target bundleno = 342 (0x156), region = 73  ;;  %646 = vmatprep.subr.bf16.mxu0 (!%p304_p8), %v758_v16  ;;  %362 = vst [vmem:[#allocation2] sm:$0x3] (!%p304_p8), %v758_v16  ;;  %s623_s6 = sshll.u32 (!%p304_p8), %s310_s5, 6  ;;  %662 = vmatprep.mubr.msk.bf16.mxu0 (!%p304_p8), %vm759_vm0, %v758_v16 }
  0x21   : > { %s312_s7 = scalar_lea.vmem (!%p304_p8), [#allocation3], %s623_s6  ;;  %p347_p9 = scmp.lt.s32.totalorder (!%p304_p8), %s748_s17, 1 }
  0x22   : > { %v708_v17 = vld [vmem:[%s312_s7] sm:$0xff] (!%p304_p8)   ;;  %v709_v18 = vld [vmem:[%s312_s7 + $0x8] sm:$0xff] (!%p304_p8)   ;;  %v710_v19 = vld [vmem:[%s312_s7 + $0x10] sm:$0xff] (!%p304_p8)  }
  0x23   : > { %647 = vmatpush3.bf16.msra.mxu0 (!%p304_p8), %v708_v17  ;;  %v711_v20 = vld [vmem:[%s312_s7 + $0x18] sm:$0xff] (!%p304_p8)   ;;  %v712_v21 = vld [vmem:[%s312_s7 + $0x20] sm:$0xff] (!%p304_p8)   ;;  %v713_v22 = vld [vmem:[%s312_s7 + $0x28] sm:$0xff] (!%p304_p8)  }
  0x24   : > { %648 = vmatprep.subr.bf16.mxu0 (!%p304_p8), %v758_v16  ;;  %v714_v23 = vld [vmem:[%s312_s7 + $0x30] sm:$0xff] (!%p304_p8)   ;;  %v715_v24 = vld [vmem:[%s312_s7 + $0x38] sm:$0xff] (!%p304_p8)  }
  0x27   : > { %649 = vmatpush3.bf16.msra.mxu0 %v709_v18  ;;  %v363_v26 = vld [vmem:[#allocation2] sm:$0x3]  ;;  %s890_s17 = smov (!%p347_p9, %s748_s17), 1 }
  0x28   : > { %650 = vmatprep.subr.bf16.mxu0 %v758_v16  ;;  %s349_s12 = scalar_lea.vmem %s880_s2, %s890_s17  ;;  %s352_s15 = scalar_lea.vmem %s881_s3, %s890_s17 }
  0x29   : > { %v633_v53 = vld [vmem:[%s349_s12] ss:$0 sm:$0xff]  ;;  %s624_s21 = sshll.u32 %s890_s17, 1 }
  0x2a   : > { %v634_v55 = vld [vmem:[%s352_s15] ss:$0 sm:$0xff]  ;;  %s356_s25 = scalar_lea.vmem %s882_s4, %s624_s21 }
  0x2b   : > { %651 = vmatpush3.bf16.msra.mxu0 %v710_v19 }
  0x2c   : > { %652 = vmatprep.subr.bf16.mxu0 %v758_v16 }
  0x2f   : > { %653 = vmatpush3.bf16.msra.mxu0 %v711_v20 }
  0x30   : > { %654 = vmatprep.subr.bf16.mxu0 %v758_v16 }
  0x33   : > { %655 = vmatpush3.bf16.msra.mxu0 %v712_v21 }
  0x34   : > { %656 = vmatprep.subr.bf16.mxu0 %v758_v16 }
  0x37   : > { %657 = vmatpush3.bf16.msra.mxu0 %v713_v22 }
  0x38   : > { %658 = vmatprep.subr.bf16.mxu0 %v758_v16 }
  0x3b   : > { %659 = vmatpush3.bf16.msra.mxu0 %v714_v23 }
  0x3c   : > { %660 = vmatprep.subr.bf16.mxu0 %v758_v16 }
  0x3f   : > { %661 = vmatpush3.bf16.msra.mxu0 %v715_v24 }
  0x42   : > { %663 = vmatmul.mubr.bf16.vlgmr.msra.gmra.mrb[0].mxu0 %v364_v25 }
 0x115   : > { %v463_v27 = vpop.f32.mrb[0].mxu0 }
 0x116   : > { %v469_v28 = vadd.f32 %v463_v27, %v363_v26  ;;  %v664_v29 = vpop.f32.mrb[1].mxu0 }
 0x117   : > { %v466_v30 = vpop.f32.mrb[2].mxu0 }
 0x118   : > { %470 = vst [vmem:[#allocation2] sm:$0x3] %v469_v28  ;;  %v665_v31 = vpop.f32.mrb[3].mxu0 }
 0x11f   : > { %v474_v32 = vld [vmem:[#allocation2] sm:$0x3] }
 0x120   : > { %v476_v33 = vsel %vm475_vm1, %v474_v32, 0.0 }
 0x121   : > { %v477_v34 = vrot.slane %v476_v33, 4 }
 0x123   : > { %v478_v35 = vadd.f32 %v477_v34, %v476_v33 }
 0x125   : > { %v479_v36 = vrot.slane %v478_v35, 2 }
 0x127   : > { %v480_v37 = vadd.f32 %v479_v36, %v478_v35 }
 0x129   : > { %v481_v38 = vrot.slane %v480_v37, 1 }
 0x12b   : > { %v482_v39 = vadd.f32 %v481_v38, %v480_v37 }
 0x12d   : > { %v484_v40 = vmul.f32 0.5, %v482_v39 }
 0x12f   : > { %v485_v41 = vsub.f32 %v474_v32, %v484_v40 }
 0x131   : > { %v486_v42 = vmul.f32 %v485_v41, %v485_v41 }
 0x133   : > { %v487_v43 = vsel %vm475_vm1, %v486_v42, 0.0 }
 0x134   : > { %v488_v44 = vrot.slane %v487_v43, 4 }
 0x136   : > { %v489_v45 = vadd.f32 %v488_v44, %v487_v43 }
 0x138   : > { %v490_v46 = vrot.slane %v489_v45, 2 }
 0x13a   : > { %v491_v47 = vadd.f32 %v490_v46, %v489_v45 }
 0x13c   : > { %v492_v48 = vrot.slane %v491_v47, 1 }
 0x13e   : > { %v493_v49 = vadd.f32 %v492_v48, %v491_v47 }
 0x140   : > { %v494_v50 = vmul.f32 0.5, %v493_v49 }
 0x142   : > { %v495_v51 = vadd.f32 1e-05, %v494_v50 }
 0x144   : > { %716 = vrsqrt.f32 %v495_v51 }
 0x14e   : > { %v717_v52 = vpop.eup %716 }
 0x14f   : > { %v497_v54 = vmul.f32 %v717_v52, %v485_v41 }
 0x151   : > { %v505_v56 = vmul.f32 %v633_v53, %v497_v54 }
 0x153   : > { %v513_v57 = vadd.f32 %v634_v55, %v505_v56 }
 0x155   : > { %514 = vst [vmem:[%s356_s25] sm:$0x3] %v513_v57 }
 0x156 PF: > { %s14_s19 = sadd.s32 1, %s756_s19   ;;  %s883_s15 = smov %s744_s16 }
 0x157   : > { %p11_p10 = scmp.ge.s32.totalorder %s14_s19, 4   ;;  %s884_s16 = smov %s820_s23 }
 0x158   : > { %s885_s17 = smov %s752_s18  ;;  %s886_s18 = smov %s888_s20 }
 0x159   :  { %13 = sbr.rel (!%p11_p10) target bundleno = 3 (0x3), region = 129 }

// kernel: shedd_forward.54
= control target key start
LH: loop header
LB: loop body
LE: loop exit
PB: predicated region body
PF: predicated region fallthrough
CT: control target
= control target key end

     0   :  { %s1272_s18 = smov 0   ;;  %s1274_s19 = smov 0   ;;  %s1531_s0 = inlined_call_operand.vmem [shape: bf16[2,2304], index: 0, kind: input, shape index: {}]   ;;  %s1532_s1 = inlined_call_operand.vmem [shape: bf16[2304,256], index: 1, kind: input, shape index: {}]   ;;  %s1533_s2 = inlined_call_operand.vmem [shape: f32[1,256], index: 2, kind: input, shape index: {}]   ;;  %s1534_s3 = inlined_call_operand.vmem [shape: f32[1,256], index: 3, kind: input, shape index: {}]   ;;  %s1535_s4 = inlined_call_operand.vmem [shape: f32[2,256], index: 4, kind: input, shape index: {}]   ;;  %s1536_s5 = inlined_call_operand.vmem [shape: f32[2,256], index: 5, kind: output, shape index: {}]  }
   0x1   :  { %s1276_s20 = smov 0   ;;  %s1278_s21 = smov 0  }
   0x2   :  { %s1280_s22 = smov 0   ;;  %s1282_s23 = smov 0  }
   0x3   :  { %s1284_s24 = smov 0  }
   0x4 LB: > { %s24_s25 = sadd.s32 1, %s1228_s22  ;;  %s27_s26 = sadd.s32 1, %s1232_s23  ;;  %s1236_s24 = sphi %s1284_s24, %s15_s24   ;;  %s1232_s23 = sphi %s1282_s23, %s1543_s23   ;;  %s1228_s22 = sphi %s1280_s22, %s1542_s22   ;;  %s1224_s21 = sphi %s1278_s21, %s1541_s21   ;;  %s1220_s20 = sphi %s1276_s20, %s1540_s20   ;;  %s1216_s19 = sphi %s1274_s19, %s1539_s19   ;;  %s1212_s18 = sphi %s1272_s18, %s1538_s18  }
   0x5   : > { %p25_p0 = scmp.ge.s32.totalorder %s24_s25, 6  ;;  %p69_p1 = scmp.ne.s32.totalorder %s1216_s19, %s1212_s18 }
   0x6   : > { %p70_p2 = scmp.eq.s32.totalorder %s1236_s24, 0  ;;  %s62_s30 = sadd.s32 1, %s1216_s19 }
   0x7   : > { %s1545_s25 = smov (%p25_p0, %s24_s25), 0  ;;  %s1547_s26 = smov (!%p25_p0, %s27_s26), %s1232_s23 }
   0x8   : > { %p71_p3 = por %p70_p2, %p69_p1  ;;  %p29_p4 = scmp.ge.s32.totalorder %s1547_s26, 2 }
   0x9   : > { %s57_s27 = ssub.s32 %s1228_s22, %s1545_s25  ;;  %p1005_p6 = scmp.ge.s32.totalorder %s1236_s24, 12 }
   0xa   : > { %s1549_s26 = smov (%p29_p4, %s1547_s26), 0 }
   0xb   : > { %s58_s28 = ssub.s32 %s1232_s23, %s1549_s26  ;;  %199 = sbr.rel (%p1005_p6) target bundleno = 57 (0x39), region = 16 }
   0xc   : > { %s59_s29 = sor.u32 %s58_s28, %s57_s27 }
   0xd   : > { %p60_p5 = scmp.eq.s32.totalorder %s59_s29, 0 }
   0xf   : > { %s1323_s6 = scalar_select %p60_p5, %s1216_s19, %s62_s30  }
  0x12   : > { %210 = sbr.rel (!%p71_p3) target bundleno = 57 (0x39), region = 24  ;;  %s212_s7 = sand.u32 (%p71_p3), 1, %s1216_s19  }
  0x13   : > { %s1042_s8 = smul.u32 (%p71_p3), 96, %s1228_s22 }
  0x14   : > { %s1094_s9 = smul.u32 (%p71_p3), 192, %s212_s7 }
  0x15   : > { %s217_s10 = sadd.s32 (%p71_p3), %s1232_s23, %s1042_s8 }
  0x16   : > { %s1007_s11 = sshll.u32 (%p71_p3), %s217_s10, 2  ;;  %s1337_s15 = scalar_lea.vmem (%p71_p3), [#allocation3], %s1094_s9 }
  0x17   : > { %s1332_s14 = scalar_lea.vmem (%p71_p3), %s1532_s1, %s1007_s11 }
  0x18   : > { %v235_v0 = vld [vmem:[%s1332_s14] sm:$0xf] (%p71_p3)  ;;  %v237_v1 = vld [vmem:[%s1332_s14 + $0x8] sm:$0xf] (%p71_p3)  ;;  %v239_v2 = vld [vmem:[%s1332_s14 + $0x10] sm:$0xf] (%p71_p3) }
  0x19   : > { %236 = vst [vmem:[%s1337_s15] sm:$0xf] %v235_v0  ;;  %238 = vst [vmem:[%s1337_s15 + $0x4] sm:$0xf] %v237_v1  ;;  %v241_v3 = vld [vmem:[%s1332_s14 + $0x18] sm:$0xf] }
  0x1a   : > { %240 = vst [vmem:[%s1337_s15 + $0x8] sm:$0xf] %v239_v2  ;;  %v243_v4 = vld [vmem:[%s1332_s14 + $0x20] sm:$0xf]  ;;  %v245_v5 = vld [vmem:[%s1332_s14 + $0x28] sm:$0xf] }
  0x1b   : > { %242 = vst [vmem:[%s1337_s15 + $0xc] sm:$0xf] %v241_v3  ;;  %244 = vst [vmem:[%s1337_s15 + $0x10] sm:$0xf] %v243_v4  ;;  %v247_v6 = vld [vmem:[%s1332_s14 + $0x30] sm:$0xf] }
  0x1c   : > { %246 = vst [vmem:[%s1337_s15 + $0x14] sm:$0xf] %v245_v5  ;;  %v249_v7 = vld [vmem:[%s1332_s14 + $0x38] sm:$0xf]  ;;  %v251_v8 = vld [vmem:[%s1332_s14 + $0x40] sm:$0xf] }
  0x1d   : > { %248 = vst [vmem:[%s1337_s15 + $0x18] sm:$0xf] %v247_v6  ;;  %250 = vst [vmem:[%s1337_s15 + $0x1c] sm:$0xf] %v249_v7  ;;  %v253_v9 = vld [vmem:[%s1332_s14 + $0x48] sm:$0xf] }
  0x1e   : > { %252 = vst [vmem:[%s1337_s15 + $0x20] sm:$0xf] %v251_v8  ;;  %v255_v10 = vld [vmem:[%s1332_s14 + $0x50] sm:$0xf]  ;;  %v257_v11 = vld [vmem:[%s1332_s14 + $0x58] sm:$0xf] }
  0x1f   : > { %254 = vst [vmem:[%s1337_s15 + $0x24] sm:$0xf] %v253_v9  ;;  %256 = vst [vmem:[%s1337_s15 + $0x28] sm:$0xf] %v255_v10  ;;  %v259_v12 = vld [vmem:[%s1332_s14 + $0x60] sm:$0xf] }
  0x20   : > { %258 = vst [vmem:[%s1337_s15 + $0x2c] sm:$0xf] %v257_v11  ;;  %v261_v13 = vld [vmem:[%s1332_s14 + $0x68] sm:$0xf]  ;;  %v263_v14 = vld [vmem:[%s1332_s14 + $0x70] sm:$0xf] }
  0x21   : > { %260 = vst [vmem:[%s1337_s15 + $0x30] sm:$0xf] %v259_v12  ;;  %262 = vst [vmem:[%s1337_s15 + $0x34] sm:$0xf] %v261_v13  ;;  %v265_v15 = vld [vmem:[%s1332_s14 + $0x78] sm:$0xf] }
  0x22   : > { %264 = vst [vmem:[%s1337_s15 + $0x38] sm:$0xf] %v263_v14  ;;  %v267_v16 = vld [vmem:[%s1332_s14 + $0x80] sm:$0xf]  ;;  %v269_v17 = vld [vmem:[%s1332_s14 + $0x88] sm:$0xf] }
  0x23   : > { %266 = vst [vmem:[%s1337_s15 + $0x3c] sm:$0xf] %v265_v15  ;;  %268 = vst [vmem:[%s1337_s15 + $0x40] sm:$0xf] %v267_v16  ;;  %v271_v18 = vld [vmem:[%s1332_s14 + $0x90] sm:$0xf] }
  0x24   : > { %270 = vst [vmem:[%s1337_s15 + $0x44] sm:$0xf] %v269_v17  ;;  %v273_v19 = vld [vmem:[%s1332_s14 + $0x98] sm:$0xf]  ;;  %v275_v20 = vld [vmem:[%s1332_s14 + $0xa0] sm:$0xf] }
  0x25   : > { %272 = vst [vmem:[%s1337_s15 + $0x48] sm:$0xf] %v271_v18  ;;  %274 = vst [vmem:[%s1337_s15 + $0x4c] sm:$0xf] %v273_v19  ;;  %v277_v21 = vld [vmem:[%s1332_s14 + $0xa8] sm:$0xf] }
  0x26   : > { %276 = vst [vmem:[%s1337_s15 + $0x50] sm:$0xf] %v275_v20  ;;  %v279_v22 = vld [vmem:[%s1332_s14 + $0xb0] sm:$0xf]  ;;  %v281_v23 = vld [vmem:[%s1332_s14 + $0xb8] sm:$0xf] }
  0x27   : > { %278 = vst [vmem:[%s1337_s15 + $0x54] sm:$0xf] %v277_v21  ;;  %280 = vst [vmem:[%s1337_s15 + $0x58] sm:$0xf] %v279_v22  ;;  %v283_v24 = vld [vmem:[%s1332_s14 + $0xc0] sm:$0xf] }
  0x28   : > { %282 = vst [vmem:[%s1337_s15 + $0x5c] sm:$0xf] %v281_v23  ;;  %v285_v25 = vld [vmem:[%s1332_s14 + $0xc8] sm:$0xf]  ;;  %v287_v26 = vld [vmem:[%s1332_s14 + $0xd0] sm:$0xf] }
  0x29   : > { %284 = vst [vmem:[%s1337_s15 + $0x60] sm:$0xf] %v283_v24  ;;  %286 = vst [vmem:[%s1337_s15 + $0x64] sm:$0xf] %v285_v25  ;;  %v289_v27 = vld [vmem:[%s1332_s14 + $0xd8] sm:$0xf] }
  0x2a   : > { %288 = vst [vmem:[%s1337_s15 + $0x68] sm:$0xf] %v287_v26  ;;  %v291_v28 = vld [vmem:[%s1332_s14 + $0xe0] sm:$0xf]  ;;  %v293_v29 = vld [vmem:[%s1332_s14 + $0xe8] sm:$0xf] }
  0x2b   : > { %290 = vst [vmem:[%s1337_s15 + $0x6c] sm:$0xf] %v289_v27  ;;  %292 = vst [vmem:[%s1337_s15 + $0x70] sm:$0xf] %v291_v28  ;;  %v295_v30 = vld [vmem:[%s1332_s14 + $0xf0] sm:$0xf] }
  0x2c   : > { %294 = vst [vmem:[%s1337_s15 + $0x74] sm:$0xf] %v293_v29  ;;  %v297_v31 = vld [vmem:[%s1332_s14 + $0xf8] sm:$0xf]  ;;  %v299_v32 = vld [vmem:[%s1332_s14 + $0x100] sm:$0xf] }
  0x2d   : > { %296 = vst [vmem:[%s1337_s15 + $0x78] sm:$0xf] %v295_v30  ;;  %298 = vst [vmem:[%s1337_s15 + $0x7c] sm:$0xf] %v297_v31  ;;  %v301_v33 = vld [vmem:[%s1332_s14 + $0x108] sm:$0xf] }
  0x2e   : > { %300 = vst [vmem:[%s1337_s15 + $0x80] sm:$0xf] %v299_v32  ;;  %v303_v34 = vld [vmem:[%s1332_s14 + $0x110] sm:$0xf]  ;;  %v305_v35 = vld [vmem:[%s1332_s14 + $0x118] sm:$0xf] }
  0x2f   : > { %302 = vst [vmem:[%s1337_s15 + $0x84] sm:$0xf] %v301_v33  ;;  %304 = vst [vmem:[%s1337_s15 + $0x88] sm:$0xf] %v303_v34  ;;  %v307_v36 = vld [vmem:[%s1332_s14 + $0x120] sm:$0xf] }
  0x30   : > { %306 = vst [vmem:[%s1337_s15 + $0x8c] sm:$0xf] %v305_v35  ;;  %v309_v37 = vld [vmem:[%s1332_s14 + $0x128] sm:$0xf]  ;;  %v311_v38 = vld [vmem:[%s1332_s14 + $0x130] sm:$0xf] }
  0x31   : > { %308 = vst [vmem:[%s1337_s15 + $0x90] sm:$0xf] %v307_v36  ;;  %310 = vst [vmem:[%s1337_s15 + $0x94] sm:$0xf] %v309_v37  ;;  %v313_v39 = vld [vmem:[%s1332_s14 + $0x138] sm:$0xf] }
  0x32   : > { %312 = vst [vmem:[%s1337_s15 + $0x98] sm:$0xf] %v311_v38  ;;  %v315_v40 = vld [vmem:[%s1332_s14 + $0x140] sm:$0xf]  ;;  %v317_v41 = vld [vmem:[%s1332_s14 + $0x148] sm:$0xf] }
  0x33   : > { %314 = vst [vmem:[%s1337_s15 + $0x9c] sm:$0xf] %v313_v39  ;;  %316 = vst [vmem:[%s1337_s15 + $0xa0] sm:$0xf] %v315_v40  ;;  %v319_v42 = vld [vmem:[%s1332_s14 + $0x150] sm:$0xf] }
  0x34   : > { %318 = vst [vmem:[%s1337_s15 + $0xa4] sm:$0xf] %v317_v41  ;;  %v321_v43 = vld [vmem:[%s1332_s14 + $0x158] sm:$0xf]  ;;  %v323_v44 = vld [vmem:[%s1332_s14 + $0x160] sm:$0xf] }
  0x35   : > { %320 = vst [vmem:[%s1337_s15 + $0xa8] sm:$0xf] %v319_v42  ;;  %322 = vst [vmem:[%s1337_s15 + $0xac] sm:$0xf] %v321_v43  ;;  %v325_v45 = vld [vmem:[%s1332_s14 + $0x168] sm:$0xf] }
  0x36   : > { %324 = vst [vmem:[%s1337_s15 + $0xb0] sm:$0xf] %v323_v44  ;;  %v327_v46 = vld [vmem:[%s1332_s14 + $0x170] sm:$0xf]  ;;  %v329_v47 = vld [vmem:[%s1332_s14 + $0x178] sm:$0xf] }
  0x37   : > { %326 = vst [vmem:[%s1337_s15 + $0xb4] sm:$0xf] %v325_v45  ;;  %328 = vst [vmem:[%s1337_s15 + $0xb8] sm:$0xf] %v327_v46 }
  0x38   : > { %330 = vst [vmem:[%s1337_s15 + $0xbc] sm:$0xf] %v329_v47 }
  0x39 PF: > { %p1008_p7 = scmp.ge.s32.totalorder %s1236_s24, 1  ;;  %p467_p8 = scmp.lt.s32.totalorder %s1236_s24, 13 }
  0x3b   : > { %p468_p9 = pnand %p1008_p7, %p467_p8 }
  0x3c   : > { %s474_s16 = sand.u32 (!%p468_p9), 1, %s1212_s18   ;;  %s514_s17 = smul.u32 (!%p468_p9), 3, %s1220_s20 }
  0x3d   : > { %471 = sbr.rel (%p468_p9) target bundleno = 395 (0x18b), region = 77  ;;  %p520_p10 = scmp.lt.s32.totalorder (!%p468_p9), %s1224_s21, 1 }
  0x3e   : > { %s1095_s27 = smul.u32 (!%p468_p9), 192, %s474_s16  ;;  %p515_p11 = scmp.lt.s32.totalorder (!%p468_p9), %s514_s17, 17 }
  0x3f   : > { %p1011_p12 = scmp.ne.s32.totalorder (!%p468_p9), %s1220_s20, 0 }
  0x40   : > { %s1465_s30 = scalar_lea.vmem (!%p468_p9), [#allocation3], %s1095_s27 }
  0x44   : > { %s1551_s17 = smov (!%p515_p11, %s514_s17), 17  ;;  %s1553_s21 = smov (!%p520_p10, %s1224_s21), 1 }
  0x45   : > { %s522_s18 = scalar_lea.vmem %s1533_s2, %s1553_s21  ;;  %s525_s11 = scalar_lea.vmem %s1534_s3, %s1553_s21  ;;  %v1238_v48 = vmov (!%p1011_p12), 0.0  }
  0x46   : > { %s1009_s12 = sshll.u32 %s1553_s21, 1  ;;  %538 = sbr.rel (%p1011_p12) target bundleno = 77 (0x4d), region = 85  ;;  %539 = vst [vmem:[#allocation2] sm:$0x3] (!%p1011_p12), %v1238_v48 }
  0x47   : > { %s1458_s15 = scalar_lea.vmem %s1535_s4, %s1009_s12  ;;  %s1463_s29 = scalar_lea.vmem %s1536_s5, %s1009_s12 }
  0x4d PF: > { %v1156_v49 = vld [vmem:[%s1465_s30 + $0x40] sm:$0xff]   ;;  %v1239_v50 = vmov 0.0   ;;  %vm1240_vm0 = vmmov 0   ;;  %v1159_v53 = vld [vmem:[%s1465_s30 + $0x48] sm:$0xff]   ;;  %v1162_v56 = vld [vmem:[%s1465_s30 + $0x50] sm:$0xff]   ;;  %v602_v6 = vlaneseq  ;;  %s1537_s8 = scalar_lea.vmem %s1531_s0, %s1551_s17  ;;  %p1037_p13 = scmp.ne.s32.totalorder %s1220_s20, 5 }
  0x4e   : > { %1074 = vmatprep.subr.bf16.mxu1 %v1239_v50  ;;  %v1157_v51 = vld [vmem:[%s1465_s30] sm:$0xff]   ;;  %1043 = vmatprep.subr.bf16.mxu0 %v1156_v49  ;;  %v1160_v54 = vld [vmem:[%s1465_s30 + $0x8] sm:$0xff]   ;;  %v1163_v57 = vld [vmem:[%s1465_s30 + $0x10] sm:$0xff]   ;;  %v1241_v10 = vmov 1966171168   ;;  %vm848_vm1 = vcmask (!%p1037_p13), 1041408  }
  0x4f   : > { %v1158_v52 = vld [vmem:[%s1465_s30 + $0x80] sm:$0xff]   ;;  %1090 = vmatprep.mubr.msk.bf16.mxu1 %vm1240_vm0, %v1239_v50  ;;  %1044 = vmatpush3.bf16.msra.mxu0 %v1157_v51  ;;  %v1161_v55 = vld [vmem:[%s1465_s30 + $0x88] sm:$0xff]   ;;  %v1164_v58 = vld [vmem:[%s1465_s30 + $0x90] sm:$0xff]   ;;  %v600_v11 = vunpack.c.l.s4 %v1241_v10  ;;  %v603_v12 = vshrl.u32 %v602_v6, 7 }
  0x50   : > { %1075 = vmatpush3.bf16.msra.mxu1 %v1158_v52  ;;  %1045 = vmatprep.subr.bf16.mxu0 %v1159_v53  ;;  %v1165_v59 = vld [vmem:[%s1465_s30 + $0x58] sm:$0xff]   ;;  %v1168_v62 = vld [vmem:[%s1465_s30 + $0x60] sm:$0xff]   ;;  %v1171_v1 = vld [vmem:[%s1465_s30 + $0x68] sm:$0xff]  }
  0x51   : > { %1076 = vmatprep.subr.bf16.mxu1 %v1239_v50  ;;  %v1166_v60 = vld [vmem:[%s1465_s30 + $0x18] sm:$0xff]   ;;  %v1169_v63 = vld [vmem:[%s1465_s30 + $0x20] sm:$0xff]   ;;  %v1172_v2 = vld [vmem:[%s1465_s30 + $0x28] sm:$0xff]   ;;  %v601_v15 = vunpack.c.0.s8 %v600_v11 }
  0x52   : > { %v1167_v61 = vld [vmem:[%s1465_s30 + $0x98] sm:$0xff]   ;;  %v1170_v0 = vld [vmem:[%s1465_s30 + $0xa0] sm:$0xff]   ;;  %v1173_v3 = vld [vmem:[%s1465_s30 + $0xa8] sm:$0xff]  }
  0x53   : > { %1046 = vmatpush3.bf16.msra.mxu0 %v1160_v54  ;;  %v1174_v4 = vld [vmem:[%s1465_s30 + $0x70] sm:$0xff]   ;;  %v1177_v8 = vld [vmem:[%s1465_s30 + $0x78] sm:$0xff]   ;;  %v604_v17 = vsub.s32 %v601_v15, %v603_v12 }
  0x54   : > { %1077 = vmatpush3.bf16.msra.mxu1 %v1161_v55  ;;  %1047 = vmatprep.subr.bf16.mxu0 %v1162_v56  ;;  %v1175_v5 = vld [vmem:[%s1465_s30 + $0x30] sm:$0xff]   ;;  %v1012_v9 = vld.sshfl [vmem:[%s1537_s8] sm:$0x13 pattern:$0x75316420] }
  0x55   : > { %1078 = vmatprep.subr.bf16.mxu1 %v1239_v50  ;;  %v1176_v7 = vld [vmem:[%s1465_s30 + $0xb0] sm:$0xff]   ;;  %v1178_v13 = vld [vmem:[%s1465_s30 + $0x38] sm:$0xff]   ;;  %v598_v14 = vcombine.high %v1012_v9, %v1012_v9  ;;  %v605_v19 = vrot.slane %v1012_v9, %v604_v17 }
  0x56   : > { %v1179_v16 = vld [vmem:[%s1465_s30 + $0xb8] sm:$0xff]  }
  0x57   : > { %1048 = vmatpush3.bf16.msra.mxu0 %v1163_v57  ;;  %v612_v18 = vrot.slane %v598_v14, %v604_v17  ;;  %v613_v20 = vcombine.high %v605_v19, %v605_v19  ;;  %v540_v27 = vld [vmem:[#allocation2] sm:$0x3] }
  0x58   : > { %1079 = vmatpush3.bf16.msra.mxu1 %v1164_v58  ;;  %1049 = vmatprep.subr.bf16.mxu0 %v1165_v59  ;;  %v1038_v54 = vld [vmem:[%s522_s18] ss:$0 sm:$0xff] (!%p1037_p13) }
  0x59   : > { %1080 = vmatprep.subr.bf16.mxu1 %v1239_v50  ;;  %793 = vmatprep.mubr.bf16.mxu0 %v612_v18  ;;  %v1039_v56 = vld [vmem:[%s525_s11] ss:$0 sm:$0xff] (!%p1037_p13) }
  0x5a   : > { %v887_v58 = vld [vmem:[%s1458_s15] sm:$0x3] (!%p1037_p13) }
  0x5b   : > { %1050 = vmatpush3.bf16.msra.mxu0 %v1166_v60 }
  0x5c   : > { %1081 = vmatpush3.bf16.msra.mxu1 %v1167_v61  ;;  %1051 = vmatprep.subr.bf16.mxu0 %v1168_v62 }
  0x5d   : > { %1082 = vmatprep.subr.bf16.mxu1 %v1239_v50 }
  0x5f   : > { %1052 = vmatpush3.bf16.msra.mxu0 %v1169_v63 }
  0x60   : > { %1083 = vmatpush3.bf16.msra.mxu1 %v1170_v0  ;;  %1053 = vmatprep.subr.bf16.mxu0 %v1171_v1 }
  0x61   : > { %1084 = vmatprep.subr.bf16.mxu1 %v1239_v50 }
  0x63   : > { %1054 = vmatpush3.bf16.msra.mxu0 %v1172_v2 }
  0x64   : > { %1085 = vmatpush3.bf16.msra.mxu1 %v1173_v3  ;;  %1055 = vmatprep.subr.bf16.mxu0 %v1174_v4 }
  0x65   : > { %1086 = vmatprep.subr.bf16.mxu1 %v1239_v50 }
  0x67   : > { %1056 = vmatpush3.bf16.msra.mxu0 %v1175_v5 }
  0x68   : > { %1087 = vmatpush3.bf16.msra.mxu1 %v1176_v7  ;;  %1057 = vmatprep.subr.bf16.mxu0 %v1177_v8 }
  0x69   : > { %1088 = vmatprep.subr.bf16.mxu1 %v1239_v50 }
  0x6b   : > { %1058 = vmatpush3.bf16.msra.mxu0 %v1178_v13 }
  0x6c   : > { %1089 = vmatpush3.bf16.msra.mxu1 %v1179_v16 }
  0x6e   : > { %794 = vmatmul.mubr.bf16.vlgmr.msra.gmra.mrb[0].mxu0 %v605_v19 }
  0x6f   : > { %1091 = vmatmul.mubr.bf16.vlgmr.msra.gmra.mrb[0].mxu1 %v613_v20 }
 0x141   : > { %v1059_v21 = vpop.f32.mrb[0].mxu0 }
 0x142   : > { %v835_v22 = vpop.f32.mrb[0].mxu1  ;;  %v1060_v23 = vpop.f32.mrb[1].mxu0 }
 0x143   : > { %v1061_v24 = vadd.f32 %v1060_v23, %v1059_v21  ;;  %v1092_v25 = vpop.f32.mrb[1].mxu1  ;;  %v1062_v26 = vpop.f32.mrb[2].mxu0  ;;  %846 = sbr.rel (%p1037_p13) target bundleno = 395 (0x18b), region = 89 }
 0x144   : > { %v838_v28 = vpop.f32.mrb[2].mxu1  ;;  %v1063_v29 = vpop.f32.mrb[3].mxu0 }
 0x145   : > { %v836_v30 = vadd.f32 %v1061_v24, %v835_v22  ;;  %v1093_v31 = vpop.f32.mrb[3].mxu1 }
 0x147   : > { %v841_v32 = vadd.f32 %v836_v30, %v540_v27 }
 0x149   : > { %842 = vst [vmem:[#allocation2] sm:$0x3] %v841_v32 }
 0x150   : > { %v847_v33 = vld [vmem:[#allocation2] sm:$0x3] }
 0x151   : > { %v849_v34 = vsel %vm848_vm1, %v847_v33, 0.0 }
 0x152   : > { %v850_v35 = vrot.slane %v849_v34, 4 }
 0x154   : > { %v851_v36 = vadd.f32 %v850_v35, %v849_v34 }
 0x156   : > { %v852_v37 = vrot.slane %v851_v36, 2 }
 0x158   : > { %v853_v38 = vadd.f32 %v852_v37, %v851_v36 }
 0x15a   : > { %v854_v39 = vrot.slane %v853_v38, 1 }
 0x15c   : > { %v855_v40 = vadd.f32 %v854_v39, %v853_v38 }
 0x15e   : > { %v857_v41 = vmul.f32 0.5, %v855_v40 }
 0x160   : > { %v858_v42 = vsub.f32 %v847_v33, %v857_v41 }
 0x162   : > { %v859_v43 = vmul.f32 %v858_v42, %v858_v42 }
 0x164   : > { %v860_v44 = vsel %vm848_vm1, %v859_v43, 0.0 }
 0x165   : > { %v861_v45 = vrot.slane %v860_v44, 4 }
 0x167   : > { %v862_v46 = vadd.f32 %v861_v45, %v860_v44 }
 0x169   : > { %v863_v47 = vrot.slane %v862_v46, 2 }
 0x16b   : > { %v864_v48 = vadd.f32 %v863_v47, %v862_v46 }
 0x16d   : > { %v865_v49 = vrot.slane %v864_v48, 1 }
 0x16f   : > { %v866_v50 = vadd.f32 %v865_v49, %v864_v48 }
 0x171   : > { %v867_v51 = vmul.f32 0.5, %v866_v50 }
 0x173   : > { %v868_v52 = vadd.f32 1e-05, %v867_v51 }
 0x175   : > { %1180 = vrsqrt.f32 %v868_v52 }
 0x17f   : > { %v1181_v53 = vpop.eup %1180 }
 0x180   : > { %v870_v55 = vmul.f32 %v1181_v53, %v858_v42 }
 0x182   : > { %v878_v57 = vmul.f32 %v1038_v54, %v870_v55 }
 0x184   : > { %v886_v59 = vadd.f32 %v1039_v56, %v878_v57 }
 0x186   : > { %v888_v60 = vadd.f32 %v887_v58, %v886_v59 }
 0x188   : > { %v889_v61 = vmax.f32 %v888_v60, 0.0 }
 0x18a   : > { %890 = vst [vmem:[%s1463_s29] sm:$0x3] %v889_v61 }
 0x18b PF: > { %s15_s24 = sadd.s32 1, %s1236_s24   ;;  %s1538_s18 = smov %s1216_s19 }
 0x18c   : > { %p12_p0 = scmp.ge.s32.totalorder %s15_s24, 14   ;;  %s1539_s19 = smov %s1323_s6 }
 0x18d   : > { %s1540_s20 = smov %s1228_s22  ;;  %s1541_s21 = smov %s1232_s23 }
 0x18e   : > { %s1542_s22 = smov %s1545_s25  ;;  %s1543_s23 = smov %s1549_s26 }
 0x18f   :  { %14 = sbr.rel (!%p12_p0) target bundleno = 4 (0x4), region = 136 }

// kernel: shedd_forward.55
= control target key start
LH: loop header
LB: loop body
LE: loop exit
PB: predicated region body
PF: predicated region fallthrough
CT: control target
= control target key end

     0   :  { %s1208_s15 = smov 0   ;;  %s1210_s16 = smov 0   ;;  %s1461_s0 = inlined_call_operand.vmem [shape: bf16[2,2304], index: 0, kind: input, shape index: {}]   ;;  %s1462_s1 = inlined_call_operand.vmem [shape: bf16[2304,256], index: 1, kind: input, shape index: {}]   ;;  %s1463_s2 = inlined_call_operand.vmem [shape: f32[1,256], index: 2, kind: input, shape index: {}]   ;;  %s1464_s3 = inlined_call_operand.vmem [shape: f32[1,256], index: 3, kind: input, shape index: {}]   ;;  %s1465_s4 = inlined_call_operand.vmem [shape: f32[2,256], index: 4, kind: output, shape index: {}]  }
   0x1   :  { %s1212_s17 = smov 0   ;;  %s1214_s18 = smov 0  }
   0x2   :  { %s1216_s19 = smov 0   ;;  %s1218_s20 = smov 0  }
   0x3   :  { %s1220_s21 = smov 0  }
   0x4 LB: > { %s23_s22 = sadd.s32 1, %s1169_s19  ;;  %s26_s23 = sadd.s32 1, %s1173_s20  ;;  %s1177_s21 = sphi %s1220_s21, %s14_s21   ;;  %s1173_s20 = sphi %s1218_s20, %s1471_s20   ;;  %s1169_s19 = sphi %s1216_s19, %s1470_s19   ;;  %s1165_s18 = sphi %s1214_s18, %s1469_s18   ;;  %s1161_s17 = sphi %s1212_s17, %s1468_s17   ;;  %s1157_s16 = sphi %s1210_s16, %s1467_s16   ;;  %s1153_s15 = sphi %s1208_s15, %s1466_s15  }
   0x5   : > { %p24_p0 = scmp.ge.s32.totalorder %s23_s22, 6  ;;  %p68_p1 = scmp.ne.s32.totalorder %s1157_s16, %s1153_s15 }
   0x6   : > { %p69_p2 = scmp.eq.s32.totalorder %s1177_s21, 0  ;;  %s61_s27 = sadd.s32 1, %s1157_s16 }
   0x7   : > { %s1473_s22 = smov (%p24_p0, %s23_s22), 0  ;;  %s1475_s23 = smov (!%p24_p0, %s26_s23), %s1173_s20 }
   0x8   : > { %p70_p3 = por %p69_p2, %p68_p1  ;;  %p28_p4 = scmp.ge.s32.totalorder %s1475_s23, 2 }
   0x9   : > { %s56_s24 = ssub.s32 %s1169_s19, %s1473_s22  ;;  %p947_p6 = scmp.ge.s32.totalorder %s1177_s21, 12 }
   0xa   : > { %s1477_s23 = smov (%p28_p4, %s1475_s23), 0 }
   0xb   : > { %s57_s25 = ssub.s32 %s1173_s20, %s1477_s23  ;;  %172 = sbr.rel (%p947_p6) target bundleno = 57 (0x39), region = 16 }
   0xc   : > { %s58_s26 = sor.u32 %s57_s25, %s56_s24 }
   0xd   : > { %p59_p5 = scmp.eq.s32.totalorder %s58_s26, 0 }
   0xf   : > { %s1259_s28 = scalar_select %p59_p5, %s1157_s16, %s61_s27  }
  0x12   : > { %183 = sbr.rel (!%p70_p3) target bundleno = 57 (0x39), region = 24  ;;  %s185_s29 = sand.u32 (%p70_p3), 1, %s1157_s16  }
  0x13   : > { %s983_s30 = smul.u32 (%p70_p3), 96, %s1169_s19 }
  0x14   : > { %s1035_s5 = smul.u32 (%p70_p3), 192, %s185_s29 }
  0x15   : > { %s190_s6 = sadd.s32 (%p70_p3), %s1173_s20, %s983_s30 }
  0x16   : > { %s949_s7 = sshll.u32 (%p70_p3), %s190_s6, 2  ;;  %s1273_s11 = scalar_lea.vmem (%p70_p3), [#allocation3], %s1035_s5 }
  0x17   : > { %s1268_s10 = scalar_lea.vmem (%p70_p3), %s1462_s1, %s949_s7 }
  0x18   : > { %v208_v0 = vld [vmem:[%s1268_s10] sm:$0xf] (%p70_p3)  ;;  %v210_v1 = vld [vmem:[%s1268_s10 + $0x8] sm:$0xf] (%p70_p3)  ;;  %v212_v2 = vld [vmem:[%s1268_s10 + $0x10] sm:$0xf] (%p70_p3) }
  0x19   : > { %209 = vst [vmem:[%s1273_s11] sm:$0xf] %v208_v0  ;;  %211 = vst [vmem:[%s1273_s11 + $0x4] sm:$0xf] %v210_v1  ;;  %v214_v3 = vld [vmem:[%s1268_s10 + $0x18] sm:$0xf] }
  0x1a   : > { %213 = vst [vmem:[%s1273_s11 + $0x8] sm:$0xf] %v212_v2  ;;  %v216_v4 = vld [vmem:[%s1268_s10 + $0x20] sm:$0xf]  ;;  %v218_v5 = vld [vmem:[%s1268_s10 + $0x28] sm:$0xf] }
  0x1b   : > { %215 = vst [vmem:[%s1273_s11 + $0xc] sm:$0xf] %v214_v3  ;;  %217 = vst [vmem:[%s1273_s11 + $0x10] sm:$0xf] %v216_v4  ;;  %v220_v6 = vld [vmem:[%s1268_s10 + $0x30] sm:$0xf] }
  0x1c   : > { %219 = vst [vmem:[%s1273_s11 + $0x14] sm:$0xf] %v218_v5  ;;  %v222_v7 = vld [vmem:[%s1268_s10 + $0x38] sm:$0xf]  ;;  %v224_v8 = vld [vmem:[%s1268_s10 + $0x40] sm:$0xf] }
  0x1d   : > { %221 = vst [vmem:[%s1273_s11 + $0x18] sm:$0xf] %v220_v6  ;;  %223 = vst [vmem:[%s1273_s11 + $0x1c] sm:$0xf] %v222_v7  ;;  %v226_v9 = vld [vmem:[%s1268_s10 + $0x48] sm:$0xf] }
  0x1e   : > { %225 = vst [vmem:[%s1273_s11 + $0x20] sm:$0xf] %v224_v8  ;;  %v228_v10 = vld [vmem:[%s1268_s10 + $0x50] sm:$0xf]  ;;  %v230_v11 = vld [vmem:[%s1268_s10 + $0x58] sm:$0xf] }
  0x1f   : > { %227 = vst [vmem:[%s1273_s11 + $0x24] sm:$0xf] %v226_v9  ;;  %229 = vst [vmem:[%s1273_s11 + $0x28] sm:$0xf] %v228_v10  ;;  %v232_v12 = vld [vmem:[%s1268_s10 + $0x60] sm:$0xf] }
  0x20   : > { %231 = vst [vmem:[%s1273_s11 + $0x2c] sm:$0xf] %v230_v11  ;;  %v234_v13 = vld [vmem:[%s1268_s10 + $0x68] sm:$0xf]  ;;  %v236_v14 = vld [vmem:[%s1268_s10 + $0x70] sm:$0xf] }
  0x21   : > { %233 = vst [vmem:[%s1273_s11 + $0x30] sm:$0xf] %v232_v12  ;;  %235 = vst [vmem:[%s1273_s11 + $0x34] sm:$0xf] %v234_v13  ;;  %v238_v15 = vld [vmem:[%s1268_s10 + $0x78] sm:$0xf] }
  0x22   : > { %237 = vst [vmem:[%s1273_s11 + $0x38] sm:$0xf] %v236_v14  ;;  %v240_v16 = vld [vmem:[%s1268_s10 + $0x80] sm:$0xf]  ;;  %v242_v17 = vld [vmem:[%s1268_s10 + $0x88] sm:$0xf] }
  0x23   : > { %239 = vst [vmem:[%s1273_s11 + $0x3c] sm:$0xf] %v238_v15  ;;  %241 = vst [vmem:[%s1273_s11 + $0x40] sm:$0xf] %v240_v16  ;;  %v244_v18 = vld [vmem:[%s1268_s10 + $0x90] sm:$0xf] }
  0x24   : > { %243 = vst [vmem:[%s1273_s11 + $0x44] sm:$0xf] %v242_v17  ;;  %v246_v19 = vld [vmem:[%s1268_s10 + $0x98] sm:$0xf]  ;;  %v248_v20 = vld [vmem:[%s1268_s10 + $0xa0] sm:$0xf] }
  0x25   : > { %245 = vst [vmem:[%s1273_s11 + $0x48] sm:$0xf] %v244_v18  ;;  %247 = vst [vmem:[%s1273_s11 + $0x4c] sm:$0xf] %v246_v19  ;;  %v250_v21 = vld [vmem:[%s1268_s10 + $0xa8] sm:$0xf] }
  0x26   : > { %249 = vst [vmem:[%s1273_s11 + $0x50] sm:$0xf] %v248_v20  ;;  %v252_v22 = vld [vmem:[%s1268_s10 + $0xb0] sm:$0xf]  ;;  %v254_v23 = vld [vmem:[%s1268_s10 + $0xb8] sm:$0xf] }
  0x27   : > { %251 = vst [vmem:[%s1273_s11 + $0x54] sm:$0xf] %v250_v21  ;;  %253 = vst [vmem:[%s1273_s11 + $0x58] sm:$0xf] %v252_v22  ;;  %v256_v24 = vld [vmem:[%s1268_s10 + $0xc0] sm:$0xf] }
  0x28   : > { %255 = vst [vmem:[%s1273_s11 + $0x5c] sm:$0xf] %v254_v23  ;;  %v258_v25 = vld [vmem:[%s1268_s10 + $0xc8] sm:$0xf]  ;;  %v260_v26 = vld [vmem:[%s1268_s10 + $0xd0] sm:$0xf] }
  0x29   : > { %257 = vst [vmem:[%s1273_s11 + $0x60] sm:$0xf] %v256_v24  ;;  %259 = vst [vmem:[%s1273_s11 + $0x64] sm:$0xf] %v258_v25  ;;  %v262_v27 = vld [vmem:[%s1268_s10 + $0xd8] sm:$0xf] }
  0x2a   : > { %261 = vst [vmem:[%s1273_s11 + $0x68] sm:$0xf] %v260_v26  ;;  %v264_v28 = vld [vmem:[%s1268_s10 + $0xe0] sm:$0xf]  ;;  %v266_v29 = vld [vmem:[%s1268_s10 + $0xe8] sm:$0xf] }
  0x2b   : > { %263 = vst [vmem:[%s1273_s11 + $0x6c] sm:$0xf] %v262_v27  ;;  %265 = vst [vmem:[%s1273_s11 + $0x70] sm:$0xf] %v264_v28  ;;  %v268_v30 = vld [vmem:[%s1268_s10 + $0xf0] sm:$0xf] }
  0x2c   : > { %267 = vst [vmem:[%s1273_s11 + $0x74] sm:$0xf] %v266_v29  ;;  %v270_v31 = vld [vmem:[%s1268_s10 + $0xf8] sm:$0xf]  ;;  %v272_v32 = vld [vmem:[%s1268_s10 + $0x100] sm:$0xf] }
  0x2d   : > { %269 = vst [vmem:[%s1273_s11 + $0x78] sm:$0xf] %v268_v30  ;;  %271 = vst [vmem:[%s1273_s11 + $0x7c] sm:$0xf] %v270_v31  ;;  %v274_v33 = vld [vmem:[%s1268_s10 + $0x108] sm:$0xf] }
  0x2e   : > { %273 = vst [vmem:[%s1273_s11 + $0x80] sm:$0xf] %v272_v32  ;;  %v276_v34 = vld [vmem:[%s1268_s10 + $0x110] sm:$0xf]  ;;  %v278_v35 = vld [vmem:[%s1268_s10 + $0x118] sm:$0xf] }
  0x2f   : > { %275 = vst [vmem:[%s1273_s11 + $0x84] sm:$0xf] %v274_v33  ;;  %277 = vst [vmem:[%s1273_s11 + $0x88] sm:$0xf] %v276_v34  ;;  %v280_v36 = vld [vmem:[%s1268_s10 + $0x120] sm:$0xf] }
  0x30   : > { %279 = vst [vmem:[%s1273_s11 + $0x8c] sm:$0xf] %v278_v35  ;;  %v282_v37 = vld [vmem:[%s1268_s10 + $0x128] sm:$0xf]  ;;  %v284_v38 = vld [vmem:[%s1268_s10 + $0x130] sm:$0xf] }
  0x31   : > { %281 = vst [vmem:[%s1273_s11 + $0x90] sm:$0xf] %v280_v36  ;;  %283 = vst [vmem:[%s1273_s11 + $0x94] sm:$0xf] %v282_v37  ;;  %v286_v39 = vld [vmem:[%s1268_s10 + $0x138] sm:$0xf] }
  0x32   : > { %285 = vst [vmem:[%s1273_s11 + $0x98] sm:$0xf] %v284_v38  ;;  %v288_v40 = vld [vmem:[%s1268_s10 + $0x140] sm:$0xf]  ;;  %v290_v41 = vld [vmem:[%s1268_s10 + $0x148] sm:$0xf] }
  0x33   : > { %287 = vst [vmem:[%s1273_s11 + $0x9c] sm:$0xf] %v286_v39  ;;  %289 = vst [vmem:[%s1273_s11 + $0xa0] sm:$0xf] %v288_v40  ;;  %v292_v42 = vld [vmem:[%s1268_s10 + $0x150] sm:$0xf] }
  0x34   : > { %291 = vst [vmem:[%s1273_s11 + $0xa4] sm:$0xf] %v290_v41  ;;  %v294_v43 = vld [vmem:[%s1268_s10 + $0x158] sm:$0xf]  ;;  %v296_v44 = vld [vmem:[%s1268_s10 + $0x160] sm:$0xf] }
  0x35   : > { %293 = vst [vmem:[%s1273_s11 + $0xa8] sm:$0xf] %v292_v42  ;;  %295 = vst [vmem:[%s1273_s11 + $0xac] sm:$0xf] %v294_v43  ;;  %v298_v45 = vld [vmem:[%s1268_s10 + $0x168] sm:$0xf] }
  0x36   : > { %297 = vst [vmem:[%s1273_s11 + $0xb0] sm:$0xf] %v296_v44  ;;  %v300_v46 = vld [vmem:[%s1268_s10 + $0x170] sm:$0xf]  ;;  %v302_v47 = vld [vmem:[%s1268_s10 + $0x178] sm:$0xf] }
  0x37   : > { %299 = vst [vmem:[%s1273_s11 + $0xb4] sm:$0xf] %v298_v45  ;;  %301 = vst [vmem:[%s1273_s11 + $0xb8] sm:$0xf] %v300_v46 }
  0x38   : > { %303 = vst [vmem:[%s1273_s11 + $0xbc] sm:$0xf] %v302_v47 }
  0x39 PF: > { %p950_p7 = scmp.ge.s32.totalorder %s1177_s21, 1  ;;  %p433_p8 = scmp.lt.s32.totalorder %s1177_s21, 13 }
  0x3b   : > { %p434_p9 = pnand %p950_p7, %p433_p8 }
  0x3c   : > { %s440_s12 = sand.u32 (!%p434_p9), 1, %s1153_s15   ;;  %s474_s13 = smul.u32 (!%p434_p9), 3, %s1161_s17 }
  0x3d   : > { %437 = sbr.rel (%p434_p9) target bundleno = 394 (0x18a), region = 73  ;;  %p480_p10 = scmp.lt.s32.totalorder (!%p434_p9), %s1165_s18, 1 }
  0x3e   : > { %s1036_s14 = smul.u32 (!%p434_p9), 192, %s440_s12  ;;  %p475_p11 = scmp.lt.s32.totalorder (!%p434_p9), %s474_s13, 17 }
  0x3f   : > { %p952_p12 = scmp.ne.s32.totalorder (!%p434_p9), %s1161_s17, 0 }
  0x40   : > { %s1396_s11 = scalar_lea.vmem (!%p434_p9), [#allocation3], %s1036_s14 }
  0x44   : > { %s1479_s13 = smov (!%p475_p11, %s474_s13), 17  ;;  %s1481_s18 = smov (!%p480_p10, %s1165_s18), 1 }
  0x45   : > { %s477_s26 = scalar_lea.vmem %s1461_s0, %s1479_s13  ;;  %s482_s15 = scalar_lea.vmem %s1463_s2, %s1481_s18  ;;  %v1179_v48 = vmov (!%p952_p12), 0.0  }
  0x46   : > { %s485_s6 = scalar_lea.vmem %s1464_s3, %s1481_s18  ;;  %s951_s7 = sshll.u32 %s1481_s18, 1  ;;  %495 = vst [vmem:[#allocation2] sm:$0x3] (!%p952_p12), %v1179_v48 }
  0x47   : > { %s1394_s10 = scalar_lea.vmem %s1465_s4, %s951_s7  ;;  %494 = sbr.rel (%p952_p12) target bundleno = 78 (0x4e), region = 81 }
  0x4e PF: > { %v1097_v49 = vld [vmem:[%s1396_s11 + $0x40] sm:$0xff]   ;;  %v1180_v50 = vmov 0.0   ;;  %vm1181_vm0 = vmmov 0   ;;  %v1100_v53 = vld [vmem:[%s1396_s11 + $0x48] sm:$0xff]   ;;  %v1103_v56 = vld [vmem:[%s1396_s11 + $0x50] sm:$0xff]   ;;  %v558_v6 = vlaneseq  ;;  %p978_p13 = scmp.ne.s32.totalorder %s1161_s17, 5 }
  0x4f   : > { %1015 = vmatprep.subr.bf16.mxu1 %v1180_v50  ;;  %v1098_v51 = vld [vmem:[%s1396_s11] sm:$0xff]   ;;  %984 = vmatprep.subr.bf16.mxu0 %v1097_v49  ;;  %v1101_v54 = vld [vmem:[%s1396_s11 + $0x8] sm:$0xff]   ;;  %v1104_v57 = vld [vmem:[%s1396_s11 + $0x10] sm:$0xff]   ;;  %v1182_v10 = vmov 1966171168   ;;  %vm804_vm1 = vcmask (!%p978_p13), 1041408  }
  0x50   : > { %v1099_v52 = vld [vmem:[%s1396_s11 + $0x80] sm:$0xff]   ;;  %1031 = vmatprep.mubr.msk.bf16.mxu1 %vm1181_vm0, %v1180_v50  ;;  %985 = vmatpush3.bf16.msra.mxu0 %v1098_v51  ;;  %v1102_v55 = vld [vmem:[%s1396_s11 + $0x88] sm:$0xff]   ;;  %v1105_v58 = vld [vmem:[%s1396_s11 + $0x90] sm:$0xff]   ;;  %v556_v11 = vunpack.c.l.s4 %v1182_v10  ;;  %v559_v12 = vshrl.u32 %v558_v6, 7 }
  0x51   : > { %1016 = vmatpush3.bf16.msra.mxu1 %v1099_v52  ;;  %986 = vmatprep.subr.bf16.mxu0 %v1100_v53  ;;  %v1106_v59 = vld [vmem:[%s1396_s11 + $0x58] sm:$0xff]   ;;  %v1109_v62 = vld [vmem:[%s1396_s11 + $0x60] sm:$0xff]   ;;  %v1112_v1 = vld [vmem:[%s1396_s11 + $0x68] sm:$0xff]  }
  0x52   : > { %1017 = vmatprep.subr.bf16.mxu1 %v1180_v50  ;;  %v1107_v60 = vld [vmem:[%s1396_s11 + $0x18] sm:$0xff]   ;;  %v1110_v63 = vld [vmem:[%s1396_s11 + $0x20] sm:$0xff]   ;;  %v1113_v2 = vld [vmem:[%s1396_s11 + $0x28] sm:$0xff]   ;;  %v557_v15 = vunpack.c.0.s8 %v556_v11 }
  0x53   : > { %v1108_v61 = vld [vmem:[%s1396_s11 + $0x98] sm:$0xff]   ;;  %v1111_v0 = vld [vmem:[%s1396_s11 + $0xa0] sm:$0xff]   ;;  %v1114_v3 = vld [vmem:[%s1396_s11 + $0xa8] sm:$0xff]  }
  0x54   : > { %987 = vmatpush3.bf16.msra.mxu0 %v1101_v54  ;;  %v1115_v4 = vld [vmem:[%s1396_s11 + $0x70] sm:$0xff]   ;;  %v1118_v8 = vld [vmem:[%s1396_s11 + $0x78] sm:$0xff]   ;;  %v560_v17 = vsub.s32 %v557_v15, %v559_v12 }
  0x55   : > { %1018 = vmatpush3.bf16.msra.mxu1 %v1102_v55  ;;  %988 = vmatprep.subr.bf16.mxu0 %v1103_v56  ;;  %v1116_v5 = vld [vmem:[%s1396_s11 + $0x30] sm:$0xff]   ;;  %v953_v9 = vld.sshfl [vmem:[%s477_s26] sm:$0x13 pattern:$0x75316420] }
  0x56   : > { %1019 = vmatprep.subr.bf16.mxu1 %v1180_v50  ;;  %v1117_v7 = vld [vmem:[%s1396_s11 + $0xb0] sm:$0xff]   ;;  %v1119_v13 = vld [vmem:[%s1396_s11 + $0x38] sm:$0xff]   ;;  %v554_v14 = vcombine.high %v953_v9, %v953_v9  ;;  %v561_v19 = vrot.slane %v953_v9, %v560_v17 }
  0x57   : > { %v1120_v16 = vld [vmem:[%s1396_s11 + $0xb8] sm:$0xff]  }
  0x58   : > { %989 = vmatpush3.bf16.msra.mxu0 %v1104_v57  ;;  %v568_v18 = vrot.slane %v554_v14, %v560_v17  ;;  %v569_v20 = vcombine.high %v561_v19, %v561_v19  ;;  %v496_v27 = vld [vmem:[#allocation2] sm:$0x3] }
  0x59   : > { %1020 = vmatpush3.bf16.msra.mxu1 %v1105_v58  ;;  %990 = vmatprep.subr.bf16.mxu0 %v1106_v59  ;;  %v979_v54 = vld [vmem:[%s482_s15] ss:$0 sm:$0xff] (!%p978_p13) }
  0x5a   : > { %1021 = vmatprep.subr.bf16.mxu1 %v1180_v50  ;;  %749 = vmatprep.mubr.bf16.mxu0 %v568_v18  ;;  %v980_v56 = vld [vmem:[%s485_s6] ss:$0 sm:$0xff] (!%p978_p13) }
  0x5c   : > { %991 = vmatpush3.bf16.msra.mxu0 %v1107_v60 }
  0x5d   : > { %1022 = vmatpush3.bf16.msra.mxu1 %v1108_v61  ;;  %992 = vmatprep.subr.bf16.mxu0 %v1109_v62 }
  0x5e   : > { %1023 = vmatprep.subr.bf16.mxu1 %v1180_v50 }
  0x60   : > { %993 = vmatpush3.bf16.msra.mxu0 %v1110_v63 }
  0x61   : > { %1024 = vmatpush3.bf16.msra.mxu1 %v1111_v0  ;;  %994 = vmatprep.subr.bf16.mxu0 %v1112_v1 }
  0x62   : > { %1025 = vmatprep.subr.bf16.mxu1 %v1180_v50 }
  0x64   : > { %995 = vmatpush3.bf16.msra.mxu0 %v1113_v2 }
  0x65   : > { %1026 = vmatpush3.bf16.msra.mxu1 %v1114_v3  ;;  %996 = vmatprep.subr.bf16.mxu0 %v1115_v4 }
  0x66   : > { %1027 = vmatprep.subr.bf16.mxu1 %v1180_v50 }
  0x68   : > { %997 = vmatpush3.bf16.msra.mxu0 %v1116_v5 }
  0x69   : > { %1028 = vmatpush3.bf16.msra.mxu1 %v1117_v7  ;;  %998 = vmatprep.subr.bf16.mxu0 %v1118_v8 }
  0x6a   : > { %1029 = vmatprep.subr.bf16.mxu1 %v1180_v50 }
  0x6c   : > { %999 = vmatpush3.bf16.msra.mxu0 %v1119_v13 }
  0x6d   : > { %1030 = vmatpush3.bf16.msra.mxu1 %v1120_v16 }
  0x6f   : > { %750 = vmatmul.mubr.bf16.vlgmr.msra.gmra.mrb[0].mxu0 %v561_v19 }
  0x70   : > { %1032 = vmatmul.mubr.bf16.vlgmr.msra.gmra.mrb[0].mxu1 %v569_v20 }
 0x142   : > { %v1000_v21 = vpop.f32.mrb[0].mxu0 }
 0x143   : > { %v791_v22 = vpop.f32.mrb[0].mxu1  ;;  %v1001_v23 = vpop.f32.mrb[1].mxu0 }
 0x144   : > { %v1002_v24 = vadd.f32 %v1001_v23, %v1000_v21  ;;  %v1033_v25 = vpop.f32.mrb[1].mxu1  ;;  %v1003_v26 = vpop.f32.mrb[2].mxu0  ;;  %802 = sbr.rel (%p978_p13) target bundleno = 394 (0x18a), region = 85 }
 0x145   : > { %v794_v28 = vpop.f32.mrb[2].mxu1  ;;  %v1004_v29 = vpop.f32.mrb[3].mxu0 }
 0x146   : > { %v792_v30 = vadd.f32 %v1002_v24, %v791_v22  ;;  %v1034_v31 = vpop.f32.mrb[3].mxu1 }
 0x148   : > { %v797_v32 = vadd.f32 %v792_v30, %v496_v27 }
 0x14a   : > { %798 = vst [vmem:[#allocation2] sm:$0x3] %v797_v32 }
 0x151   : > { %v803_v33 = vld [vmem:[#allocation2] sm:$0x3] }
 0x152   : > { %v805_v34 = vsel %vm804_vm1, %v803_v33, 0.0 }
 0x153   : > { %v806_v35 = vrot.slane %v805_v34, 4 }
 0x155   : > { %v807_v36 = vadd.f32 %v806_v35, %v805_v34 }
 0x157   : > { %v808_v37 = vrot.slane %v807_v36, 2 }
 0x159   : > { %v809_v38 = vadd.f32 %v808_v37, %v807_v36 }
 0x15b   : > { %v810_v39 = vrot.slane %v809_v38, 1 }
 0x15d   : > { %v811_v40 = vadd.f32 %v810_v39, %v809_v38 }
 0x15f   : > { %v813_v41 = vmul.f32 0.5, %v811_v40 }
 0x161   : > { %v814_v42 = vsub.f32 %v803_v33, %v813_v41 }
 0x163   : > { %v815_v43 = vmul.f32 %v814_v42, %v814_v42 }
 0x165   : > { %v816_v44 = vsel %vm804_vm1, %v815_v43, 0.0 }
 0x166   : > { %v817_v45 = vrot.slane %v816_v44, 4 }
 0x168   : > { %v818_v46 = vadd.f32 %v817_v45, %v816_v44 }
 0x16a   : > { %v819_v47 = vrot.slane %v818_v46, 2 }
 0x16c   : > { %v820_v48 = vadd.f32 %v819_v47, %v818_v46 }
 0x16e   : > { %v821_v49 = vrot.slane %v820_v48, 1 }
 0x170   : > { %v822_v50 = vadd.f32 %v821_v49, %v820_v48 }
 0x172   : > { %v823_v51 = vmul.f32 0.5, %v822_v50 }
 0x174   : > { %v824_v52 = vadd.f32 1e-05, %v823_v51 }
 0x176   : > { %1121 = vrsqrt.f32 %v824_v52 }
 0x180   : > { %v1122_v53 = vpop.eup %1121 }
 0x181   : > { %v826_v55 = vmul.f32 %v1122_v53, %v814_v42 }
 0x183   : > { %v834_v57 = vmul.f32 %v979_v54, %v826_v55 }
 0x185   : > { %v842_v58 = vadd.f32 %v980_v56, %v834_v57 }
 0x187   : > { %v843_v59 = vmax.f32 %v842_v58, 0.0 }
 0x189   : > { %844 = vst [vmem:[%s1394_s10] sm:$0x3] %v843_v59 }
 0x18a PF: > { %s14_s21 = sadd.s32 1, %s1177_s21   ;;  %s1466_s15 = smov %s1157_s16 }
 0x18b   : > { %p11_p0 = scmp.ge.s32.totalorder %s14_s21, 14   ;;  %s1467_s16 = smov %s1259_s28 }
 0x18c   : > { %s1468_s17 = smov %s1169_s19  ;;  %s1469_s18 = smov %s1173_s20 }
 0x18d   : > { %s1470_s19 = smov %s1473_s22  ;;  %s1471_s20 = smov %s1477_s23 }
 0x18e   :  { %13 = sbr.rel (!%p11_p0) target bundleno = 4 (0x4), region = 129 }

// kernel: shedd_forward.57
= control target key start
LH: loop header
LB: loop body
LE: loop exit
PB: predicated region body
PF: predicated region fallthrough
CT: control target
= control target key end

     0   :  { %s1208_s15 = smov 0   ;;  %s1210_s16 = smov 0   ;;  %s1461_s0 = inlined_call_operand.vmem [shape: bf16[2,2304], index: 0, kind: input, shape index: {}]   ;;  %s1462_s1 = inlined_call_operand.vmem [shape: bf16[2304,512], index: 1, kind: input, shape index: {}]   ;;  %s1463_s2 = inlined_call_operand.vmem [shape: f32[1,512], index: 2, kind: input, shape index: {}]   ;;  %s1464_s3 = inlined_call_operand.vmem [shape: f32[1,512], index: 3, kind: input, shape index: {}]   ;;  %s1465_s4 = inlined_call_operand.vmem [shape: f32[2,512], index: 4, kind: output, shape index: {}]  }
   0x1   :  { %s1212_s17 = smov 0   ;;  %s1214_s18 = smov 0  }
   0x2   :  { %s1216_s19 = smov 0   ;;  %s1218_s20 = smov 0  }
   0x3   :  { %s1220_s21 = smov 0  }
   0x4 LB: > { %s23_s22 = sadd.s32 1, %s1169_s19  ;;  %s26_s23 = sadd.s32 1, %s1173_s20  ;;  %s1177_s21 = sphi %s1220_s21, %s14_s21   ;;  %s1173_s20 = sphi %s1218_s20, %s1471_s20   ;;  %s1169_s19 = sphi %s1216_s19, %s1470_s19   ;;  %s1165_s18 = sphi %s1214_s18, %s1469_s18   ;;  %s1161_s17 = sphi %s1212_s17, %s1468_s17   ;;  %s1157_s16 = sphi %s1210_s16, %s1467_s16   ;;  %s1153_s15 = sphi %s1208_s15, %s1466_s15  }
   0x5   : > { %p24_p0 = scmp.ge.s32.totalorder %s23_s22, 6  ;;  %p68_p1 = scmp.ne.s32.totalorder %s1157_s16, %s1153_s15 }
   0x6   : > { %p69_p2 = scmp.eq.s32.totalorder %s1177_s21, 0  ;;  %s61_s27 = sadd.s32 1, %s1157_s16 }
   0x7   : > { %s1473_s22 = smov (%p24_p0, %s23_s22), 0  ;;  %s1475_s23 = smov (!%p24_p0, %s26_s23), %s1173_s20 }
   0x8   : > { %p70_p3 = por %p69_p2, %p68_p1  ;;  %p28_p4 = scmp.ge.s32.totalorder %s1475_s23, 4 }
   0x9   : > { %s56_s24 = ssub.s32 %s1169_s19, %s1473_s22  ;;  %p947_p6 = scmp.ge.s32.totalorder %s1177_s21, 24 }
   0xa   : > { %s1477_s23 = smov (%p28_p4, %s1475_s23), 0 }
   0xb   : > { %s57_s25 = ssub.s32 %s1173_s20, %s1477_s23  ;;  %172 = sbr.rel (%p947_p6) target bundleno = 57 (0x39), region = 16 }
   0xc   : > { %s58_s26 = sor.u32 %s57_s25, %s56_s24 }
   0xd   : > { %p59_p5 = scmp.eq.s32.totalorder %s58_s26, 0 }
   0xf   : > { %s1259_s28 = scalar_select %p59_p5, %s1157_s16, %s61_s27  }
  0x12   : > { %183 = sbr.rel (!%p70_p3) target bundleno = 57 (0x39), region = 24  ;;  %s185_s29 = sand.u32 (%p70_p3), 1, %s1157_s16  }
  0x13   : > { %s983_s30 = smul.u32 (%p70_p3), 192, %s1169_s19 }
  0x14   : > { %s1035_s5 = smul.u32 (%p70_p3), 192, %s185_s29 }
  0x15   : > { %s190_s6 = sadd.s32 (%p70_p3), %s1173_s20, %s983_s30 }
  0x16   : > { %s949_s7 = sshll.u32 (%p70_p3), %s190_s6, 2  ;;  %s1273_s11 = scalar_lea.vmem (%p70_p3), [#allocation3], %s1035_s5 }
  0x17   : > { %s1268_s10 = scalar_lea.vmem (%p70_p3), %s1462_s1, %s949_s7 }
  0x18   : > { %v208_v0 = vld [vmem:[%s1268_s10] sm:$0xf] (%p70_p3)  ;;  %v210_v1 = vld [vmem:[%s1268_s10 + $0x10] sm:$0xf] (%p70_p3) }
  0x19   : > { %v212_v2 = vld [vmem:[%s1268_s10 + $0x20] sm:$0xf]  ;;  %209 = vst [vmem:[%s1273_s11] sm:$0xf] %v208_v0  ;;  %211 = vst [vmem:[%s1273_s11 + $0x4] sm:$0xf] %v210_v1 }
  0x1a   : > { %213 = vst [vmem:[%s1273_s11 + $0x8] sm:$0xf] %v212_v2  ;;  %v214_v3 = vld [vmem:[%s1268_s10 + $0x30] sm:$0xf]  ;;  %v216_v4 = vld [vmem:[%s1268_s10 + $0x40] sm:$0xf] }
  0x1b   : > { %v218_v5 = vld [vmem:[%s1268_s10 + $0x50] sm:$0xf]  ;;  %215 = vst [vmem:[%s1273_s11 + $0xc] sm:$0xf] %v214_v3  ;;  %217 = vst [vmem:[%s1273_s11 + $0x10] sm:$0xf] %v216_v4 }
  0x1c   : > { %219 = vst [vmem:[%s1273_s11 + $0x14] sm:$0xf] %v218_v5  ;;  %v220_v6 = vld [vmem:[%s1268_s10 + $0x60] sm:$0xf]  ;;  %v222_v7 = vld [vmem:[%s1268_s10 + $0x70] sm:$0xf] }
  0x1d   : > { %v224_v8 = vld [vmem:[%s1268_s10 + $0x80] sm:$0xf]  ;;  %221 = vst [vmem:[%s1273_s11 + $0x18] sm:$0xf] %v220_v6  ;;  %223 = vst [vmem:[%s1273_s11 + $0x1c] sm:$0xf] %v222_v7 }
  0x1e   : > { %225 = vst [vmem:[%s1273_s11 + $0x20] sm:$0xf] %v224_v8  ;;  %v226_v9 = vld [vmem:[%s1268_s10 + $0x90] sm:$0xf]  ;;  %v228_v10 = vld [vmem:[%s1268_s10 + $0xa0] sm:$0xf] }
  0x1f   : > { %v230_v11 = vld [vmem:[%s1268_s10 + $0xb0] sm:$0xf]  ;;  %227 = vst [vmem:[%s1273_s11 + $0x24] sm:$0xf] %v226_v9  ;;  %229 = vst [vmem:[%s1273_s11 + $0x28] sm:$0xf] %v228_v10 }
  0x20   : > { %231 = vst [vmem:[%s1273_s11 + $0x2c] sm:$0xf] %v230_v11  ;;  %v232_v12 = vld [vmem:[%s1268_s10 + $0xc0] sm:$0xf]  ;;  %v234_v13 = vld [vmem:[%s1268_s10 + $0xd0] sm:$0xf] }
  0x21   : > { %v236_v14 = vld [vmem:[%s1268_s10 + $0xe0] sm:$0xf]  ;;  %233 = vst [vmem:[%s1273_s11 + $0x30] sm:$0xf] %v232_v12  ;;  %235 = vst [vmem:[%s1273_s11 + $0x34] sm:$0xf] %v234_v13 }
  0x22   : > { %237 = vst [vmem:[%s1273_s11 + $0x38] sm:$0xf] %v236_v14  ;;  %v238_v15 = vld [vmem:[%s1268_s10 + $0xf0] sm:$0xf]  ;;  %v240_v16 = vld [vmem:[%s1268_s10 + $0x100] sm:$0xf] }
  0x23   : > { %v242_v17 = vld [vmem:[%s1268_s10 + $0x110] sm:$0xf]  ;;  %239 = vst [vmem:[%s1273_s11 + $0x3c] sm:$0xf] %v238_v15  ;;  %241 = vst [vmem:[%s1273_s11 + $0x40] sm:$0xf] %v240_v16 }
  0x24   : > { %243 = vst [vmem:[%s1273_s11 + $0x44] sm:$0xf] %v242_v17  ;;  %v244_v18 = vld [vmem:[%s1268_s10 + $0x120] sm:$0xf]  ;;  %v246_v19 = vld [vmem:[%s1268_s10 + $0x130] sm:$0xf] }
  0x25   : > { %v248_v20 = vld [vmem:[%s1268_s10 + $0x140] sm:$0xf]  ;;  %245 = vst [vmem:[%s1273_s11 + $0x48] sm:$0xf] %v244_v18  ;;  %247 = vst [vmem:[%s1273_s11 + $0x4c] sm:$0xf] %v246_v19 }
  0x26   : > { %249 = vst [vmem:[%s1273_s11 + $0x50] sm:$0xf] %v248_v20  ;;  %v250_v21 = vld [vmem:[%s1268_s10 + $0x150] sm:$0xf]  ;;  %v252_v22 = vld [vmem:[%s1268_s10 + $0x160] sm:$0xf] }
  0x27   : > { %v254_v23 = vld [vmem:[%s1268_s10 + $0x170] sm:$0xf]  ;;  %251 = vst [vmem:[%s1273_s11 + $0x54] sm:$0xf] %v250_v21  ;;  %253 = vst [vmem:[%s1273_s11 + $0x58] sm:$0xf] %v252_v22 }
  0x28   : > { %255 = vst [vmem:[%s1273_s11 + $0x5c] sm:$0xf] %v254_v23  ;;  %v256_v24 = vld [vmem:[%s1268_s10 + $0x180] sm:$0xf]  ;;  %v258_v25 = vld [vmem:[%s1268_s10 + $0x190] sm:$0xf] }
  0x29   : > { %v260_v26 = vld [vmem:[%s1268_s10 + $0x1a0] sm:$0xf]  ;;  %257 = vst [vmem:[%s1273_s11 + $0x60] sm:$0xf] %v256_v24  ;;  %259 = vst [vmem:[%s1273_s11 + $0x64] sm:$0xf] %v258_v25 }
  0x2a   : > { %261 = vst [vmem:[%s1273_s11 + $0x68] sm:$0xf] %v260_v26  ;;  %v262_v27 = vld [vmem:[%s1268_s10 + $0x1b0] sm:$0xf]  ;;  %v264_v28 = vld [vmem:[%s1268_s10 + $0x1c0] sm:$0xf] }
  0x2b   : > { %v266_v29 = vld [vmem:[%s1268_s10 + $0x1d0] sm:$0xf]  ;;  %263 = vst [vmem:[%s1273_s11 + $0x6c] sm:$0xf] %v262_v27  ;;  %265 = vst [vmem:[%s1273_s11 + $0x70] sm:$0xf] %v264_v28 }
  0x2c   : > { %267 = vst [vmem:[%s1273_s11 + $0x74] sm:$0xf] %v266_v29  ;;  %v268_v30 = vld [vmem:[%s1268_s10 + $0x1e0] sm:$0xf]  ;;  %v270_v31 = vld [vmem:[%s1268_s10 + $0x1f0] sm:$0xf] }
  0x2d   : > { %v272_v32 = vld [vmem:[%s1268_s10 + $0x200] sm:$0xf]  ;;  %269 = vst [vmem:[%s1273_s11 + $0x78] sm:$0xf] %v268_v30  ;;  %271 = vst [vmem:[%s1273_s11 + $0x7c] sm:$0xf] %v270_v31 }
  0x2e   : > { %273 = vst [vmem:[%s1273_s11 + $0x80] sm:$0xf] %v272_v32  ;;  %v274_v33 = vld [vmem:[%s1268_s10 + $0x210] sm:$0xf]  ;;  %v276_v34 = vld [vmem:[%s1268_s10 + $0x220] sm:$0xf] }
  0x2f   : > { %v278_v35 = vld [vmem:[%s1268_s10 + $0x230] sm:$0xf]  ;;  %275 = vst [vmem:[%s1273_s11 + $0x84] sm:$0xf] %v274_v33  ;;  %277 = vst [vmem:[%s1273_s11 + $0x88] sm:$0xf] %v276_v34 }
  0x30   : > { %279 = vst [vmem:[%s1273_s11 + $0x8c] sm:$0xf] %v278_v35  ;;  %v280_v36 = vld [vmem:[%s1268_s10 + $0x240] sm:$0xf]  ;;  %v282_v37 = vld [vmem:[%s1268_s10 + $0x250] sm:$0xf] }
  0x31   : > { %v284_v38 = vld [vmem:[%s1268_s10 + $0x260] sm:$0xf]  ;;  %281 = vst [vmem:[%s1273_s11 + $0x90] sm:$0xf] %v280_v36  ;;  %283 = vst [vmem:[%s1273_s11 + $0x94] sm:$0xf] %v282_v37 }
  0x32   : > { %285 = vst [vmem:[%s1273_s11 + $0x98] sm:$0xf] %v284_v38  ;;  %v286_v39 = vld [vmem:[%s1268_s10 + $0x270] sm:$0xf]  ;;  %v288_v40 = vld [vmem:[%s1268_s10 + $0x280] sm:$0xf] }
  0x33   : > { %v290_v41 = vld [vmem:[%s1268_s10 + $0x290] sm:$0xf]  ;;  %287 = vst [vmem:[%s1273_s11 + $0x9c] sm:$0xf] %v286_v39  ;;  %289 = vst [vmem:[%s1273_s11 + $0xa0] sm:$0xf] %v288_v40 }
  0x34   : > { %291 = vst [vmem:[%s1273_s11 + $0xa4] sm:$0xf] %v290_v41  ;;  %v292_v42 = vld [vmem:[%s1268_s10 + $0x2a0] sm:$0xf]  ;;  %v294_v43 = vld [vmem:[%s1268_s10 + $0x2b0] sm:$0xf] }
  0x35   : > { %v296_v44 = vld [vmem:[%s1268_s10 + $0x2c0] sm:$0xf]  ;;  %293 = vst [vmem:[%s1273_s11 + $0xa8] sm:$0xf] %v292_v42  ;;  %295 = vst [vmem:[%s1273_s11 + $0xac] sm:$0xf] %v294_v43 }
  0x36   : > { %297 = vst [vmem:[%s1273_s11 + $0xb0] sm:$0xf] %v296_v44  ;;  %v298_v45 = vld [vmem:[%s1268_s10 + $0x2d0] sm:$0xf]  ;;  %v300_v46 = vld [vmem:[%s1268_s10 + $0x2e0] sm:$0xf] }
  0x37   : > { %v302_v47 = vld [vmem:[%s1268_s10 + $0x2f0] sm:$0xf]  ;;  %299 = vst [vmem:[%s1273_s11 + $0xb4] sm:$0xf] %v298_v45  ;;  %301 = vst [vmem:[%s1273_s11 + $0xb8] sm:$0xf] %v300_v46 }
  0x38   : > { %303 = vst [vmem:[%s1273_s11 + $0xbc] sm:$0xf] %v302_v47 }
  0x39 PF: > { %p950_p7 = scmp.ge.s32.totalorder %s1177_s21, 1  ;;  %p433_p8 = scmp.lt.s32.totalorder %s1177_s21, 25 }
  0x3b   : > { %p434_p9 = pnand %p950_p7, %p433_p8 }
  0x3c   : > { %s440_s12 = sand.u32 (!%p434_p9), 1, %s1153_s15   ;;  %s474_s13 = smul.u32 (!%p434_p9), 3, %s1161_s17 }
  0x3d   : > { %437 = sbr.rel (%p434_p9) target bundleno = 394 (0x18a), region = 73  ;;  %p480_p10 = scmp.lt.s32.totalorder (!%p434_p9), %s1165_s18, 3 }
  0x3e   : > { %s1036_s14 = smul.u32 (!%p434_p9), 192, %s440_s12  ;;  %p475_p11 = scmp.lt.s32.totalorder (!%p434_p9), %s474_s13, 17 }
  0x3f   : > { %p952_p12 = scmp.ne.s32.totalorder (!%p434_p9), %s1161_s17, 0 }
  0x40   : > { %s1396_s11 = scalar_lea.vmem (!%p434_p9), [#allocation3], %s1036_s14 }
  0x44   : > { %s1479_s13 = smov (!%p475_p11, %s474_s13), 17  ;;  %s1481_s18 = smov (!%p480_p10, %s1165_s18), 3 }
  0x45   : > { %s477_s26 = scalar_lea.vmem %s1461_s0, %s1479_s13  ;;  %s482_s15 = scalar_lea.vmem %s1463_s2, %s1481_s18  ;;  %v1179_v48 = vmov (!%p952_p12), 0.0  }
  0x46   : > { %s485_s6 = scalar_lea.vmem %s1464_s3, %s1481_s18  ;;  %s951_s7 = sshll.u32 %s1481_s18, 1  ;;  %495 = vst [vmem:[#allocation2] sm:$0x3] (!%p952_p12), %v1179_v48 }
  0x47   : > { %s1394_s10 = scalar_lea.vmem %s1465_s4, %s951_s7  ;;  %494 = sbr.rel (%p952_p12) target bundleno = 78 (0x4e), region = 81 }
  0x4e PF: > { %v1097_v49 = vld [vmem:[%s1396_s11 + $0x40] sm:$0xff]   ;;  %v1180_v50 = vmov 0.0   ;;  %vm1181_vm0 = vmmov 0   ;;  %v1100_v53 = vld [vmem:[%s1396_s11 + $0x48] sm:$0xff]   ;;  %v1103_v56 = vld [vmem:[%s1396_s11 + $0x50] sm:$0xff]   ;;  %v558_v6 = vlaneseq  ;;  %p978_p13 = scmp.ne.s32.totalorder %s1161_s17, 5 }
  0x4f   : > { %1015 = vmatprep.subr.bf16.mxu1 %v1180_v50  ;;  %v1098_v51 = vld [vmem:[%s1396_s11] sm:$0xff]   ;;  %984 = vmatprep.subr.bf16.mxu0 %v1097_v49  ;;  %v1101_v54 = vld [vmem:[%s1396_s11 + $0x8] sm:$0xff]   ;;  %v1104_v57 = vld [vmem:[%s1396_s11 + $0x10] sm:$0xff]   ;;  %v1182_v10 = vmov 1966171168   ;;  %vm804_vm1 = vcmask (!%p978_p13), 1041408  }
  0x50   : > { %v1099_v52 = vld [vmem:[%s1396_s11 + $0x80] sm:$0xff]   ;;  %1031 = vmatprep.mubr.msk.bf16.mxu1 %vm1181_vm0, %v1180_v50  ;;  %985 = vmatpush3.bf16.msra.mxu0 %v1098_v51  ;;  %v1102_v55 = vld [vmem:[%s1396_s11 + $0x88] sm:$0xff]   ;;  %v1105_v58 = vld [vmem:[%s1396_s11 + $0x90] sm:$0xff]   ;;  %v556_v11 = vunpack.c.l.s4 %v1182_v10  ;;  %v559_v12 = vshrl.u32 %v558_v6, 7 }
  0x51   : > { %1016 = vmatpush3.bf16.msra.mxu1 %v1099_v52  ;;  %986 = vmatprep.subr.bf16.mxu0 %v1100_v53  ;;  %v1106_v59 = vld [vmem:[%s1396_s11 + $0x58] sm:$0xff]   ;;  %v1109_v62 = vld [vmem:[%s1396_s11 + $0x60] sm:$0xff]   ;;  %v1112_v1 = vld [vmem:[%s1396_s11 + $0x68] sm:$0xff]  }
  0x52   : > { %1017 = vmatprep.subr.bf16.mxu1 %v1180_v50  ;;  %v1107_v60 = vld [vmem:[%s1396_s11 + $0x18] sm:$0xff]   ;;  %v1110_v63 = vld [vmem:[%s1396_s11 + $0x20] sm:$0xff]   ;;  %v1113_v2 = vld [vmem:[%s1396_s11 + $0x28] sm:$0xff]   ;;  %v557_v15 = vunpack.c.0.s8 %v556_v11 }
  0x53   : > { %v1108_v61 = vld [vmem:[%s1396_s11 + $0x98] sm:$0xff]   ;;  %v1111_v0 = vld [vmem:[%s1396_s11 + $0xa0] sm:$0xff]   ;;  %v1114_v3 = vld [vmem:[%s1396_s11 + $0xa8] sm:$0xff]  }
  0x54   : > { %987 = vmatpush3.bf16.msra.mxu0 %v1101_v54  ;;  %v1115_v4 = vld [vmem:[%s1396_s11 + $0x70] sm:$0xff]   ;;  %v1118_v8 = vld [vmem:[%s1396_s11 + $0x78] sm:$0xff]   ;;  %v560_v17 = vsub.s32 %v557_v15, %v559_v12 }
  0x55   : > { %1018 = vmatpush3.bf16.msra.mxu1 %v1102_v55  ;;  %988 = vmatprep.subr.bf16.mxu0 %v1103_v56  ;;  %v1116_v5 = vld [vmem:[%s1396_s11 + $0x30] sm:$0xff]   ;;  %v953_v9 = vld.sshfl [vmem:[%s477_s26] sm:$0x13 pattern:$0x75316420] }
  0x56   : > { %1019 = vmatprep.subr.bf16.mxu1 %v1180_v50  ;;  %v1117_v7 = vld [vmem:[%s1396_s11 + $0xb0] sm:$0xff]   ;;  %v1119_v13 = vld [vmem:[%s1396_s11 + $0x38] sm:$0xff]   ;;  %v554_v14 = vcombine.high %v953_v9, %v953_v9  ;;  %v561_v19 = vrot.slane %v953_v9, %v560_v17 }
  0x57   : > { %v1120_v16 = vld [vmem:[%s1396_s11 + $0xb8] sm:$0xff]  }
  0x58   : > { %989 = vmatpush3.bf16.msra.mxu0 %v1104_v57  ;;  %v568_v18 = vrot.slane %v554_v14, %v560_v17  ;;  %v569_v20 = vcombine.high %v561_v19, %v561_v19  ;;  %v496_v27 = vld [vmem:[#allocation2] sm:$0x3] }
  0x59   : > { %1020 = vmatpush3.bf16.msra.mxu1 %v1105_v58  ;;  %990 = vmatprep.subr.bf16.mxu0 %v1106_v59  ;;  %v979_v54 = vld [vmem:[%s482_s15] ss:$0 sm:$0xff] (!%p978_p13) }
  0x5a   : > { %1021 = vmatprep.subr.bf16.mxu1 %v1180_v50  ;;  %749 = vmatprep.mubr.bf16.mxu0 %v568_v18  ;;  %v980_v56 = vld [vmem:[%s485_s6] ss:$0 sm:$0xff] (!%p978_p13) }
  0x5c   : > { %991 = vmatpush3.bf16.msra.mxu0 %v1107_v60 }
  0x5d   : > { %1022 = vmatpush3.bf16.msra.mxu1 %v1108_v61  ;;  %992 = vmatprep.subr.bf16.mxu0 %v1109_v62 }
  0x5e   : > { %1023 = vmatprep.subr.bf16.mxu1 %v1180_v50 }
  0x60   : > { %993 = vmatpush3.bf16.msra.mxu0 %v1110_v63 }
  0x61   : > { %1024 = vmatpush3.bf16.msra.mxu1 %v1111_v0  ;;  %994 = vmatprep.subr.bf16.mxu0 %v1112_v1 }
  0x62   : > { %1025 = vmatprep.subr.bf16.mxu1 %v1180_v50 }
  0x64   : > { %995 = vmatpush3.bf16.msra.mxu0 %v1113_v2 }
  0x65   : > { %1026 = vmatpush3.bf16.msra.mxu1 %v1114_v3  ;;  %996 = vmatprep.subr.bf16.mxu0 %v1115_v4 }
  0x66   : > { %1027 = vmatprep.subr.bf16.mxu1 %v1180_v50 }
  0x68   : > { %997 = vmatpush3.bf16.msra.mxu0 %v1116_v5 }
  0x69   : > { %1028 = vmatpush3.bf16.msra.mxu1 %v1117_v7  ;;  %998 = vmatprep.subr.bf16.mxu0 %v1118_v8 }
  0x6a   : > { %1029 = vmatprep.subr.bf16.mxu1 %v1180_v50 }
  0x6c   : > { %999 = vmatpush3.bf16.msra.mxu0 %v1119_v13 }
  0x6d   : > { %1030 = vmatpush3.bf16.msra.mxu1 %v1120_v16 }
  0x6f   : > { %750 = vmatmul.mubr.bf16.vlgmr.msra.gmra.mrb[0].mxu0 %v561_v19 }
  0x70   : > { %1032 = vmatmul.mubr.bf16.vlgmr.msra.gmra.mrb[0].mxu1 %v569_v20 }
 0x142   : > { %v1000_v21 = vpop.f32.mrb[0].mxu0 }
 0x143   : > { %v791_v22 = vpop.f32.mrb[0].mxu1  ;;  %v1001_v23 = vpop.f32.mrb[1].mxu0 }
 0x144   : > { %v1002_v24 = vadd.f32 %v1001_v23, %v1000_v21  ;;  %v1033_v25 = vpop.f32.mrb[1].mxu1  ;;  %v1003_v26 = vpop.f32.mrb[2].mxu0  ;;  %802 = sbr.rel (%p978_p13) target bundleno = 394 (0x18a), region = 85 }
 0x145   : > { %v794_v28 = vpop.f32.mrb[2].mxu1  ;;  %v1004_v29 = vpop.f32.mrb[3].mxu0 }
 0x146   : > { %v792_v30 = vadd.f32 %v1002_v24, %v791_v22  ;;  %v1034_v31 = vpop.f32.mrb[3].mxu1 }
 0x148   : > { %v797_v32 = vadd.f32 %v792_v30, %v496_v27 }
 0x14a   : > { %798 = vst [vmem:[#allocation2] sm:$0x3] %v797_v32 }
 0x151   : > { %v803_v33 = vld [vmem:[#allocation2] sm:$0x3] }
 0x152   : > { %v805_v34 = vsel %vm804_vm1, %v803_v33, 0.0 }
 0x153   : > { %v806_v35 = vrot.slane %v805_v34, 4 }
 0x155   : > { %v807_v36 = vadd.f32 %v806_v35, %v805_v34 }
 0x157   : > { %v808_v37 = vrot.slane %v807_v36, 2 }
 0x159   : > { %v809_v38 = vadd.f32 %v808_v37, %v807_v36 }
 0x15b   : > { %v810_v39 = vrot.slane %v809_v38, 1 }
 0x15d   : > { %v811_v40 = vadd.f32 %v810_v39, %v809_v38 }
 0x15f   : > { %v813_v41 = vmul.f32 0.5, %v811_v40 }
 0x161   : > { %v814_v42 = vsub.f32 %v803_v33, %v813_v41 }
 0x163   : > { %v815_v43 = vmul.f32 %v814_v42, %v814_v42 }
 0x165   : > { %v816_v44 = vsel %vm804_vm1, %v815_v43, 0.0 }
 0x166   : > { %v817_v45 = vrot.slane %v816_v44, 4 }
 0x168   : > { %v818_v46 = vadd.f32 %v817_v45, %v816_v44 }
 0x16a   : > { %v819_v47 = vrot.slane %v818_v46, 2 }
 0x16c   : > { %v820_v48 = vadd.f32 %v819_v47, %v818_v46 }
 0x16e   : > { %v821_v49 = vrot.slane %v820_v48, 1 }
 0x170   : > { %v822_v50 = vadd.f32 %v821_v49, %v820_v48 }
 0x172   : > { %v823_v51 = vmul.f32 0.5, %v822_v50 }
 0x174   : > { %v824_v52 = vadd.f32 1e-05, %v823_v51 }
 0x176   : > { %1121 = vrsqrt.f32 %v824_v52 }
 0x180   : > { %v1122_v53 = vpop.eup %1121 }
 0x181   : > { %v826_v55 = vmul.f32 %v1122_v53, %v814_v42 }
 0x183   : > { %v834_v57 = vmul.f32 %v979_v54, %v826_v55 }
 0x185   : > { %v842_v58 = vadd.f32 %v980_v56, %v834_v57 }
 0x187   : > { %v843_v59 = vmax.f32 %v842_v58, 0.0 }
 0x189   : > { %844 = vst [vmem:[%s1394_s10] sm:$0x3] %v843_v59 }
 0x18a PF: > { %s14_s21 = sadd.s32 1, %s1177_s21   ;;  %s1466_s15 = smov %s1157_s16 }
 0x18b   : > { %p11_p0 = scmp.ge.s32.totalorder %s14_s21, 26   ;;  %s1467_s16 = smov %s1259_s28 }
 0x18c   : > { %s1468_s17 = smov %s1169_s19  ;;  %s1469_s18 = smov %s1173_s20 }
 0x18d   : > { %s1470_s19 = smov %s1473_s22  ;;  %s1471_s20 = smov %s1477_s23 }
 0x18e   :  { %13 = sbr.rel (!%p11_p0) target bundleno = 4 (0x4), region = 129 }

// kernel: shedd_forward.58
= control target key start
LH: loop header
LB: loop body
LE: loop exit
PB: predicated region body
PF: predicated region fallthrough
CT: control target
= control target key end

     0   :  { %s953_s15 = smov 0   ;;  %s955_s16 = smov 0   ;;  %s1114_s0 = inlined_call_operand.vmem [shape: bf16[2,256], index: 0, kind: input, shape index: {}]   ;;  %s1115_s1 = inlined_call_operand.vmem [shape: bf16[256,512], index: 1, kind: input, shape index: {}]   ;;  %s1116_s2 = inlined_call_operand.vmem [shape: f32[1,512], index: 2, kind: input, shape index: {}]   ;;  %s1117_s3 = inlined_call_operand.vmem [shape: f32[1,512], index: 3, kind: input, shape index: {}]   ;;  %s1118_s4 = inlined_call_operand.vmem [shape: f32[2,512], index: 4, kind: output, shape index: {}]  }
   0x1   :  { %s957_s17 = smov 0   ;;  %s959_s18 = smov 0  }
   0x2   :  { %s961_s19 = smov 0  }
   0x3 LB: > { %s26_s20 = sadd.s32 1, %s920_s18  ;;  %p68_p1 = scmp.ne.s32.totalorder %s912_s16, %s908_s15  ;;  %s924_s19 = sphi %s961_s19, %s14_s19   ;;  %s920_s18 = sphi %s959_s18, %s1122_s18   ;;  %s916_s17 = sphi %s957_s17, %s1121_s17   ;;  %s912_s16 = sphi %s955_s16, %s1120_s16   ;;  %s908_s15 = sphi %s953_s15, %s1119_s15  }
   0x4   : > { %p28_p0 = scmp.ge.s32.totalorder %s26_s20, 4  ;;  %p69_p2 = scmp.eq.s32.totalorder %s924_s19, 0 }
   0x5   : > { %s61_s22 = sadd.s32 1, %s912_s16  ;;  %p777_p5 = scmp.ge.s32.totalorder %s924_s19, 4 }
   0x6   : > { %s1124_s20 = smov (%p28_p0, %s26_s20), 0  ;;  %p70_p3 = por %p69_p2, %p68_p1 }
   0x7   : > { %s57_s21 = ssub.s32 %s920_s18, %s1124_s20  ;;  %180 = sbr.rel (%p777_p5) target bundleno = 39 (0x27), region = 20 }
   0x8   : > { %p59_p4 = scmp.eq.s32.totalorder %s57_s21, 0 }
   0xa   : > { %s988_s23 = scalar_select %p59_p4, %s912_s16, %s61_s22  }
   0xe   : > { %183 = sbr.rel (!%p70_p3) target bundleno = 39 (0x27), region = 24  ;;  %s185_s24 = sand.u32 (%p70_p3), 1, %s912_s16  }
   0xf   : > { %s779_s25 = sshll.u32 (%p70_p3), %s920_s18, 2  ;;  %s778_s26 = sshll.u32 (%p70_p3), %s185_s24, 7 }
  0x10   : > { %s996_s29 = scalar_lea.vmem (%p70_p3), %s1115_s1, %s779_s25  ;;  %s1000_s30 = scalar_lea.vmem (%p70_p3), [#allocation3], %s778_s26 }
  0x11   : > { %v208_v0 = vld [vmem:[%s996_s29] sm:$0xf] (%p70_p3)  ;;  %v210_v1 = vld [vmem:[%s996_s29 + $0x10] sm:$0xf] (%p70_p3) }
  0x12   : > { %209 = vst [vmem:[%s1000_s30] sm:$0xf] (%p70_p3), %v208_v0  ;;  %211 = vst [vmem:[%s1000_s30 + $0x4] sm:$0xf] (%p70_p3), %v210_v1  ;;  %v212_v2 = vld [vmem:[%s996_s29 + $0x20] sm:$0xf] (%p70_p3) }
  0x13   : > { %v214_v3 = vld [vmem:[%s996_s29 + $0x30] sm:$0xf] (%p70_p3)  ;;  %v216_v4 = vld [vmem:[%s996_s29 + $0x40] sm:$0xf] (%p70_p3)  ;;  %213 = vst [vmem:[%s1000_s30 + $0x8] sm:$0xf] (%p70_p3), %v212_v2 }
  0x14   : > { %215 = vst [vmem:[%s1000_s30 + $0xc] sm:$0xf] (%p70_p3), %v214_v3  ;;  %217 = vst [vmem:[%s1000_s30 + $0x10] sm:$0xf] (%p70_p3), %v216_v4  ;;  %v218_v5 = vld [vmem:[%s996_s29 + $0x50] sm:$0xf] (%p70_p3) }
  0x15   : > { %v220_v6 = vld [vmem:[%s996_s29 + $0x60] sm:$0xf]  ;;  %v222_v7 = vld [vmem:[%s996_s29 + $0x70] sm:$0xf]  ;;  %219 = vst [vmem:[%s1000_s30 + $0x14] sm:$0xf] %v218_v5 }
  0x16   : > { %221 = vst [vmem:[%s1000_s30 + $0x18] sm:$0xf] %v220_v6  ;;  %223 = vst [vmem:[%s1000_s30 + $0x1c] sm:$0xf] %v222_v7  ;;  %v224_v8 = vld [vmem:[%s996_s29 + $0x80] sm:$0xf] }
  0x17   : > { %v226_v9 = vld [vmem:[%s996_s29 + $0x90] sm:$0xf]  ;;  %v228_v10 = vld [vmem:[%s996_s29 + $0xa0] sm:$0xf]  ;;  %225 = vst [vmem:[%s1000_s30 + $0x20] sm:$0xf] %v224_v8 }
  0x18   : > { %227 = vst [vmem:[%s1000_s30 + $0x24] sm:$0xf] %v226_v9  ;;  %229 = vst [vmem:[%s1000_s30 + $0x28] sm:$0xf] %v228_v10  ;;  %v230_v11 = vld [vmem:[%s996_s29 + $0xb0] sm:$0xf] }
  0x19   : > { %v232_v12 = vld [vmem:[%s996_s29 + $0xc0] sm:$0xf]  ;;  %v234_v13 = vld [vmem:[%s996_s29 + $0xd0] sm:$0xf]  ;;  %231 = vst [vmem:[%s1000_s30 + $0x2c] sm:$0xf] %v230_v11 }
  0x1a   : > { %233 = vst [vmem:[%s1000_s30 + $0x30] sm:$0xf] %v232_v12  ;;  %235 = vst [vmem:[%s1000_s30 + $0x34] sm:$0xf] %v234_v13  ;;  %v236_v14 = vld [vmem:[%s996_s29 + $0xe0] sm:$0xf] }
  0x1b   : > { %v238_v15 = vld [vmem:[%s996_s29 + $0xf0] sm:$0xf]  ;;  %v240_v16 = vld [vmem:[%s996_s29 + $0x100] sm:$0xf]  ;;  %237 = vst [vmem:[%s1000_s30 + $0x38] sm:$0xf] %v236_v14 }
  0x1c   : > { %239 = vst [vmem:[%s1000_s30 + $0x3c] sm:$0xf] %v238_v15  ;;  %241 = vst [vmem:[%s1000_s30 + $0x40] sm:$0xf] %v240_v16  ;;  %v242_v17 = vld [vmem:[%s996_s29 + $0x110] sm:$0xf] }
  0x1d   : > { %v244_v18 = vld [vmem:[%s996_s29 + $0x120] sm:$0xf]  ;;  %v246_v19 = vld [vmem:[%s996_s29 + $0x130] sm:$0xf]  ;;  %243 = vst [vmem:[%s1000_s30 + $0x44] sm:$0xf] %v242_v17 }
  0x1e   : > { %245 = vst [vmem:[%s1000_s30 + $0x48] sm:$0xf] %v244_v18  ;;  %247 = vst [vmem:[%s1000_s30 + $0x4c] sm:$0xf] %v246_v19  ;;  %v248_v20 = vld [vmem:[%s996_s29 + $0x140] sm:$0xf] }
  0x1f   : > { %v250_v21 = vld [vmem:[%s996_s29 + $0x150] sm:$0xf]  ;;  %v252_v22 = vld [vmem:[%s996_s29 + $0x160] sm:$0xf]  ;;  %249 = vst [vmem:[%s1000_s30 + $0x50] sm:$0xf] %v248_v20 }
  0x20   : > { %251 = vst [vmem:[%s1000_s30 + $0x54] sm:$0xf] %v250_v21  ;;  %253 = vst [vmem:[%s1000_s30 + $0x58] sm:$0xf] %v252_v22  ;;  %v254_v23 = vld [vmem:[%s996_s29 + $0x170] sm:$0xf] }
  0x21   : > { %v256_v24 = vld [vmem:[%s996_s29 + $0x180] sm:$0xf]  ;;  %v258_v25 = vld [vmem:[%s996_s29 + $0x190] sm:$0xf]  ;;  %255 = vst [vmem:[%s1000_s30 + $0x5c] sm:$0xf] %v254_v23 }
  0x22   : > { %257 = vst [vmem:[%s1000_s30 + $0x60] sm:$0xf] %v256_v24  ;;  %259 = vst [vmem:[%s1000_s30 + $0x64] sm:$0xf] %v258_v25  ;;  %v260_v26 = vld [vmem:[%s996_s29 + $0x1a0] sm:$0xf] }
  0x23   : > { %v262_v27 = vld [vmem:[%s996_s29 + $0x1b0] sm:$0xf]  ;;  %v264_v28 = vld [vmem:[%s996_s29 + $0x1c0] sm:$0xf]  ;;  %261 = vst [vmem:[%s1000_s30 + $0x68] sm:$0xf] %v260_v26 }
  0x24   : > { %263 = vst [vmem:[%s1000_s30 + $0x6c] sm:$0xf] %v262_v27  ;;  %265 = vst [vmem:[%s1000_s30 + $0x70] sm:$0xf] %v264_v28  ;;  %v266_v29 = vld [vmem:[%s996_s29 + $0x1d0] sm:$0xf] }
  0x25   : > { %v268_v30 = vld [vmem:[%s996_s29 + $0x1e0] sm:$0xf]  ;;  %v270_v31 = vld [vmem:[%s996_s29 + $0x1f0] sm:$0xf]  ;;  %267 = vst [vmem:[%s1000_s30 + $0x74] sm:$0xf] %v266_v29 }
  0x26   : > { %269 = vst [vmem:[%s1000_s30 + $0x78] sm:$0xf] %v268_v30  ;;  %271 = vst [vmem:[%s1000_s30 + $0x7c] sm:$0xf] %v270_v31 }
  0x27 PF: > { %p780_p6 = scmp.ge.s32.totalorder %s924_s19, 1  ;;  %p369_p7 = scmp.lt.s32.totalorder %s924_s19, 5 }
  0x29   : > { %p370_p8 = pnand %p780_p6, %p369_p7 }
  0x2a   : > { %s376_s5 = sand.u32 (!%p370_p8), 1, %s908_s15   ;;  %v783_v32 = vld.sshfl [vmem:[%s1114_s0] sm:$0x11 pattern:$0x75316420] (!%p370_p8)  ;;  %v478_v33 = vlaneseq (!%p370_p8)  ;;  %v927_v58 = vmov (!%p370_p8), 0.0  }
  0x2b   : > { %373 = sbr.rel (%p370_p8) target bundleno = 357 (0x165), region = 73  ;;  %s781_s8 = sshll.u32 (!%p370_p8), %s376_s5, 7  ;;  %v926_v34 = vmov (!%p370_p8), 1966171168   ;;  %v474_v39 = vcombine.high (!%p370_p8), %v783_v32, %v783_v32  ;;  %431 = vst [vmem:[#allocation2] sm:$0x3] (!%p370_p8), %v927_v58 }
  0x2c   : > { %v476_v35 = vunpack.c.l.s4 (!%p370_p8), %v926_v34  ;;  %v479_v36 = vshrl.u32 (!%p370_p8), %v478_v33, 7  ;;  %s1070_s9 = scalar_lea.vmem (!%p370_p8), [#allocation3], %s781_s8  ;;  %vm633_vm0 = vcmask (!%p370_p8), 1041408   ;;  %p416_p9 = scmp.lt.s32.totalorder (!%p370_p8), %s916_s17, 3 }
  0x2d   : > { %v868_v37 = vld [vmem:[%s1070_s9 + $0x40] sm:$0xff] (!%p370_p8)   ;;  %v870_v41 = vld [vmem:[%s1070_s9 + $0x48] sm:$0xff] (!%p370_p8)   ;;  %v872_v44 = vld [vmem:[%s1070_s9 + $0x50] sm:$0xff] (!%p370_p8)  }
  0x2e   : > { %v869_v38 = vld [vmem:[%s1070_s9] sm:$0xff] (!%p370_p8)   ;;  %v477_v40 = vunpack.c.0.s8 (!%p370_p8), %v476_v35  ;;  %804 = vmatprep.subr.bf16.mxu0 (!%p370_p8), %v868_v37  ;;  %v871_v42 = vld [vmem:[%s1070_s9 + $0x8] sm:$0xff] (!%p370_p8)   ;;  %v873_v46 = vld [vmem:[%s1070_s9 + $0x10] sm:$0xff] (!%p370_p8)  }
  0x2f   : > { %805 = vmatpush3.bf16.msra.mxu0 (!%p370_p8), %v869_v38  ;;  %v874_v47 = vld [vmem:[%s1070_s9 + $0x58] sm:$0xff] (!%p370_p8)   ;;  %v876_v49 = vld [vmem:[%s1070_s9 + $0x60] sm:$0xff] (!%p370_p8)   ;;  %v878_v51 = vld [vmem:[%s1070_s9 + $0x68] sm:$0xff] (!%p370_p8)  }
  0x30   : > { %v480_v43 = vsub.s32 (!%p370_p8), %v477_v40, %v479_v36  ;;  %806 = vmatprep.subr.bf16.mxu0 (!%p370_p8), %v870_v41  ;;  %v875_v48 = vld [vmem:[%s1070_s9 + $0x18] sm:$0xff] (!%p370_p8)   ;;  %v877_v50 = vld [vmem:[%s1070_s9 + $0x20] sm:$0xff] (!%p370_p8)   ;;  %v879_v52 = vld [vmem:[%s1070_s9 + $0x28] sm:$0xff] (!%p370_p8)  }
  0x31   : > { %v880_v53 = vld [vmem:[%s1070_s9 + $0x70] sm:$0xff] (!%p370_p8)   ;;  %v882_v55 = vld [vmem:[%s1070_s9 + $0x78] sm:$0xff] (!%p370_p8)  }
  0x32   : > { %v488_v45 = vrot.slane %v474_v39, %v480_v43  ;;  %v881_v54 = vld [vmem:[%s1070_s9 + $0x30] sm:$0xff]   ;;  %v883_v56 = vld [vmem:[%s1070_s9 + $0x38] sm:$0xff]   ;;  %v481_v57 = vrot.slane %v783_v32, %v480_v43  ;;  %s1126_s17 = smov (!%p416_p9, %s916_s17), 3 }
  0x33   : > { %807 = vmatpush3.bf16.msra.mxu0 %v871_v42  ;;  %v432_v60 = vld [vmem:[#allocation2] sm:$0x3]  ;;  %s418_s12 = scalar_lea.vmem %s1116_s2, %s1126_s17  ;;  %s421_s15 = scalar_lea.vmem %s1117_s3, %s1126_s17 }
  0x34   : > { %619 = vmatprep.mubr.bf16.mxu0 %v488_v45  ;;  %808 = vmatprep.subr.bf16.mxu0 %v872_v44  ;;  %v800_v23 = vld [vmem:[%s418_s12] ss:$0 sm:$0xff]  ;;  %s782_s21 = sshll.u32 %s1126_s17, 1 }
  0x35   : > { %v801_v25 = vld [vmem:[%s421_s15] ss:$0 sm:$0xff]  ;;  %s425_s25 = scalar_lea.vmem %s1118_s4, %s782_s21 }
  0x37   : > { %809 = vmatpush3.bf16.msra.mxu0 %v873_v46 }
  0x38   : > { %810 = vmatprep.subr.bf16.mxu0 %v874_v47 }
  0x3b   : > { %811 = vmatpush3.bf16.msra.mxu0 %v875_v48 }
  0x3c   : > { %812 = vmatprep.subr.bf16.mxu0 %v876_v49 }
  0x3f   : > { %813 = vmatpush3.bf16.msra.mxu0 %v877_v50 }
  0x40   : > { %814 = vmatprep.subr.bf16.mxu0 %v878_v51 }
  0x43   : > { %815 = vmatpush3.bf16.msra.mxu0 %v879_v52 }
  0x44   : > { %816 = vmatprep.subr.bf16.mxu0 %v880_v53 }
  0x47   : > { %817 = vmatpush3.bf16.msra.mxu0 %v881_v54 }
  0x48   : > { %818 = vmatprep.subr.bf16.mxu0 %v882_v55 }
  0x4b   : > { %819 = vmatpush3.bf16.msra.mxu0 %v883_v56 }
  0x4e   : > { %620 = vmatmul.mubr.bf16.vlgmr.msra.gmra.mrb[0].mxu0 %v481_v57 }
 0x121   : > { %v820_v59 = vpop.f32.mrb[0].mxu0 }
 0x122   : > { %v821_v61 = vpop.f32.mrb[1].mxu0 }
 0x123   : > { %v822_v62 = vadd.f32 %v821_v61, %v820_v59  ;;  %v823_v63 = vpop.f32.mrb[2].mxu0 }
 0x124   : > { %v824_v0 = vpop.f32.mrb[3].mxu0 }
 0x125   : > { %v627_v1 = vadd.f32 %v822_v62, %v432_v60 }
 0x127   : > { %628 = vst [vmem:[#allocation2] sm:$0x3] %v627_v1 }
 0x12e   : > { %v632_v2 = vld [vmem:[#allocation2] sm:$0x3] }
 0x12f   : > { %v634_v3 = vsel %vm633_vm0, %v632_v2, 0.0 }
 0x130   : > { %v635_v4 = vrot.slane %v634_v3, 4 }
 0x132   : > { %v636_v5 = vadd.f32 %v635_v4, %v634_v3 }
 0x134   : > { %v637_v6 = vrot.slane %v636_v5, 2 }
 0x136   : > { %v638_v7 = vadd.f32 %v637_v6, %v636_v5 }
 0x138   : > { %v639_v8 = vrot.slane %v638_v7, 1 }
 0x13a   : > { %v640_v9 = vadd.f32 %v639_v8, %v638_v7 }
 0x13c   : > { %v642_v10 = vmul.f32 0.5, %v640_v9 }
 0x13e   : > { %v643_v11 = vsub.f32 %v632_v2, %v642_v10 }
 0x140   : > { %v644_v12 = vmul.f32 %v643_v11, %v643_v11 }
 0x142   : > { %v645_v13 = vsel %vm633_vm0, %v644_v12, 0.0 }
 0x143   : > { %v646_v14 = vrot.slane %v645_v13, 4 }
 0x145   : > { %v647_v15 = vadd.f32 %v646_v14, %v645_v13 }
 0x147   : > { %v648_v16 = vrot.slane %v647_v15, 2 }
 0x149   : > { %v649_v17 = vadd.f32 %v648_v16, %v647_v15 }
 0x14b   : > { %v650_v18 = vrot.slane %v649_v17, 1 }
 0x14d   : > { %v651_v19 = vadd.f32 %v650_v18, %v649_v17 }
 0x14f   : > { %v652_v20 = vmul.f32 0.5, %v651_v19 }
 0x151   : > { %v653_v21 = vadd.f32 1e-05, %v652_v20 }
 0x153   : > { %884 = vrsqrt.f32 %v653_v21 }
 0x15d   : > { %v885_v22 = vpop.eup %884 }
 0x15e   : > { %v655_v24 = vmul.f32 %v885_v22, %v643_v11 }
 0x160   : > { %v663_v26 = vmul.f32 %v800_v23, %v655_v24 }
 0x162   : > { %v671_v27 = vadd.f32 %v801_v25, %v663_v26 }
 0x164   : > { %672 = vst [vmem:[%s425_s25] sm:$0x3] %v671_v27 }
 0x165 PF: > { %s14_s19 = sadd.s32 1, %s924_s19   ;;  %s1119_s15 = smov %s912_s16 }
 0x166   : > { %p11_p10 = scmp.ge.s32.totalorder %s14_s19, 6   ;;  %s1120_s16 = smov %s988_s23 }
 0x167   : > { %s1121_s17 = smov %s920_s18  ;;  %s1122_s18 = smov %s1124_s20 }
 0x168   :  { %13 = sbr.rel (!%p11_p10) target bundleno = 3 (0x3), region = 129 }

// kernel: shedd_forward.59
= control target key start
LH: loop header
LB: loop body
LE: loop exit
PB: predicated region body
PF: predicated region fallthrough
CT: control target
= control target key end

     0   :  { %s1409_s18 = smov 0   ;;  %s1411_s19 = smov 0   ;;  %s1708_s0 = inlined_call_operand.vmem [shape: bf16[2,4608], index: 0, kind: input, shape index: {}]   ;;  %s1709_s1 = inlined_call_operand.vmem [shape: bf16[4608,512], index: 1, kind: input, shape index: {}]   ;;  %s1710_s2 = inlined_call_operand.vmem [shape: f32[1,512], index: 2, kind: input, shape index: {}]   ;;  %s1711_s3 = inlined_call_operand.vmem [shape: f32[1,512], index: 3, kind: input, shape index: {}]   ;;  %s1712_s4 = inlined_call_operand.vmem [shape: f32[2,512], index: 4, kind: input, shape index: {}]   ;;  %s1713_s5 = inlined_call_operand.vmem [shape: f32[2,512], index: 5, kind: output, shape index: {}]  }
   0x1   :  { %s1413_s20 = smov 0   ;;  %s1415_s21 = smov 0  }
   0x2   :  { %s1417_s22 = smov 0   ;;  %s1419_s23 = smov 0  }
   0x3   :  { %s1421_s24 = smov 0  }
   0x4 LB: > { %s24_s25 = sadd.s32 1, %s1367_s22  ;;  %s27_s26 = sadd.s32 1, %s1371_s23  ;;  %s1375_s24 = sphi %s1421_s24, %s15_s24   ;;  %s1371_s23 = sphi %s1419_s23, %s1720_s23   ;;  %s1367_s22 = sphi %s1417_s22, %s1719_s22   ;;  %s1363_s21 = sphi %s1415_s21, %s1718_s21   ;;  %s1359_s20 = sphi %s1413_s20, %s1717_s20   ;;  %s1355_s19 = sphi %s1411_s19, %s1716_s19   ;;  %s1351_s18 = sphi %s1409_s18, %s1715_s18  }
   0x5   : > { %p25_p0 = scmp.ge.s32.totalorder %s24_s25, 9  ;;  %p69_p1 = scmp.ne.s32.totalorder %s1355_s19, %s1351_s18 }
   0x6   : > { %p70_p2 = scmp.eq.s32.totalorder %s1375_s24, 0  ;;  %s62_s30 = sadd.s32 1, %s1355_s19 }
   0x7   : > { %s1722_s25 = smov (%p25_p0, %s24_s25), 0  ;;  %s1724_s26 = smov (!%p25_p0, %s27_s26), %s1371_s23 }
   0x8   : > { %p71_p3 = por %p70_p2, %p69_p1  ;;  %p29_p4 = scmp.ge.s32.totalorder %s1724_s26, 4 }
   0x9   : > { %s57_s27 = ssub.s32 %s1367_s22, %s1722_s25  ;;  %p1135_p6 = scmp.ge.s32.totalorder %s1375_s24, 36 }
   0xa   : > { %s1726_s26 = smov (%p29_p4, %s1724_s26), 0 }
   0xb   : > { %s58_s28 = ssub.s32 %s1371_s23, %s1726_s26  ;;  %199 = sbr.rel (%p1135_p6) target bundleno = 67 (0x43), region = 16 }
   0xc   : > { %s59_s29 = sor.u32 %s58_s28, %s57_s27 }
   0xd   : > { %p60_p5 = scmp.eq.s32.totalorder %s59_s29, 0 }
   0xf   : > { %s1460_s6 = scalar_select %p60_p5, %s1355_s19, %s62_s30  }
  0x12   : > { %210 = sbr.rel (!%p71_p3) target bundleno = 67 (0x43), region = 24  ;;  %s212_s7 = sand.u32 (%p71_p3), 1, %s1355_s19  }
  0x13   : > { %s1184_s8 = sshll.u32 (%p71_p3), %s1367_s22, 8  ;;  %s1136_s9 = sshll.u32 (%p71_p3), %s212_s7, 8 }
  0x14   : > { %s217_s10 = sadd.s32 (%p71_p3), %s1371_s23, %s1184_s8  ;;  %s1474_s15 = scalar_lea.vmem (%p71_p3), [#allocation3], %s1136_s9 }
  0x15   : > { %s1139_s11 = sshll.u32 (%p71_p3), %s217_s10, 2 }
  0x16   : > { %s1469_s14 = scalar_lea.vmem (%p71_p3), %s1709_s1, %s1139_s11 }
  0x17   : > { %v235_v0 = vld [vmem:[%s1469_s14] sm:$0xf] (%p71_p3)  ;;  %v237_v1 = vld [vmem:[%s1469_s14 + $0x10] sm:$0xf] (%p71_p3) }
  0x18   : > { %v239_v2 = vld [vmem:[%s1469_s14 + $0x20] sm:$0xf] (%p71_p3)  ;;  %236 = vst [vmem:[%s1474_s15] sm:$0xf] (%p71_p3), %v235_v0  ;;  %238 = vst [vmem:[%s1474_s15 + $0x4] sm:$0xf] (%p71_p3), %v237_v1 }
  0x19   : > { %240 = vst [vmem:[%s1474_s15 + $0x8] sm:$0xf] %v239_v2  ;;  %v241_v3 = vld [vmem:[%s1469_s14 + $0x30] sm:$0xf]  ;;  %v243_v4 = vld [vmem:[%s1469_s14 + $0x40] sm:$0xf] }
  0x1a   : > { %v245_v5 = vld [vmem:[%s1469_s14 + $0x50] sm:$0xf]  ;;  %242 = vst [vmem:[%s1474_s15 + $0xc] sm:$0xf] %v241_v3  ;;  %244 = vst [vmem:[%s1474_s15 + $0x10] sm:$0xf] %v243_v4 }
  0x1b   : > { %246 = vst [vmem:[%s1474_s15 + $0x14] sm:$0xf] %v245_v5  ;;  %v247_v6 = vld [vmem:[%s1469_s14 + $0x60] sm:$0xf]  ;;  %v249_v7 = vld [vmem:[%s1469_s14 + $0x70] sm:$0xf] }
  0x1c   : > { %v251_v8 = vld [vmem:[%s1469_s14 + $0x80] sm:$0xf]  ;;  %248 = vst [vmem:[%s1474_s15 + $0x18] sm:$0xf] %v247_v6  ;;  %250 = vst [vmem:[%s1474_s15 + $0x1c] sm:$0xf] %v249_v7 }
  0x1d   : > { %252 = vst [vmem:[%s1474_s15 + $0x20] sm:$0xf] %v251_v8  ;;  %v253_v9 = vld [vmem:[%s1469_s14 + $0x90] sm:$0xf]  ;;  %v255_v10 = vld [vmem:[%s1469_s14 + $0xa0] sm:$0xf] }
  0x1e   : > { %v257_v11 = vld [vmem:[%s1469_s14 + $0xb0] sm:$0xf]  ;;  %254 = vst [vmem:[%s1474_s15 + $0x24] sm:$0xf] %v253_v9  ;;  %256 = vst [vmem:[%s1474_s15 + $0x28] sm:$0xf] %v255_v10 }
  0x1f   : > { %258 = vst [vmem:[%s1474_s15 + $0x2c] sm:$0xf] %v257_v11  ;;  %v259_v12 = vld [vmem:[%s1469_s14 + $0xc0] sm:$0xf]  ;;  %v261_v13 = vld [vmem:[%s1469_s14 + $0xd0] sm:$0xf] }
  0x20   : > { %v263_v14 = vld [vmem:[%s1469_s14 + $0xe0] sm:$0xf]  ;;  %260 = vst [vmem:[%s1474_s15 + $0x30] sm:$0xf] %v259_v12  ;;  %262 = vst [vmem:[%s1474_s15 + $0x34] sm:$0xf] %v261_v13 }
  0x21   : > { %264 = vst [vmem:[%s1474_s15 + $0x38] sm:$0xf] %v263_v14  ;;  %v265_v15 = vld [vmem:[%s1469_s14 + $0xf0] sm:$0xf]  ;;  %v267_v16 = vld [vmem:[%s1469_s14 + $0x100] sm:$0xf] }
  0x22   : > { %v269_v17 = vld [vmem:[%s1469_s14 + $0x110] sm:$0xf]  ;;  %266 = vst [vmem:[%s1474_s15 + $0x3c] sm:$0xf] %v265_v15  ;;  %268 = vst [vmem:[%s1474_s15 + $0x40] sm:$0xf] %v267_v16 }
  0x23   : > { %270 = vst [vmem:[%s1474_s15 + $0x44] sm:$0xf] %v269_v17  ;;  %v271_v18 = vld [vmem:[%s1469_s14 + $0x120] sm:$0xf]  ;;  %v273_v19 = vld [vmem:[%s1469_s14 + $0x130] sm:$0xf] }
  0x24   : > { %v275_v20 = vld [vmem:[%s1469_s14 + $0x140] sm:$0xf]  ;;  %272 = vst [vmem:[%s1474_s15 + $0x48] sm:$0xf] %v271_v18  ;;  %274 = vst [vmem:[%s1474_s15 + $0x4c] sm:$0xf] %v273_v19 }
  0x25   : > { %276 = vst [vmem:[%s1474_s15 + $0x50] sm:$0xf] %v275_v20  ;;  %v277_v21 = vld [vmem:[%s1469_s14 + $0x150] sm:$0xf]  ;;  %v279_v22 = vld [vmem:[%s1469_s14 + $0x160] sm:$0xf] }
  0x26   : > { %v281_v23 = vld [vmem:[%s1469_s14 + $0x170] sm:$0xf]  ;;  %278 = vst [vmem:[%s1474_s15 + $0x54] sm:$0xf] %v277_v21  ;;  %280 = vst [vmem:[%s1474_s15 + $0x58] sm:$0xf] %v279_v22 }
  0x27   : > { %282 = vst [vmem:[%s1474_s15 + $0x5c] sm:$0xf] %v281_v23  ;;  %v283_v24 = vld [vmem:[%s1469_s14 + $0x180] sm:$0xf]  ;;  %v285_v25 = vld [vmem:[%s1469_s14 + $0x190] sm:$0xf] }
  0x28   : > { %v287_v26 = vld [vmem:[%s1469_s14 + $0x1a0] sm:$0xf]  ;;  %284 = vst [vmem:[%s1474_s15 + $0x60] sm:$0xf] %v283_v24  ;;  %286 = vst [vmem:[%s1474_s15 + $0x64] sm:$0xf] %v285_v25 }
  0x29   : > { %288 = vst [vmem:[%s1474_s15 + $0x68] sm:$0xf] %v287_v26  ;;  %v289_v27 = vld [vmem:[%s1469_s14 + $0x1b0] sm:$0xf]  ;;  %v291_v28 = vld [vmem:[%s1469_s14 + $0x1c0] sm:$0xf] }
  0x2a   : > { %v293_v29 = vld [vmem:[%s1469_s14 + $0x1d0] sm:$0xf]  ;;  %290 = vst [vmem:[%s1474_s15 + $0x6c] sm:$0xf] %v289_v27  ;;  %292 = vst [vmem:[%s1474_s15 + $0x70] sm:$0xf] %v291_v28 }
  0x2b   : > { %294 = vst [vmem:[%s1474_s15 + $0x74] sm:$0xf] %v293_v29  ;;  %v295_v30 = vld [vmem:[%s1469_s14 + $0x1e0] sm:$0xf]  ;;  %v297_v31 = vld [vmem:[%s1469_s14 + $0x1f0] sm:$0xf] }
  0x2c   : > { %v299_v32 = vld [vmem:[%s1469_s14 + $0x200] sm:$0xf]  ;;  %296 = vst [vmem:[%s1474_s15 + $0x78] sm:$0xf] %v295_v30  ;;  %298 = vst [vmem:[%s1474_s15 + $0x7c] sm:$0xf] %v297_v31 }
  0x2d   : > { %300 = vst [vmem:[%s1474_s15 + $0x80] sm:$0xf] %v299_v32  ;;  %v301_v33 = vld [vmem:[%s1469_s14 + $0x210] sm:$0xf]  ;;  %v303_v34 = vld [vmem:[%s1469_s14 + $0x220] sm:$0xf] }
  0x2e   : > { %v305_v35 = vld [vmem:[%s1469_s14 + $0x230] sm:$0xf]  ;;  %302 = vst [vmem:[%s1474_s15 + $0x84] sm:$0xf] %v301_v33  ;;  %304 = vst [vmem:[%s1474_s15 + $0x88] sm:$0xf] %v303_v34 }
  0x2f   : > { %306 = vst [vmem:[%s1474_s15 + $0x8c] sm:$0xf] %v305_v35  ;;  %v307_v36 = vld [vmem:[%s1469_s14 + $0x240] sm:$0xf]  ;;  %v309_v37 = vld [vmem:[%s1469_s14 + $0x250] sm:$0xf] }
  0x30   : > { %v311_v38 = vld [vmem:[%s1469_s14 + $0x260] sm:$0xf]  ;;  %308 = vst [vmem:[%s1474_s15 + $0x90] sm:$0xf] %v307_v36  ;;  %310 = vst [vmem:[%s1474_s15 + $0x94] sm:$0xf] %v309_v37 }
  0x31   : > { %312 = vst [vmem:[%s1474_s15 + $0x98] sm:$0xf] %v311_v38  ;;  %v313_v39 = vld [vmem:[%s1469_s14 + $0x270] sm:$0xf]  ;;  %v315_v40 = vld [vmem:[%s1469_s14 + $0x280] sm:$0xf] }
  0x32   : > { %v317_v41 = vld [vmem:[%s1469_s14 + $0x290] sm:$0xf]  ;;  %314 = vst [vmem:[%s1474_s15 + $0x9c] sm:$0xf] %v313_v39  ;;  %316 = vst [vmem:[%s1474_s15 + $0xa0] sm:$0xf] %v315_v40 }
  0x33   : > { %318 = vst [vmem:[%s1474_s15 + $0xa4] sm:$0xf] %v317_v41  ;;  %v319_v42 = vld [vmem:[%s1469_s14 + $0x2a0] sm:$0xf]  ;;  %v321_v43 = vld [vmem:[%s1469_s14 + $0x2b0] sm:$0xf] }
  0x34   : > { %v323_v44 = vld [vmem:[%s1469_s14 + $0x2c0] sm:$0xf]  ;;  %320 = vst [vmem:[%s1474_s15 + $0xa8] sm:$0xf] %v319_v42  ;;  %322 = vst [vmem:[%s1474_s15 + $0xac] sm:$0xf] %v321_v43 }
  0x35   : > { %324 = vst [vmem:[%s1474_s15 + $0xb0] sm:$0xf] %v323_v44  ;;  %v325_v45 = vld [vmem:[%s1469_s14 + $0x2d0] sm:$0xf]  ;;  %v327_v46 = vld [vmem:[%s1469_s14 + $0x2e0] sm:$0xf] }
  0x36   : > { %v329_v47 = vld [vmem:[%s1469_s14 + $0x2f0] sm:$0xf]  ;;  %326 = vst [vmem:[%s1474_s15 + $0xb4] sm:$0xf] %v325_v45  ;;  %328 = vst [vmem:[%s1474_s15 + $0xb8] sm:$0xf] %v327_v46 }
  0x37   : > { %330 = vst [vmem:[%s1474_s15 + $0xbc] sm:$0xf] %v329_v47  ;;  %v331_v48 = vld [vmem:[%s1469_s14 + $0x300] sm:$0xf]  ;;  %v333_v49 = vld [vmem:[%s1469_s14 + $0x310] sm:$0xf] }
  0x38   : > { %v335_v50 = vld [vmem:[%s1469_s14 + $0x320] sm:$0xf]  ;;  %332 = vst [vmem:[%s1474_s15 + $0xc0] sm:$0xf] %v331_v48  ;;  %334 = vst [vmem:[%s1474_s15 + $0xc4] sm:$0xf] %v333_v49 }
  0x39   : > { %336 = vst [vmem:[%s1474_s15 + $0xc8] sm:$0xf] %v335_v50  ;;  %v337_v51 = vld [vmem:[%s1469_s14 + $0x330] sm:$0xf]  ;;  %v339_v52 = vld [vmem:[%s1469_s14 + $0x340] sm:$0xf] }
  0x3a   : > { %v341_v53 = vld [vmem:[%s1469_s14 + $0x350] sm:$0xf]  ;;  %338 = vst [vmem:[%s1474_s15 + $0xcc] sm:$0xf] %v337_v51  ;;  %340 = vst [vmem:[%s1474_s15 + $0xd0] sm:$0xf] %v339_v52 }
  0x3b   : > { %342 = vst [vmem:[%s1474_s15 + $0xd4] sm:$0xf] %v341_v53  ;;  %v343_v54 = vld [vmem:[%s1469_s14 + $0x360] sm:$0xf]  ;;  %v345_v55 = vld [vmem:[%s1469_s14 + $0x370] sm:$0xf] }
  0x3c   : > { %v347_v56 = vld [vmem:[%s1469_s14 + $0x380] sm:$0xf]  ;;  %344 = vst [vmem:[%s1474_s15 + $0xd8] sm:$0xf] %v343_v54  ;;  %346 = vst [vmem:[%s1474_s15 + $0xdc] sm:$0xf] %v345_v55 }
  0x3d   : > { %348 = vst [vmem:[%s1474_s15 + $0xe0] sm:$0xf] %v347_v56  ;;  %v349_v57 = vld [vmem:[%s1469_s14 + $0x390] sm:$0xf]  ;;  %v351_v58 = vld [vmem:[%s1469_s14 + $0x3a0] sm:$0xf] }
  0x3e   : > { %v353_v59 = vld [vmem:[%s1469_s14 + $0x3b0] sm:$0xf]  ;;  %350 = vst [vmem:[%s1474_s15 + $0xe4] sm:$0xf] %v349_v57  ;;  %352 = vst [vmem:[%s1474_s15 + $0xe8] sm:$0xf] %v351_v58 }
  0x3f   : > { %354 = vst [vmem:[%s1474_s15 + $0xec] sm:$0xf] %v353_v59  ;;  %v355_v60 = vld [vmem:[%s1469_s14 + $0x3c0] sm:$0xf]  ;;  %v357_v61 = vld [vmem:[%s1469_s14 + $0x3d0] sm:$0xf] }
  0x40   : > { %v359_v62 = vld [vmem:[%s1469_s14 + $0x3e0] sm:$0xf]  ;;  %356 = vst [vmem:[%s1474_s15 + $0xf0] sm:$0xf] %v355_v60  ;;  %358 = vst [vmem:[%s1474_s15 + $0xf4] sm:$0xf] %v357_v61 }
  0x41   : > { %360 = vst [vmem:[%s1474_s15 + $0xf8] sm:$0xf] %v359_v62  ;;  %v361_v63 = vld [vmem:[%s1469_s14 + $0x3f0] sm:$0xf] }
  0x42   : > { %362 = vst [vmem:[%s1474_s15 + $0xfc] sm:$0xf] %v361_v63 }
  0x43 PF: > { %p1140_p7 = scmp.ge.s32.totalorder %s1375_s24, 1  ;;  %p531_p8 = scmp.lt.s32.totalorder %s1375_s24, 37 }
  0x45   : > { %p532_p9 = pnand %p1140_p7, %p531_p8 }
  0x46   : > { %s538_s16 = sand.u32 (!%p532_p9), 1, %s1351_s18   ;;  %s1142_s17 = sshll.u32 (!%p532_p9), %s1359_s20, 2 }
  0x47   : > { %535 = sbr.rel (%p532_p9) target bundleno = 407 (0x197), region = 77  ;;  %s1141_s27 = sshll.u32 (!%p532_p9), %s538_s16, 8 }
  0x48   : > { %p579_p10 = scmp.lt.s32.totalorder (!%p532_p9), %s1142_s17, 35  ;;  %p584_p11 = scmp.lt.s32.totalorder (!%p532_p9), %s1363_s21, 3 }
  0x49   : > { %s1634_s30 = scalar_lea.vmem (!%p532_p9), [#allocation3], %s1141_s27  ;;  %p1145_p12 = scmp.ne.s32.totalorder (!%p532_p9), %s1359_s20, 0 }
  0x4e   : > { %s1728_s17 = smov (!%p579_p10, %s1142_s17), 35  ;;  %s1730_s21 = smov (!%p584_p11, %s1363_s21), 3 }
  0x4f   : > { %s586_s18 = scalar_lea.vmem %s1710_s2, %s1730_s21  ;;  %s589_s11 = scalar_lea.vmem %s1711_s3, %s1730_s21  ;;  %v1377_v0 = vmov (!%p1145_p12), 0.0  }
  0x50   : > { %s1143_s12 = sshll.u32 %s1730_s21, 1  ;;  %602 = sbr.rel (%p1145_p12) target bundleno = 87 (0x57), region = 85  ;;  %603 = vst [vmem:[#allocation2] sm:$0x3] (!%p1145_p12), %v1377_v0 }
  0x51   : > { %s1627_s15 = scalar_lea.vmem %s1712_s4, %s1143_s12  ;;  %s1632_s29 = scalar_lea.vmem %s1713_s5, %s1143_s12 }
  0x57 PF: > { %v1287_v1 = vld [vmem:[%s1634_s30 + $0x40] sm:$0xff]   ;;  %v1291_v5 = vld [vmem:[%s1634_s30 + $0x48] sm:$0xff]   ;;  %v1295_v9 = vld [vmem:[%s1634_s30 + $0x50] sm:$0xff]   ;;  %v682_v31 = vlaneseq  ;;  %s1714_s8 = scalar_lea.vmem %s1708_s0, %s1728_s17  ;;  %v1378_v35 = vmov 1966171168   ;;  %p1179_p13 = scmp.ne.s32.totalorder %s1359_s20, 8 }
  0x58   : > { %v1288_v2 = vld [vmem:[%s1634_s30 + $0xc0] sm:$0xff]   ;;  %1185 = vmatprep.subr.bf16.mxu0 %v1287_v1  ;;  %v1292_v6 = vld [vmem:[%s1634_s30 + $0xc8] sm:$0xff]   ;;  %v1296_v10 = vld [vmem:[%s1634_s30 + $0xd0] sm:$0xff]   ;;  %v680_v36 = vunpack.c.l.s4 %v1378_v35  ;;  %vm978_vm0 = vcmask (!%p1179_p13), 1041408  }
  0x59   : > { %v1289_v3 = vld [vmem:[%s1634_s30] sm:$0xff]   ;;  %1207 = vmatprep.subr.bf16.mxu1 %v1288_v2  ;;  %v1293_v7 = vld [vmem:[%s1634_s30 + $0x8] sm:$0xff]   ;;  %v1297_v11 = vld [vmem:[%s1634_s30 + $0x10] sm:$0xff]   ;;  %v683_v37 = vshrl.u32 %v682_v31, 7 }
  0x5a   : > { %v1290_v4 = vld [vmem:[%s1634_s30 + $0x80] sm:$0xff]   ;;  %1186 = vmatpush3.bf16.msra.mxu0 %v1289_v3  ;;  %v1294_v8 = vld [vmem:[%s1634_s30 + $0x88] sm:$0xff]   ;;  %v1298_v12 = vld [vmem:[%s1634_s30 + $0x90] sm:$0xff]   ;;  %v681_v39 = vunpack.c.0.s8 %v680_v36 }
  0x5b   : > { %1208 = vmatpush3.bf16.msra.mxu1 %v1290_v4  ;;  %1187 = vmatprep.subr.bf16.mxu0 %v1291_v5  ;;  %v1299_v13 = vld [vmem:[%s1634_s30 + $0x58] sm:$0xff]   ;;  %v1303_v17 = vld [vmem:[%s1634_s30 + $0x60] sm:$0xff]   ;;  %v1307_v21 = vld [vmem:[%s1634_s30 + $0x68] sm:$0xff]  }
  0x5c   : > { %1209 = vmatprep.subr.bf16.mxu1 %v1292_v6  ;;  %v1300_v14 = vld [vmem:[%s1634_s30 + $0xd8] sm:$0xff]   ;;  %v1304_v18 = vld [vmem:[%s1634_s30 + $0xe0] sm:$0xff]   ;;  %v1308_v22 = vld [vmem:[%s1634_s30 + $0xe8] sm:$0xff]   ;;  %v684_v40 = vsub.s32 %v681_v39, %v683_v37 }
  0x5d   : > { %v1301_v15 = vld [vmem:[%s1634_s30 + $0x18] sm:$0xff]   ;;  %v1305_v19 = vld [vmem:[%s1634_s30 + $0x20] sm:$0xff]   ;;  %v1309_v23 = vld [vmem:[%s1634_s30 + $0x28] sm:$0xff]  }
  0x5e   : > { %1188 = vmatpush3.bf16.msra.mxu0 %v1293_v7  ;;  %v1302_v16 = vld [vmem:[%s1634_s30 + $0x98] sm:$0xff]   ;;  %v1306_v20 = vld [vmem:[%s1634_s30 + $0xa0] sm:$0xff]   ;;  %v1310_v24 = vld [vmem:[%s1634_s30 + $0xa8] sm:$0xff]  }
  0x5f   : > { %1210 = vmatpush3.bf16.msra.mxu1 %v1294_v8  ;;  %1189 = vmatprep.subr.bf16.mxu0 %v1295_v9  ;;  %v1311_v25 = vld [vmem:[%s1634_s30 + $0x70] sm:$0xff]   ;;  %v1315_v29 = vld [vmem:[%s1634_s30 + $0x78] sm:$0xff]  }
  0x60   : > { %1211 = vmatprep.subr.bf16.mxu1 %v1296_v10  ;;  %v1312_v26 = vld [vmem:[%s1634_s30 + $0xf0] sm:$0xff]   ;;  %v1316_v30 = vld [vmem:[%s1634_s30 + $0xf8] sm:$0xff]  }
  0x61   : > { %v1313_v27 = vld [vmem:[%s1634_s30 + $0x30] sm:$0xff]   ;;  %v1317_v32 = vld [vmem:[%s1634_s30 + $0x38] sm:$0xff]  }
  0x62   : > { %1190 = vmatpush3.bf16.msra.mxu0 %v1297_v11  ;;  %v1314_v28 = vld [vmem:[%s1634_s30 + $0xb0] sm:$0xff]   ;;  %v1318_v33 = vld [vmem:[%s1634_s30 + $0xb8] sm:$0xff]  }
  0x63   : > { %1212 = vmatpush3.bf16.msra.mxu1 %v1298_v12  ;;  %1191 = vmatprep.subr.bf16.mxu0 %v1299_v13  ;;  %v1146_v34 = vld.sshfl [vmem:[%s1714_s8] sm:$0x33 pattern:$0x75316420] }
  0x64   : > { %1213 = vmatprep.subr.bf16.mxu1 %v1300_v14  ;;  %v678_v38 = vcombine.high %v1146_v34, %v1146_v34  ;;  %v685_v42 = vrot.slane %v1146_v34, %v684_v40  ;;  %v604_v54 = vld [vmem:[#allocation2] sm:$0x3] }
  0x66   : > { %1192 = vmatpush3.bf16.msra.mxu0 %v1301_v15  ;;  %v692_v41 = vrot.slane %v678_v38, %v684_v40  ;;  %v693_v44 = vcombine.high %v685_v42, %v685_v42  ;;  %v1180_v15 = vld [vmem:[%s586_s18] ss:$0 sm:$0xff] (!%p1179_p13) }
  0x67   : > { %1214 = vmatpush3.bf16.msra.mxu1 %v1302_v16  ;;  %1193 = vmatprep.subr.bf16.mxu0 %v1303_v17  ;;  %v1181_v17 = vld [vmem:[%s589_s11] ss:$0 sm:$0xff] (!%p1179_p13) }
  0x68   : > { %1215 = vmatprep.subr.bf16.mxu1 %v1304_v18  ;;  %923 = vmatprep.mubr.bf16.mxu0 %v692_v41  ;;  %v694_v43 = vcombine.high %v692_v41, %v692_v41 }
  0x6a   : > { %1194 = vmatpush3.bf16.msra.mxu0 %v1305_v19  ;;  %963 = vmatprep.mubr.bf16.mxu1 %v694_v43  ;;  %v1017_v19 = vld [vmem:[%s1627_s15] sm:$0x3] (!%p1179_p13) }
  0x6b   : > { %1216 = vmatpush3.bf16.msra.mxu1 %v1306_v20  ;;  %1195 = vmatprep.subr.bf16.mxu0 %v1307_v21 }
  0x6c   : > { %1217 = vmatprep.subr.bf16.mxu1 %v1308_v22 }
  0x6e   : > { %1196 = vmatpush3.bf16.msra.mxu0 %v1309_v23 }
  0x6f   : > { %1218 = vmatpush3.bf16.msra.mxu1 %v1310_v24  ;;  %1197 = vmatprep.subr.bf16.mxu0 %v1311_v25 }
  0x70   : > { %1219 = vmatprep.subr.bf16.mxu1 %v1312_v26 }
  0x72   : > { %1198 = vmatpush3.bf16.msra.mxu0 %v1313_v27 }
  0x73   : > { %1220 = vmatpush3.bf16.msra.mxu1 %v1314_v28  ;;  %1199 = vmatprep.subr.bf16.mxu0 %v1315_v29 }
  0x74   : > { %1221 = vmatprep.subr.bf16.mxu1 %v1316_v30 }
  0x76   : > { %1200 = vmatpush3.bf16.msra.mxu0 %v1317_v32 }
  0x77   : > { %1222 = vmatpush3.bf16.msra.mxu1 %v1318_v33 }
  0x79   : > { %924 = vmatmul.mubr.bf16.vlgmr.msra.gmra.mrb[0].mxu0 %v685_v42 }
  0x7a   : > { %964 = vmatmul.mubr.bf16.vlgmr.msra.gmra.mrb[0].mxu1 %v693_v44 }
 0x14c   : > { %v1201_v45 = vpop.f32.mrb[0].mxu0 }
 0x14d   : > { %v1202_v46 = vpop.f32.mrb[1].mxu0  ;;  %v1223_v47 = vpop.f32.mrb[0].mxu1 }
 0x14e   : > { %v1203_v48 = vadd.f32 %v1202_v46, %v1201_v45  ;;  %v1204_v49 = vpop.f32.mrb[2].mxu0  ;;  %v1224_v50 = vpop.f32.mrb[1].mxu1 }
 0x14f   : > { %v1205_v51 = vpop.f32.mrb[3].mxu0  ;;  %v1225_v52 = vadd.f32 %v1224_v50, %v1223_v47  ;;  %v1226_v53 = vpop.f32.mrb[2].mxu1  ;;  %976 = sbr.rel (%p1179_p13) target bundleno = 407 (0x197), region = 89 }
 0x150   : > { %v1227_v55 = vpop.f32.mrb[3].mxu1 }
 0x151   : > { %v966_v56 = vadd.f32 %v1225_v52, %v1203_v48 }
 0x153   : > { %v971_v57 = vadd.f32 %v966_v56, %v604_v54 }
 0x155   : > { %972 = vst [vmem:[#allocation2] sm:$0x3] %v971_v57 }
 0x15c   : > { %v977_v58 = vld [vmem:[#allocation2] sm:$0x3] }
 0x15d   : > { %v979_v59 = vsel %vm978_vm0, %v977_v58, 0.0 }
 0x15e   : > { %v980_v60 = vrot.slane %v979_v59, 4 }
 0x160   : > { %v981_v61 = vadd.f32 %v980_v60, %v979_v59 }
 0x162   : > { %v982_v62 = vrot.slane %v981_v61, 2 }
 0x164   : > { %v983_v63 = vadd.f32 %v982_v62, %v981_v61 }
 0x166   : > { %v984_v0 = vrot.slane %v983_v63, 1 }
 0x168   : > { %v985_v1 = vadd.f32 %v984_v0, %v983_v63 }
 0x16a   : > { %v987_v2 = vmul.f32 0.5, %v985_v1 }
 0x16c   : > { %v988_v3 = vsub.f32 %v977_v58, %v987_v2 }
 0x16e   : > { %v989_v4 = vmul.f32 %v988_v3, %v988_v3 }
 0x170   : > { %v990_v5 = vsel %vm978_vm0, %v989_v4, 0.0 }
 0x171   : > { %v991_v6 = vrot.slane %v990_v5, 4 }
 0x173   : > { %v992_v7 = vadd.f32 %v991_v6, %v990_v5 }
 0x175   : > { %v993_v8 = vrot.slane %v992_v7, 2 }
 0x177   : > { %v994_v9 = vadd.f32 %v993_v8, %v992_v7 }
 0x179   : > { %v995_v10 = vrot.slane %v994_v9, 1 }
 0x17b   : > { %v996_v11 = vadd.f32 %v995_v10, %v994_v9 }
 0x17d   : > { %v997_v12 = vmul.f32 0.5, %v996_v11 }
 0x17f   : > { %v998_v13 = vadd.f32 1e-05, %v997_v12 }
 0x181   : > { %1319 = vrsqrt.f32 %v998_v13 }
 0x18b   : > { %v1320_v14 = vpop.eup %1319 }
 0x18c   : > { %v1000_v16 = vmul.f32 %v1320_v14, %v988_v3 }
 0x18e   : > { %v1008_v18 = vmul.f32 %v1180_v15, %v1000_v16 }
 0x190   : > { %v1016_v20 = vadd.f32 %v1181_v17, %v1008_v18 }
 0x192   : > { %v1018_v21 = vadd.f32 %v1017_v19, %v1016_v20 }
 0x194   : > { %v1019_v22 = vmax.f32 %v1018_v21, 0.0 }
 0x196   : > { %1020 = vst [vmem:[%s1632_s29] sm:$0x3] %v1019_v22 }
 0x197 PF: > { %s15_s24 = sadd.s32 1, %s1375_s24   ;;  %s1715_s18 = smov %s1355_s19 }
 0x198   : > { %p12_p0 = scmp.ge.s32.totalorder %s15_s24, 38   ;;  %s1716_s19 = smov %s1460_s6 }
 0x199   : > { %s1717_s20 = smov %s1367_s22  ;;  %s1718_s21 = smov %s1371_s23 }
 0x19a   : > { %s1719_s22 = smov %s1722_s25  ;;  %s1720_s23 = smov %s1726_s26 }
 0x19b   :  { %14 = sbr.rel (!%p12_p0) target bundleno = 4 (0x4), region = 136 }

// kernel: shedd_forward.60
= control target key start
LH: loop header
LB: loop body
LE: loop exit
PB: predicated region body
PF: predicated region fallthrough
CT: control target
= control target key end

     0   :  { %s1345_s15 = smov 0   ;;  %s1347_s16 = smov 0   ;;  %s1638_s0 = inlined_call_operand.vmem [shape: bf16[2,4608], index: 0, kind: input, shape index: {}]   ;;  %s1639_s1 = inlined_call_operand.vmem [shape: bf16[4608,512], index: 1, kind: input, shape index: {}]   ;;  %s1640_s2 = inlined_call_operand.vmem [shape: f32[1,512], index: 2, kind: input, shape index: {}]   ;;  %s1641_s3 = inlined_call_operand.vmem [shape: f32[1,512], index: 3, kind: input, shape index: {}]   ;;  %s1642_s4 = inlined_call_operand.vmem [shape: f32[2,512], index: 4, kind: output, shape index: {}]  }
   0x1   :  { %s1349_s17 = smov 0   ;;  %s1351_s18 = smov 0  }
   0x2   :  { %s1353_s19 = smov 0   ;;  %s1355_s20 = smov 0  }
   0x3   :  { %s1357_s21 = smov 0  }
   0x4 LB: > { %s23_s22 = sadd.s32 1, %s1308_s19  ;;  %s26_s23 = sadd.s32 1, %s1312_s20  ;;  %s1316_s21 = sphi %s1357_s21, %s14_s21   ;;  %s1312_s20 = sphi %s1355_s20, %s1648_s20   ;;  %s1308_s19 = sphi %s1353_s19, %s1647_s19   ;;  %s1304_s18 = sphi %s1351_s18, %s1646_s18   ;;  %s1300_s17 = sphi %s1349_s17, %s1645_s17   ;;  %s1296_s16 = sphi %s1347_s16, %s1644_s16   ;;  %s1292_s15 = sphi %s1345_s15, %s1643_s15  }
   0x5   : > { %p24_p0 = scmp.ge.s32.totalorder %s23_s22, 9  ;;  %p68_p1 = scmp.ne.s32.totalorder %s1296_s16, %s1292_s15 }
   0x6   : > { %p69_p2 = scmp.eq.s32.totalorder %s1316_s21, 0  ;;  %s61_s27 = sadd.s32 1, %s1296_s16 }
   0x7   : > { %s1650_s22 = smov (%p24_p0, %s23_s22), 0  ;;  %s1652_s23 = smov (!%p24_p0, %s26_s23), %s1312_s20 }
   0x8   : > { %p70_p3 = por %p69_p2, %p68_p1  ;;  %p28_p4 = scmp.ge.s32.totalorder %s1652_s23, 4 }
   0x9   : > { %s56_s24 = ssub.s32 %s1308_s19, %s1650_s22  ;;  %p1077_p6 = scmp.ge.s32.totalorder %s1316_s21, 36 }
   0xa   : > { %s1654_s23 = smov (%p28_p4, %s1652_s23), 0 }
   0xb   : > { %s57_s25 = ssub.s32 %s1312_s20, %s1654_s23  ;;  %172 = sbr.rel (%p1077_p6) target bundleno = 67 (0x43), region = 16 }
   0xc   : > { %s58_s26 = sor.u32 %s57_s25, %s56_s24 }
   0xd   : > { %p59_p5 = scmp.eq.s32.totalorder %s58_s26, 0 }
   0xf   : > { %s1396_s28 = scalar_select %p59_p5, %s1296_s16, %s61_s27  }
  0x12   : > { %183 = sbr.rel (!%p70_p3) target bundleno = 67 (0x43), region = 24  ;;  %s185_s29 = sand.u32 (%p70_p3), 1, %s1296_s16  }
  0x13   : > { %s1125_s30 = sshll.u32 (%p70_p3), %s1308_s19, 8  ;;  %s1078_s5 = sshll.u32 (%p70_p3), %s185_s29, 8 }
  0x14   : > { %s190_s6 = sadd.s32 (%p70_p3), %s1312_s20, %s1125_s30  ;;  %s1410_s11 = scalar_lea.vmem (%p70_p3), [#allocation3], %s1078_s5 }
  0x15   : > { %s1081_s7 = sshll.u32 (%p70_p3), %s190_s6, 2 }
  0x16   : > { %s1405_s10 = scalar_lea.vmem (%p70_p3), %s1639_s1, %s1081_s7 }
  0x17   : > { %v208_v0 = vld [vmem:[%s1405_s10] sm:$0xf] (%p70_p3)  ;;  %v210_v1 = vld [vmem:[%s1405_s10 + $0x10] sm:$0xf] (%p70_p3) }
  0x18   : > { %v212_v2 = vld [vmem:[%s1405_s10 + $0x20] sm:$0xf] (%p70_p3)  ;;  %209 = vst [vmem:[%s1410_s11] sm:$0xf] (%p70_p3), %v208_v0  ;;  %211 = vst [vmem:[%s1410_s11 + $0x4] sm:$0xf] (%p70_p3), %v210_v1 }
  0x19   : > { %213 = vst [vmem:[%s1410_s11 + $0x8] sm:$0xf] %v212_v2  ;;  %v214_v3 = vld [vmem:[%s1405_s10 + $0x30] sm:$0xf]  ;;  %v216_v4 = vld [vmem:[%s1405_s10 + $0x40] sm:$0xf] }
  0x1a   : > { %v218_v5 = vld [vmem:[%s1405_s10 + $0x50] sm:$0xf]  ;;  %215 = vst [vmem:[%s1410_s11 + $0xc] sm:$0xf] %v214_v3  ;;  %217 = vst [vmem:[%s1410_s11 + $0x10] sm:$0xf] %v216_v4 }
  0x1b   : > { %219 = vst [vmem:[%s1410_s11 + $0x14] sm:$0xf] %v218_v5  ;;  %v220_v6 = vld [vmem:[%s1405_s10 + $0x60] sm:$0xf]  ;;  %v222_v7 = vld [vmem:[%s1405_s10 + $0x70] sm:$0xf] }
  0x1c   : > { %v224_v8 = vld [vmem:[%s1405_s10 + $0x80] sm:$0xf]  ;;  %221 = vst [vmem:[%s1410_s11 + $0x18] sm:$0xf] %v220_v6  ;;  %223 = vst [vmem:[%s1410_s11 + $0x1c] sm:$0xf] %v222_v7 }
  0x1d   : > { %225 = vst [vmem:[%s1410_s11 + $0x20] sm:$0xf] %v224_v8  ;;  %v226_v9 = vld [vmem:[%s1405_s10 + $0x90] sm:$0xf]  ;;  %v228_v10 = vld [vmem:[%s1405_s10 + $0xa0] sm:$0xf] }
  0x1e   : > { %v230_v11 = vld [vmem:[%s1405_s10 + $0xb0] sm:$0xf]  ;;  %227 = vst [vmem:[%s1410_s11 + $0x24] sm:$0xf] %v226_v9  ;;  %229 = vst [vmem:[%s1410_s11 + $0x28] sm:$0xf] %v228_v10 }
  0x1f   : > { %231 = vst [vmem:[%s1410_s11 + $0x2c] sm:$0xf] %v230_v11  ;;  %v232_v12 = vld [vmem:[%s1405_s10 + $0xc0] sm:$0xf]  ;;  %v234_v13 = vld [vmem:[%s1405_s10 + $0xd0] sm:$0xf] }
  0x20   : > { %v236_v14 = vld [vmem:[%s1405_s10 + $0xe0] sm:$0xf]  ;;  %233 = vst [vmem:[%s1410_s11 + $0x30] sm:$0xf] %v232_v12  ;;  %235 = vst [vmem:[%s1410_s11 + $0x34] sm:$0xf] %v234_v13 }
  0x21   : > { %237 = vst [vmem:[%s1410_s11 + $0x38] sm:$0xf] %v236_v14  ;;  %v238_v15 = vld [vmem:[%s1405_s10 + $0xf0] sm:$0xf]  ;;  %v240_v16 = vld [vmem:[%s1405_s10 + $0x100] sm:$0xf] }
  0x22   : > { %v242_v17 = vld [vmem:[%s1405_s10 + $0x110] sm:$0xf]  ;;  %239 = vst [vmem:[%s1410_s11 + $0x3c] sm:$0xf] %v238_v15  ;;  %241 = vst [vmem:[%s1410_s11 + $0x40] sm:$0xf] %v240_v16 }
  0x23   : > { %243 = vst [vmem:[%s1410_s11 + $0x44] sm:$0xf] %v242_v17  ;;  %v244_v18 = vld [vmem:[%s1405_s10 + $0x120] sm:$0xf]  ;;  %v246_v19 = vld [vmem:[%s1405_s10 + $0x130] sm:$0xf] }
  0x24   : > { %v248_v20 = vld [vmem:[%s1405_s10 + $0x140] sm:$0xf]  ;;  %245 = vst [vmem:[%s1410_s11 + $0x48] sm:$0xf] %v244_v18  ;;  %247 = vst [vmem:[%s1410_s11 + $0x4c] sm:$0xf] %v246_v19 }
  0x25   : > { %249 = vst [vmem:[%s1410_s11 + $0x50] sm:$0xf] %v248_v20  ;;  %v250_v21 = vld [vmem:[%s1405_s10 + $0x150] sm:$0xf]  ;;  %v252_v22 = vld [vmem:[%s1405_s10 + $0x160] sm:$0xf] }
  0x26   : > { %v254_v23 = vld [vmem:[%s1405_s10 + $0x170] sm:$0xf]  ;;  %251 = vst [vmem:[%s1410_s11 + $0x54] sm:$0xf] %v250_v21  ;;  %253 = vst [vmem:[%s1410_s11 + $0x58] sm:$0xf] %v252_v22 }
  0x27   : > { %255 = vst [vmem:[%s1410_s11 + $0x5c] sm:$0xf] %v254_v23  ;;  %v256_v24 = vld [vmem:[%s1405_s10 + $0x180] sm:$0xf]  ;;  %v258_v25 = vld [vmem:[%s1405_s10 + $0x190] sm:$0xf] }
  0x28   : > { %v260_v26 = vld [vmem:[%s1405_s10 + $0x1a0] sm:$0xf]  ;;  %257 = vst [vmem:[%s1410_s11 + $0x60] sm:$0xf] %v256_v24  ;;  %259 = vst [vmem:[%s1410_s11 + $0x64] sm:$0xf] %v258_v25 }
  0x29   : > { %261 = vst [vmem:[%s1410_s11 + $0x68] sm:$0xf] %v260_v26  ;;  %v262_v27 = vld [vmem:[%s1405_s10 + $0x1b0] sm:$0xf]  ;;  %v264_v28 = vld [vmem:[%s1405_s10 + $0x1c0] sm:$0xf] }
  0x2a   : > { %v266_v29 = vld [vmem:[%s1405_s10 + $0x1d0] sm:$0xf]  ;;  %263 = vst [vmem:[%s1410_s11 + $0x6c] sm:$0xf] %v262_v27  ;;  %265 = vst [vmem:[%s1410_s11 + $0x70] sm:$0xf] %v264_v28 }
  0x2b   : > { %267 = vst [vmem:[%s1410_s11 + $0x74] sm:$0xf] %v266_v29  ;;  %v268_v30 = vld [vmem:[%s1405_s10 + $0x1e0] sm:$0xf]  ;;  %v270_v31 = vld [vmem:[%s1405_s10 + $0x1f0] sm:$0xf] }
  0x2c   : > { %v272_v32 = vld [vmem:[%s1405_s10 + $0x200] sm:$0xf]  ;;  %269 = vst [vmem:[%s1410_s11 + $0x78] sm:$0xf] %v268_v30  ;;  %271 = vst [vmem:[%s1410_s11 + $0x7c] sm:$0xf] %v270_v31 }
  0x2d   : > { %273 = vst [vmem:[%s1410_s11 + $0x80] sm:$0xf] %v272_v32  ;;  %v274_v33 = vld [vmem:[%s1405_s10 + $0x210] sm:$0xf]  ;;  %v276_v34 = vld [vmem:[%s1405_s10 + $0x220] sm:$0xf] }
  0x2e   : > { %v278_v35 = vld [vmem:[%s1405_s10 + $0x230] sm:$0xf]  ;;  %275 = vst [vmem:[%s1410_s11 + $0x84] sm:$0xf] %v274_v33  ;;  %277 = vst [vmem:[%s1410_s11 + $0x88] sm:$0xf] %v276_v34 }
  0x2f   : > { %279 = vst [vmem:[%s1410_s11 + $0x8c] sm:$0xf] %v278_v35  ;;  %v280_v36 = vld [vmem:[%s1405_s10 + $0x240] sm:$0xf]  ;;  %v282_v37 = vld [vmem:[%s1405_s10 + $0x250] sm:$0xf] }
  0x30   : > { %v284_v38 = vld [vmem:[%s1405_s10 + $0x260] sm:$0xf]  ;;  %281 = vst [vmem:[%s1410_s11 + $0x90] sm:$0xf] %v280_v36  ;;  %283 = vst [vmem:[%s1410_s11 + $0x94] sm:$0xf] %v282_v37 }
  0x31   : > { %285 = vst [vmem:[%s1410_s11 + $0x98] sm:$0xf] %v284_v38  ;;  %v286_v39 = vld [vmem:[%s1405_s10 + $0x270] sm:$0xf]  ;;  %v288_v40 = vld [vmem:[%s1405_s10 + $0x280] sm:$0xf] }
  0x32   : > { %v290_v41 = vld [vmem:[%s1405_s10 + $0x290] sm:$0xf]  ;;  %287 = vst [vmem:[%s1410_s11 + $0x9c] sm:$0xf] %v286_v39  ;;  %289 = vst [vmem:[%s1410_s11 + $0xa0] sm:$0xf] %v288_v40 }
  0x33   : > { %291 = vst [vmem:[%s1410_s11 + $0xa4] sm:$0xf] %v290_v41  ;;  %v292_v42 = vld [vmem:[%s1405_s10 + $0x2a0] sm:$0xf]  ;;  %v294_v43 = vld [vmem:[%s1405_s10 + $0x2b0] sm:$0xf] }
  0x34   : > { %v296_v44 = vld [vmem:[%s1405_s10 + $0x2c0] sm:$0xf]  ;;  %293 = vst [vmem:[%s1410_s11 + $0xa8] sm:$0xf] %v292_v42  ;;  %295 = vst [vmem:[%s1410_s11 + $0xac] sm:$0xf] %v294_v43 }
  0x35   : > { %297 = vst [vmem:[%s1410_s11 + $0xb0] sm:$0xf] %v296_v44  ;;  %v298_v45 = vld [vmem:[%s1405_s10 + $0x2d0] sm:$0xf]  ;;  %v300_v46 = vld [vmem:[%s1405_s10 + $0x2e0] sm:$0xf] }
  0x36   : > { %v302_v47 = vld [vmem:[%s1405_s10 + $0x2f0] sm:$0xf]  ;;  %299 = vst [vmem:[%s1410_s11 + $0xb4] sm:$0xf] %v298_v45  ;;  %301 = vst [vmem:[%s1410_s11 + $0xb8] sm:$0xf] %v300_v46 }
  0x37   : > { %303 = vst [vmem:[%s1410_s11 + $0xbc] sm:$0xf] %v302_v47  ;;  %v304_v48 = vld [vmem:[%s1405_s10 + $0x300] sm:$0xf]  ;;  %v306_v49 = vld [vmem:[%s1405_s10 + $0x310] sm:$0xf] }
  0x38   : > { %v308_v50 = vld [vmem:[%s1405_s10 + $0x320] sm:$0xf]  ;;  %305 = vst [vmem:[%s1410_s11 + $0xc0] sm:$0xf] %v304_v48  ;;  %307 = vst [vmem:[%s1410_s11 + $0xc4] sm:$0xf] %v306_v49 }
  0x39   : > { %309 = vst [vmem:[%s1410_s11 + $0xc8] sm:$0xf] %v308_v50  ;;  %v310_v51 = vld [vmem:[%s1405_s10 + $0x330] sm:$0xf]  ;;  %v312_v52 = vld [vmem:[%s1405_s10 + $0x340] sm:$0xf] }
  0x3a   : > { %v314_v53 = vld [vmem:[%s1405_s10 + $0x350] sm:$0xf]  ;;  %311 = vst [vmem:[%s1410_s11 + $0xcc] sm:$0xf] %v310_v51  ;;  %313 = vst [vmem:[%s1410_s11 + $0xd0] sm:$0xf] %v312_v52 }
  0x3b   : > { %315 = vst [vmem:[%s1410_s11 + $0xd4] sm:$0xf] %v314_v53  ;;  %v316_v54 = vld [vmem:[%s1405_s10 + $0x360] sm:$0xf]  ;;  %v318_v55 = vld [vmem:[%s1405_s10 + $0x370] sm:$0xf] }
  0x3c   : > { %v320_v56 = vld [vmem:[%s1405_s10 + $0x380] sm:$0xf]  ;;  %317 = vst [vmem:[%s1410_s11 + $0xd8] sm:$0xf] %v316_v54  ;;  %319 = vst [vmem:[%s1410_s11 + $0xdc] sm:$0xf] %v318_v55 }
  0x3d   : > { %321 = vst [vmem:[%s1410_s11 + $0xe0] sm:$0xf] %v320_v56  ;;  %v322_v57 = vld [vmem:[%s1405_s10 + $0x390] sm:$0xf]  ;;  %v324_v58 = vld [vmem:[%s1405_s10 + $0x3a0] sm:$0xf] }
  0x3e   : > { %v326_v59 = vld [vmem:[%s1405_s10 + $0x3b0] sm:$0xf]  ;;  %323 = vst [vmem:[%s1410_s11 + $0xe4] sm:$0xf] %v322_v57  ;;  %325 = vst [vmem:[%s1410_s11 + $0xe8] sm:$0xf] %v324_v58 }
  0x3f   : > { %327 = vst [vmem:[%s1410_s11 + $0xec] sm:$0xf] %v326_v59  ;;  %v328_v60 = vld [vmem:[%s1405_s10 + $0x3c0] sm:$0xf]  ;;  %v330_v61 = vld [vmem:[%s1405_s10 + $0x3d0] sm:$0xf] }
  0x40   : > { %v332_v62 = vld [vmem:[%s1405_s10 + $0x3e0] sm:$0xf]  ;;  %329 = vst [vmem:[%s1410_s11 + $0xf0] sm:$0xf] %v328_v60  ;;  %331 = vst [vmem:[%s1410_s11 + $0xf4] sm:$0xf] %v330_v61 }
  0x41   : > { %333 = vst [vmem:[%s1410_s11 + $0xf8] sm:$0xf] %v332_v62  ;;  %v334_v63 = vld [vmem:[%s1405_s10 + $0x3f0] sm:$0xf] }
  0x42   : > { %335 = vst [vmem:[%s1410_s11 + $0xfc] sm:$0xf] %v334_v63 }
  0x43 PF: > { %p1082_p7 = scmp.ge.s32.totalorder %s1316_s21, 1  ;;  %p497_p8 = scmp.lt.s32.totalorder %s1316_s21, 37 }
  0x45   : > { %p498_p9 = pnand %p1082_p7, %p497_p8 }
  0x46   : > { %s504_s12 = sand.u32 (!%p498_p9), 1, %s1292_s15   ;;  %s1084_s13 = sshll.u32 (!%p498_p9), %s1300_s17, 2 }
  0x47   : > { %501 = sbr.rel (%p498_p9) target bundleno = 406 (0x196), region = 73  ;;  %s1083_s14 = sshll.u32 (!%p498_p9), %s504_s12, 8 }
  0x48   : > { %p539_p10 = scmp.lt.s32.totalorder (!%p498_p9), %s1084_s13, 35  ;;  %p544_p11 = scmp.lt.s32.totalorder (!%p498_p9), %s1304_s18, 3 }
  0x49   : > { %s1565_s11 = scalar_lea.vmem (!%p498_p9), [#allocation3], %s1083_s14  ;;  %p1086_p12 = scmp.ne.s32.totalorder (!%p498_p9), %s1300_s17, 0 }
  0x4e   : > { %s1656_s13 = smov (!%p539_p10, %s1084_s13), 35  ;;  %s1658_s18 = smov (!%p544_p11, %s1304_s18), 3 }
  0x4f   : > { %s541_s26 = scalar_lea.vmem %s1638_s0, %s1656_s13  ;;  %s546_s15 = scalar_lea.vmem %s1640_s2, %s1658_s18  ;;  %v1318_v0 = vmov (!%p1086_p12), 0.0  }
  0x50   : > { %s549_s6 = scalar_lea.vmem %s1641_s3, %s1658_s18  ;;  %s1085_s7 = sshll.u32 %s1658_s18, 1  ;;  %559 = vst [vmem:[#allocation2] sm:$0x3] (!%p1086_p12), %v1318_v0 }
  0x51   : > { %s1563_s10 = scalar_lea.vmem %s1642_s4, %s1085_s7  ;;  %558 = sbr.rel (%p1086_p12) target bundleno = 88 (0x58), region = 81 }
  0x58 PF: > { %v1228_v1 = vld [vmem:[%s1565_s11 + $0x40] sm:$0xff]   ;;  %v1232_v5 = vld [vmem:[%s1565_s11 + $0x48] sm:$0xff]   ;;  %v1236_v9 = vld [vmem:[%s1565_s11 + $0x50] sm:$0xff]   ;;  %v638_v31 = vlaneseq  ;;  %v1319_v35 = vmov 1966171168   ;;  %p1120_p13 = scmp.ne.s32.totalorder %s1300_s17, 8 }
  0x59   : > { %v1229_v2 = vld [vmem:[%s1565_s11 + $0xc0] sm:$0xff]   ;;  %1126 = vmatprep.subr.bf16.mxu0 %v1228_v1  ;;  %v1233_v6 = vld [vmem:[%s1565_s11 + $0xc8] sm:$0xff]   ;;  %v1237_v10 = vld [vmem:[%s1565_s11 + $0xd0] sm:$0xff]   ;;  %v636_v36 = vunpack.c.l.s4 %v1319_v35  ;;  %vm934_vm0 = vcmask (!%p1120_p13), 1041408  }
  0x5a   : > { %v1230_v3 = vld [vmem:[%s1565_s11] sm:$0xff]   ;;  %1148 = vmatprep.subr.bf16.mxu1 %v1229_v2  ;;  %v1234_v7 = vld [vmem:[%s1565_s11 + $0x8] sm:$0xff]   ;;  %v1238_v11 = vld [vmem:[%s1565_s11 + $0x10] sm:$0xff]   ;;  %v639_v37 = vshrl.u32 %v638_v31, 7 }
  0x5b   : > { %v1231_v4 = vld [vmem:[%s1565_s11 + $0x80] sm:$0xff]   ;;  %1127 = vmatpush3.bf16.msra.mxu0 %v1230_v3  ;;  %v1235_v8 = vld [vmem:[%s1565_s11 + $0x88] sm:$0xff]   ;;  %v1239_v12 = vld [vmem:[%s1565_s11 + $0x90] sm:$0xff]   ;;  %v637_v39 = vunpack.c.0.s8 %v636_v36 }
  0x5c   : > { %1149 = vmatpush3.bf16.msra.mxu1 %v1231_v4  ;;  %1128 = vmatprep.subr.bf16.mxu0 %v1232_v5  ;;  %v1240_v13 = vld [vmem:[%s1565_s11 + $0x58] sm:$0xff]   ;;  %v1244_v17 = vld [vmem:[%s1565_s11 + $0x60] sm:$0xff]   ;;  %v1248_v21 = vld [vmem:[%s1565_s11 + $0x68] sm:$0xff]  }
  0x5d   : > { %1150 = vmatprep.subr.bf16.mxu1 %v1233_v6  ;;  %v1241_v14 = vld [vmem:[%s1565_s11 + $0xd8] sm:$0xff]   ;;  %v1245_v18 = vld [vmem:[%s1565_s11 + $0xe0] sm:$0xff]   ;;  %v1249_v22 = vld [vmem:[%s1565_s11 + $0xe8] sm:$0xff]   ;;  %v640_v40 = vsub.s32 %v637_v39, %v639_v37 }
  0x5e   : > { %v1242_v15 = vld [vmem:[%s1565_s11 + $0x18] sm:$0xff]   ;;  %v1246_v19 = vld [vmem:[%s1565_s11 + $0x20] sm:$0xff]   ;;  %v1250_v23 = vld [vmem:[%s1565_s11 + $0x28] sm:$0xff]  }
  0x5f   : > { %1129 = vmatpush3.bf16.msra.mxu0 %v1234_v7  ;;  %v1243_v16 = vld [vmem:[%s1565_s11 + $0x98] sm:$0xff]   ;;  %v1247_v20 = vld [vmem:[%s1565_s11 + $0xa0] sm:$0xff]   ;;  %v1251_v24 = vld [vmem:[%s1565_s11 + $0xa8] sm:$0xff]  }
  0x60   : > { %1151 = vmatpush3.bf16.msra.mxu1 %v1235_v8  ;;  %1130 = vmatprep.subr.bf16.mxu0 %v1236_v9  ;;  %v1252_v25 = vld [vmem:[%s1565_s11 + $0x70] sm:$0xff]   ;;  %v1256_v29 = vld [vmem:[%s1565_s11 + $0x78] sm:$0xff]  }
  0x61   : > { %1152 = vmatprep.subr.bf16.mxu1 %v1237_v10  ;;  %v1253_v26 = vld [vmem:[%s1565_s11 + $0xf0] sm:$0xff]   ;;  %v1257_v30 = vld [vmem:[%s1565_s11 + $0xf8] sm:$0xff]  }
  0x62   : > { %v1254_v27 = vld [vmem:[%s1565_s11 + $0x30] sm:$0xff]   ;;  %v1258_v32 = vld [vmem:[%s1565_s11 + $0x38] sm:$0xff]  }
  0x63   : > { %1131 = vmatpush3.bf16.msra.mxu0 %v1238_v11  ;;  %v1255_v28 = vld [vmem:[%s1565_s11 + $0xb0] sm:$0xff]   ;;  %v1259_v33 = vld [vmem:[%s1565_s11 + $0xb8] sm:$0xff]  }
  0x64   : > { %1153 = vmatpush3.bf16.msra.mxu1 %v1239_v12  ;;  %1132 = vmatprep.subr.bf16.mxu0 %v1240_v13  ;;  %v1087_v34 = vld.sshfl [vmem:[%s541_s26] sm:$0x33 pattern:$0x75316420] }
  0x65   : > { %1154 = vmatprep.subr.bf16.mxu1 %v1241_v14  ;;  %v634_v38 = vcombine.high %v1087_v34, %v1087_v34  ;;  %v641_v42 = vrot.slane %v1087_v34, %v640_v40  ;;  %v560_v54 = vld [vmem:[#allocation2] sm:$0x3] }
  0x67   : > { %1133 = vmatpush3.bf16.msra.mxu0 %v1242_v15  ;;  %v648_v41 = vrot.slane %v634_v38, %v640_v40  ;;  %v649_v44 = vcombine.high %v641_v42, %v641_v42  ;;  %v1121_v15 = vld [vmem:[%s546_s15] ss:$0 sm:$0xff] (!%p1120_p13) }
  0x68   : > { %1155 = vmatpush3.bf16.msra.mxu1 %v1243_v16  ;;  %1134 = vmatprep.subr.bf16.mxu0 %v1244_v17  ;;  %v1122_v17 = vld [vmem:[%s549_s6] ss:$0 sm:$0xff] (!%p1120_p13) }
  0x69   : > { %1156 = vmatprep.subr.bf16.mxu1 %v1245_v18  ;;  %879 = vmatprep.mubr.bf16.mxu0 %v648_v41  ;;  %v650_v43 = vcombine.high %v648_v41, %v648_v41 }
  0x6b   : > { %1135 = vmatpush3.bf16.msra.mxu0 %v1246_v19  ;;  %919 = vmatprep.mubr.bf16.mxu1 %v650_v43 }
  0x6c   : > { %1157 = vmatpush3.bf16.msra.mxu1 %v1247_v20  ;;  %1136 = vmatprep.subr.bf16.mxu0 %v1248_v21 }
  0x6d   : > { %1158 = vmatprep.subr.bf16.mxu1 %v1249_v22 }
  0x6f   : > { %1137 = vmatpush3.bf16.msra.mxu0 %v1250_v23 }
  0x70   : > { %1159 = vmatpush3.bf16.msra.mxu1 %v1251_v24  ;;  %1138 = vmatprep.subr.bf16.mxu0 %v1252_v25 }
  0x71   : > { %1160 = vmatprep.subr.bf16.mxu1 %v1253_v26 }
  0x73   : > { %1139 = vmatpush3.bf16.msra.mxu0 %v1254_v27 }
  0x74   : > { %1161 = vmatpush3.bf16.msra.mxu1 %v1255_v28  ;;  %1140 = vmatprep.subr.bf16.mxu0 %v1256_v29 }
  0x75   : > { %1162 = vmatprep.subr.bf16.mxu1 %v1257_v30 }
  0x77   : > { %1141 = vmatpush3.bf16.msra.mxu0 %v1258_v32 }
  0x78   : > { %1163 = vmatpush3.bf16.msra.mxu1 %v1259_v33 }
  0x7a   : > { %880 = vmatmul.mubr.bf16.vlgmr.msra.gmra.mrb[0].mxu0 %v641_v42 }
  0x7b   : > { %920 = vmatmul.mubr.bf16.vlgmr.msra.gmra.mrb[0].mxu1 %v649_v44 }
 0x14d   : > { %v1142_v45 = vpop.f32.mrb[0].mxu0 }
 0x14e   : > { %v1143_v46 = vpop.f32.mrb[1].mxu0  ;;  %v1164_v47 = vpop.f32.mrb[0].mxu1 }
 0x14f   : > { %v1144_v48 = vadd.f32 %v1143_v46, %v1142_v45  ;;  %v1145_v49 = vpop.f32.mrb[2].mxu0  ;;  %v1165_v50 = vpop.f32.mrb[1].mxu1 }
 0x150   : > { %v1146_v51 = vpop.f32.mrb[3].mxu0  ;;  %v1166_v52 = vadd.f32 %v1165_v50, %v1164_v47  ;;  %v1167_v53 = vpop.f32.mrb[2].mxu1  ;;  %932 = sbr.rel (%p1120_p13) target bundleno = 406 (0x196), region = 85 }
 0x151   : > { %v1168_v55 = vpop.f32.mrb[3].mxu1 }
 0x152   : > { %v922_v56 = vadd.f32 %v1166_v52, %v1144_v48 }
 0x154   : > { %v927_v57 = vadd.f32 %v922_v56, %v560_v54 }
 0x156   : > { %928 = vst [vmem:[#allocation2] sm:$0x3] %v927_v57 }
 0x15d   : > { %v933_v58 = vld [vmem:[#allocation2] sm:$0x3] }
 0x15e   : > { %v935_v59 = vsel %vm934_vm0, %v933_v58, 0.0 }
 0x15f   : > { %v936_v60 = vrot.slane %v935_v59, 4 }
 0x161   : > { %v937_v61 = vadd.f32 %v936_v60, %v935_v59 }
 0x163   : > { %v938_v62 = vrot.slane %v937_v61, 2 }
 0x165   : > { %v939_v63 = vadd.f32 %v938_v62, %v937_v61 }
 0x167   : > { %v940_v0 = vrot.slane %v939_v63, 1 }
 0x169   : > { %v941_v1 = vadd.f32 %v940_v0, %v939_v63 }
 0x16b   : > { %v943_v2 = vmul.f32 0.5, %v941_v1 }
 0x16d   : > { %v944_v3 = vsub.f32 %v933_v58, %v943_v2 }
 0x16f   : > { %v945_v4 = vmul.f32 %v944_v3, %v944_v3 }
 0x171   : > { %v946_v5 = vsel %vm934_vm0, %v945_v4, 0.0 }
 0x172   : > { %v947_v6 = vrot.slane %v946_v5, 4 }
 0x174   : > { %v948_v7 = vadd.f32 %v947_v6, %v946_v5 }
 0x176   : > { %v949_v8 = vrot.slane %v948_v7, 2 }
 0x178   : > { %v950_v9 = vadd.f32 %v949_v8, %v948_v7 }
 0x17a   : > { %v951_v10 = vrot.slane %v950_v9, 1 }
 0x17c   : > { %v952_v11 = vadd.f32 %v951_v10, %v950_v9 }
 0x17e   : > { %v953_v12 = vmul.f32 0.5, %v952_v11 }
 0x180   : > { %v954_v13 = vadd.f32 1e-05, %v953_v12 }
 0x182   : > { %1260 = vrsqrt.f32 %v954_v13 }
 0x18c   : > { %v1261_v14 = vpop.eup %1260 }
 0x18d   : > { %v956_v16 = vmul.f32 %v1261_v14, %v944_v3 }
 0x18f   : > { %v964_v18 = vmul.f32 %v1121_v15, %v956_v16 }
 0x191   : > { %v972_v19 = vadd.f32 %v1122_v17, %v964_v18 }
 0x193   : > { %v973_v20 = vmax.f32 %v972_v19, 0.0 }
 0x195   : > { %974 = vst [vmem:[%s1563_s10] sm:$0x3] %v973_v20 }
 0x196 PF: > { %s14_s21 = sadd.s32 1, %s1316_s21   ;;  %s1643_s15 = smov %s1296_s16 }
 0x197   : > { %p11_p0 = scmp.ge.s32.totalorder %s14_s21, 38   ;;  %s1644_s16 = smov %s1396_s28 }
 0x198   : > { %s1645_s17 = smov %s1308_s19  ;;  %s1646_s18 = smov %s1312_s20 }
 0x199   : > { %s1647_s19 = smov %s1650_s22  ;;  %s1648_s20 = smov %s1654_s23 }
 0x19a   :  { %13 = sbr.rel (!%p11_p0) target bundleno = 4 (0x4), region = 129 }

// kernel: shedd_forward.62
= control target key start
LH: loop header
LB: loop body
LE: loop exit
PB: predicated region body
PF: predicated region fallthrough
CT: control target
= control target key end

     0   :  { %v505_v22 = vmov 1966171168   ;;  %v99_v24 = vlaneseq  ;;  %vm388_vm0 = vcmask 91136   ;;  %s631_s1 = inlined_call_operand.vmem [shape: bf16[512,12], index: 1, kind: input, shape index: {}]   ;;  %s632_s0 = inlined_call_operand.vmem [shape: bf16[2,512], index: 0, kind: input, shape index: {}]   ;;  %s633_s2 = inlined_call_operand.vmem [shape: f32[1,12], index: 2, kind: input, shape index: {}]   ;;  %s634_s3 = inlined_call_operand.vmem [shape: f32[2,12], index: 3, kind: output, shape index: {}]  }
   0x1   :  { %v473_v0 = vld [vmem:[%s631_s1 + $0x40] sm:$0xff]   ;;  %v477_v4 = vld [vmem:[%s631_s1 + $0x48] sm:$0xff]   ;;  %v481_v8 = vld [vmem:[%s631_s1 + $0x50] sm:$0xff]   ;;  %v97_v23 = vunpack.c.l.s4 %v505_v22 }
   0x2   :  { %v474_v1 = vld [vmem:[%s631_s1 + $0xc0] sm:$0xff]   ;;  %428 = vmatprep.subr.bf16.mxu0 %v473_v0  ;;  %v478_v5 = vld [vmem:[%s631_s1 + $0xc8] sm:$0xff]   ;;  %v482_v9 = vld [vmem:[%s631_s1 + $0xd0] sm:$0xff]   ;;  %v100_v30 = vshrl.u32 %v99_v24, 7 }
   0x3   :  { %v475_v2 = vld [vmem:[%s631_s1] sm:$0xff]   ;;  %450 = vmatprep.subr.bf16.mxu1 %v474_v1  ;;  %v479_v6 = vld [vmem:[%s631_s1 + $0x8] sm:$0xff]   ;;  %v483_v10 = vld [vmem:[%s631_s1 + $0x10] sm:$0xff]   ;;  %v98_v29 = vunpack.c.0.s8 %v97_v23 }
   0x4   :  { %v476_v3 = vld [vmem:[%s631_s1 + $0x80] sm:$0xff]   ;;  %429 = vmatpush3.bf16.msra.mxu0 %v475_v2  ;;  %v480_v7 = vld [vmem:[%s631_s1 + $0x88] sm:$0xff]   ;;  %v484_v11 = vld [vmem:[%s631_s1 + $0x90] sm:$0xff]  }
   0x5   :  { %451 = vmatpush3.bf16.msra.mxu1 %v476_v3  ;;  %430 = vmatprep.subr.bf16.mxu0 %v477_v4  ;;  %v485_v12 = vld [vmem:[%s631_s1 + $0x58] sm:$0xff]   ;;  %v489_v16 = vld [vmem:[%s631_s1 + $0x60] sm:$0xff]   ;;  %v493_v20 = vld [vmem:[%s631_s1 + $0x68] sm:$0xff]   ;;  %v101_v35 = vsub.s32 %v98_v29, %v100_v30 }
   0x6   :  { %452 = vmatprep.subr.bf16.mxu1 %v478_v5  ;;  %v486_v13 = vld [vmem:[%s631_s1 + $0xd8] sm:$0xff]   ;;  %v490_v17 = vld [vmem:[%s631_s1 + $0xe0] sm:$0xff]   ;;  %v494_v21 = vld [vmem:[%s631_s1 + $0xe8] sm:$0xff]  }
   0x7   :  { %v487_v14 = vld [vmem:[%s631_s1 + $0x18] sm:$0xff]   ;;  %v491_v18 = vld [vmem:[%s631_s1 + $0x20] sm:$0xff]   ;;  %v495_v25 = vld [vmem:[%s631_s1 + $0x28] sm:$0xff]  }
   0x8   :  { %431 = vmatpush3.bf16.msra.mxu0 %v479_v6  ;;  %v488_v15 = vld [vmem:[%s631_s1 + $0x98] sm:$0xff]   ;;  %v492_v19 = vld [vmem:[%s631_s1 + $0xa0] sm:$0xff]   ;;  %v496_v26 = vld [vmem:[%s631_s1 + $0xa8] sm:$0xff]  }
   0x9   :  { %453 = vmatpush3.bf16.msra.mxu1 %v480_v7  ;;  %432 = vmatprep.subr.bf16.mxu0 %v481_v8  ;;  %v497_v27 = vld [vmem:[%s631_s1 + $0x70] sm:$0xff]   ;;  %v501_v33 = vld [vmem:[%s631_s1 + $0x78] sm:$0xff]   ;;  %v395_v38 = vld.sshfl [vmem:[%s632_s0] sm:$0x33 pattern:$0x75316420] }
   0xa   :  { %454 = vmatprep.subr.bf16.mxu1 %v482_v9  ;;  %v498_v28 = vld [vmem:[%s631_s1 + $0xf0] sm:$0xff]   ;;  %v502_v34 = vld [vmem:[%s631_s1 + $0xf8] sm:$0xff]   ;;  %v95_v39 = vcombine.high %v395_v38, %v395_v38  ;;  %v102_v40 = vrot.slane %v395_v38, %v101_v35  ;;  %v394_v45 = vld [vmem:[%s633_s2] ss:$0 sm:$0xff] }
   0xb   :  { %v499_v31 = vld [vmem:[%s631_s1 + $0x30] sm:$0xff]   ;;  %v503_v36 = vld [vmem:[%s631_s1 + $0x38] sm:$0xff]  }
   0xc   :  { %433 = vmatpush3.bf16.msra.mxu0 %v483_v10  ;;  %v500_v32 = vld [vmem:[%s631_s1 + $0xb0] sm:$0xff]   ;;  %v504_v37 = vld [vmem:[%s631_s1 + $0xb8] sm:$0xff]   ;;  %v109_v41 = vrot.slane %v95_v39, %v101_v35  ;;  %v110_v42 = vcombine.high %v102_v40, %v102_v40 }
   0xd   :  { %455 = vmatpush3.bf16.msra.mxu1 %v484_v11  ;;  %434 = vmatprep.subr.bf16.mxu0 %v485_v12 }
   0xe   :  { %456 = vmatprep.subr.bf16.mxu1 %v486_v13  ;;  %340 = vmatprep.mubr.bf16.mxu0 %v109_v41  ;;  %v111_v43 = vcombine.high %v109_v41, %v109_v41 }
  0x10   :  { %435 = vmatpush3.bf16.msra.mxu0 %v487_v14  ;;  %380 = vmatprep.mubr.bf16.mxu1 %v111_v43 }
  0x11   :  { %457 = vmatpush3.bf16.msra.mxu1 %v488_v15  ;;  %436 = vmatprep.subr.bf16.mxu0 %v489_v16 }
  0x12   :  { %458 = vmatprep.subr.bf16.mxu1 %v490_v17 }
  0x14   :  { %437 = vmatpush3.bf16.msra.mxu0 %v491_v18 }
  0x15   :  { %459 = vmatpush3.bf16.msra.mxu1 %v492_v19  ;;  %438 = vmatprep.subr.bf16.mxu0 %v493_v20 }
  0x16   :  { %460 = vmatprep.subr.bf16.mxu1 %v494_v21 }
  0x18   :  { %439 = vmatpush3.bf16.msra.mxu0 %v495_v25 }
  0x19   :  { %461 = vmatpush3.bf16.msra.mxu1 %v496_v26  ;;  %440 = vmatprep.subr.bf16.mxu0 %v497_v27 }
  0x1a   :  { %462 = vmatprep.subr.bf16.mxu1 %v498_v28 }
  0x1c   :  { %441 = vmatpush3.bf16.msra.mxu0 %v499_v31 }
  0x1d   :  { %463 = vmatpush3.bf16.msra.mxu1 %v500_v32  ;;  %442 = vmatprep.subr.bf16.mxu0 %v501_v33 }
  0x1e   :  { %464 = vmatprep.subr.bf16.mxu1 %v502_v34 }
  0x20   :  { %443 = vmatpush3.bf16.msra.mxu0 %v503_v36 }
  0x21   :  { %465 = vmatpush3.bf16.msra.mxu1 %v504_v37 }
  0x23   :  { %341 = vmatmul.mubr.bf16.vlgmr.msra.gmra.mrb[0].mxu0 %v102_v40 }
  0x24   :  { %381 = vmatmul.mubr.bf16.vlgmr.msra.gmra.mrb[0].mxu1 %v110_v42 }
  0xf6   :  { %v444_v44 = vpop.f32.mrb[0].mxu0 }
  0xf7   :  { %v445_v46 = vpop.f32.mrb[1].mxu0  ;;  %v466_v47 = vpop.f32.mrb[0].mxu1 }
  0xf8   :  { %v446_v48 = vadd.f32 %v445_v46, %v444_v44  ;;  %v447_v49 = vpop.f32.mrb[2].mxu0  ;;  %v467_v50 = vpop.f32.mrb[1].mxu1 }
  0xf9   :  { %v448_v51 = vpop.f32.mrb[3].mxu0  ;;  %v468_v53 = vadd.f32 %v467_v50, %v466_v47  ;;  %v469_v54 = vpop.f32.mrb[2].mxu1 }
  0xfa   :  { %v343_v52 = vadd.f32 %v446_v48, %v394_v45  ;;  %v470_v55 = vpop.f32.mrb[3].mxu1 }
  0xfc   :  { %v383_v56 = vadd.f32 %v468_v53, %v343_v52 }
  0xfe   :  { %389 = vst.msk [vmem:[%s634_s3] sm:$0x3] %vm388_vm0, %v383_v56 }

// kernel: shedd_forward.63
= control target key start
LH: loop header
LB: loop body
LE: loop exit
PB: predicated region body
PF: predicated region fallthrough
CT: control target
= control target key end

     0   :  { %vm22_vm0 = vcmask 523264   ;;  %v642_v1 = vmov 0.0   ;;  %s899_s1 = inlined_call_operand.vmem [shape: bf16[128,64], index: 1, kind: input, shape index: {}]   ;;  %s900_s0 = inlined_call_operand.vmem [shape: bf16[128,128], index: 0, kind: input, shape index: {}]   ;;  %s901_s2 = inlined_call_operand.vmem [shape: f32[1,64], index: 2, kind: input, shape index: {}]   ;;  %s902_s3 = inlined_call_operand.vmem [shape: f32[1,64], index: 3, kind: input, shape index: {}]   ;;  %s903_s4 = inlined_call_operand.vmem [shape: f32[128,64], index: 4, kind: output, shape index: {}]  }
   0x1   :  { %v624_v0 = vld [vmem:[%s899_s1] sm:$0xff]   ;;  %25 = vst.msk [vmem:[#allocation2 + $0x10] sm:$0xff] %vm22_vm0, %v642_v1  ;;  %23 = vst.msk [vmem:[#allocation2] sm:$0xff] %vm22_vm0, %v642_v1  ;;  %v625_v2 = vld [vmem:[%s899_s1 + $0x8] sm:$0xff]  }
   0x2   :  { %24 = vst.msk [vmem:[#allocation2 + $0x8] sm:$0xff] %vm22_vm0, %v642_v1  ;;  %26 = vst.msk [vmem:[#allocation2 + $0x18] sm:$0xff] %vm22_vm0, %v642_v1  ;;  %575 = vmatprep.subr.bf16.mxu0 %v624_v0  ;;  %607 = vmatprep.subr.bf16.mxu1 %v624_v0  ;;  %v626_v3 = vld [vmem:[%s899_s1 + $0x10] sm:$0xff]   ;;  %v627_v4 = vld [vmem:[%s899_s1 + $0x18] sm:$0xff]  }
   0x3   :  { %27 = vst.msk [vmem:[#allocation2 + $0x20] sm:$0xff] %vm22_vm0, %v642_v1  ;;  %28 = vst.msk [vmem:[#allocation2 + $0x28] sm:$0xff] %vm22_vm0, %v642_v1  ;;  %576 = vmatpush3.bf16.msra.mxu0 %v624_v0  ;;  %615 = vmatpush3.bf16.msra.mxu1 %v624_v0  ;;  %v632_v5 = vld [vmem:[%s900_s0] sm:$0xff]   ;;  %v629_v8 = vld [vmem:[%s899_s1 + $0x28] sm:$0xff]  }
   0x4   :  { %29 = vst.msk [vmem:[#allocation2 + $0x30] sm:$0xff] %vm22_vm0, %v642_v1  ;;  %30 = vst.msk [vmem:[#allocation2 + $0x38] sm:$0xff] %vm22_vm0, %v642_v1  ;;  %577 = vmatprep.subr.bf16.mxu0 %v625_v2  ;;  %608 = vmatprep.subr.bf16.mxu1 %v625_v2  ;;  %v628_v6 = vld [vmem:[%s899_s1 + $0x20] sm:$0xff]   ;;  %v630_v9 = vld [vmem:[%s899_s1 + $0x30] sm:$0xff]  }
   0x5   :  { %31 = vst.msk [vmem:[#allocation2 + $0x40] sm:$0xff] %vm22_vm0, %v642_v1  ;;  %32 = vst.msk [vmem:[#allocation2 + $0x48] sm:$0xff] %vm22_vm0, %v642_v1  ;;  %591 = vmatprep.mubr.bf16.mxu0 %v632_v5  ;;  %v636_v7 = vld [vmem:[%s900_s0 + $0x20] sm:$0xff]   ;;  %v631_v10 = vld [vmem:[%s899_s1 + $0x38] sm:$0xff]  }
   0x6   :  { %33 = vst.msk [vmem:[#allocation2 + $0x50] sm:$0xff] %vm22_vm0, %v642_v1  ;;  %34 = vst.msk [vmem:[#allocation2 + $0x58] sm:$0xff] %vm22_vm0, %v642_v1  ;;  %599 = vmatprep.mubr.bf16.mxu1 %v636_v7  ;;  %v633_v11 = vld [vmem:[%s900_s0 + $0x8] sm:$0xff]   ;;  %v634_v13 = vld [vmem:[%s900_s0 + $0x10] sm:$0xff]  }
   0x7   :  { %35 = vst.msk [vmem:[#allocation2 + $0x60] sm:$0xff] %vm22_vm0, %v642_v1  ;;  %36 = vst.msk [vmem:[#allocation2 + $0x68] sm:$0xff] %vm22_vm0, %v642_v1  ;;  %578 = vmatpush3.bf16.msra.mxu0 %v625_v2  ;;  %616 = vmatpush3.bf16.msra.mxu1 %v625_v2  ;;  %v637_v12 = vld [vmem:[%s900_s0 + $0x28] sm:$0xff]   ;;  %v638_v14 = vld [vmem:[%s900_s0 + $0x30] sm:$0xff]  }
   0x8   :  { %37 = vst.msk [vmem:[#allocation2 + $0x70] sm:$0xff] %vm22_vm0, %v642_v1  ;;  %38 = vst.msk [vmem:[#allocation2 + $0x78] sm:$0xff] %vm22_vm0, %v642_v1  ;;  %579 = vmatprep.subr.bf16.mxu0 %v626_v3  ;;  %609 = vmatprep.subr.bf16.mxu1 %v626_v3  ;;  %v635_v15 = vld [vmem:[%s900_s0 + $0x18] sm:$0xff]   ;;  %v41_v17 = vld [vmem:[#allocation2 + $0x10] sm:$0xff] }
   0x9   :  { %v639_v16 = vld [vmem:[%s900_s0 + $0x38] sm:$0xff]   ;;  %v39_v19 = vld [vmem:[#allocation2] sm:$0xff]  ;;  %v40_v27 = vld [vmem:[#allocation2 + $0x8] sm:$0xff] }
   0xa   :  { %v42_v22 = vld [vmem:[#allocation2 + $0x18] sm:$0xff]  ;;  %v43_v43 = vld [vmem:[#allocation2 + $0x20] sm:$0xff]  ;;  %v44_v51 = vld [vmem:[#allocation2 + $0x28] sm:$0xff] }
   0xb   :  { %580 = vmatpush3.bf16.msra.mxu0 %v626_v3  ;;  %617 = vmatpush3.bf16.msra.mxu1 %v626_v3  ;;  %v45_v41 = vld [vmem:[#allocation2 + $0x30] sm:$0xff]  ;;  %v46_v46 = vld [vmem:[#allocation2 + $0x38] sm:$0xff] }
   0xc   :  { %581 = vmatprep.subr.bf16.mxu0 %v627_v4  ;;  %610 = vmatprep.subr.bf16.mxu1 %v627_v4  ;;  %v47_v20 = vld [vmem:[#allocation2 + $0x40] sm:$0xff]  ;;  %v48_v30 = vld [vmem:[#allocation2 + $0x48] sm:$0xff] }
   0xd   :  { %v49_v18 = vld [vmem:[#allocation2 + $0x50] sm:$0xff]  ;;  %v50_v24 = vld [vmem:[#allocation2 + $0x58] sm:$0xff] }
   0xe   :  { %v51_v44 = vld [vmem:[#allocation2 + $0x60] sm:$0xff]  ;;  %v52_v54 = vld [vmem:[#allocation2 + $0x68] sm:$0xff] }
   0xf   :  { %582 = vmatpush3.bf16.msra.mxu0 %v627_v4  ;;  %618 = vmatpush3.bf16.msra.mxu1 %v627_v4  ;;  %v53_v42 = vld [vmem:[#allocation2 + $0x70] sm:$0xff]  ;;  %v54_v48 = vld [vmem:[#allocation2 + $0x78] sm:$0xff] }
  0x10   :  { %583 = vmatprep.subr.bf16.mxu0 %v628_v6  ;;  %611 = vmatprep.subr.bf16.mxu1 %v628_v6 }
  0x13   :  { %584 = vmatpush3.bf16.msra.mxu0 %v628_v6  ;;  %619 = vmatpush3.bf16.msra.mxu1 %v628_v6 }
  0x14   :  { %585 = vmatprep.subr.bf16.mxu0 %v629_v8  ;;  %612 = vmatprep.subr.bf16.mxu1 %v629_v8 }
  0x17   :  { %586 = vmatpush3.bf16.msra.mxu0 %v629_v8  ;;  %620 = vmatpush3.bf16.msra.mxu1 %v629_v8 }
  0x18   :  { %587 = vmatprep.subr.bf16.mxu0 %v630_v9  ;;  %613 = vmatprep.subr.bf16.mxu1 %v630_v9 }
  0x1b   :  { %588 = vmatpush3.bf16.msra.mxu0 %v630_v9  ;;  %621 = vmatpush3.bf16.msra.mxu1 %v630_v9 }
  0x1c   :  { %589 = vmatprep.subr.bf16.mxu0 %v631_v10  ;;  %614 = vmatprep.subr.bf16.mxu1 %v631_v10 }
  0x1f   :  { %590 = vmatpush3.bf16.msra.mxu0 %v631_v10  ;;  %622 = vmatpush3.bf16.msra.mxu1 %v631_v10 }
  0x22   :  { %592 = vmatmul.mubr.bf16.vlgmr.msra.gmra.mrb[0].mxu0 %v633_v11  ;;  %600 = vmatmul.mubr.bf16.vlgmr.msra.gmra.mrb[0].mxu1 %v637_v12 }
  0x23   :  { %595 = vmatprep.mubr.bf16.mxu0 %v634_v13  ;;  %603 = vmatprep.mubr.bf16.mxu1 %v638_v14 }
  0x2a   :  { %596 = vmatmul.mubr.bf16.gmra.mrb[4].mxu0 %v635_v15  ;;  %604 = vmatmul.mubr.bf16.gmra.mrb[4].mxu1 %v639_v16 }
  0xf5   :  { %v593_v21 = vpop.f32.mrb[0].mxu0  ;;  %v601_v23 = vpop.f32.mrb[0].mxu1 }
  0xf6   :  { %v282_v25 = vadd.f32 %v593_v21, %v41_v17  ;;  %v217_v26 = vpop.f32.mrb[1].mxu0  ;;  %v290_v28 = vadd.f32 %v601_v23, %v49_v18  ;;  %v249_v29 = vpop.f32.mrb[1].mxu1 }
  0xf7   :  { %v280_v31 = vadd.f32 %v217_v26, %v39_v19  ;;  %v594_v32 = vpop.f32.mrb[2].mxu0  ;;  %v288_v33 = vadd.f32 %v249_v29, %v47_v20  ;;  %v602_v34 = vpop.f32.mrb[2].mxu1 }
  0xf8   :  { %299 = vst.msk [vmem:[#allocation2 + $0x10] sm:$0xff] %vm22_vm0, %v282_v25  ;;  %v283_v35 = vadd.f32 %v594_v32, %v42_v22  ;;  %v220_v36 = vpop.f32.mrb[3].mxu0  ;;  %307 = vst.msk [vmem:[#allocation2 + $0x50] sm:$0xff] %vm22_vm0, %v290_v28  ;;  %v291_v37 = vadd.f32 %v602_v34, %v50_v24  ;;  %v252_v38 = vpop.f32.mrb[3].mxu1 }
  0xf9   :  { %297 = vst.msk [vmem:[#allocation2] sm:$0xff] %vm22_vm0, %v280_v31  ;;  %v281_v39 = vadd.f32 %v220_v36, %v40_v27  ;;  %305 = vst.msk [vmem:[#allocation2 + $0x40] sm:$0xff] %vm22_vm0, %v288_v33  ;;  %v289_v40 = vadd.f32 %v252_v38, %v48_v30 }
  0xfa   :  { %300 = vst.msk [vmem:[#allocation2 + $0x18] sm:$0xff] %vm22_vm0, %v283_v35  ;;  %308 = vst.msk [vmem:[#allocation2 + $0x58] sm:$0xff] %vm22_vm0, %v291_v37 }
  0xfb   :  { %298 = vst.msk [vmem:[#allocation2 + $0x8] sm:$0xff] %vm22_vm0, %v281_v39  ;;  %306 = vst.msk [vmem:[#allocation2 + $0x48] sm:$0xff] %vm22_vm0, %v289_v40 }
  0xfd   :  { %v597_v45 = vpop.f32.mrb[4].mxu0  ;;  %v605_v47 = vpop.f32.mrb[4].mxu1 }
  0xfe   :  { %v286_v49 = vadd.f32 %v597_v45, %v45_v41  ;;  %v233_v50 = vpop.f32.mrb[5].mxu0  ;;  %v294_v52 = vadd.f32 %v605_v47, %v53_v42  ;;  %v265_v53 = vpop.f32.mrb[5].mxu1 }
  0xff   :  { %v284_v55 = vadd.f32 %v233_v50, %v43_v43  ;;  %v598_v56 = vpop.f32.mrb[6].mxu0  ;;  %v292_v57 = vadd.f32 %v265_v53, %v51_v44  ;;  %v606_v58 = vpop.f32.mrb[6].mxu1  ;;  %v318_v2 = vld [vmem:[#allocation2 + $0x10] sm:$0xff] }
 0x100   :  { %v740_v59 = vld [vmem:[#allocation2] sm:$0xff]  ;;  %303 = vst.msk [vmem:[#allocation2 + $0x30] sm:$0xff] %vm22_vm0, %v286_v49  ;;  %v287_v60 = vadd.f32 %v598_v56, %v46_v46  ;;  %v236_v61 = vpop.f32.mrb[7].mxu0  ;;  %311 = vst.msk [vmem:[#allocation2 + $0x70] sm:$0xff] %vm22_vm0, %v294_v52  ;;  %v295_v62 = vadd.f32 %v606_v58, %v54_v48  ;;  %v268_v63 = vpop.f32.mrb[7].mxu1  ;;  %v335_v8 = vsel %vm22_vm0, %v318_v2, 0.0 }
 0x101   :  { %301 = vst.msk [vmem:[#allocation2 + $0x20] sm:$0xff] %vm22_vm0, %v284_v55  ;;  %v285_v0 = vadd.f32 %v236_v61, %v44_v51  ;;  %309 = vst.msk [vmem:[#allocation2 + $0x60] sm:$0xff] %vm22_vm0, %v292_v57  ;;  %v293_v1 = vadd.f32 %v268_v63, %v52_v54  ;;  %v332_v4 = vsel %vm22_vm0, %v740_v59, 0.0  ;;  %v319_v6 = vld [vmem:[#allocation2 + $0x18] sm:$0xff]  ;;  %v324_v20 = vld [vmem:[#allocation2 + $0x40] sm:$0xff] }
 0x102   :  { %v317_v3 = vld [vmem:[#allocation2 + $0x8] sm:$0xff]  ;;  %304 = vst.msk [vmem:[#allocation2 + $0x38] sm:$0xff] %vm22_vm0, %v287_v60  ;;  %312 = vst.msk [vmem:[#allocation2 + $0x78] sm:$0xff] %vm22_vm0, %v295_v62  ;;  %v337_v10 = vsel %vm22_vm0, %v319_v6, 0.0  ;;  %v347_v24 = vsel %vm22_vm0, %v324_v20, 0.0  ;;  %v326_v27 = vld [vmem:[#allocation2 + $0x50] sm:$0xff] }
 0x103   :  { %v333_v5 = vsel %vm22_vm0, %v317_v3, 0.0  ;;  %302 = vst.msk [vmem:[#allocation2 + $0x28] sm:$0xff] %vm22_vm0, %v285_v0  ;;  %310 = vst.msk [vmem:[#allocation2 + $0x68] sm:$0xff] %vm22_vm0, %v293_v1  ;;  %v325_v26 = vld [vmem:[#allocation2 + $0x48] sm:$0xff]  ;;  %v327_v30 = vld [vmem:[#allocation2 + $0x58] sm:$0xff]  ;;  %v351_v33 = vsel %vm22_vm0, %v326_v27, 0.0 }
 0x104   :  { %v334_v7 = vadd.f32 %v333_v5, %v332_v4  ;;  %v349_v29 = vsel %vm22_vm0, %v325_v26, 0.0  ;;  %v353_v35 = vsel %vm22_vm0, %v327_v30, 0.0 }
 0x106   :  { %v336_v9 = vadd.f32 %v335_v8, %v334_v7 }
 0x107   :  { %v322_v14 = vld [vmem:[#allocation2 + $0x30] sm:$0xff] }
 0x108   :  { %v320_v11 = vld [vmem:[#allocation2 + $0x20] sm:$0xff]  ;;  %v338_v12 = vadd.f32 %v337_v10, %v336_v9  ;;  %v343_v21 = vsel %vm22_vm0, %v322_v14, 0.0  ;;  %v330_v39 = vld [vmem:[#allocation2 + $0x70] sm:$0xff] }
 0x109   :  { %v339_v13 = vsel %vm22_vm0, %v320_v11, 0.0  ;;  %v323_v18 = vld [vmem:[#allocation2 + $0x38] sm:$0xff]  ;;  %v328_v32 = vld [vmem:[#allocation2 + $0x60] sm:$0xff]  ;;  %v359_v44 = vsel %vm22_vm0, %v330_v39, 0.0 }
 0x10a   :  { %v340_v15 = vadd.f32 %v339_v13, %v338_v12  ;;  %v321_v16 = vld [vmem:[#allocation2 + $0x28] sm:$0xff]  ;;  %v345_v23 = vsel %vm22_vm0, %v323_v18, 0.0  ;;  %v355_v36 = vsel %vm22_vm0, %v328_v32, 0.0  ;;  %v331_v42 = vld [vmem:[#allocation2 + $0x78] sm:$0xff] }
 0x10b   :  { %v341_v17 = vsel %vm22_vm0, %v321_v16, 0.0  ;;  %v329_v38 = vld [vmem:[#allocation2 + $0x68] sm:$0xff]  ;;  %v361_v46 = vsel %vm22_vm0, %v331_v42, 0.0 }
 0x10c   :  { %v342_v19 = vadd.f32 %v341_v17, %v340_v15  ;;  %v357_v41 = vsel %vm22_vm0, %v329_v38, 0.0 }
 0x10e   :  { %v344_v22 = vadd.f32 %v343_v21, %v342_v19 }
 0x110   :  { %v346_v25 = vadd.f32 %v345_v23, %v344_v22 }
 0x112   :  { %v348_v28 = vadd.f32 %v347_v24, %v346_v25 }
 0x114   :  { %v350_v31 = vadd.f32 %v349_v29, %v348_v28 }
 0x116   :  { %v352_v34 = vadd.f32 %v351_v33, %v350_v31 }
 0x118   :  { %v354_v37 = vadd.f32 %v353_v35, %v352_v34 }
 0x11a   :  { %v356_v40 = vadd.f32 %v355_v36, %v354_v37 }
 0x11c   :  { %v358_v43 = vadd.f32 %v357_v41, %v356_v40 }
 0x11e   :  { %v360_v45 = vadd.f32 %v359_v44, %v358_v43 }
 0x120   :  { %v362_v47 = vadd.f32 %v361_v46, %v360_v45 }
 0x122   :  { %v363_v48 = vrot.slane %v362_v47, 4 }
 0x124   :  { %v364_v49 = vadd.f32 %v363_v48, %v362_v47 }
 0x126   :  { %v365_v50 = vrot.slane %v364_v49, 2 }
 0x128   :  { %v366_v51 = vadd.f32 %v365_v50, %v364_v49 }
 0x12a   :  { %v367_v52 = vrot.slane %v366_v51, 1 }
 0x12c   :  { %v368_v53 = vadd.f32 %v367_v52, %v366_v51 }
 0x12e   :  { %v370_v54 = vmul.f32 0.0078125, %v368_v53 }
 0x130   :  { %v768_v55 = vsub.f32 %v740_v59, %v370_v54  ;;  %v770_v56 = vsub.f32 %v317_v3, %v370_v54  ;;  %v772_v57 = vsub.f32 %v318_v2, %v370_v54  ;;  %v774_v58 = vsub.f32 %v319_v6, %v370_v54 }
 0x131   :  { %v780_v62 = vsub.f32 %v320_v11, %v370_v54  ;;  %v784_v0 = vsub.f32 %v321_v16, %v370_v54  ;;  %v790_v4 = vsub.f32 %v322_v14, %v370_v54  ;;  %v795_v8 = vsub.f32 %v323_v18, %v370_v54 }
 0x132   :  { %v387_v60 = vmul.f32 %v768_v55, %v768_v55  ;;  %v388_v61 = vmul.f32 %v770_v56, %v770_v56  ;;  %v389_v63 = vmul.f32 %v772_v57, %v772_v57  ;;  %v390_v59 = vmul.f32 %v774_v58, %v774_v58 }
 0x133   :  { %v391_v5 = vmul.f32 %v780_v62, %v780_v62  ;;  %v392_v9 = vmul.f32 %v784_v0, %v784_v0  ;;  %v800_v12 = vsub.f32 %v324_v20, %v370_v54  ;;  %v393_v13 = vmul.f32 %v790_v4, %v790_v4 }
 0x134   :  { %v403_v1 = vsel %vm22_vm0, %v387_v60, 0.0  ;;  %v404_v2 = vsel %vm22_vm0, %v388_v61, 0.0  ;;  %v406_v6 = vsel %vm22_vm0, %v389_v63, 0.0  ;;  %v408_v10 = vsel %vm22_vm0, %v390_v59, 0.0 }
 0x135   :  { %v405_v3 = vadd.f32 %v404_v2, %v403_v1  ;;  %v410_v14 = vsel %vm22_vm0, %v391_v5, 0.0  ;;  %v380_v16 = vsub.f32 %v325_v26, %v370_v54  ;;  %v394_v17 = vmul.f32 %v795_v8, %v795_v8 }
 0x136   :  { %v412_v18 = vsel %vm22_vm0, %v392_v9, 0.0  ;;  %v381_v21 = vsub.f32 %v326_v27, %v370_v54  ;;  %v395_v22 = vmul.f32 %v800_v12, %v800_v12  ;;  %v414_v20 = vsel %vm22_vm0, %v393_v13, 0.0 }
 0x137   :  { %v407_v7 = vadd.f32 %v406_v6, %v405_v3  ;;  %v382_v24 = vsub.f32 %v327_v30, %v370_v54  ;;  %v396_v25 = vmul.f32 %v380_v16, %v380_v16  ;;  %v416_v28 = vsel %vm22_vm0, %v394_v17, 0.0  ;;  %v557_v17 = vld [vmem:[%s901_s2] ss:$0 sm:$0xff] }
 0x138   :  { %v383_v31 = vsub.f32 %v328_v32, %v370_v54  ;;  %v397_v26 = vmul.f32 %v381_v21, %v381_v21  ;;  %v418_v33 = vsel %vm22_vm0, %v395_v22, 0.0  ;;  %v384_v35 = vsub.f32 %v329_v38, %v370_v54 }
 0x139   :  { %v409_v11 = vadd.f32 %v408_v10, %v407_v7  ;;  %v398_v36 = vmul.f32 %v382_v24, %v382_v24  ;;  %v420_v27 = vsel %vm22_vm0, %v396_v25, 0.0  ;;  %v385_v40 = vsub.f32 %v330_v39, %v370_v54 }
 0x13a   :  { %v399_v41 = vmul.f32 %v383_v31, %v383_v31  ;;  %v422_v43 = vsel %vm22_vm0, %v397_v26, 0.0  ;;  %v386_v30 = vsub.f32 %v331_v42, %v370_v54  ;;  %v400_v45 = vmul.f32 %v384_v35, %v384_v35  ;;  %v558_v26 = vld [vmem:[%s902_s3] ss:$0 sm:$0xff] }
 0x13b   :  { %v411_v15 = vadd.f32 %v410_v14, %v409_v11  ;;  %v424_v46 = vsel %vm22_vm0, %v398_v36, 0.0  ;;  %v401_v32 = vmul.f32 %v385_v40, %v385_v40 }
 0x13c   :  { %v426_v48 = vsel %vm22_vm0, %v399_v41, 0.0  ;;  %v402_v50 = vmul.f32 %v386_v30, %v386_v30  ;;  %v428_v38 = vsel %vm22_vm0, %v400_v45, 0.0 }
 0x13d   :  { %v413_v19 = vadd.f32 %v412_v18, %v411_v15  ;;  %v430_v52 = vsel %vm22_vm0, %v401_v32, 0.0 }
 0x13e   :  { %v432_v53 = vsel %vm22_vm0, %v402_v50, 0.0 }
 0x13f   :  { %v415_v23 = vadd.f32 %v414_v20, %v413_v19 }
 0x141   :  { %v417_v29 = vadd.f32 %v416_v28, %v415_v23 }
 0x143   :  { %v419_v34 = vadd.f32 %v418_v33, %v417_v29 }
 0x145   :  { %v421_v37 = vadd.f32 %v420_v27, %v419_v34 }
 0x147   :  { %v423_v44 = vadd.f32 %v422_v43, %v421_v37 }
 0x149   :  { %v425_v47 = vadd.f32 %v424_v46, %v423_v44 }
 0x14b   :  { %v427_v49 = vadd.f32 %v426_v48, %v425_v47 }
 0x14d   :  { %v429_v51 = vadd.f32 %v428_v38, %v427_v49 }
 0x14f   :  { %v431_v39 = vadd.f32 %v430_v52, %v429_v51 }
 0x151   :  { %v433_v60 = vadd.f32 %v432_v53, %v431_v39 }
 0x153   :  { %v434_v61 = vrot.slane %v433_v60, 4 }
 0x155   :  { %v435_v42 = vadd.f32 %v434_v61, %v433_v60 }
 0x157   :  { %v436_v54 = vrot.slane %v435_v42, 2 }
 0x159   :  { %v437_v63 = vadd.f32 %v436_v54, %v435_v42 }
 0x15b   :  { %v438_v59 = vrot.slane %v437_v63, 1 }
 0x15d   :  { %v439_v1 = vadd.f32 %v438_v59, %v437_v63 }
 0x15f   :  { %v440_v2 = vmul.f32 0.0078125, %v439_v1 }
 0x161   :  { %v441_v3 = vadd.f32 1e-05, %v440_v2 }
 0x163   :  { %640 = vrsqrt.f32 %v441_v3 }
 0x16d   :  { %v641_v5 = vpop.eup %640 }
 0x16e   :  { %v443_v6 = vmul.f32 %v641_v5, %v768_v55  ;;  %v444_v7 = vmul.f32 %v641_v5, %v770_v56  ;;  %v445_v9 = vmul.f32 %v641_v5, %v772_v57  ;;  %v446_v10 = vmul.f32 %v641_v5, %v774_v58 }
 0x16f   :  { %v447_v11 = vmul.f32 %v641_v5, %v780_v62  ;;  %v448_v13 = vmul.f32 %v641_v5, %v784_v0  ;;  %v449_v14 = vmul.f32 %v641_v5, %v790_v4  ;;  %v450_v15 = vmul.f32 %v641_v5, %v795_v8 }
 0x170   :  { %v451_v55 = vmul.f32 %v641_v5, %v800_v12  ;;  %v452_v18 = vmul.f32 %v641_v5, %v380_v16  ;;  %v453_v56 = vmul.f32 %v641_v5, %v381_v21  ;;  %v454_v19 = vmul.f32 %v641_v5, %v382_v24 }
 0x171   :  { %v455_v57 = vmul.f32 %v641_v5, %v383_v31  ;;  %v456_v22 = vmul.f32 %v641_v5, %v384_v35  ;;  %v457_v58 = vmul.f32 %v641_v5, %v385_v40  ;;  %v458_v20 = vmul.f32 %v641_v5, %v386_v30 }
 0x172   :  { %v466_v62 = vmul.f32 %v557_v17, %v443_v6  ;;  %v467_v23 = vmul.f32 %v557_v17, %v444_v7  ;;  %v468_v0 = vmul.f32 %v557_v17, %v445_v9  ;;  %v469_v25 = vmul.f32 %v557_v17, %v446_v10 }
 0x173   :  { %v470_v4 = vmul.f32 %v557_v17, %v447_v11  ;;  %v471_v28 = vmul.f32 %v557_v17, %v448_v13  ;;  %v472_v8 = vmul.f32 %v557_v17, %v449_v14  ;;  %v473_v29 = vmul.f32 %v557_v17, %v450_v15 }
 0x174   :  { %v474_v12 = vmul.f32 %v557_v17, %v451_v55  ;;  %v475_v16 = vmul.f32 %v557_v17, %v452_v18  ;;  %v476_v21 = vmul.f32 %v557_v17, %v453_v56  ;;  %v477_v24 = vmul.f32 %v557_v17, %v454_v19 }
 0x175   :  { %v478_v31 = vmul.f32 %v557_v17, %v455_v57  ;;  %v479_v33 = vmul.f32 %v557_v17, %v456_v22  ;;  %v480_v34 = vmul.f32 %v557_v17, %v457_v58  ;;  %v481_v35 = vmul.f32 %v557_v17, %v458_v20 }
 0x176   :  { %v489_v36 = vadd.f32 %v558_v26, %v466_v62  ;;  %v490_v27 = vadd.f32 %v558_v26, %v467_v23  ;;  %v491_v37 = vadd.f32 %v558_v26, %v468_v0  ;;  %v492_v40 = vadd.f32 %v558_v26, %v469_v25 }
 0x177   :  { %v493_v41 = vadd.f32 %v558_v26, %v470_v4  ;;  %v494_v43 = vadd.f32 %v558_v26, %v471_v28  ;;  %v495_v44 = vadd.f32 %v558_v26, %v472_v8  ;;  %v496_v30 = vadd.f32 %v558_v26, %v473_v29 }
 0x178   :  { %v497_v45 = vadd.f32 %v558_v26, %v474_v12  ;;  %v498_v46 = vadd.f32 %v558_v26, %v475_v16  ;;  %v499_v47 = vadd.f32 %v558_v26, %v476_v21  ;;  %v500_v32 = vadd.f32 %v558_v26, %v477_v24 }
 0x179   :  { %v501_v48 = vadd.f32 %v558_v26, %v478_v31  ;;  %v502_v49 = vadd.f32 %v558_v26, %v479_v33  ;;  %v503_v50 = vadd.f32 %v558_v26, %v480_v34  ;;  %v504_v38 = vadd.f32 %v558_v26, %v481_v35 }
 0x17a   :  { %v505_v51 = vmax.f32 %v489_v36, 0.0  ;;  %v506_v52 = vmax.f32 %v490_v27, 0.0  ;;  %v507_v39 = vmax.f32 %v491_v37, 0.0  ;;  %v508_v53 = vmax.f32 %v492_v40, 0.0 }
 0x17b   :  { %v509_v60 = vmax.f32 %v493_v41, 0.0  ;;  %v510_v61 = vmax.f32 %v494_v43, 0.0  ;;  %v511_v42 = vmax.f32 %v495_v44, 0.0  ;;  %v512_v54 = vmax.f32 %v496_v30, 0.0 }
 0x17c   :  { %v513_v63 = vmax.f32 %v497_v45, 0.0  ;;  %v514_v59 = vmax.f32 %v498_v46, 0.0  ;;  %v515_v1 = vmax.f32 %v499_v47, 0.0  ;;  %v516_v2 = vmax.f32 %v500_v32, 0.0  ;;  %521 = vst.msk [vmem:[%s903_s4] sm:$0xff] %vm22_vm0, %v505_v51  ;;  %522 = vst.msk [vmem:[%s903_s4 + $0x8] sm:$0xff] %vm22_vm0, %v506_v52 }
 0x17d   :  { %523 = vst.msk [vmem:[%s903_s4 + $0x10] sm:$0xff] %vm22_vm0, %v507_v39  ;;  %524 = vst.msk [vmem:[%s903_s4 + $0x18] sm:$0xff] %vm22_vm0, %v508_v53  ;;  %v517_v3 = vmax.f32 %v501_v48, 0.0  ;;  %v518_v5 = vmax.f32 %v502_v49, 0.0  ;;  %v519_v6 = vmax.f32 %v503_v50, 0.0  ;;  %v520_v7 = vmax.f32 %v504_v38, 0.0 }
 0x17e   :  { %525 = vst.msk [vmem:[%s903_s4 + $0x20] sm:$0xff] %vm22_vm0, %v509_v60  ;;  %526 = vst.msk [vmem:[%s903_s4 + $0x28] sm:$0xff] %vm22_vm0, %v510_v61 }
 0x17f   :  { %527 = vst.msk [vmem:[%s903_s4 + $0x30] sm:$0xff] %vm22_vm0, %v511_v42  ;;  %528 = vst.msk [vmem:[%s903_s4 + $0x38] sm:$0xff] %vm22_vm0, %v512_v54 }
 0x180   :  { %529 = vst.msk [vmem:[%s903_s4 + $0x40] sm:$0xff] %vm22_vm0, %v513_v63  ;;  %530 = vst.msk [vmem:[%s903_s4 + $0x48] sm:$0xff] %vm22_vm0, %v514_v59 }
 0x181   :  { %531 = vst.msk [vmem:[%s903_s4 + $0x50] sm:$0xff] %vm22_vm0, %v515_v1  ;;  %532 = vst.msk [vmem:[%s903_s4 + $0x58] sm:$0xff] %vm22_vm0, %v516_v2 }
 0x182   :  { %533 = vst.msk [vmem:[%s903_s4 + $0x60] sm:$0xff] %vm22_vm0, %v517_v3  ;;  %534 = vst.msk [vmem:[%s903_s4 + $0x68] sm:$0xff] %vm22_vm0, %v518_v5 }
 0x183   :  { %535 = vst.msk [vmem:[%s903_s4 + $0x70] sm:$0xff] %vm22_vm0, %v519_v6  ;;  %536 = vst.msk [vmem:[%s903_s4 + $0x78] sm:$0xff] %vm22_vm0, %v520_v7 }

// kernel: shedd_forward.77
= control target key start
LH: loop header
LB: loop body
LE: loop exit
PB: predicated region body
PF: predicated region fallthrough
CT: control target
= control target key end

     0   :  { %s2104_s0 = inlined_call_operand.hbm [shape: bf16[2,2304], index: 0, kind: input, shape index: {}]   ;;  %s2105_s1 = inlined_call_operand.vmem [shape: bf16[2304,256], index: 1, kind: input, shape index: {}]   ;;  %s2106_s2 = inlined_call_operand.hbm [shape: f32[1,256], index: 2, kind: input, shape index: {}]   ;;  %s2107_s3 = inlined_call_operand.hbm [shape: f32[1,256], index: 3, kind: input, shape index: {}]   ;;  %s2108_s4 = inlined_call_operand.hbm [shape: f32[2,256], index: 4, kind: input, shape index: {}]   ;;  %s2109_s5 = inlined_call_operand.vmem [shape: f32[2,256], index: 5, kind: output, shape index: {}]  }
   0x1   :  { %2118 = sst [smem:[#allocation22_spill]] %s2109_s5 }
   0x2   :  { %10 = vsyncpa [#allocation4], 0 }
   0x3   :  { %12 = vsyncpa [#allocation4 + $0x1], 0 }
   0x4   :  { %13 = vsyncpa [#allocation7], 0 }
   0x5   :  { %15 = vsyncpa [#allocation7 + $0x1], 0 }
   0x6   :  { %16 = vsyncpa [#allocation10], 0 }
   0x7   :  { %18 = vsyncpa [#allocation10 + $0x1], 0  ;;  %s1634_s18 = smov 0   ;;  %s1636_s19 = smov 0  }
   0x8   :  { %s1638_s20 = smov 0   ;;  %s1640_s21 = smov 0  }
   0x9   :  { %s1642_s22 = smov 0   ;;  %s1644_s23 = smov 0  }
   0xa   :  { %s1646_s24 = smov 0   ;;  %s1648_s25 = smov 0  }
   0xb   :  { %s1650_s26 = smov 0   ;;  %s1652_s27 = smov 0  }
   0xc   :  { %s1654_s28 = smov 0   ;;  %s1656_s29 = smov 0  }
   0xd   :  { %s1658_s30 = smov 0  }
   0xe LB: > { %2119 = sst [smem:[#allocation14_spill]] %s1574_s25  ;;  %s2110_s6 = sadd.s32 4294967295, %s1594_s30   ;;  %s1594_s30 = sphi %s1658_s30, %s24_s30   ;;  %s1590_s29 = sphi %s1656_s29, %s2160_s29   ;;  %s1586_s28 = sphi %s1654_s28, %s2159_s28   ;;  %s1582_s27 = sphi %s1652_s27, %s2158_s27   ;;  %s1578_s26 = sphi %s1650_s26, %s2157_s26   ;;  %s1574_s25 = sphi %s1648_s25, %s2156_s25   ;;  %s1570_s24 = sphi %s1646_s24, %s2155_s24   ;;  %s1566_s23 = sphi %s1644_s23, %s2154_s23   ;;  %s1562_s22 = sphi %s1642_s22, %s2153_s22   ;;  %s1558_s21 = sphi %s1640_s21, %s2152_s21   ;;  %s1554_s20 = sphi %s1638_s20, %s2151_s20   ;;  %s1550_s19 = sphi %s1636_s19, %s2150_s19   ;;  %s1546_s18 = sphi %s1634_s18, %s2149_s18  }
   0xf   : > { %2120 = sst [smem:[#allocation15_spill]] %s1578_s26  ;;  %s33_s7 = sadd.s32 1, %s1586_s28 }
  0x10   : > { %2121 = sst [smem:[#allocation16_spill]] %s1582_s27  ;;  %p34_p0 = scmp.ge.s32.totalorder %s33_s7, 6 }
  0x11   : > { %s36_s8 = sadd.s32 1, %s1590_s29  ;;  %s43_s9 = sadd.s32 1, %s1574_s25 }
  0x12   : > { %p50_p1 = scmp.ne.s32.totalorder %s1574_s25, %s1570_s24  ;;  %s2162_s7 = smov (%p34_p0, %s33_s7), 0 }
  0x13   : > { %2122 = sst [smem:[#allocation17_spill]] %s2162_s7  ;;  %s2164_s8 = smov (!%p34_p0, %s36_s8), %s1590_s29 }
  0x14   : > { %s40_s10 = ssub.s32 %s1586_s28, %s2162_s7  ;;  %p51_p2 = scmp.eq.s32.totalorder %s1594_s30, 0 }
  0x15   : > { %p38_p3 = scmp.ge.s32.totalorder %s2164_s8, 2  ;;  %p41_p4 = scmp.eq.s32.totalorder %s40_s10, 0 }
  0x16   : > { %p1711_p5 = por %p51_p2, %p50_p1  ;;  %p56_p6 = scmp.ne.s32.totalorder %s1570_s24, %s1566_s23 }
  0x17   : > { %s2166_s8 = smov (%p38_p3, %s2164_s8), 0  ;;  %p1723_p7 = scmp.eq.s32.totalorder %s2110_s6, 0 }
  0x18   : > { %2124 = sst [smem:[#allocation18_spill]] %s2166_s8  ;;  %s67_s14 = ssub.s32 %s1590_s29, %s2166_s8 }
  0x19   : > { %s1719_s12 = scalar_select %p41_p4, %s1574_s25, %s43_s9  }
  0x1a   : > { %s68_s15 = sor.u32 %s67_s14, %s40_s10  ;;  %s71_s16 = sadd.s32 1, %s1562_s22 }
  0x1b   : > { %2125 = sst [smem:[#allocation19_spill]] %s1719_s12  ;;  %p1732_p8 = por %p1723_p7, %p56_p6 }
  0x1c   : > { %p69_p9 = scmp.eq.s32.totalorder %s68_s15, 0  ;;  %p78_p10 = scmp.ne.s32.totalorder %s1562_s22, %s1558_s21 }
  0x1d   : > { %s2127_s17 = scalar_select %p1732_p8, 1, 0 }
  0x1e   : > { %p95_p11 = scmp.eq.s32.totalorder %s67_s14, 0  ;;  %p1743_p12 = por %p78_p10, %p51_p2 }
  0x1f   : > { %s1739_s23 = scalar_select %p69_p9, %s1562_s22, %s71_s16  }
  0x20   : > { %s2129_s9 = scalar_select %p1743_p12, 1, 0 }
  0x21   : > { %2128 = sst [smem:[#allocation20_spill]] %s1739_s23  ;;  %s97_s6 = sadd.s32 1, %s1554_s20 }
  0x22   : > { %s1749_s7 = scalar_select %p95_p11, %s1554_s20, %s97_s6  }
  0x23   : > { %p104_p13 = scmp.ne.s32.totalorder %s1554_s20, %s1550_s19  ;;  %p110_p0 = scmp.ne.s32.totalorder %s1550_s19, %s1546_s18 }
  0x24   : > { %2130 = sst [smem:[#allocation21_spill]] %s1749_s7  ;;  %p1127_p4 = scmp.ge.s32.totalorder %s1594_s30, 12 }
  0x25   : > { %p1757_p1 = por %p104_p13, %p51_p2  ;;  %p1763_p3 = por %p110_p0, %p1723_p7 }
  0x26   : > { %208 = sbr.rel (%p1127_p4) target bundleno = 179 (0xb3), region = 16  ;;  %s212_s6 = sand.u32 (!%p1127_p4), 1, %s1574_s25  }
  0x27   : > { %s2131_s10 = scalar_select %p1757_p1, 1, 0 }
  0x28   : > { %s2132_s14 = scalar_select %p1763_p3, 1, 0 }
  0x29   : > { %s1169_s15 = smul.u32 (!%p1127_p4), 48, %s1586_s28  ;;  %s213_s7 = scalar_lea.sflag (!%p1127_p4), [#allocation4], %s212_s6 }
  0x2a   : > { %s1222_s16 = smul.u32 (!%p1127_p4), 3, %s212_s6  ;;  %s1372_s27 = scalar_lea.hbm (!%p1127_p4), %s2104_s0, 288 }
  0x2b   : > { %s1773_s12 = scalar_lea.hbm (!%p1127_p4), %s2104_s0, %s1169_s15 }
  0x2c   : > { %s216_s13 = scalar_lea.vmem (!%p1127_p4), [#allocation3], %s1222_s16  ;;  %s1368_s26 = scalar_lea.hbm (!%p1127_p4), %s1773_s12, 48 }
  0x2d   : > { %s224_s23 = sshll.u32 %s216_s13, 4  ;;  %p1369_p2 = scmp.ne.s32.totalorder %s1773_s12, %s1368_s26  ;;  %s225_s23 = int_to_ptr.vmem [resolvable:$true] %s224_s23 }
  0x2e   : > { %p1373_p9 = scmp.lt.u32.totalorder %s1773_s12, %s2104_s0  ;;  %p1374_p10 = scmp.lt.u32.totalorder %s1372_s27, %s1368_s26 }
  0x2f   : > { %p1370_p6 = pnand %p1369_p2, %p1711_p5  ;;  %p1376_p13 = scmp.lt.u32.totalorder %s1368_s26, %s1773_s12 }
  0x30   : > { %p1375_p11 = por %p1374_p10, %p1373_p9 }
  0x31   : > { %p1371_p7 = pneg %p1370_p6 }
  0x32   : > { %p1377_p0 = por %p1376_p13, %p1375_p11 }
  0x34   : > { %p1378_p4 = pnand %p1377_p0, %p1371_p7 }
  0x36   : > { %1381 = shalt.err (!%p1378_p4)
}
  0x37   : > { %s1382_s6 = scalar_lea.vmem %s225_s23, 48  ;;  %s1596_s16 = smov [#allocation3]  }
  0x38   : > { %p1383_p3 = scmp.ne.s32.totalorder %s225_s23, %s1382_s6  ;;  %s1386_s18 = sshll.u32 %s1596_s16, 4  ;;  %s1387_s18 = int_to_ptr.vmem [resolvable:$false] %s1386_s18 }
  0x39   : > { %s1388_s5 = scalar_lea.vmem %s1387_s18, 96  ;;  %p1389_p8 = scmp.lt.s32.totalorder %s225_s23, %s1387_s18 }
  0x3a   : > { %p1384_p2 = pnand %p1383_p3, %p1711_p5  ;;  %p1390_p1 = scmp.lt.s32.totalorder %s1388_s5, %s1382_s6 }
  0x3c   : > { %p1385_p6 = pneg %p1384_p2  ;;  %p1391_p12 = por %p1390_p1, %p1389_p8 }
  0x3e   : > { %p1392_p9 = pnand %p1391_p12, %p1385_p6 }
  0x40   : > { %1395 = shalt.err (!%p1392_p9)
}
  0x41   : > { %1226 = dma.hbm_to_vmem [thread:$0]  (%p1711_p5), %s1773_s12, 48, %s225_s23, %s213_s7  }
  0x42   : > { %p2133_p7 = scmp.ne.s32.totalorder %s2129_s9, 0 }
  0x43   : > { %s232_s25 = sand.u32 (%p2133_p7), 1, %s1562_s22   ;;  %s1170_s26 = smul.u32 (%p2133_p7), 96, %s1586_s28 }
  0x44   : > { %230 = sbr.rel (!%p2133_p7) target bundleno = 105 (0x69), region = 24 }
  0x45   : > { %s1223_s27 = smul.u32 (%p2133_p7), 192, %s232_s25  ;;  %s237_s13 = sadd.s32 (%p2133_p7), %s1590_s29, %s1170_s26 }
  0x46   : > { %s1130_s8 = sshll.u32 (%p2133_p7), %s237_s13, 2 }
  0x47   : > { %s1800_s16 = scalar_lea.vmem (%p2133_p7), %s2105_s1, %s1130_s8  ;;  %s1805_s7 = scalar_lea.vmem (%p2133_p7), [#allocation5], %s1223_s27 }
  0x48   : > { %v255_v0 = vld [vmem:[%s1800_s16] sm:$0xf] (%p2133_p7)  ;;  %v257_v1 = vld [vmem:[%s1800_s16 + $0x8] sm:$0xf] (%p2133_p7)  ;;  %v259_v2 = vld [vmem:[%s1800_s16 + $0x10] sm:$0xf] (%p2133_p7) }
  0x49   : > { %256 = vst [vmem:[%s1805_s7] sm:$0xf] (%p2133_p7), %v255_v0  ;;  %258 = vst [vmem:[%s1805_s7 + $0x4] sm:$0xf] (%p2133_p7), %v257_v1  ;;  %v261_v3 = vld [vmem:[%s1800_s16 + $0x18] sm:$0xf] (%p2133_p7) }
  0x4a   : > { %260 = vst [vmem:[%s1805_s7 + $0x8] sm:$0xf] (%p2133_p7), %v259_v2  ;;  %v263_v4 = vld [vmem:[%s1800_s16 + $0x20] sm:$0xf] (%p2133_p7)  ;;  %v265_v5 = vld [vmem:[%s1800_s16 + $0x28] sm:$0xf] (%p2133_p7) }
  0x4b   : > { %262 = vst [vmem:[%s1805_s7 + $0xc] sm:$0xf] %v261_v3  ;;  %264 = vst [vmem:[%s1805_s7 + $0x10] sm:$0xf] %v263_v4  ;;  %v267_v6 = vld [vmem:[%s1800_s16 + $0x30] sm:$0xf] }
  0x4c   : > { %266 = vst [vmem:[%s1805_s7 + $0x14] sm:$0xf] %v265_v5  ;;  %v269_v7 = vld [vmem:[%s1800_s16 + $0x38] sm:$0xf]  ;;  %v271_v8 = vld [vmem:[%s1800_s16 + $0x40] sm:$0xf] }
  0x4d   : > { %268 = vst [vmem:[%s1805_s7 + $0x18] sm:$0xf] %v267_v6  ;;  %270 = vst [vmem:[%s1805_s7 + $0x1c] sm:$0xf] %v269_v7  ;;  %v273_v9 = vld [vmem:[%s1800_s16 + $0x48] sm:$0xf] }
  0x4e   : > { %272 = vst [vmem:[%s1805_s7 + $0x20] sm:$0xf] %v271_v8  ;;  %v275_v10 = vld [vmem:[%s1800_s16 + $0x50] sm:$0xf]  ;;  %v277_v11 = vld [vmem:[%s1800_s16 + $0x58] sm:$0xf] }
  0x4f   : > { %274 = vst [vmem:[%s1805_s7 + $0x24] sm:$0xf] %v273_v9  ;;  %276 = vst [vmem:[%s1805_s7 + $0x28] sm:$0xf] %v275_v10  ;;  %v279_v12 = vld [vmem:[%s1800_s16 + $0x60] sm:$0xf] }
  0x50   : > { %278 = vst [vmem:[%s1805_s7 + $0x2c] sm:$0xf] %v277_v11  ;;  %v281_v13 = vld [vmem:[%s1800_s16 + $0x68] sm:$0xf]  ;;  %v283_v14 = vld [vmem:[%s1800_s16 + $0x70] sm:$0xf] }
  0x51   : > { %280 = vst [vmem:[%s1805_s7 + $0x30] sm:$0xf] %v279_v12  ;;  %282 = vst [vmem:[%s1805_s7 + $0x34] sm:$0xf] %v281_v13  ;;  %v285_v15 = vld [vmem:[%s1800_s16 + $0x78] sm:$0xf] }
  0x52   : > { %284 = vst [vmem:[%s1805_s7 + $0x38] sm:$0xf] %v283_v14  ;;  %v287_v16 = vld [vmem:[%s1800_s16 + $0x80] sm:$0xf]  ;;  %v289_v17 = vld [vmem:[%s1800_s16 + $0x88] sm:$0xf] }
  0x53   : > { %286 = vst [vmem:[%s1805_s7 + $0x3c] sm:$0xf] %v285_v15  ;;  %288 = vst [vmem:[%s1805_s7 + $0x40] sm:$0xf] %v287_v16  ;;  %v291_v18 = vld [vmem:[%s1800_s16 + $0x90] sm:$0xf] }
  0x54   : > { %290 = vst [vmem:[%s1805_s7 + $0x44] sm:$0xf] %v289_v17  ;;  %v293_v19 = vld [vmem:[%s1800_s16 + $0x98] sm:$0xf]  ;;  %v295_v20 = vld [vmem:[%s1800_s16 + $0xa0] sm:$0xf] }
  0x55   : > { %292 = vst [vmem:[%s1805_s7 + $0x48] sm:$0xf] %v291_v18  ;;  %294 = vst [vmem:[%s1805_s7 + $0x4c] sm:$0xf] %v293_v19  ;;  %v297_v21 = vld [vmem:[%s1800_s16 + $0xa8] sm:$0xf] }
  0x56   : > { %296 = vst [vmem:[%s1805_s7 + $0x50] sm:$0xf] %v295_v20  ;;  %v299_v22 = vld [vmem:[%s1800_s16 + $0xb0] sm:$0xf]  ;;  %v301_v23 = vld [vmem:[%s1800_s16 + $0xb8] sm:$0xf] }
  0x57   : > { %298 = vst [vmem:[%s1805_s7 + $0x54] sm:$0xf] %v297_v21  ;;  %300 = vst [vmem:[%s1805_s7 + $0x58] sm:$0xf] %v299_v22  ;;  %v303_v24 = vld [vmem:[%s1800_s16 + $0xc0] sm:$0xf] }
  0x58   : > { %302 = vst [vmem:[%s1805_s7 + $0x5c] sm:$0xf] %v301_v23  ;;  %v305_v25 = vld [vmem:[%s1800_s16 + $0xc8] sm:$0xf]  ;;  %v307_v26 = vld [vmem:[%s1800_s16 + $0xd0] sm:$0xf] }
  0x59   : > { %304 = vst [vmem:[%s1805_s7 + $0x60] sm:$0xf] %v303_v24  ;;  %306 = vst [vmem:[%s1805_s7 + $0x64] sm:$0xf] %v305_v25  ;;  %v309_v27 = vld [vmem:[%s1800_s16 + $0xd8] sm:$0xf] }
  0x5a   : > { %308 = vst [vmem:[%s1805_s7 + $0x68] sm:$0xf] %v307_v26  ;;  %v311_v28 = vld [vmem:[%s1800_s16 + $0xe0] sm:$0xf]  ;;  %v313_v29 = vld [vmem:[%s1800_s16 + $0xe8] sm:$0xf] }
  0x5b   : > { %310 = vst [vmem:[%s1805_s7 + $0x6c] sm:$0xf] %v309_v27  ;;  %312 = vst [vmem:[%s1805_s7 + $0x70] sm:$0xf] %v311_v28  ;;  %v315_v30 = vld [vmem:[%s1800_s16 + $0xf0] sm:$0xf] }
  0x5c   : > { %314 = vst [vmem:[%s1805_s7 + $0x74] sm:$0xf] %v313_v29  ;;  %v317_v31 = vld [vmem:[%s1800_s16 + $0xf8] sm:$0xf]  ;;  %v319_v32 = vld [vmem:[%s1800_s16 + $0x100] sm:$0xf] }
  0x5d   : > { %316 = vst [vmem:[%s1805_s7 + $0x78] sm:$0xf] %v315_v30  ;;  %318 = vst [vmem:[%s1805_s7 + $0x7c] sm:$0xf] %v317_v31  ;;  %v321_v33 = vld [vmem:[%s1800_s16 + $0x108] sm:$0xf] }
  0x5e   : > { %320 = vst [vmem:[%s1805_s7 + $0x80] sm:$0xf] %v319_v32  ;;  %v323_v34 = vld [vmem:[%s1800_s16 + $0x110] sm:$0xf]  ;;  %v325_v35 = vld [vmem:[%s1800_s16 + $0x118] sm:$0xf] }
  0x5f   : > { %322 = vst [vmem:[%s1805_s7 + $0x84] sm:$0xf] %v321_v33  ;;  %324 = vst [vmem:[%s1805_s7 + $0x88] sm:$0xf] %v323_v34  ;;  %v327_v36 = vld [vmem:[%s1800_s16 + $0x120] sm:$0xf] }
  0x60   : > { %326 = vst [vmem:[%s1805_s7 + $0x8c] sm:$0xf] %v325_v35  ;;  %v329_v37 = vld [vmem:[%s1800_s16 + $0x128] sm:$0xf]  ;;  %v331_v38 = vld [vmem:[%s1800_s16 + $0x130] sm:$0xf] }
  0x61   : > { %328 = vst [vmem:[%s1805_s7 + $0x90] sm:$0xf] %v327_v36  ;;  %330 = vst [vmem:[%s1805_s7 + $0x94] sm:$0xf] %v329_v37  ;;  %v333_v39 = vld [vmem:[%s1800_s16 + $0x138] sm:$0xf] }
  0x62   : > { %332 = vst [vmem:[%s1805_s7 + $0x98] sm:$0xf] %v331_v38  ;;  %v335_v40 = vld [vmem:[%s1800_s16 + $0x140] sm:$0xf]  ;;  %v337_v41 = vld [vmem:[%s1800_s16 + $0x148] sm:$0xf] }
  0x63   : > { %334 = vst [vmem:[%s1805_s7 + $0x9c] sm:$0xf] %v333_v39  ;;  %336 = vst [vmem:[%s1805_s7 + $0xa0] sm:$0xf] %v335_v40  ;;  %v339_v42 = vld [vmem:[%s1800_s16 + $0x150] sm:$0xf] }
  0x64   : > { %338 = vst [vmem:[%s1805_s7 + $0xa4] sm:$0xf] %v337_v41  ;;  %v341_v43 = vld [vmem:[%s1800_s16 + $0x158] sm:$0xf]  ;;  %v343_v44 = vld [vmem:[%s1800_s16 + $0x160] sm:$0xf] }
  0x65   : > { %340 = vst [vmem:[%s1805_s7 + $0xa8] sm:$0xf] %v339_v42  ;;  %342 = vst [vmem:[%s1805_s7 + $0xac] sm:$0xf] %v341_v43  ;;  %v345_v45 = vld [vmem:[%s1800_s16 + $0x168] sm:$0xf] }
  0x66   : > { %344 = vst [vmem:[%s1805_s7 + $0xb0] sm:$0xf] %v343_v44  ;;  %v347_v46 = vld [vmem:[%s1800_s16 + $0x170] sm:$0xf]  ;;  %v349_v47 = vld [vmem:[%s1800_s16 + $0x178] sm:$0xf] }
  0x67   : > { %346 = vst [vmem:[%s1805_s7 + $0xb4] sm:$0xf] %v345_v45  ;;  %348 = vst [vmem:[%s1805_s7 + $0xb8] sm:$0xf] %v347_v46 }
  0x68   : > { %350 = vst [vmem:[%s1805_s7 + $0xbc] sm:$0xf] %v349_v47 }
  0x69 PF: > { %s470_s11 = sand.u32 1, %s1594_s30   ;;  %s1902_s12 = sand.u32 1, %s1554_s20  }
  0x6a   : > { %s1131_s23 = sshll.u32 %s1590_s29, 4  ;;  %s473_s9 = scalar_lea.vmem [#allocation6], %s1902_s12 }
  0x6b   : > { %s480_s18 = sshll.u32 %s473_s9, 4  ;;  %s1911_s26 = scalar_lea.hbm %s2106_s2, %s1131_s23  ;;  %s481_s18 = int_to_ptr.vmem [resolvable:$true] %s480_s18 }
  0x6c   : > { %s1913_s27 = scalar_lea.sflag [#allocation7], %s470_s11  ;;  %s1396_s13 = scalar_lea.hbm %s1911_s26, 16 }
  0x6d   : > { %p1397_p5 = scmp.ne.s32.totalorder %s1911_s26, %s1396_s13  ;;  %p2134_p8 = scmp.ne.s32.totalorder %s2131_s10, 0 }
  0x6e   : > { %s1400_s6 = scalar_lea.hbm %s2106_s2, 32  ;;  %p1401_p3 = scmp.lt.u32.totalorder %s1911_s26, %s2106_s2 }
  0x6f   : > { %p1398_p12 = pnand %p1397_p5, %p2134_p8  ;;  %p1402_p10 = scmp.lt.u32.totalorder %s1400_s6, %s1396_s13 }
  0x70   : > { %p1404_p13 = scmp.lt.u32.totalorder %s1396_s13, %s1911_s26 }
  0x71   : > { %p1399_p1 = pneg %p1398_p12  ;;  %p1403_p11 = por %p1402_p10, %p1401_p3 }
  0x73   : > { %p1405_p0 = por %p1404_p13, %p1403_p11 }
  0x75   : > { %p1406_p4 = pnand %p1405_p0, %p1399_p1 }
  0x77   : > { %1409 = shalt.err (!%p1406_p4)
}
  0x78   : > { %s1410_s11 = scalar_lea.vmem %s481_s18, 16  ;;  %s1597_s9 = smov [#allocation6]  }
  0x79   : > { %p1411_p2 = scmp.ne.s32.totalorder %s481_s18, %s1410_s11  ;;  %s1414_s5 = sshll.u32 %s1597_s9, 4  ;;  %s1415_s5 = int_to_ptr.vmem [resolvable:$false] %s1414_s5 }
  0x7a   : > { %s1416_s25 = scalar_lea.vmem %s1415_s5, 32  ;;  %p1417_p7 = scmp.lt.s32.totalorder %s481_s18, %s1415_s5 }
  0x7b   : > { %p1412_p6 = pnand %p1411_p2, %p2134_p8  ;;  %p1418_p5 = scmp.lt.s32.totalorder %s1416_s25, %s1410_s11 }
  0x7d   : > { %p1413_p9 = pneg %p1412_p6  ;;  %p1419_p12 = por %p1418_p5, %p1417_p7 }
  0x7f   : > { %p1420_p3 = pnand %p1419_p12, %p1413_p9 }
  0x81   : > { %1423 = shalt.err (!%p1420_p3)
}
  0x82   : > { %1227 = dma.hbm_to_vmem [thread:$0]  (%p2134_p8), %s1911_s26, 16, %s481_s18, %s1913_s27  }
  0x83   : > { %s1938_s15 = scalar_lea.hbm %s2107_s3, %s1131_s23  ;;  %s490_s6 = scalar_lea.vmem [#allocation8], %s1902_s12 }
  0x84   : > { %s497_s16 = sshll.u32 %s490_s6, 4  ;;  %s1133_s7 = sshll.u32 %s1902_s12, 1  ;;  %s498_s16 = int_to_ptr.vmem [resolvable:$true] %s497_s16 }
  0x85   : > { %s1424_s11 = scalar_lea.hbm %s1938_s15, 16  ;;  %s1428_s9 = scalar_lea.hbm %s2107_s3, 32 }
  0x86   : > { %p1425_p1 = scmp.ne.s32.totalorder %s1938_s15, %s1424_s11  ;;  %p1429_p13 = scmp.lt.u32.totalorder %s1938_s15, %s2107_s3 }
  0x87   : > { %p1430_p0 = scmp.lt.u32.totalorder %s1428_s9, %s1424_s11  ;;  %p1432_p2 = scmp.lt.u32.totalorder %s1424_s11, %s1938_s15 }
  0x88   : > { %p1426_p10 = pnand %p1425_p1, %p2134_p8 }
  0x89   : > { %p1431_p4 = por %p1430_p0, %p1429_p13 }
  0x8a   : > { %p1427_p11 = pneg %p1426_p10 }
  0x8b   : > { %p1433_p6 = por %p1432_p2, %p1431_p4 }
  0x8d   : > { %p1434_p9 = pnand %p1433_p6, %p1427_p11 }
  0x8f   : > { %1437 = shalt.err (!%p1434_p9)
}
  0x90   : > { %s1438_s25 = scalar_lea.vmem %s498_s16, 16  ;;  %s1598_s13 = smov [#allocation8]  }
  0x91   : > { %p1439_p7 = scmp.ne.s32.totalorder %s498_s16, %s1438_s25  ;;  %s1442_s8 = sshll.u32 %s1598_s13, 4  ;;  %s1443_s8 = int_to_ptr.vmem [resolvable:$false] %s1442_s8 }
  0x92   : > { %s1444_s6 = scalar_lea.vmem %s1443_s8, 32  ;;  %p1445_p3 = scmp.lt.s32.totalorder %s498_s16, %s1443_s8 }
  0x93   : > { %p1440_p5 = pnand %p1439_p7, %p2134_p8  ;;  %p1446_p1 = scmp.lt.s32.totalorder %s1444_s6, %s1438_s25 }
  0x95   : > { %p1441_p12 = pneg %p1440_p5  ;;  %p1447_p10 = por %p1446_p1, %p1445_p3 }
  0x97   : > { %p1448_p0 = pnand %p1447_p10, %p1441_p12 }
  0x99   : > { %1451 = shalt.err (!%p1448_p0)
}
  0x9a   : > { %1228 = dma.hbm_to_vmem [thread:$0]  (%p2134_p8), %s1938_s15, 16, %s498_s16, %s1913_s27  }
  0x9b   : > { %s1134_s11 = sshll.u32 %s1590_s29, 5  ;;  %s508_s5 = scalar_lea.vmem [#allocation9], %s1133_s7 }
  0x9c   : > { %s1964_s9 = scalar_lea.hbm %s2108_s4, %s1134_s11  ;;  %s515_s23 = sshll.u32 %s508_s5, 4  ;;  %s516_s23 = int_to_ptr.vmem [resolvable:$true] %s515_s23 }
  0x9d   : > { %s505_s25 = scalar_lea.sflag [#allocation10], %s1902_s12  ;;  %s1452_s13 = scalar_lea.hbm %s1964_s9, 32 }
  0x9e   : > { %p1453_p11 = scmp.ne.s32.totalorder %s1964_s9, %s1452_s13  ;;  %s1456_s16 = scalar_lea.hbm %s2108_s4, 64 }
  0x9f   : > { %p1457_p2 = scmp.lt.u32.totalorder %s1964_s9, %s2108_s4  ;;  %p1458_p6 = scmp.lt.u32.totalorder %s1456_s16, %s1452_s13 }
  0xa0   : > { %p1454_p13 = pnand %p1453_p11, %p2134_p8  ;;  %p1460_p7 = scmp.lt.u32.totalorder %s1452_s13, %s1964_s9 }
  0xa1   : > { %p1459_p9 = por %p1458_p6, %p1457_p2 }
  0xa2   : > { %p1455_p4 = pneg %p1454_p13 }
  0xa3   : > { %p1461_p5 = por %p1460_p7, %p1459_p9 }
  0xa5   : > { %p1462_p12 = pnand %p1461_p5, %p1455_p4 }
  0xa7   : > { %1465 = shalt.err (!%p1462_p12)
}
  0xa8   : > { %s1466_s12 = scalar_lea.vmem %s516_s23, 32  ;;  %s1599_s7 = smov [#allocation9]  }
  0xa9   : > { %p1467_p3 = scmp.ne.s32.totalorder %s516_s23, %s1466_s12  ;;  %s1470_s11 = sshll.u32 %s1599_s7, 4  ;;  %s1471_s11 = int_to_ptr.vmem [resolvable:$false] %s1470_s11 }
  0xaa   : > { %s1472_s18 = scalar_lea.vmem %s1471_s11, 64  ;;  %p1473_p0 = scmp.lt.s32.totalorder %s516_s23, %s1471_s11 }
  0xab   : > { %p1468_p1 = pnand %p1467_p3, %p2134_p8  ;;  %p1474_p11 = scmp.lt.s32.totalorder %s1472_s18, %s1466_s12 }
  0xad   : > { %p1469_p10 = pneg %p1468_p1  ;;  %p1475_p13 = por %p1474_p11, %p1473_p0 }
  0xaf   : > { %p1476_p2 = pnand %p1475_p13, %p1469_p10 }
  0xb1   : > { %1479 = shalt.err (!%p1476_p2)
}
  0xb2   : > { %1229 = dma.hbm_to_vmem [thread:$0]  (%p2134_p8), %s1964_s9, 32, %s516_s23, %s505_s25  }
  0xb3 PF: > { %p1135_p4 = scmp.ge.s32.totalorder %s1594_s30, 1  ;;  %p520_p6 = scmp.lt.s32.totalorder %s1594_s30, 13 }
  0xb5   : > { %p521_p9 = pnand %p1135_p4, %p520_p6 }
  0xb6   : > { %s526_s26 = sand.u32 (!%p521_p9), 1, %s1570_s24   ;;  %p2135_p7 = scmp.ne.s32.totalorder (!%p521_p9), %s2127_s17, 0 }
  0xb7   : > { %524 = sbr.rel (%p521_p9) target bundleno = 534 (0x216), region = 77  ;;  %s527_s13 = scalar_lea.sflag (!%p521_p9), [#allocation4], %s526_s26 }
  0xb8   : > { %s1989_s5 = smul.u32 (!%p521_p9), 3, %s526_s26 }
  0xba   : > { %s530_s27 = scalar_lea.vmem (!%p521_p9), [#allocation3], %s1989_s5 }
  0xbe   : > { %1533 = dma.done.wait (%p2135_p7), %s527_s13, 48  }
  0xbf   : > { %1535 = vsyncadd (%p2135_p7), %s527_s13, 4294967248  ;;  %s536_s10 = sand.u32 1, %s1558_s21   ;;  %s2136_s9 = sadd.s32 4294967295, %s1594_s30  }
  0xc0   : > { %s542_s23 = sand.u32 1, %s2136_s9   ;;  %s1225_s25 = smul.u32 192, %s536_s10 }
  0xc1   : > { %s2000_s15 = sand.u32 1, %s1550_s19   ;;  %s543_s8 = scalar_lea.sflag [#allocation7], %s542_s23 }
  0xc2   : > { %s2002_s16 = scalar_lea.vmem [#allocation5], %s1225_s25  ;;  %s545_s6 = scalar_lea.vmem [#allocation6], %s2000_s15 }
  0xc3   : > { %p2137_p8 = scmp.ne.s32.totalorder %s2132_s14, 0 }
  0xc5   : > { %1537 = dma.done.wait (%p2137_p8), %s543_s8, 32  }
  0xc6   : > { %1539 = vsyncadd (%p2137_p8), %s543_s8, 4294967264  ;;  %s1136_s21 = sshll.u32 %s2000_s15, 1  ;;  %s553_s17 = scalar_lea.vmem [#allocation8], %s2000_s15 }
  0xc7   : > { %s559_s12 = scalar_lea.sflag [#allocation10], %s2000_s15  ;;  %s2012_s7 = scalar_lea.vmem [#allocation9], %s1136_s21 }
  0xc8   : > { %1541 = dma.done.wait (%p2137_p8), %s559_s12, 32  }
  0xc9   : > { %1543 = vsyncadd (%p2137_p8), %s559_s12, 4294967264  ;;  %s2138_s11 = sld [smem:[#allocation16_spill]]  ;;  %s2140_s23 = sld [smem:[#allocation15_spill]] }
  0xca   : > { %s2139_s10 = sld [smem:[#allocation22_spill]] }
  0xcf   : > { %p607_p5 = scmp.lt.s32.totalorder %s2138_s11, 1  ;;  %p1138_p12 = scmp.ne.s32.totalorder %s2140_s23, 0 }
  0xd0   : > { %v1600_v48 = vmov (!%p1138_p12), 0.0  }
  0xd1   : > { %s2168_s11 = smov (!%p607_p5, %s2138_s11), 1  ;;  %615 = sbr.rel (%p1138_p12) target bundleno = 216 (0xd8), region = 101 }
  0xd2   : > { %s1137_s18 = sshll.u32 %s2168_s11, 1  ;;  %616 = vst [vmem:[#allocation2] sm:$0x3] (!%p1138_p12), %v1600_v48 }
  0xd3   : > { %s2023_s9 = scalar_lea.vmem %s2139_s10, %s1137_s18 }
  0xd8 PF: > { %v1342_v49 = vld [vmem:[%s2002_s16 + $0x40] sm:$0xff]   ;;  %v1601_v50 = vmov 0.0   ;;  %vm1602_vm0 = vmmov 0   ;;  %v1345_v53 = vld [vmem:[%s2002_s16 + $0x48] sm:$0xff]   ;;  %v1348_v56 = vld [vmem:[%s2002_s16 + $0x50] sm:$0xff]   ;;  %v679_v6 = vlaneseq  ;;  %s2141_s14 = sld [smem:[#allocation15_spill]] }
  0xd9   : > { %1202 = vmatprep.subr.bf16.mxu1 %v1601_v50  ;;  %v1343_v51 = vld [vmem:[%s2002_s16] sm:$0xff]   ;;  %1171 = vmatprep.subr.bf16.mxu0 %v1342_v49  ;;  %v1346_v54 = vld [vmem:[%s2002_s16 + $0x8] sm:$0xff]   ;;  %v1349_v57 = vld [vmem:[%s2002_s16 + $0x10] sm:$0xff]   ;;  %v1603_v10 = vmov 1966171168  }
  0xda   : > { %v1344_v52 = vld [vmem:[%s2002_s16 + $0x80] sm:$0xff]   ;;  %1218 = vmatprep.mubr.msk.bf16.mxu1 %vm1602_vm0, %v1601_v50  ;;  %1172 = vmatpush3.bf16.msra.mxu0 %v1343_v51  ;;  %v1347_v55 = vld [vmem:[%s2002_s16 + $0x88] sm:$0xff]   ;;  %v1350_v58 = vld [vmem:[%s2002_s16 + $0x90] sm:$0xff]   ;;  %v677_v11 = vunpack.c.l.s4 %v1603_v10  ;;  %v680_v12 = vshrl.u32 %v679_v6, 7 }
  0xdb   : > { %1203 = vmatpush3.bf16.msra.mxu1 %v1344_v52  ;;  %1173 = vmatprep.subr.bf16.mxu0 %v1345_v53  ;;  %v1351_v59 = vld [vmem:[%s2002_s16 + $0x58] sm:$0xff]   ;;  %v1354_v62 = vld [vmem:[%s2002_s16 + $0x60] sm:$0xff]   ;;  %v1357_v1 = vld [vmem:[%s2002_s16 + $0x68] sm:$0xff]  }
  0xdc   : > { %1204 = vmatprep.subr.bf16.mxu1 %v1601_v50  ;;  %v1352_v60 = vld [vmem:[%s2002_s16 + $0x18] sm:$0xff]   ;;  %v1355_v63 = vld [vmem:[%s2002_s16 + $0x20] sm:$0xff]   ;;  %v1358_v2 = vld [vmem:[%s2002_s16 + $0x28] sm:$0xff]   ;;  %v678_v15 = vunpack.c.0.s8 %v677_v11 }
  0xdd   : > { %v1353_v61 = vld [vmem:[%s2002_s16 + $0x98] sm:$0xff]   ;;  %v1356_v0 = vld [vmem:[%s2002_s16 + $0xa0] sm:$0xff]   ;;  %v1359_v3 = vld [vmem:[%s2002_s16 + $0xa8] sm:$0xff]  }
  0xde   : > { %1174 = vmatpush3.bf16.msra.mxu0 %v1346_v54  ;;  %v1360_v4 = vld [vmem:[%s2002_s16 + $0x70] sm:$0xff]   ;;  %v1363_v8 = vld [vmem:[%s2002_s16 + $0x78] sm:$0xff]   ;;  %v681_v17 = vsub.s32 %v678_v15, %v680_v12  ;;  %p1164_p3 = scmp.ne.s32.totalorder %s2141_s14, 5 }
  0xdf   : > { %1205 = vmatpush3.bf16.msra.mxu1 %v1347_v55  ;;  %1175 = vmatprep.subr.bf16.mxu0 %v1348_v56  ;;  %v1361_v5 = vld [vmem:[%s2002_s16 + $0x30] sm:$0xff]   ;;  %v1139_v9 = vld.sshfl [vmem:[%s530_s27] sm:$0x13 pattern:$0x75316420]  ;;  %vm925_vm1 = vcmask (!%p1164_p3), 1041408  }
  0xe0   : > { %1206 = vmatprep.subr.bf16.mxu1 %v1601_v50  ;;  %v1362_v7 = vld [vmem:[%s2002_s16 + $0xb0] sm:$0xff]   ;;  %v1364_v13 = vld [vmem:[%s2002_s16 + $0x38] sm:$0xff]   ;;  %v675_v14 = vcombine.high %v1139_v9, %v1139_v9  ;;  %v682_v19 = vrot.slane %v1139_v9, %v681_v17 }
  0xe1   : > { %v1365_v16 = vld [vmem:[%s2002_s16 + $0xb8] sm:$0xff]  }
  0xe2   : > { %1176 = vmatpush3.bf16.msra.mxu0 %v1349_v57  ;;  %v689_v18 = vrot.slane %v675_v14, %v681_v17  ;;  %v690_v20 = vcombine.high %v682_v19, %v682_v19  ;;  %v617_v27 = vld [vmem:[#allocation2] sm:$0x3] }
  0xe3   : > { %1207 = vmatpush3.bf16.msra.mxu1 %v1350_v58  ;;  %1177 = vmatprep.subr.bf16.mxu0 %v1351_v59  ;;  %v1165_v54 = vld [vmem:[%s545_s6] ss:$0 sm:$0xff] (!%p1164_p3)  ;;  %v964_v58 = vld [vmem:[%s2012_s7] sm:$0x3] (!%p1164_p3) }
  0xe4   : > { %1208 = vmatprep.subr.bf16.mxu1 %v1601_v50  ;;  %870 = vmatprep.mubr.bf16.mxu0 %v689_v18  ;;  %v1166_v56 = vld [vmem:[%s553_s17] ss:$0 sm:$0xff] (!%p1164_p3) }
  0xe6   : > { %1178 = vmatpush3.bf16.msra.mxu0 %v1352_v60 }
  0xe7   : > { %1209 = vmatpush3.bf16.msra.mxu1 %v1353_v61  ;;  %1179 = vmatprep.subr.bf16.mxu0 %v1354_v62 }
  0xe8   : > { %1210 = vmatprep.subr.bf16.mxu1 %v1601_v50 }
  0xea   : > { %1180 = vmatpush3.bf16.msra.mxu0 %v1355_v63 }
  0xeb   : > { %1211 = vmatpush3.bf16.msra.mxu1 %v1356_v0  ;;  %1181 = vmatprep.subr.bf16.mxu0 %v1357_v1 }
  0xec   : > { %1212 = vmatprep.subr.bf16.mxu1 %v1601_v50 }
  0xee   : > { %1182 = vmatpush3.bf16.msra.mxu0 %v1358_v2 }
  0xef   : > { %1213 = vmatpush3.bf16.msra.mxu1 %v1359_v3  ;;  %1183 = vmatprep.subr.bf16.mxu0 %v1360_v4 }
  0xf0   : > { %1214 = vmatprep.subr.bf16.mxu1 %v1601_v50 }
  0xf2   : > { %1184 = vmatpush3.bf16.msra.mxu0 %v1361_v5 }
  0xf3   : > { %1215 = vmatpush3.bf16.msra.mxu1 %v1362_v7  ;;  %1185 = vmatprep.subr.bf16.mxu0 %v1363_v8 }
  0xf4   : > { %1216 = vmatprep.subr.bf16.mxu1 %v1601_v50 }
  0xf6   : > { %1186 = vmatpush3.bf16.msra.mxu0 %v1364_v13 }
  0xf7   : > { %1217 = vmatpush3.bf16.msra.mxu1 %v1365_v16 }
  0xf9   : > { %871 = vmatmul.mubr.bf16.vlgmr.msra.gmra.mrb[0].mxu0 %v682_v19 }
  0xfa   : > { %1219 = vmatmul.mubr.bf16.vlgmr.msra.gmra.mrb[0].mxu1 %v690_v20 }
 0x1cc   : > { %v1187_v21 = vpop.f32.mrb[0].mxu0 }
 0x1cd   : > { %v912_v22 = vpop.f32.mrb[0].mxu1  ;;  %v1188_v23 = vpop.f32.mrb[1].mxu0 }
 0x1ce   : > { %v1189_v24 = vadd.f32 %v1188_v23, %v1187_v21  ;;  %v1220_v25 = vpop.f32.mrb[1].mxu1  ;;  %v1190_v26 = vpop.f32.mrb[2].mxu0  ;;  %923 = sbr.rel (%p1164_p3) target bundleno = 534 (0x216), region = 105 }
 0x1cf   : > { %v915_v28 = vpop.f32.mrb[2].mxu1  ;;  %v1191_v29 = vpop.f32.mrb[3].mxu0 }
 0x1d0   : > { %v913_v30 = vadd.f32 %v1189_v24, %v912_v22  ;;  %v1221_v31 = vpop.f32.mrb[3].mxu1 }
 0x1d2   : > { %v918_v32 = vadd.f32 %v913_v30, %v617_v27 }
 0x1d4   : > { %919 = vst [vmem:[#allocation2] sm:$0x3] %v918_v32 }
 0x1db   : > { %v924_v33 = vld [vmem:[#allocation2] sm:$0x3] }
 0x1dc   : > { %v926_v34 = vsel %vm925_vm1, %v924_v33, 0.0 }
 0x1dd   : > { %v927_v35 = vrot.slane %v926_v34, 4 }
 0x1df   : > { %v928_v36 = vadd.f32 %v927_v35, %v926_v34 }
 0x1e1   : > { %v929_v37 = vrot.slane %v928_v36, 2 }
 0x1e3   : > { %v930_v38 = vadd.f32 %v929_v37, %v928_v36 }
 0x1e5   : > { %v931_v39 = vrot.slane %v930_v38, 1 }
 0x1e7   : > { %v932_v40 = vadd.f32 %v931_v39, %v930_v38 }
 0x1e9   : > { %v934_v41 = vmul.f32 0.5, %v932_v40 }
 0x1eb   : > { %v935_v42 = vsub.f32 %v924_v33, %v934_v41 }
 0x1ed   : > { %v936_v43 = vmul.f32 %v935_v42, %v935_v42 }
 0x1ef   : > { %v937_v44 = vsel %vm925_vm1, %v936_v43, 0.0 }
 0x1f0   : > { %v938_v45 = vrot.slane %v937_v44, 4 }
 0x1f2   : > { %v939_v46 = vadd.f32 %v938_v45, %v937_v44 }
 0x1f4   : > { %v940_v47 = vrot.slane %v939_v46, 2 }
 0x1f6   : > { %v941_v48 = vadd.f32 %v940_v47, %v939_v46 }
 0x1f8   : > { %v942_v49 = vrot.slane %v941_v48, 1 }
 0x1fa   : > { %v943_v50 = vadd.f32 %v942_v49, %v941_v48 }
 0x1fc   : > { %v944_v51 = vmul.f32 0.5, %v943_v50 }
 0x1fe   : > { %v945_v52 = vadd.f32 1e-05, %v944_v51 }
 0x200   : > { %1366 = vrsqrt.f32 %v945_v52 }
 0x20a   : > { %v1367_v53 = vpop.eup %1366 }
 0x20b   : > { %v947_v55 = vmul.f32 %v1367_v53, %v935_v42 }
 0x20d   : > { %v955_v57 = vmul.f32 %v1165_v54, %v947_v55 }
 0x20f   : > { %v963_v59 = vadd.f32 %v1166_v56, %v955_v57 }
 0x211   : > { %v965_v60 = vadd.f32 %v964_v58, %v963_v59 }
 0x213   : > { %v966_v61 = vmax.f32 %v965_v60, 0.0 }
 0x215   : > { %967 = vst [vmem:[%s2023_s9] sm:$0x3] %v966_v61 }
 0x216 PF: > { %s24_s30 = sadd.s32 1, %s1594_s30   ;;  %s2143_s27 = sld [smem:[#allocation21_spill]] }
 0x217   : > { %p2060_p1 = scmp.ge.s32.totalorder %s24_s30, 14   ;;  %s2144_s25 = sld [smem:[#allocation20_spill]] }
 0x218   : > { %s2145_s15 = sld [smem:[#allocation14_spill]]  ;;  %s2146_s16 = sld [smem:[#allocation19_spill]] }
 0x219   : > { %s2147_s8 = sld [smem:[#allocation17_spill]]  ;;  %s2148_s6 = sld [smem:[#allocation18_spill]] }
 0x21a   : > { %s2149_s18 = smov %s1550_s19  ;;  %s2150_s19 = smov %s1554_s20 }
 0x21b   : > { %s2152_s21 = smov %s1562_s22  ;;  %s2154_s23 = smov %s1570_s24 }
 0x21c   : > { %s2151_s20 = smov %s2143_s27  ;;  %s2157_s26 = smov %s1586_s28 }
 0x21d   : > { %s2153_s22 = smov %s2144_s25  ;;  %s2158_s27 = smov %s1590_s29 }
 0x21e   : > { %s2155_s24 = smov %s2145_s15  ;;  %s2156_s25 = smov %s2146_s16 }
 0x21f   : > { %s2159_s28 = smov %s2147_s8  ;;  %s2160_s29 = smov %s2148_s6 }
 0x220   :  { %23 = sbr.rel (!%p2060_p1) target bundleno = 14 (0xe), region = 174 }
 0x227   :  { %987 = vsyncpa [#allocation4], 1 }
 0x228   :  { %989 = vsyncpa [#allocation4 + $0x1], 1 }
 0x229   :  { %990 = vsyncpa [#allocation7], 1 }
 0x22a   :  { %992 = vsyncpa [#allocation7 + $0x1], 1 }
 0x22b   :  { %993 = vsyncpa [#allocation10], 1 }
 0x22c   :  { %995 = vsyncpa [#allocation10 + $0x1], 1 }

</bundles_post_ra>
